<compile_context>
chip_gen: v7x
topology: tpu7x:2x2x1
jax: 0.10.0
libtpu: 0.0.40
codegen_flags: <defaults>
</compile_context>

<pallas_src>
import jax
import jax.numpy as jnp
from jax.experimental import pallas as pl
from jax.experimental.pallas import tpu as pltpu

# torchvision alexnet.features conv shapes (Cout, Cin, KH, KW) at 0,3,6,8,10.
_CONV_SHAPES = [(64, 3, 11, 11), (192, 64, 5, 5), (384, 192, 3, 3),
                (256, 384, 3, 3), (256, 256, 3, 3)]

_VMEM_LIMIT_BYTES = 48 * 1024 * 1024   # headroom below v7x's 64 MiB physical VMEM


def _round_up(v, m):
    return ((v + m - 1) // m) * m


# ---------------------------------------------------------------------------
# In-kernel helpers (static shapes, aligned slices only)
# ---------------------------------------------------------------------------
def _maxpool_3x3_s2(xe, c, h_out, w_out):
    """3x3 / stride-2 maxpool.  `xe` is (H, ceil(W/2), 2C) with even/odd input
    columns paired on the channel axis (free glue reshape).  The row reduction
    uses even/odd ROW pairing (major-axis reshape) - no Python loop / stack."""
    a = xe[:, 0:w_out, 0:c]              # input columns 2w
    b = xe[:, 0:w_out, c:2 * c]          # input columns 2w + 1
    d = xe[:, 1:w_out + 1, 0:c]          # input columns 2w + 2
    wmax = jnp.maximum(jnp.maximum(a, b), d)                   # (H, w_out, C)
    r0 = wmax[0:2 * h_out].reshape(h_out, 2, w_out, c)         # rows 2h, 2h+1
    r1 = wmax[1:2 * h_out + 1].reshape(h_out, 2, w_out, c)     # rows 2h+1, 2h+2
    return jnp.maximum(jnp.maximum(r0[:, 0], r0[:, 1]), r1[:, 1])


def _store_padded_bf16(xpad_ref, val, pad, hp, wp):
    """Write val[:, :wp] (cast to bf16) into the interior of the padded scratch
    and zero ONLY the border.  The interior is overwritten every step, so the
    full-scratch zeroing of the old version is gone; doing the (cheap) border
    every step keeps this correct however the grid is split across cores."""
    h_pad, w_pad, c = xpad_ref.shape
    z = lambda h, w: jnp.zeros((h, w, c), xpad_ref.dtype)
    xpad_ref[pl.ds(0, pad), :, :] = z(pad, w_pad)                          # top
    xpad_ref[pl.ds(pad + hp, h_pad - pad - hp), :, :] = z(h_pad - pad - hp, w_pad)
    xpad_ref[pl.ds(pad, hp), pl.ds(0, pad), :] = z(hp, pad)                # left
    xpad_ref[pl.ds(pad, hp), pl.ds(pad + wp, w_pad - pad - wp), :] = (
        z(hp, w_pad - pad - wp))                                           # right
    xpad_ref[pl.ds(pad, hp), pl.ds(pad, wp), :] = (
        val[:, :wp, :].astype(xpad_ref.dtype))                             # interior


def _conv_bias_relu(xpad_ref, w_ref, b_ref, hp, wp_p):
    """'same' stride-1 conv over the zero-padded bf16 scratch image.
    Row-band K-reduction: kh MXU dots with K = kw*Cin (bf16 operands, f32
    accumulation).  Returns (hp, wp_p, Cout) f32 post bias+ReLU; columns past
    the valid width hold garbage and are handled by the caller."""
    kh, kwcin, cout = w_ref.shape
    h_pad, w_pad, cin = xpad_ref.shape
    kw = kwcin // cin
    xp = xpad_ref[...]
    # Width expansion, done ONCE (kw slices): xe[h, w, kj*cin + c] = xp[h, w+kj, c]
    xe = jnp.concatenate([xp[:, kj:kj + wp_p, :] for kj in range(kw)], axis=-1)
    xe = xe.reshape(h_pad * wp_p, kwcin)      # wp_p % 8 == 0 -> layout-aligned
    acc = jnp.zeros((hp * wp_p, cout), jnp.float32)
    for ki in range(kh):                      # kh row-band dots, 8-aligned slices
        lhs = xe[ki * wp_p:(ki + hp) * wp_p]
        acc = acc + jnp.dot(lhs, w_ref[ki], preferred_element_type=jnp.float32)
    y = jnp.maximum(acc + b_ref[...], 0.0)
    return y.reshape(hp, wp_p, cout)


# ---------------------------------------------------------------------------
# slice1: conv1 (11x11, stride 4, pad 2) = glue im2col + tiled matmul kernel
# ---------------------------------------------------------------------------
def _matmul_bias_relu_kernel(a_ref, w_ref, b_ref, of_ref, ob_ref):
    acc = jnp.dot(a_ref[...], w_ref[...], preferred_element_type=jnp.float32)
    y = jnp.maximum(acc + b_ref[...], 0.0)
    of_ref[...] = y                              # f32 feature (returned)
    ob_ref[...] = y.astype(jnp.bfloat16)         # bf16 hand-off to slice2


def _matmul_bias_relu(a_bf16, w_bf16, b_f32, tm=512):
    m, k = a_bf16.shape
    cout = w_bf16.shape[1]
    mp = _round_up(m, tm)
    if mp != m:
        a_bf16 = jnp.pad(a_bf16, ((0, mp - m), (0, 0)))
    of, ob = pl.pallas_call(
        _matmul_bias_relu_kernel,
        out_shape=(jax.ShapeDtypeStruct((mp, cout), jnp.float32),
                   jax.ShapeDtypeStruct((mp, cout), jnp.bfloat16)),
        grid=(mp // tm,),
        in_specs=[pl.BlockSpec((tm, k), lambda i: (i, 0)),
                  pl.BlockSpec((k, cout), lambda i: (0, 0)),
                  pl.BlockSpec((1, cout), lambda i: (0, 0))],
        out_specs=(pl.BlockSpec((tm, cout), lambda i: (i, 0)),
                   pl.BlockSpec((tm, cout), lambda i: (i, 0))),
        compiler_params=pltpu.CompilerParams(
            dimension_semantics=("parallel",),
            vmem_limit_bytes=_VMEM_LIMIT_BYTES),
    )(a_bf16, w_bf16, b_f32)
    return of[:m], ob[:m]


def _im2col(x_nhwc, kh, kw, stride, pad):
    # TODO(synk): on v5e this glue im2col re-reads the padded input ~7.6x; a
    # lax.conv_general_dilated_patches / in-kernel gather variant would cut
    # that HBM traffic further.
    x = jnp.pad(x_nhwc, ((0, 0), (pad, pad), (pad, pad), (0, 0)))
    n, h, w, c = x.shape
    ho = (h - kh) // stride + 1
    wo = (w - kw) // stride + 1
    cols = [x[:, i:i + stride * (ho - 1) + 1:stride,
              j:j + stride * (wo - 1) + 1:stride, :]
            for i in range(kh) for j in range(kw)]
    patches = jnp.concatenate(cols, axis=-1)            # (N, Ho, Wo, kh*kw*C)
    return patches.reshape(n * ho * wo, kh * kw * c), n, ho, wo


def conv1_im2col_relu(x_nhwc, w_mat_bf16, b_f32, stride, pad, kh, kw):
    a, n, ho, wo = _im2col(x_nhwc, kh, kw, stride, pad)
    a = a.astype(jnp.bfloat16)
    k_p = w_mat_bf16.shape[0]
    if k_p != a.shape[1]:                         # K padded to a multiple of 128
        a = jnp.pad(a, ((0, 0), (0, k_p - a.shape[1])))
    cout = w_mat_bf16.shape[1]
    yf, yb = _matmul_bias_relu(a, w_mat_bf16, b_f32)
    return yf.reshape(n, ho, wo, cout), yb.reshape(n, ho, wo, cout)


# ---------------------------------------------------------------------------
# Glue: pair even/odd columns on the channel axis (free reshape) so the fused
# pool kernels never need strided column slicing.
# ---------------------------------------------------------------------------
def _pair_even_odd_cols(x_nhwc):
    n, h, w, c = x_nhwc.shape
    if w % 2:
        # Padded column is never read by any 3x3/stride-2 window (post-ReLU data,
        # pad value 0 is also the safe value).
        x_nhwc = jnp.pad(x_nhwc, ((0, 0), (0, 0), (0, 1), (0, 0)))
        w += 1
    return x_nhwc.reshape(n, h, w // 2, 2 * c)


# ---------------------------------------------------------------------------
# slice2: fused MaxPool(3,2) + Conv(5x5, pad 2) + ReLU
# ---------------------------------------------------------------------------
def _make_pool_conv_kernel(cin, hp, wp, wp_p, pad):
    def kernel(x_ref, w_ref, b_ref, of_ref, ob_ref, xpad_ref):
        pooled = _maxpool_3x3_s2(x_ref[...], cin, hp, wp)      # (hp, wp, cin) bf16
        _store_padded_bf16(xpad_ref, pooled, pad, hp, wp)
        y = _conv_bias_relu(xpad_ref, w_ref, b_ref, hp, wp_p)  # (hp, wp_p, cout) f32
        of_ref[...] = y
        ob_ref[...] = y.astype(jnp.bfloat16)
    return kernel


def pool_conv_relu(x_bf, valid_w, w_bf, b_f32, pad):
    n, hi, _, cin = x_bf.shape
    kh, kwcin, cout = w_bf.shape
    assert kwcin % cin == 0 and kh == 2 * pad + 1
    hp, wp = (hi - 3) // 2 + 1, (valid_w - 3) // 2 + 1
    wp_p = _round_up(wp, 8)
    xe = _pair_even_odd_cols(x_bf)
    w2 = xe.shape[2]
    assert hi >= 2 * hp + 1 and w2 >= wp + 1
    of, ob = pl.pallas_call(
        _make_pool_conv_kernel(cin, hp, wp, wp_p, pad),
        out_shape=(jax.ShapeDtypeStruct((n, hp, wp_p, cout), jnp.float32),
                   jax.ShapeDtypeStruct((n, hp, wp_p, cout), jnp.bfloat16)),
        grid=(n,),
        in_specs=[
            pl.BlockSpec((None, hi, w2, 2 * cin), lambda i: (i, 0, 0, 0)),
            pl.BlockSpec(w_bf.shape, lambda i: (0, 0, 0)),
            pl.BlockSpec((1, cout), lambda i: (0, 0)),
        ],
        out_specs=(pl.BlockSpec((None, hp, wp_p, cout), lambda i: (i, 0, 0, 0)),
                   pl.BlockSpec((None, hp, wp_p, cout), lambda i: (i, 0, 0, 0))),
        scratch_shapes=[pltpu.VMEM((hp + 2 * pad, wp_p + 2 * pad, cin),
                                   jnp.bfloat16)],
        compiler_params=pltpu.CompilerParams(
            dimension_semantics=("parallel",),
            vmem_limit_bytes=_VMEM_LIMIT_BYTES),
    )(xe, w_bf, b_f32)
    return of, ob, wp


# ---------------------------------------------------------------------------
# slice3+4+5: fused MaxPool(3,2) + Conv3 + Conv4 + Conv5 (3x3, pad 1) + ReLU
# ---------------------------------------------------------------------------
# TODO(synk): for very large inputs (>=384^2) on v7x, add a second 'parallel'
# grid axis over pooled output-row tiles (with halo rows) so both TensorCores
# get work at batch=1 and activation tiles stay inside the 64 MiB VMEM budget;
# constant-index-map weights could then also be single-buffered.
def _make_pool_conv_chain_kernel(c2, hp, wp, wp_p):
    def kernel(x_ref, w3_ref, b3_ref, w4_ref, b4_ref, w5_ref, b5_ref,
               o3_ref, o4_ref, o5_ref, xp3_ref, xp4_ref, xp5_ref):
        pooled = _maxpool_3x3_s2(x_ref[...], c2, hp, wp)
        _store_padded_bf16(xp3_ref, pooled, 1, hp, wp)
        h3 = _conv_bias_relu(xp3_ref, w3_ref, b3_ref, hp, wp_p)
        o3_ref[...] = h3
        _store_padded_bf16(xp4_ref, h3, 1, hp, wp)      # garbage cols dropped here
        h4 = _conv_bias_relu(xp4_ref, w4_ref, b4_ref, hp, wp_p)
        o4_ref[...] = h4
        _store_padded_bf16(xp5_ref, h4, 1, hp, wp)
        h5 = _conv_bias_relu(xp5_ref, w5_ref, b5_ref, hp, wp_p)
        o5_ref[...] = h5
    return kernel


def pool_conv_chain_relu(x_bf, valid_w, w3, b3, w4, b4, w5, b5):
    n, hi, _, c2 = x_bf.shape
    hp, wp = (hi - 3) // 2 + 1, (valid_w - 3) // 2 + 1
    wp_p = _round_up(wp, 8)
    c3, c4, c5 = w3.shape[2], w4.shape[2], w5.shape[2]
    xe = _pair_even_odd_cols(x_bf)
    w2 = xe.shape[2]
    assert hi >= 2 * hp + 1 and w2 >= wp + 1
    h3, h4, h5 = pl.pallas_call(
        _make_pool_conv_chain_kernel(c2, hp, wp, wp_p),
        out_shape=(jax.ShapeDtypeStruct((n, hp, wp_p, c3), jnp.float32),
                   jax.ShapeDtypeStruct((n, hp, wp_p, c4), jnp.float32),
                   jax.ShapeDtypeStruct((n, hp, wp_p, c5), jnp.float32)),
        grid=(n,),
        in_specs=[
            pl.BlockSpec((None, hi, w2, 2 * c2), lambda i: (i, 0, 0, 0)),
            pl.BlockSpec(w3.shape, lambda i: (0, 0, 0)),
            pl.BlockSpec((1, c3), lambda i: (0, 0)),
            pl.BlockSpec(w4.shape, lambda i: (0, 0, 0)),
            pl.BlockSpec((1, c4), lambda i: (0, 0)),
            pl.BlockSpec(w5.shape, lambda i: (0, 0, 0)),
            pl.BlockSpec((1, c5), lambda i: (0, 0)),
        ],
        out_specs=(pl.BlockSpec((None, hp, wp_p, c3), lambda i: (i, 0, 0, 0)),
                   pl.BlockSpec((None, hp, wp_p, c4), lambda i: (i, 0, 0, 0)),
                   pl.BlockSpec((None, hp, wp_p, c5), lambda i: (i, 0, 0, 0))),
        scratch_shapes=[pltpu.VMEM((hp + 2, wp_p + 2, c2), jnp.bfloat16),
                        pltpu.VMEM((hp + 2, wp_p + 2, c3), jnp.bfloat16),
                        pltpu.VMEM((hp + 2, wp_p + 2, c4), jnp.bfloat16)],
        compiler_params=pltpu.CompilerParams(
            dimension_semantics=("parallel",),
            vmem_limit_bytes=_VMEM_LIMIT_BYTES),
    )(xe, w3, b3, w4, b4, w5, b5)
    return h3, h4, h5, wp


# ---------------------------------------------------------------------------
# Parameters
# ---------------------------------------------------------------------------
def init_params(key):
    # TODO(synk): torchvision pretrained-weight loading is unavailable here;
    # deterministic synthetic params with the exact AlexNet shapes are used.
    params = []
    for i, s in enumerate(_CONV_SHAPES):
        kw_, kb = jax.random.split(jax.random.fold_in(key, i))
        fan_in = s[1] * s[2] * s[3]
        w = jax.random.normal(kw_, s, jnp.float32) * (1.0 / jnp.sqrt(fan_in))
        b = jax.random.normal(kb, (s[0],), jnp.float32) * 0.01
        params.append((w, b))
    return params


def prepare_params(params):
    """torch OIHW f32 -> kernel layout, channels zero-padded to multiples of 128:
       conv1 : (K_p, Cout_p) bf16 im2col matmul weight
       conv2-5: (KH, KW*Cin_p, Cout_p) bf16 row-band weight (kj-major, c-minor)
       biases: (1, Cout_p) f32."""
    prepared = []
    prev_cout_p = None
    for idx, (w, b) in enumerate(params):
        cout, cin, kh, kw = w.shape
        cout_p = _round_up(cout, 128)
        wt = jnp.transpose(w, (2, 3, 1, 0))                 # (KH, KW, Cin, Cout)
        if idx == 0:
            k = kh * kw * cin
            k_p = _round_up(k, 128)
            wk = jnp.pad(wt.reshape(k, cout),
                         ((0, k_p - k), (0, cout_p - cout))).astype(jnp.bfloat16)
        else:
            cin_p = prev_cout_p
            wk = jnp.pad(wt, ((0, 0), (0, 0), (0, cin_p - cin),
                              (0, cout_p - cout)))
            wk = wk.reshape(kh, kw * cin_p, cout_p).astype(jnp.bfloat16)
        bk = jnp.pad(b, (0, cout_p - cout)).reshape(1, cout_p).astype(jnp.float32)
        prepared.append((wk, bk))
        prev_cout_p = cout_p
    return prepared


# ---------------------------------------------------------------------------
# Forward pass (returns relu1..relu5 in NCHW f32, like the torch module)
# ---------------------------------------------------------------------------
def alexnet_forward(x_nchw, kparams):
    (w1, b1), (w2, b2), (w3, b3), (w4, b4), (w5, b5) = kparams
    x = jnp.transpose(x_nchw, (0, 2, 3, 1)).astype(jnp.float32)          # NHWC
    # slice1: Conv(3->64, k11, s4, p2) + ReLU   (f32 feature + bf16 hand-off)
    h1f, h1b = conv1_im2col_relu(x, w1, b1, stride=4, pad=2, kh=11, kw=11)
    # slice2: MaxPool(3,2) + Conv(64->192, k5, p2) + ReLU   (fused)
    h2f, h2b, w2v = pool_conv_relu(h1b, h1b.shape[2], w2, b2, pad=2)
    # slice3..5: MaxPool(3,2) + Conv3 + Conv4 + Conv5 (k3, p1) + ReLU (fused)
    h3f, h4f, h5f, w3v = pool_conv_chain_relu(h2b, w2v, w3, b3, w4, b4, w5, b5)

    def to_nchw(t, valid_w, c):          # drop width/channel padding, NHWC->NCHW
        return jnp.transpose(t[:, :, :valid_w, :c], (0, 3, 1, 2))

    return (to_nchw(h1f, h1f.shape[2], _CONV_SHAPES[0][0]),
            to_nchw(h2f, w2v, _CONV_SHAPES[1][0]),
            to_nchw(h3f, w3v, _CONV_SHAPES[2][0]),
            to_nchw(h4f, w3v, _CONV_SHAPES[3][0]),
            to_nchw(h5f, w3v, _CONV_SHAPES[4][0]))


# ---------------------------------------------------------------------------
# Pure-JAX f32 reference (for tolerance-asserted correctness check)
# ---------------------------------------------------------------------------
def alexnet_reference(x_nchw, params):
    x = jnp.transpose(x_nchw, (0, 2, 3, 1)).astype(jnp.float32)

    def conv(x, w, b, stride, pad):
        wt = jnp.transpose(w, (2, 3, 1, 0))                  # OIHW -> HWIO
        y = jax.lax.conv_general_dilated(
            x, wt, (stride, stride), [(pad, pad), (pad, pad)],
            dimension_numbers=("NHWC", "HWIO", "NHWC"))
        return jnp.maximum(y + b, 0.0)

    def pool(x):
        return jax.lax.reduce_window(x, -jnp.inf, jax.lax.max,
                                     (1, 3, 3, 1), (1, 2, 2, 1), "VALID")

    (w1, b1), (w2, b2), (w3, b3), (w4, b4), (w5, b5) = params
    h1 = conv(x, w1, b1, 4, 2)
    h2 = conv(pool(h1), w2, b2, 1, 2)
    h3 = conv(pool(h2), w3, b3, 1, 1)
    h4 = conv(h3, w4, b4, 1, 1)
    h5 = conv(h4, w5, b5, 1, 1)
    to_nchw = lambda t: jnp.transpose(t, (0, 3, 1, 2))
    return tuple(map(to_nchw, (h1, h2, h3, h4, h5)))


if __name__ == "__main__":
    key = jax.random.PRNGKey(0)
    kx, kp = jax.random.split(key)
    # Small AlexNet-compatible input: batch=2, channels=3, spatial=64.
    x = jax.random.normal(kx, (2, 3, 64, 64), jnp.float32)
    params = init_params(kp)
    kparams = prepare_params(params)

    outs = jax.block_until_ready(jax.jit(alexnet_forward)(x, kparams))
    refs = jax.block_until_ready(jax.jit(alexnet_reference)(x, params))

    expected = [(2, 64, 15, 15), (2, 192, 7, 7), (2, 384, 3, 3),
                (2, 256, 3, 3), (2, 256, 3, 3)]
    for o, r, e in zip(outs, refs, expected):
        assert o.shape == e and r.shape == e, (o.shape, r.shape, e)
        assert o.dtype == jnp.float32
        err = float(jnp.max(jnp.abs(o - r)))
        scale = float(jnp.max(jnp.abs(r))) + 1e-6
        # bf16 MXU operands (f32 accumulation) vs f32 reference -> loose tol.
        assert err <= 0.08 * scale + 1e-2, ("mismatch vs reference", err, scale)
    print("KERNEL_OK")
</pallas_src>

<mosaic_0001>
module attributes {stable_mosaic.version = 11 : i64} {
  func.func @_matmul_bias_relu_kernel(%arg0: i32, %arg1: memref<512x384xbf16, #tpu.memory_space<vmem>>, %arg2: memref<384x128xbf16, #tpu.memory_space<vmem>>, %arg3: memref<1x128xf32, #tpu.memory_space<vmem>>, %arg4: memref<512x128xf32, #tpu.memory_space<vmem>>, %arg5: memref<512x128xbf16, #tpu.memory_space<vmem>>) attributes {dimension_semantics = [#tpu.dimension_semantics<parallel>], iteration_bounds = array<i64: 1>, scalar_prefetch = 0 : i64, scratch_operands = 0 : i64, tpu.core_type = #tpu.core_type<tc>, window_params = [{transform_indices = @transform_0, window_bounds = array<i64: 512, 384>}, {pipeline_mode = #tpu.pipeline_mode<synchronous>, transform_indices = @transform_1, window_bounds = array<i64: 384, 128>}, {pipeline_mode = #tpu.pipeline_mode<synchronous>, transform_indices = @transform_2, window_bounds = array<i64: 1, 128>}, {transform_indices = @transform_3, window_bounds = array<i64: 512, 128>}, {transform_indices = @transform_4, window_bounds = array<i64: 512, 128>}]} {
    %c0 = arith.constant 0 : index
    %c0_0 = arith.constant 0 : index
    %0 = vector.load %arg1[%c0, %c0_0] : memref<512x384xbf16, #tpu.memory_space<vmem>>, vector<512x384xbf16>
    %c0_1 = arith.constant 0 : index
    %c0_2 = arith.constant 0 : index
    %1 = vector.load %arg2[%c0_1, %c0_2] : memref<384x128xbf16, #tpu.memory_space<vmem>>, vector<384x128xbf16>
    %cst = arith.constant dense<0.000000e+00> : vector<512x128xf32>
    %2 = tpu.matmul %0, %1, %cst {dimension_numbers = #tpu.dot_dimension_numbers<[1], [0], [0], [1], [0, 0, 1, 1], [], []>} : vector<512x384xbf16>, vector<384x128xbf16>, vector<512x128xf32> -> vector<512x128xf32>
    %c0_3 = arith.constant 0 : index
    %c0_4 = arith.constant 0 : index
    %3 = vector.load %arg3[%c0_3, %c0_4] : memref<1x128xf32, #tpu.memory_space<vmem>>, vector<1x128xf32>
    %4 = vector.broadcast %3 : vector<1x128xf32> to vector<512x128xf32>
    %5 = arith.addf %2, %4 : vector<512x128xf32>
    %cst_5 = arith.constant 0.000000e+00 : f32
    %6 = vector.broadcast %cst_5 : f32 to vector<512x128xf32>
    %7 = arith.maximumf %5, %6 : vector<512x128xf32>
    %c0_6 = arith.constant 0 : index
    %c0_7 = arith.constant 0 : index
    %8 = vector.load %arg4[%c0_6, %c0_7] : memref<512x128xf32, #tpu.memory_space<vmem>>, vector<512x128xf32>
    tpu.vector_store %arg4[%c0_6, %c0_7], %7 {strides = array<i32>} : memref<512x128xf32, #tpu.memory_space<vmem>>, vector<512x128xf32>,
    %9 = arith.truncf %7 : vector<512x128xf32> to vector<512x128xbf16>
    %c0_8 = arith.constant 0 : index
    %c0_9 = arith.constant 0 : index
    %10 = vector.load %arg5[%c0_8, %c0_9] : memref<512x128xbf16, #tpu.memory_space<vmem>>, vector<512x128xbf16>
    tpu.vector_store %arg5[%c0_8, %c0_9], %9 {strides = array<i32>} : memref<512x128xbf16, #tpu.memory_space<vmem>>, vector<512x128xbf16>,
    return
  }
  func.func @transform_0(%arg0: i32) -> (i32, i32) {
    %c0_i32 = arith.constant 0 : i32
    %c0_i32_0 = arith.constant 0 : i32
    return %arg0, %c0_i32 : i32, i32
  }
  func.func @transform_1(%arg0: i32) -> (i32, i32) {
    %c0_i32 = arith.constant 0 : i32
    %c0_i32_0 = arith.constant 0 : i32
    %c0_i32_1 = arith.constant 0 : i32
    return %c0_i32, %c0_i32_0 : i32, i32
  }
  func.func @transform_2(%arg0: i32) -> (i32, i32) {
    %c0_i32 = arith.constant 0 : i32
    %c0_i32_0 = arith.constant 0 : i32
    %c0_i32_1 = arith.constant 0 : i32
    return %c0_i32, %c0_i32_0 : i32, i32
  }
  func.func @transform_3(%arg0: i32) -> (i32, i32) {
    %c0_i32 = arith.constant 0 : i32
    %c0_i32_0 = arith.constant 0 : i32
    return %arg0, %c0_i32 : i32, i32
  }
  func.func @transform_4(%arg0: i32) -> (i32, i32) {
    %c0_i32 = arith.constant 0 : i32
    %c0_i32_0 = arith.constant 0 : i32
    return %arg0, %c0_i32 : i32, i32
  }
}

module attributes {stable_mosaic.version = 11 : i64} {
  func.func @kernel(%arg0: i32, %arg1: memref<1x15x8x256xbf16, #tpu.memory_space<vmem>>, %arg2: memref<5x640x256xbf16, #tpu.memory_space<vmem>>, %arg3: memref<1x256xf32, #tpu.memory_space<vmem>>, %arg4: memref<1x7x8x256xf32, #tpu.memory_space<vmem>>, %arg5: memref<1x7x8x256xbf16, #tpu.memory_space<vmem>>, %arg6: memref<11x12x128xbf16, #tpu.memory_space<vmem>>) attributes {dimension_semantics = [#tpu.dimension_semantics<parallel>], iteration_bounds = array<i64: 2>, scalar_prefetch = 0 : i64, scratch_operands = 1 : i64, tpu.core_type = #tpu.core_type<tc>, window_params = [{transform_indices = @transform_0, window_bounds = array<i64: 1, 15, 8, 256>}, {pipeline_mode = #tpu.pipeline_mode<synchronous>, transform_indices = @transform_1, window_bounds = array<i64: 5, 640, 256>}, {pipeline_mode = #tpu.pipeline_mode<synchronous>, transform_indices = @transform_2, window_bounds = array<i64: 1, 256>}, {transform_indices = @transform_3, window_bounds = array<i64: 1, 7, 8, 256>}, {transform_indices = @transform_4, window_bounds = array<i64: 1, 7, 8, 256>}]} {
    %c0 = arith.constant 0 : index
    %c0_0 = arith.constant 0 : index
    %c0_1 = arith.constant 0 : index
    %c0_2 = arith.constant 0 : index
    %0 = vector.load %arg1[%c0, %c0_0, %c0_1, %c0_2] : memref<1x15x8x256xbf16, #tpu.memory_space<vmem>>, vector<1x15x8x256xbf16>
    %1 = vector.shape_cast %0 : vector<1x15x8x256xbf16> to vector<15x8x256xbf16>
    %2 = vector.extract_strided_slice %1 {offsets = [0, 0, 0], sizes = [15, 7, 128], strides = [1, 1, 1]} : vector<15x8x256xbf16> to vector<15x7x128xbf16>
    %3 = vector.extract_strided_slice %1 {offsets = [0, 0, 128], sizes = [15, 7, 128], strides = [1, 1, 1]} : vector<15x8x256xbf16> to vector<15x7x128xbf16>
    %4 = vector.extract_strided_slice %1 {offsets = [0, 1, 0], sizes = [15, 7, 128], strides = [1, 1, 1]} : vector<15x8x256xbf16> to vector<15x7x128xbf16>
    %5 = arith.maximumf %2, %3 : vector<15x7x128xbf16>
    %6 = arith.maximumf %5, %4 : vector<15x7x128xbf16>
    %7 = vector.extract_strided_slice %6 {offsets = [0, 0, 0], sizes = [14, 7, 128], strides = [1, 1, 1]} : vector<15x7x128xbf16> to vector<14x7x128xbf16>
    %8 = vector.shape_cast %7 : vector<14x7x128xbf16> to vector<7x2x7x128xbf16>
    %9 = vector.extract_strided_slice %6 {offsets = [1, 0, 0], sizes = [14, 7, 128], strides = [1, 1, 1]} : vector<15x7x128xbf16> to vector<14x7x128xbf16>
    %10 = vector.shape_cast %9 : vector<14x7x128xbf16> to vector<7x2x7x128xbf16>
    %11 = vector.extract_strided_slice %8 {offsets = [0, 0, 0, 0], sizes = [7, 1, 7, 128], strides = [1, 1, 1, 1]} : vector<7x2x7x128xbf16> to vector<7x1x7x128xbf16>
    %12 = vector.shape_cast %11 : vector<7x1x7x128xbf16> to vector<7x7x128xbf16>
    %13 = vector.extract_strided_slice %8 {offsets = [0, 1, 0, 0], sizes = [7, 1, 7, 128], strides = [1, 1, 1, 1]} : vector<7x2x7x128xbf16> to vector<7x1x7x128xbf16>
    %14 = vector.shape_cast %13 : vector<7x1x7x128xbf16> to vector<7x7x128xbf16>
    %15 = arith.maximumf %12, %14 : vector<7x7x128xbf16>
    %16 = vector.extract_strided_slice %10 {offsets = [0, 1, 0, 0], sizes = [7, 1, 7, 128], strides = [1, 1, 1, 1]} : vector<7x2x7x128xbf16> to vector<7x1x7x128xbf16>
    %17 = vector.shape_cast %16 : vector<7x1x7x128xbf16> to vector<7x7x128xbf16>
    %18 = arith.maximumf %15, %17 : vector<7x7x128xbf16>
    %cst = arith.constant 0.000000e+00 : bf16
    %19 = vector.broadcast %cst : bf16 to vector<2x12x128xbf16>
    %c0_3 = arith.constant 0 : index
    %c0_4 = arith.constant 0 : index
    %c0_5 = arith.constant 0 : index
    %20 = vector.load %arg6[%c0_3, %c0_4, %c0_5] : memref<11x12x128xbf16, #tpu.memory_space<vmem>>, vector<2x12x128xbf16>
    tpu.vector_store %arg6[%c0_3, %c0_4, %c0_5], %19 {strides = array<i32>} : memref<11x12x128xbf16, #tpu.memory_space<vmem>>, vector<2x12x128xbf16>,
    %cst_6 = arith.constant 0.000000e+00 : bf16
    %21 = vector.broadcast %cst_6 : bf16 to vector<2x12x128xbf16>
    %c9 = arith.constant 9 : index
    %c0_7 = arith.constant 0 : index
    %c0_8 = arith.constant 0 : index
    %22 = vector.load %arg6[%c9, %c0_7, %c0_8] : memref<11x12x128xbf16, #tpu.memory_space<vmem>>, vector<2x12x128xbf16>
    tpu.vector_store %arg6[%c9, %c0_7, %c0_8], %21 {strides = array<i32>} : memref<11x12x128xbf16, #tpu.memory_space<vmem>>, vector<2x12x128xbf16>,
    %cst_9 = arith.constant 0.000000e+00 : bf16
    %23 = vector.broadcast %cst_9 : bf16 to vector<7x2x128xbf16>
    %c2 = arith.constant 2 : index
    %c0_10 = arith.constant 0 : index
    %c0_11 = arith.constant 0 : index
    %24 = vector.load %arg6[%c2, %c0_10, %c0_11] : memref<11x12x128xbf16, #tpu.memory_space<vmem>>, vector<7x2x128xbf16>
    tpu.vector_store %arg6[%c2, %c0_10, %c0_11], %23 {strides = array<i32>} : memref<11x12x128xbf16, #tpu.memory_space<vmem>>, vector<7x2x128xbf16>,
    %cst_12 = arith.constant 0.000000e+00 : bf16
    %25 = vector.broadcast %cst_12 : bf16 to vector<7x3x128xbf16>
    %c2_13 = arith.constant 2 : index
    %c9_14 = arith.constant 9 : index
    %c0_15 = arith.constant 0 : index
    %26 = vector.load %arg6[%c2_13, %c9_14, %c0_15] : memref<11x12x128xbf16, #tpu.memory_space<vmem>>, vector<7x3x128xbf16>
    tpu.vector_store %arg6[%c2_13, %c9_14, %c0_15], %25 {strides = array<i32>} : memref<11x12x128xbf16, #tpu.memory_space<vmem>>, vector<7x3x128xbf16>,
    %c2_16 = arith.constant 2 : index
    %c2_17 = arith.constant 2 : index
    %c0_18 = arith.constant 0 : index
    %27 = vector.load %arg6[%c2_16, %c2_17, %c0_18] : memref<11x12x128xbf16, #tpu.memory_space<vmem>>, vector<7x7x128xbf16>
    tpu.vector_store %arg6[%c2_16, %c2_17, %c0_18], %18 {strides = array<i32>} : memref<11x12x128xbf16, #tpu.memory_space<vmem>>, vector<7x7x128xbf16>,
    %c0_19 = arith.constant 0 : index
    %c0_20 = arith.constant 0 : index
    %c0_21 = arith.constant 0 : index
    %28 = vector.load %arg6[%c0_19, %c0_20, %c0_21] : memref<11x12x128xbf16, #tpu.memory_space<vmem>>, vector<11x12x128xbf16>
    %29 = vector.extract_strided_slice %28 {offsets = [0, 0, 0], sizes = [11, 8, 128], strides = [1, 1, 1]} : vector<11x12x128xbf16> to vector<11x8x128xbf16>
    %30 = vector.extract_strided_slice %28 {offsets = [0, 1, 0], sizes = [11, 8, 128], strides = [1, 1, 1]} : vector<11x12x128xbf16> to vector<11x8x128xbf16>
    %31 = vector.extract_strided_slice %28 {offsets = [0, 2, 0], sizes = [11, 8, 128], strides = [1, 1, 1]} : vector<11x12x128xbf16> to vector<11x8x128xbf16>
    %32 = vector.extract_strided_slice %28 {offsets = [0, 3, 0], sizes = [11, 8, 128], strides = [1, 1, 1]} : vector<11x12x128xbf16> to vector<11x8x128xbf16>
    %33 = vector.extract_strided_slice %28 {offsets = [0, 4, 0], sizes = [11, 8, 128], strides = [1, 1, 1]} : vector<11x12x128xbf16> to vector<11x8x128xbf16>
    %34 = tpu.concatenate %29, %30, %31, %32, %33 in 2 : vector<11x8x128xbf16>, vector<11x8x128xbf16>, vector<11x8x128xbf16>, vector<11x8x128xbf16>, vector<11x8x128xbf16> -> vector<11x8x640xbf16>
    %35 = vector.shape_cast %34 : vector<11x8x640xbf16> to vector<88x640xbf16>
    %cst_22 = arith.constant 0.000000e+00 : f32
    %36 = vector.broadcast %cst_22 : f32 to vector<56x256xf32>
    %37 = vector.extract_strided_slice %35 {offsets = [0, 0], sizes = [56, 640], strides = [1, 1]} : vector<88x640xbf16> to vector<56x640xbf16>
    %c0_23 = arith.constant 0 : index
    %c0_24 = arith.constant 0 : index
    %c0_25 = arith.constant 0 : index
    %38 = vector.load %arg2[%c0_23, %c0_24, %c0_25] : memref<5x640x256xbf16, #tpu.memory_space<vmem>>, vector<1x640x256xbf16>
    %39 = vector.shape_cast %38 : vector<1x640x256xbf16> to vector<640x256xbf16>
    %cst_26 = arith.constant dense<0.000000e+00> : vector<56x256xf32>
    %40 = tpu.matmul %37, %39, %cst_26 {dimension_numbers = #tpu.dot_dimension_numbers<[1], [0], [0], [1], [0, 0, 1, 1], [], []>} : vector<56x640xbf16>, vector<640x256xbf16>, vector<56x256xf32> -> vector<56x256xf32>
    %41 = arith.addf %36, %40 : vector<56x256xf32>
    %42 = vector.extract_strided_slice %35 {offsets = [8, 0], sizes = [56, 640], strides = [1, 1]} : vector<88x640xbf16> to vector<56x640xbf16>
    %c1 = arith.constant 1 : index
    %c0_27 = arith.constant 0 : index
    %c0_28 = arith.constant 0 : index
    %43 = vector.load %arg2[%c1, %c0_27, %c0_28] : memref<5x640x256xbf16, #tpu.memory_space<vmem>>, vector<1x640x256xbf16>
    %44 = vector.shape_cast %43 : vector<1x640x256xbf16> to vector<640x256xbf16>
    %cst_29 = arith.constant dense<0.000000e+00> : vector<56x256xf32>
    %45 = tpu.matmul %42, %44, %cst_29 {dimension_numbers = #tpu.dot_dimension_numbers<[1], [0], [0], [1], [0, 0, 1, 1], [], []>} : vector<56x640xbf16>, vector<640x256xbf16>, vector<56x256xf32> -> vector<56x256xf32>
    %46 = arith.addf %41, %45 : vector<56x256xf32>
    %47 = vector.extract_strided_slice %35 {offsets = [16, 0], sizes = [56, 640], strides = [1, 1]} : vector<88x640xbf16> to vector<56x640xbf16>
    %c2_30 = arith.constant 2 : index
    %c0_31 = arith.constant 0 : index
    %c0_32 = arith.constant 0 : index
    %48 = vector.load %arg2[%c2_30, %c0_31, %c0_32] : memref<5x640x256xbf16, #tpu.memory_space<vmem>>, vector<1x640x256xbf16>
    %49 = vector.shape_cast %48 : vector<1x640x256xbf16> to vector<640x256xbf16>
    %cst_33 = arith.constant dense<0.000000e+00> : vector<56x256xf32>
    %50 = tpu.matmul %47, %49, %cst_33 {dimension_numbers = #tpu.dot_dimension_numbers<[1], [0], [0], [1], [0, 0, 1, 1], [], []>} : vector<56x640xbf16>, vector<640x256xbf16>, vector<56x256xf32> -> vector<56x256xf32>
    %51 = arith.addf %46, %50 : vector<56x256xf32>
    %52 = vector.extract_strided_slice %35 {offsets = [24, 0], sizes = [56, 640], strides = [1, 1]} : vector<88x640xbf16> to vector<56x640xbf16>
    %c3 = arith.constant 3 : index
    %c0_34 = arith.constant 0 : index
    %c0_35 = arith.constant 0 : index
    %53 = vector.load %arg2[%c3, %c0_34, %c0_35] : memref<5x640x256xbf16, #tpu.memory_space<vmem>>, vector<1x640x256xbf16>
    %54 = vector.shape_cast %53 : vector<1x640x256xbf16> to vector<640x256xbf16>
    %cst_36 = arith.constant dense<0.000000e+00> : vector<56x256xf32>
    %55 = tpu.matmul %52, %54, %cst_36 {dimension_numbers = #tpu.dot_dimension_numbers<[1], [0], [0], [1], [0, 0, 1, 1], [], []>} : vector<56x640xbf16>, vector<640x256xbf16>, vector<56x256xf32> -> vector<56x256xf32>
    %56 = arith.addf %51, %55 : vector<56x256xf32>
    %57 = vector.extract_strided_slice %35 {offsets = [32, 0], sizes = [56, 640], strides = [1, 1]} : vector<88x640xbf16> to vector<56x640xbf16>
    %c4 = arith.constant 4 : index
    %c0_37 = arith.constant 0 : index
    %c0_38 = arith.constant 0 : index
    %58 = vector.load %arg2[%c4, %c0_37, %c0_38] : memref<5x640x256xbf16, #tpu.memory_space<vmem>>, vector<1x640x256xbf16>
    %59 = vector.shape_cast %58 : vector<1x640x256xbf16> to vector<640x256xbf16>
    %cst_39 = arith.constant dense<0.000000e+00> : vector<56x256xf32>
    %60 = tpu.matmul %57, %59, %cst_39 {dimension_numbers = #tpu.dot_dimension_numbers<[1], [0], [0], [1], [0, 0, 1, 1], [], []>} : vector<56x640xbf16>, vector<640x256xbf16>, vector<56x256xf32> -> vector<56x256xf32>
    %61 = arith.addf %56, %60 : vector<56x256xf32>
    %c0_40 = arith.constant 0 : index
    %c0_41 = arith.constant 0 : index
    %62 = vector.load %arg3[%c0_40, %c0_41] : memref<1x256xf32, #tpu.memory_space<vmem>>, vector<1x256xf32>
    %63 = vector.broadcast %62 : vector<1x256xf32> to vector<56x256xf32>
    %64 = arith.addf %61, %63 : vector<56x256xf32>
    %cst_42 = arith.constant 0.000000e+00 : f32
    %65 = vector.broadcast %cst_42 : f32 to vector<56x256xf32>
    %66 = arith.maximumf %64, %65 : vector<56x256xf32>
    %67 = vector.shape_cast %66 : vector<56x256xf32> to vector<7x8x256xf32>
    %c0_43 = arith.constant 0 : index
    %c0_44 = arith.constant 0 : index
    %c0_45 = arith.constant 0 : index
    %c0_46 = arith.constant 0 : index
    %68 = vector.load %arg4[%c0_43, %c0_44, %c0_45, %c0_46] : memref<1x7x8x256xf32, #tpu.memory_space<vmem>>, vector<1x7x8x256xf32>
    %69 = vector.shape_cast %68 : vector<1x7x8x256xf32> to vector<7x8x256xf32>
    %70 = vector.shape_cast %67 : vector<7x8x256xf32> to vector<1x7x8x256xf32>
    tpu.vector_store %arg4[%c0_43, %c0_44, %c0_45, %c0_46], %70 {strides = array<i32>} : memref<1x7x8x256xf32, #tpu.memory_space<vmem>>, vector<1x7x8x256xf32>,
    %71 = arith.truncf %67 : vector<7x8x256xf32> to vector<7x8x256xbf16>
    %c0_47 = arith.constant 0 : index
    %c0_48 = arith.constant 0 : index
    %c0_49 = arith.constant 0 : index
    %c0_50 = arith.constant 0 : index
    %72 = vector.load %arg5[%c0_47, %c0_48, %c0_49, %c0_50] : memref<1x7x8x256xbf16, #tpu.memory_space<vmem>>, vector<1x7x8x256xbf16>
    %73 = vector.shape_cast %72 : vector<1x7x8x256xbf16> to vector<7x8x256xbf16>
    %74 = vector.shape_cast %71 : vector<7x8x256xbf16> to vector<1x7x8x256xbf16>
    tpu.vector_store %arg5[%c0_47, %c0_48, %c0_49, %c0_50], %74 {strides = array<i32>} : memref<1x7x8x256xbf16, #tpu.memory_space<vmem>>, vector<1x7x8x256xbf16>,
    return
  }
  func.func @transform_0(%arg0: i32) -> (i32, i32, i32, i32) {
    %c0_i32 = arith.constant 0 : i32
    %c0_i32_0 = arith.constant 0 : i32
    %c0_i32_1 = arith.constant 0 : i32
    %c0_i32_2 = arith.constant 0 : i32
    return %arg0, %c0_i32, %c0_i32_0, %c0_i32_1 : i32, i32, i32, i32
  }
  func.func @transform_1(%arg0: i32) -> (i32, i32, i32) {
    %c0_i32 = arith.constant 0 : i32
    %c0_i32_0 = arith.constant 0 : i32
    %c0_i32_1 = arith.constant 0 : i32
    %c0_i32_2 = arith.constant 0 : i32
    return %c0_i32, %c0_i32_0, %c0_i32_1 : i32, i32, i32
  }
  func.func @transform_2(%arg0: i32) -> (i32, i32) {
    %c0_i32 = arith.constant 0 : i32
    %c0_i32_0 = arith.constant 0 : i32
    %c0_i32_1 = arith.constant 0 : i32
    return %c0_i32, %c0_i32_0 : i32, i32
  }
  func.func @transform_3(%arg0: i32) -> (i32, i32, i32, i32) {
    %c0_i32 = arith.constant 0 : i32
    %c0_i32_0 = arith.constant 0 : i32
    %c0_i32_1 = arith.constant 0 : i32
    %c0_i32_2 = arith.constant 0 : i32
    return %arg0, %c0_i32, %c0_i32_0, %c0_i32_1 : i32, i32, i32, i32
  }
  func.func @transform_4(%arg0: i32) -> (i32, i32, i32, i32) {
    %c0_i32 = arith.constant 0 : i32
    %c0_i32_0 = arith.constant 0 : i32
    %c0_i32_1 = arith.constant 0 : i32
    %c0_i32_2 = arith.constant 0 : i32
    return %arg0, %c0_i32, %c0_i32_0, %c0_i32_1 : i32, i32, i32, i32
  }
}

module attributes {stable_mosaic.version = 11 : i64} {
  func.func @kernel(%arg0: i32, %arg1: memref<1x7x4x512xbf16, #tpu.memory_space<vmem>>, %arg2: memref<3x768x384xbf16, #tpu.memory_space<vmem>>, %arg3: memref<1x384xf32, #tpu.memory_space<vmem>>, %arg4: memref<3x1152x256xbf16, #tpu.memory_space<vmem>>, %arg5: memref<1x256xf32, #tpu.memory_space<vmem>>, %arg6: memref<3x768x256xbf16, #tpu.memory_space<vmem>>, %arg7: memref<1x256xf32, #tpu.memory_space<vmem>>, %arg8: memref<1x3x8x384xf32, #tpu.memory_space<vmem>>, %arg9: memref<1x3x8x256xf32, #tpu.memory_space<vmem>>, %arg10: memref<1x3x8x256xf32, #tpu.memory_space<vmem>>, %arg11: memref<5x10x256xbf16, #tpu.memory_space<vmem>>, %arg12: memref<5x10x384xbf16, #tpu.memory_space<vmem>>, %arg13: memref<5x10x256xbf16, #tpu.memory_space<vmem>>) attributes {dimension_semantics = [#tpu.dimension_semantics<parallel>], iteration_bounds = array<i64: 2>, scalar_prefetch = 0 : i64, scratch_operands = 3 : i64, tpu.core_type = #tpu.core_type<tc>, window_params = [{transform_indices = @transform_0, window_bounds = array<i64: 1, 7, 4, 512>}, {pipeline_mode = #tpu.pipeline_mode<synchronous>, transform_indices = @transform_1, window_bounds = array<i64: 3, 768, 384>}, {pipeline_mode = #tpu.pipeline_mode<synchronous>, transform_indices = @transform_2, window_bounds = array<i64: 1, 384>}, {pipeline_mode = #tpu.pipeline_mode<synchronous>, transform_indices = @transform_3, window_bounds = array<i64: 3, 1152, 256>}, {pipeline_mode = #tpu.pipeline_mode<synchronous>, transform_indices = @transform_4, window_bounds = array<i64: 1, 256>}, {pipeline_mode = #tpu.pipeline_mode<synchronous>, transform_indices = @transform_5, window_bounds = array<i64: 3, 768, 256>}, {pipeline_mode = #tpu.pipeline_mode<synchronous>, transform_indices = @transform_6, window_bounds = array<i64: 1, 256>}, {transform_indices = @transform_7, window_bounds = array<i64: 1, 3, 8, 384>}, {transform_indices = @transform_8, window_bounds = array<i64: 1, 3, 8, 256>}, {transform_indices = @transform_9, window_bounds = array<i64: 1, 3, 8, 256>}]} {
    %c0 = arith.constant 0 : index
    %c0_0 = arith.constant 0 : index
    %c0_1 = arith.constant 0 : index
    %c0_2 = arith.constant 0 : index
    %0 = vector.load %arg1[%c0, %c0_0, %c0_1, %c0_2] : memref<1x7x4x512xbf16, #tpu.memory_space<vmem>>, vector<1x7x4x512xbf16>
    %1 = vector.shape_cast %0 : vector<1x7x4x512xbf16> to vector<7x4x512xbf16>
    %2 = vector.extract_strided_slice %1 {offsets = [0, 0, 0], sizes = [7, 3, 256], strides = [1, 1, 1]} : vector<7x4x512xbf16> to vector<7x3x256xbf16>
    %3 = vector.extract_strided_slice %1 {offsets = [0, 0, 256], sizes = [7, 3, 256], strides = [1, 1, 1]} : vector<7x4x512xbf16> to vector<7x3x256xbf16>
    %4 = vector.extract_strided_slice %1 {offsets = [0, 1, 0], sizes = [7, 3, 256], strides = [1, 1, 1]} : vector<7x4x512xbf16> to vector<7x3x256xbf16>
    %5 = arith.maximumf %2, %3 : vector<7x3x256xbf16>
    %6 = arith.maximumf %5, %4 : vector<7x3x256xbf16>
    %7 = vector.extract_strided_slice %6 {offsets = [0, 0, 0], sizes = [6, 3, 256], strides = [1, 1, 1]} : vector<7x3x256xbf16> to vector<6x3x256xbf16>
    %8 = vector.shape_cast %7 : vector<6x3x256xbf16> to vector<3x2x3x256xbf16>
    %9 = vector.extract_strided_slice %6 {offsets = [1, 0, 0], sizes = [6, 3, 256], strides = [1, 1, 1]} : vector<7x3x256xbf16> to vector<6x3x256xbf16>
    %10 = vector.shape_cast %9 : vector<6x3x256xbf16> to vector<3x2x3x256xbf16>
    %11 = vector.extract_strided_slice %8 {offsets = [0, 0, 0, 0], sizes = [3, 1, 3, 256], strides = [1, 1, 1, 1]} : vector<3x2x3x256xbf16> to vector<3x1x3x256xbf16>
    %12 = vector.shape_cast %11 : vector<3x1x3x256xbf16> to vector<3x3x256xbf16>
    %13 = vector.extract_strided_slice %8 {offsets = [0, 1, 0, 0], sizes = [3, 1, 3, 256], strides = [1, 1, 1, 1]} : vector<3x2x3x256xbf16> to vector<3x1x3x256xbf16>
    %14 = vector.shape_cast %13 : vector<3x1x3x256xbf16> to vector<3x3x256xbf16>
    %15 = arith.maximumf %12, %14 : vector<3x3x256xbf16>
    %16 = vector.extract_strided_slice %10 {offsets = [0, 1, 0, 0], sizes = [3, 1, 3, 256], strides = [1, 1, 1, 1]} : vector<3x2x3x256xbf16> to vector<3x1x3x256xbf16>
    %17 = vector.shape_cast %16 : vector<3x1x3x256xbf16> to vector<3x3x256xbf16>
    %18 = arith.maximumf %15, %17 : vector<3x3x256xbf16>
    %cst = arith.constant 0.000000e+00 : bf16
    %19 = vector.broadcast %cst : bf16 to vector<1x10x256xbf16>
    %c0_3 = arith.constant 0 : index
    %c0_4 = arith.constant 0 : index
    %c0_5 = arith.constant 0 : index
    %20 = vector.load %arg11[%c0_3, %c0_4, %c0_5] : memref<5x10x256xbf16, #tpu.memory_space<vmem>>, vector<1x10x256xbf16>
    tpu.vector_store %arg11[%c0_3, %c0_4, %c0_5], %19 {strides = array<i32>} : memref<5x10x256xbf16, #tpu.memory_space<vmem>>, vector<1x10x256xbf16>,
    %cst_6 = arith.constant 0.000000e+00 : bf16
    %21 = vector.broadcast %cst_6 : bf16 to vector<1x10x256xbf16>
    %c4 = arith.constant 4 : index
    %c0_7 = arith.constant 0 : index
    %c0_8 = arith.constant 0 : index
    %22 = vector.load %arg11[%c4, %c0_7, %c0_8] : memref<5x10x256xbf16, #tpu.memory_space<vmem>>, vector<1x10x256xbf16>
    tpu.vector_store %arg11[%c4, %c0_7, %c0_8], %21 {strides = array<i32>} : memref<5x10x256xbf16, #tpu.memory_space<vmem>>, vector<1x10x256xbf16>,
    %cst_9 = arith.constant 0.000000e+00 : bf16
    %23 = vector.broadcast %cst_9 : bf16 to vector<3x1x256xbf16>
    %c1 = arith.constant 1 : index
    %c0_10 = arith.constant 0 : index
    %c0_11 = arith.constant 0 : index
    %24 = vector.load %arg11[%c1, %c0_10, %c0_11] : memref<5x10x256xbf16, #tpu.memory_space<vmem>>, vector<3x1x256xbf16>
    tpu.vector_store %arg11[%c1, %c0_10, %c0_11], %23 {strides = array<i32>} : memref<5x10x256xbf16, #tpu.memory_space<vmem>>, vector<3x1x256xbf16>,
    %cst_12 = arith.constant 0.000000e+00 : bf16
    %25 = vector.broadcast %cst_12 : bf16 to vector<3x6x256xbf16>
    %c1_13 = arith.constant 1 : index
    %c4_14 = arith.constant 4 : index
    %c0_15 = arith.constant 0 : index
    %26 = vector.load %arg11[%c1_13, %c4_14, %c0_15] : memref<5x10x256xbf16, #tpu.memory_space<vmem>>, vector<3x6x256xbf16>
    tpu.vector_store %arg11[%c1_13, %c4_14, %c0_15], %25 {strides = array<i32>} : memref<5x10x256xbf16, #tpu.memory_space<vmem>>, vector<3x6x256xbf16>,
    %c1_16 = arith.constant 1 : index
    %c1_17 = arith.constant 1 : index
    %c0_18 = arith.constant 0 : index
    %27 = vector.load %arg11[%c1_16, %c1_17, %c0_18] : memref<5x10x256xbf16, #tpu.memory_space<vmem>>, vector<3x3x256xbf16>
    tpu.vector_store %arg11[%c1_16, %c1_17, %c0_18], %18 {strides = array<i32>} : memref<5x10x256xbf16, #tpu.memory_space<vmem>>, vector<3x3x256xbf16>,
    %c0_19 = arith.constant 0 : index
    %c0_20 = arith.constant 0 : index
    %c0_21 = arith.constant 0 : index
    %28 = vector.load %arg11[%c0_19, %c0_20, %c0_21] : memref<5x10x256xbf16, #tpu.memory_space<vmem>>, vector<5x10x256xbf16>
    %29 = vector.extract_strided_slice %28 {offsets = [0, 0, 0], sizes = [5, 8, 256], strides = [1, 1, 1]} : vector<5x10x256xbf16> to vector<5x8x256xbf16>
    %30 = vector.extract_strided_slice %28 {offsets = [0, 1, 0], sizes = [5, 8, 256], strides = [1, 1, 1]} : vector<5x10x256xbf16> to vector<5x8x256xbf16>
    %31 = vector.extract_strided_slice %28 {offsets = [0, 2, 0], sizes = [5, 8, 256], strides = [1, 1, 1]} : vector<5x10x256xbf16> to vector<5x8x256xbf16>
    %32 = tpu.concatenate %29, %30, %31 in 2 : vector<5x8x256xbf16>, vector<5x8x256xbf16>, vector<5x8x256xbf16> -> vector<5x8x768xbf16>
    %33 = vector.shape_cast %32 : vector<5x8x768xbf16> to vector<40x768xbf16>
    %cst_22 = arith.constant 0.000000e+00 : f32
    %34 = vector.broadcast %cst_22 : f32 to vector<24x384xf32>
    %35 = vector.extract_strided_slice %33 {offsets = [0, 0], sizes = [24, 768], strides = [1, 1]} : vector<40x768xbf16> to vector<24x768xbf16>
    %c0_23 = arith.constant 0 : index
    %c0_24 = arith.constant 0 : index
    %c0_25 = arith.constant 0 : index
    %36 = vector.load %arg2[%c0_23, %c0_24, %c0_25] : memref<3x768x384xbf16, #tpu.memory_space<vmem>>, vector<1x768x384xbf16>
    %37 = vector.shape_cast %36 : vector<1x768x384xbf16> to vector<768x384xbf16>
    %cst_26 = arith.constant dense<0.000000e+00> : vector<24x384xf32>
    %38 = tpu.matmul %35, %37, %cst_26 {dimension_numbers = #tpu.dot_dimension_numbers<[1], [0], [0], [1], [0, 0, 1, 1], [], []>} : vector<24x768xbf16>, vector<768x384xbf16>, vector<24x384xf32> -> vector<24x384xf32>
    %39 = arith.addf %34, %38 : vector<24x384xf32>
    %40 = vector.extract_strided_slice %33 {offsets = [8, 0], sizes = [24, 768], strides = [1, 1]} : vector<40x768xbf16> to vector<24x768xbf16>
    %c1_27 = arith.constant 1 : index
    %c0_28 = arith.constant 0 : index
    %c0_29 = arith.constant 0 : index
    %41 = vector.load %arg2[%c1_27, %c0_28, %c0_29] : memref<3x768x384xbf16, #tpu.memory_space<vmem>>, vector<1x768x384xbf16>
    %42 = vector.shape_cast %41 : vector<1x768x384xbf16> to vector<768x384xbf16>
    %cst_30 = arith.constant dense<0.000000e+00> : vector<24x384xf32>
    %43 = tpu.matmul %40, %42, %cst_30 {dimension_numbers = #tpu.dot_dimension_numbers<[1], [0], [0], [1], [0, 0, 1, 1], [], []>} : vector<24x768xbf16>, vector<768x384xbf16>, vector<24x384xf32> -> vector<24x384xf32>
    %44 = arith.addf %39, %43 : vector<24x384xf32>
    %45 = vector.extract_strided_slice %33 {offsets = [16, 0], sizes = [24, 768], strides = [1, 1]} : vector<40x768xbf16> to vector<24x768xbf16>
    %c2 = arith.constant 2 : index
    %c0_31 = arith.constant 0 : index
    %c0_32 = arith.constant 0 : index
    %46 = vector.load %arg2[%c2, %c0_31, %c0_32] : memref<3x768x384xbf16, #tpu.memory_space<vmem>>, vector<1x768x384xbf16>
    %47 = vector.shape_cast %46 : vector<1x768x384xbf16> to vector<768x384xbf16>
    %cst_33 = arith.constant dense<0.000000e+00> : vector<24x384xf32>
    %48 = tpu.matmul %45, %47, %cst_33 {dimension_numbers = #tpu.dot_dimension_numbers<[1], [0], [0], [1], [0, 0, 1, 1], [], []>} : vector<24x768xbf16>, vector<768x384xbf16>, vector<24x384xf32> -> vector<24x384xf32>
    %49 = arith.addf %44, %48 : vector<24x384xf32>
    %c0_34 = arith.constant 0 : index
    %c0_35 = arith.constant 0 : index
    %50 = vector.load %arg3[%c0_34, %c0_35] : memref<1x384xf32, #tpu.memory_space<vmem>>, vector<1x384xf32>
    %51 = vector.broadcast %50 : vector<1x384xf32> to vector<24x384xf32>
    %52 = arith.addf %49, %51 : vector<24x384xf32>
    %cst_36 = arith.constant 0.000000e+00 : f32
    %53 = vector.broadcast %cst_36 : f32 to vector<24x384xf32>
    %54 = arith.maximumf %52, %53 : vector<24x384xf32>
    %55 = vector.shape_cast %54 : vector<24x384xf32> to vector<3x8x384xf32>
    %c0_37 = arith.constant 0 : index
    %c0_38 = arith.constant 0 : index
    %c0_39 = arith.constant 0 : index
    %c0_40 = arith.constant 0 : index
    %56 = vector.load %arg8[%c0_37, %c0_38, %c0_39, %c0_40] : memref<1x3x8x384xf32, #tpu.memory_space<vmem>>, vector<1x3x8x384xf32>
    %57 = vector.shape_cast %56 : vector<1x3x8x384xf32> to vector<3x8x384xf32>
    %58 = vector.shape_cast %55 : vector<3x8x384xf32> to vector<1x3x8x384xf32>
    tpu.vector_store %arg8[%c0_37, %c0_38, %c0_39, %c0_40], %58 {strides = array<i32>} : memref<1x3x8x384xf32, #tpu.memory_space<vmem>>, vector<1x3x8x384xf32>,
    %cst_41 = arith.constant 0.000000e+00 : bf16
    %59 = vector.broadcast %cst_41 : bf16 to vector<1x10x384xbf16>
    %c0_42 = arith.constant 0 : index
    %c0_43 = arith.constant 0 : index
    %c0_44 = arith.constant 0 : index
    %60 = vector.load %arg12[%c0_42, %c0_43, %c0_44] : memref<5x10x384xbf16, #tpu.memory_space<vmem>>, vector<1x10x384xbf16>
    tpu.vector_store %arg12[%c0_42, %c0_43, %c0_44], %59 {strides = array<i32>} : memref<5x10x384xbf16, #tpu.memory_space<vmem>>, vector<1x10x384xbf16>,
    %cst_45 = arith.constant 0.000000e+00 : bf16
    %61 = vector.broadcast %cst_45 : bf16 to vector<1x10x384xbf16>
    %c4_46 = arith.constant 4 : index
    %c0_47 = arith.constant 0 : index
    %c0_48 = arith.constant 0 : index
    %62 = vector.load %arg12[%c4_46, %c0_47, %c0_48] : memref<5x10x384xbf16, #tpu.memory_space<vmem>>, vector<1x10x384xbf16>
    tpu.vector_store %arg12[%c4_46, %c0_47, %c0_48], %61 {strides = array<i32>} : memref<5x10x384xbf16, #tpu.memory_space<vmem>>, vector<1x10x384xbf16>,
    %cst_49 = arith.constant 0.000000e+00 : bf16
    %63 = vector.broadcast %cst_49 : bf16 to vector<3x1x384xbf16>
    %c1_50 = arith.constant 1 : index
    %c0_51 = arith.constant 0 : index
    %c0_52 = arith.constant 0 : index
    %64 = vector.load %arg12[%c1_50, %c0_51, %c0_52] : memref<5x10x384xbf16, #tpu.memory_space<vmem>>, vector<3x1x384xbf16>
    tpu.vector_store %arg12[%c1_50, %c0_51, %c0_52], %63 {strides = array<i32>} : memref<5x10x384xbf16, #tpu.memory_space<vmem>>, vector<3x1x384xbf16>,
    %cst_53 = arith.constant 0.000000e+00 : bf16
    %65 = vector.broadcast %cst_53 : bf16 to vector<3x6x384xbf16>
    %c1_54 = arith.constant 1 : index
    %c4_55 = arith.constant 4 : index
    %c0_56 = arith.constant 0 : index
    %66 = vector.load %arg12[%c1_54, %c4_55, %c0_56] : memref<5x10x384xbf16, #tpu.memory_space<vmem>>, vector<3x6x384xbf16>
    tpu.vector_store %arg12[%c1_54, %c4_55, %c0_56], %65 {strides = array<i32>} : memref<5x10x384xbf16, #tpu.memory_space<vmem>>, vector<3x6x384xbf16>,
    %67 = vector.extract_strided_slice %55 {offsets = [0, 0, 0], sizes = [3, 3, 384], strides = [1, 1, 1]} : vector<3x8x384xf32> to vector<3x3x384xf32>
    %68 = arith.truncf %67 : vector<3x3x384xf32> to vector<3x3x384xbf16>
    %c1_57 = arith.constant 1 : index
    %c1_58 = arith.constant 1 : index
    %c0_59 = arith.constant 0 : index
    %69 = vector.load %arg12[%c1_57, %c1_58, %c0_59] : memref<5x10x384xbf16, #tpu.memory_space<vmem>>, vector<3x3x384xbf16>
    tpu.vector_store %arg12[%c1_57, %c1_58, %c0_59], %68 {strides = array<i32>} : memref<5x10x384xbf16, #tpu.memory_space<vmem>>, vector<3x3x384xbf16>,
    %c0_60 = arith.constant 0 : index
    %c0_61 = arith.constant 0 : index
    %c0_62 = arith.constant 0 : index
    %70 = vector.load %arg12[%c0_60, %c0_61, %c0_62] : memref<5x10x384xbf16, #tpu.memory_space<vmem>>, vector<5x10x384xbf16>
    %71 = vector.extract_strided_slice %70 {offsets = [0, 0, 0], sizes = [5, 8, 384], strides = [1, 1, 1]} : vector<5x10x384xbf16> to vector<5x8x384xbf16>
    %72 = vector.extract_strided_slice %70 {offsets = [0, 1, 0], sizes = [5, 8, 384], strides = [1, 1, 1]} : vector<5x10x384xbf16> to vector<5x8x384xbf16>
    %73 = vector.extract_strided_slice %70 {offsets = [0, 2, 0], sizes = [5, 8, 384], strides = [1, 1, 1]} : vector<5x10x384xbf16> to vector<5x8x384xbf16>
    %74 = tpu.concatenate %71, %72, %73 in 2 : vector<5x8x384xbf16>, vector<5x8x384xbf16>, vector<5x8x384xbf16> -> vector<5x8x1152xbf16>
    %75 = vector.shape_cast %74 : vector<5x8x1152xbf16> to vector<40x1152xbf16>
    %cst_63 = arith.constant 0.000000e+00 : f32
    %76 = vector.broadcast %cst_63 : f32 to vector<24x256xf32>
    %77 = vector.extract_strided_slice %75 {offsets = [0, 0], sizes = [24, 1152], strides = [1, 1]} : vector<40x1152xbf16> to vector<24x1152xbf16>
    %c0_64 = arith.constant 0 : index
    %c0_65 = arith.constant 0 : index
    %c0_66 = arith.constant 0 : index
    %78 = vector.load %arg4[%c0_64, %c0_65, %c0_66] : memref<3x1152x256xbf16, #tpu.memory_space<vmem>>, vector<1x1152x256xbf16>
    %79 = vector.shape_cast %78 : vector<1x1152x256xbf16> to vector<1152x256xbf16>
    %cst_67 = arith.constant dense<0.000000e+00> : vector<24x256xf32>
    %80 = tpu.matmul %77, %79, %cst_67 {dimension_numbers = #tpu.dot_dimension_numbers<[1], [0], [0], [1], [0, 0, 1, 1], [], []>} : vector<24x1152xbf16>, vector<1152x256xbf16>, vector<24x256xf32> -> vector<24x256xf32>
    %81 = arith.addf %76, %80 : vector<24x256xf32>
    %82 = vector.extract_strided_slice %75 {offsets = [8, 0], sizes = [24, 1152], strides = [1, 1]} : vector<40x1152xbf16> to vector<24x1152xbf16>
    %c1_68 = arith.constant 1 : index
    %c0_69 = arith.constant 0 : index
    %c0_70 = arith.constant 0 : index
    %83 = vector.load %arg4[%c1_68, %c0_69, %c0_70] : memref<3x1152x256xbf16, #tpu.memory_space<vmem>>, vector<1x1152x256xbf16>
    %84 = vector.shape_cast %83 : vector<1x1152x256xbf16> to vector<1152x256xbf16>
    %cst_71 = arith.constant dense<0.000000e+00> : vector<24x256xf32>
    %85 = tpu.matmul %82, %84, %cst_71 {dimension_numbers = #tpu.dot_dimension_numbers<[1], [0], [0], [1], [0, 0, 1, 1], [], []>} : vector<24x1152xbf16>, vector<1152x256xbf16>, vector<24x256xf32> -> vector<24x256xf32>
    %86 = arith.addf %81, %85 : vector<24x256xf32>
    %87 = vector.extract_strided_slice %75 {offsets = [16, 0], sizes = [24, 1152], strides = [1, 1]} : vector<40x1152xbf16> to vector<24x1152xbf16>
    %c2_72 = arith.constant 2 : index
    %c0_73 = arith.constant 0 : index
    %c0_74 = arith.constant 0 : index
    %88 = vector.load %arg4[%c2_72, %c0_73, %c0_74] : memref<3x1152x256xbf16, #tpu.memory_space<vmem>>, vector<1x1152x256xbf16>
    %89 = vector.shape_cast %88 : vector<1x1152x256xbf16> to vector<1152x256xbf16>
    %cst_75 = arith.constant dense<0.000000e+00> : vector<24x256xf32>
    %90 = tpu.matmul %87, %89, %cst_75 {dimension_numbers = #tpu.dot_dimension_numbers<[1], [0], [0], [1], [0, 0, 1, 1], [], []>} : vector<24x1152xbf16>, vector<1152x256xbf16>, vector<24x256xf32> -> vector<24x256xf32>
    %91 = arith.addf %86, %90 : vector<24x256xf32>
    %c0_76 = arith.constant 0 : index
    %c0_77 = arith.constant 0 : index
    %92 = vector.load %arg5[%c0_76, %c0_77] : memref<1x256xf32, #tpu.memory_space<vmem>>, vector<1x256xf32>
    %93 = vector.broadcast %92 : vector<1x256xf32> to vector<24x256xf32>
    %94 = arith.addf %91, %93 : vector<24x256xf32>
    %cst_78 = arith.constant 0.000000e+00 : f32
    %95 = vector.broadcast %cst_78 : f32 to vector<24x256xf32>
    %96 = arith.maximumf %94, %95 : vector<24x256xf32>
    %97 = vector.shape_cast %96 : vector<24x256xf32> to vector<3x8x256xf32>
    %c0_79 = arith.constant 0 : index
    %c0_80 = arith.constant 0 : index
    %c0_81 = arith.constant 0 : index
    %c0_82 = arith.constant 0 : index
    %98 = vector.load %arg9[%c0_79, %c0_80, %c0_81, %c0_82] : memref<1x3x8x256xf32, #tpu.memory_space<vmem>>, vector<1x3x8x256xf32>
    %99 = vector.shape_cast %98 : vector<1x3x8x256xf32> to vector<3x8x256xf32>
    %100 = vector.shape_cast %97 : vector<3x8x256xf32> to vector<1x3x8x256xf32>
    tpu.vector_store %arg9[%c0_79, %c0_80, %c0_81, %c0_82], %100 {strides = array<i32>} : memref<1x3x8x256xf32, #tpu.memory_space<vmem>>, vector<1x3x8x256xf32>,
    %cst_83 = arith.constant 0.000000e+00 : bf16
    %101 = vector.broadcast %cst_83 : bf16 to vector<1x10x256xbf16>
    %c0_84 = arith.constant 0 : index
    %c0_85 = arith.constant 0 : index
    %c0_86 = arith.constant 0 : index
    %102 = vector.load %arg13[%c0_84, %c0_85, %c0_86] : memref<5x10x256xbf16, #tpu.memory_space<vmem>>, vector<1x10x256xbf16>
    tpu.vector_store %arg13[%c0_84, %c0_85, %c0_86], %101 {strides = array<i32>} : memref<5x10x256xbf16, #tpu.memory_space<vmem>>, vector<1x10x256xbf16>,
    %cst_87 = arith.constant 0.000000e+00 : bf16
    %103 = vector.broadcast %cst_87 : bf16 to vector<1x10x256xbf16>
    %c4_88 = arith.constant 4 : index
    %c0_89 = arith.constant 0 : index
    %c0_90 = arith.constant 0 : index
    %104 = vector.load %arg13[%c4_88, %c0_89, %c0_90] : memref<5x10x256xbf16, #tpu.memory_space<vmem>>, vector<1x10x256xbf16>
    tpu.vector_store %arg13[%c4_88, %c0_89, %c0_90], %103 {strides = array<i32>} : memref<5x10x256xbf16, #tpu.memory_space<vmem>>, vector<1x10x256xbf16>,
    %cst_91 = arith.constant 0.000000e+00 : bf16
    %105 = vector.broadcast %cst_91 : bf16 to vector<3x1x256xbf16>
    %c1_92 = arith.constant 1 : index
    %c0_93 = arith.constant 0 : index
    %c0_94 = arith.constant 0 : index
    %106 = vector.load %arg13[%c1_92, %c0_93, %c0_94] : memref<5x10x256xbf16, #tpu.memory_space<vmem>>, vector<3x1x256xbf16>
    tpu.vector_store %arg13[%c1_92, %c0_93, %c0_94], %105 {strides = array<i32>} : memref<5x10x256xbf16, #tpu.memory_space<vmem>>, vector<3x1x256xbf16>,
    %cst_95 = arith.constant 0.000000e+00 : bf16
    %107 = vector.broadcast %cst_95 : bf16 to vector<3x6x256xbf16>
    %c1_96 = arith.constant 1 : index
    %c4_97 = arith.constant 4 : index
    %c0_98 = arith.constant 0 : index
    %108 = vector.load %arg13[%c1_96, %c4_97, %c0_98] : memref<5x10x256xbf16, #tpu.memory_space<vmem>>, vector<3x6x256xbf16>
    tpu.vector_store %arg13[%c1_96, %c4_97, %c0_98], %107 {strides = array<i32>} : memref<5x10x256xbf16, #tpu.memory_space<vmem>>, vector<3x6x256xbf16>,
    %109 = vector.extract_strided_slice %97 {offsets = [0, 0, 0], sizes = [3, 3, 256], strides = [1, 1, 1]} : vector<3x8x256xf32> to vector<3x3x256xf32>
    %110 = arith.truncf %109 : vector<3x3x256xf32> to vector<3x3x256xbf16>
    %c1_99 = arith.constant 1 : index
    %c1_100 = arith.constant 1 : index
    %c0_101 = arith.constant 0 : index
    %111 = vector.load %arg13[%c1_99, %c1_100, %c0_101] : memref<5x10x256xbf16, #tpu.memory_space<vmem>>, vector<3x3x256xbf16>
    tpu.vector_store %arg13[%c1_99, %c1_100, %c0_101], %110 {strides = array<i32>} : memref<5x10x256xbf16, #tpu.memory_space<vmem>>, vector<3x3x256xbf16>,
    %c0_102 = arith.constant 0 : index
    %c0_103 = arith.constant 0 : index
    %c0_104 = arith.constant 0 : index
    %112 = vector.load %arg13[%c0_102, %c0_103, %c0_104] : memref<5x10x256xbf16, #tpu.memory_space<vmem>>, vector<5x10x256xbf16>
    %113 = vector.extract_strided_slice %112 {offsets = [0, 0, 0], sizes = [5, 8, 256], strides = [1, 1, 1]} : vector<5x10x256xbf16> to vector<5x8x256xbf16>
    %114 = vector.extract_strided_slice %112 {offsets = [0, 1, 0], sizes = [5, 8, 256], strides = [1, 1, 1]} : vector<5x10x256xbf16> to vector<5x8x256xbf16>
    %115 = vector.extract_strided_slice %112 {offsets = [0, 2, 0], sizes = [5, 8, 256], strides = [1, 1, 1]} : vector<5x10x256xbf16> to vector<5x8x256xbf16>
    %116 = tpu.concatenate %113, %114, %115 in 2 : vector<5x8x256xbf16>, vector<5x8x256xbf16>, vector<5x8x256xbf16> -> vector<5x8x768xbf16>
    %117 = vector.shape_cast %116 : vector<5x8x768xbf16> to vector<40x768xbf16>
    %cst_105 = arith.constant 0.000000e+00 : f32
    %118 = vector.broadcast %cst_105 : f32 to vector<24x256xf32>
    %119 = vector.extract_strided_slice %117 {offsets = [0, 0], sizes = [24, 768], strides = [1, 1]} : vector<40x768xbf16> to vector<24x768xbf16>
    %c0_106 = arith.constant 0 : index
    %c0_107 = arith.constant 0 : index
    %c0_108 = arith.constant 0 : index
    %120 = vector.load %arg6[%c0_106, %c0_107, %c0_108] : memref<3x768x256xbf16, #tpu.memory_space<vmem>>, vector<1x768x256xbf16>
    %121 = vector.shape_cast %120 : vector<1x768x256xbf16> to vector<768x256xbf16>
    %cst_109 = arith.constant dense<0.000000e+00> : vector<24x256xf32>
    %122 = tpu.matmul %119, %121, %cst_109 {dimension_numbers = #tpu.dot_dimension_numbers<[1], [0], [0], [1], [0, 0, 1, 1], [], []>} : vector<24x768xbf16>, vector<768x256xbf16>, vector<24x256xf32> -> vector<24x256xf32>
    %123 = arith.addf %118, %122 : vector<24x256xf32>
    %124 = vector.extract_strided_slice %117 {offsets = [8, 0], sizes = [24, 768], strides = [1, 1]} : vector<40x768xbf16> to vector<24x768xbf16>
    %c1_110 = arith.constant 1 : index
    %c0_111 = arith.constant 0 : index
    %c0_112 = arith.constant 0 : index
    %125 = vector.load %arg6[%c1_110, %c0_111, %c0_112] : memref<3x768x256xbf16, #tpu.memory_space<vmem>>, vector<1x768x256xbf16>
    %126 = vector.shape_cast %125 : vector<1x768x256xbf16> to vector<768x256xbf16>
    %cst_113 = arith.constant dense<0.000000e+00> : vector<24x256xf32>
    %127 = tpu.matmul %124, %126, %cst_113 {dimension_numbers = #tpu.dot_dimension_numbers<[1], [0], [0], [1], [0, 0, 1, 1], [], []>} : vector<24x768xbf16>, vector<768x256xbf16>, vector<24x256xf32> -> vector<24x256xf32>
    %128 = arith.addf %123, %127 : vector<24x256xf32>
    %129 = vector.extract_strided_slice %117 {offsets = [16, 0], sizes = [24, 768], strides = [1, 1]} : vector<40x768xbf16> to vector<24x768xbf16>
    %c2_114 = arith.constant 2 : index
    %c0_115 = arith.constant 0 : index
    %c0_116 = arith.constant 0 : index
    %130 = vector.load %arg6[%c2_114, %c0_115, %c0_116] : memref<3x768x256xbf16, #tpu.memory_space<vmem>>, vector<1x768x256xbf16>
    %131 = vector.shape_cast %130 : vector<1x768x256xbf16> to vector<768x256xbf16>
    %cst_117 = arith.constant dense<0.000000e+00> : vector<24x256xf32>
    %132 = tpu.matmul %129, %131, %cst_117 {dimension_numbers = #tpu.dot_dimension_numbers<[1], [0], [0], [1], [0, 0, 1, 1], [], []>} : vector<24x768xbf16>, vector<768x256xbf16>, vector<24x256xf32> -> vector<24x256xf32>
    %133 = arith.addf %128, %132 : vector<24x256xf32>
    %c0_118 = arith.constant 0 : index
    %c0_119 = arith.constant 0 : index
    %134 = vector.load %arg7[%c0_118, %c0_119] : memref<1x256xf32, #tpu.memory_space<vmem>>, vector<1x256xf32>
    %135 = vector.broadcast %134 : vector<1x256xf32> to vector<24x256xf32>
    %136 = arith.addf %133, %135 : vector<24x256xf32>
    %cst_120 = arith.constant 0.000000e+00 : f32
    %137 = vector.broadcast %cst_120 : f32 to vector<24x256xf32>
    %138 = arith.maximumf %136, %137 : vector<24x256xf32>
    %139 = vector.shape_cast %138 : vector<24x256xf32> to vector<3x8x256xf32>
    %c0_121 = arith.constant 0 : index
    %c0_122 = arith.constant 0 : index
    %c0_123 = arith.constant 0 : index
    %c0_124 = arith.constant 0 : index
    %140 = vector.load %arg10[%c0_121, %c0_122, %c0_123, %c0_124] : memref<1x3x8x256xf32, #tpu.memory_space<vmem>>, vector<1x3x8x256xf32>
    %141 = vector.shape_cast %140 : vector<1x3x8x256xf32> to vector<3x8x256xf32>
    %142 = vector.shape_cast %139 : vector<3x8x256xf32> to vector<1x3x8x256xf32>
    tpu.vector_store %arg10[%c0_121, %c0_122, %c0_123, %c0_124], %142 {strides = array<i32>} : memref<1x3x8x256xf32, #tpu.memory_space<vmem>>, vector<1x3x8x256xf32>,
    return
  }
  func.func @transform_0(%arg0: i32) -> (i32, i32, i32, i32) {
    %c0_i32 = arith.constant 0 : i32
    %c0_i32_0 = arith.constant 0 : i32
    %c0_i32_1 = arith.constant 0 : i32
    %c0_i32_2 = arith.constant 0 : i32
    return %arg0, %c0_i32, %c0_i32_0, %c0_i32_1 : i32, i32, i32, i32
  }
  func.func @transform_1(%arg0: i32) -> (i32, i32, i32) {
    %c0_i32 = arith.constant 0 : i32
    %c0_i32_0 = arith.constant 0 : i32
    %c0_i32_1 = arith.constant 0 : i32
    %c0_i32_2 = arith.constant 0 : i32
    return %c0_i32, %c0_i32_0, %c0_i32_1 : i32, i32, i32
  }
  func.func @transform_2(%arg0: i32) -> (i32, i32) {
    %c0_i32 = arith.constant 0 : i32
    %c0_i32_0 = arith.constant 0 : i32
    %c0_i32_1 = arith.constant 0 : i32
    return %c0_i32, %c0_i32_0 : i32, i32
  }
  func.func @transform_3(%arg0: i32) -> (i32, i32, i32) {
    %c0_i32 = arith.constant 0 : i32
    %c0_i32_0 = arith.constant 0 : i32
    %c0_i32_1 = arith.constant 0 : i32
    %c0_i32_2 = arith.constant 0 : i32
    return %c0_i32, %c0_i32_0, %c0_i32_1 : i32, i32, i32
  }
  func.func @transform_4(%arg0: i32) -> (i32, i32) {
    %c0_i32 = arith.constant 0 : i32
    %c0_i32_0 = arith.constant 0 : i32
    %c0_i32_1 = arith.constant 0 : i32
    return %c0_i32, %c0_i32_0 : i32, i32
  }
  func.func @transform_5(%arg0: i32) -> (i32, i32, i32) {
    %c0_i32 = arith.constant 0 : i32
    %c0_i32_0 = arith.constant 0 : i32
    %c0_i32_1 = arith.constant 0 : i32
    %c0_i32_2 = arith.constant 0 : i32
    return %c0_i32, %c0_i32_0, %c0_i32_1 : i32, i32, i32
  }
  func.func @transform_6(%arg0: i32) -> (i32, i32) {
    %c0_i32 = arith.constant 0 : i32
    %c0_i32_0 = arith.constant 0 : i32
    %c0_i32_1 = arith.constant 0 : i32
    return %c0_i32, %c0_i32_0 : i32, i32
  }
  func.func @transform_7(%arg0: i32) -> (i32, i32, i32, i32) {
    %c0_i32 = arith.constant 0 : i32
    %c0_i32_0 = arith.constant 0 : i32
    %c0_i32_1 = arith.constant 0 : i32
    %c0_i32_2 = arith.constant 0 : i32
    return %arg0, %c0_i32, %c0_i32_0, %c0_i32_1 : i32, i32, i32, i32
  }
  func.func @transform_8(%arg0: i32) -> (i32, i32, i32, i32) {
    %c0_i32 = arith.constant 0 : i32
    %c0_i32_0 = arith.constant 0 : i32
    %c0_i32_1 = arith.constant 0 : i32
    %c0_i32_2 = arith.constant 0 : i32
    return %arg0, %c0_i32, %c0_i32_0, %c0_i32_1 : i32, i32, i32, i32
  }
  func.func @transform_9(%arg0: i32) -> (i32, i32, i32, i32) {
    %c0_i32 = arith.constant 0 : i32
    %c0_i32_0 = arith.constant 0 : i32
    %c0_i32_1 = arith.constant 0 : i32
    %c0_i32_2 = arith.constant 0 : i32
    return %arg0, %c0_i32, %c0_i32_0, %c0_i32_1 : i32, i32, i32, i32
  }
}

</mosaic_0001>

<bundles_post_ra>
// kernel: alexnet_forward.3
= control target key start
LH: loop header
LB: loop body
LE: loop exit
PB: predicated region body
PF: predicated region fallthrough
CT: control target
= control target key end

     0   :  { %v2635_v0 = vmov 0   ;;  %s3536_s1 = inlined_call_operand.vmem [shape: bf16[384,128], index: 1, kind: input, shape index: {}]   ;;  %s3537_s0 = inlined_call_operand.vmem [shape: bf16[512,384], index: 0, kind: input, shape index: {}]   ;;  %s3538_s2 = inlined_call_operand.vmem [shape: f32[1,128], index: 2, kind: input, shape index: {}]   ;;  %s3539_s3 = inlined_call_operand.vmem [shape: f32[512,128], index: 3, kind: output, shape index: {0}]   ;;  %s3540_s4 = inlined_call_operand.vmem [shape: bf16[512,128], index: 4, kind: output, shape index: {1}]  }
   0x1   :  { %856 = vmatprep.subr.bf16.mxu0 %v2635_v0  ;;  %2450 = vmatprep.subr.bf16.mxu1 %v2635_v0  ;;  %v2483_v1 = vld [vmem:[%s3536_s1] sm:$0xff]   ;;  %v2484_v2 = vld [vmem:[%s3536_s1 + $0x8] sm:$0xff]   ;;  %v2485_v3 = vld [vmem:[%s3536_s1 + $0x10] sm:$0xff]  }
   0x2   :  { %857 = vmatpush1.bf16.msra.mxu0 %v2483_v1  ;;  %2466 = vmatpush1.bf16.msra.mxu1 %v2483_v1  ;;  %v2486_v4 = vld [vmem:[%s3536_s1 + $0x18] sm:$0xff]   ;;  %v2487_v5 = vld [vmem:[%s3536_s1 + $0x20] sm:$0xff]   ;;  %v2488_v7 = vld [vmem:[%s3536_s1 + $0x28] sm:$0xff]  }
   0x3   :  { %858 = vmatprep.subr.bf16.mxu0 %v2635_v0  ;;  %2451 = vmatprep.subr.bf16.mxu1 %v2635_v0  ;;  %v2501_v6 = vld [vmem:[%s3537_s0 + $0x4] ss:$12 sps:$4 sm:$0xff]   ;;  %v2490_v10 = vld [vmem:[%s3536_s1 + $0x38] sm:$0xff]   ;;  %v2492_v12 = vld [vmem:[%s3536_s1 + $0x48] sm:$0xff]  }
   0x4   :  { %v2504_v8 = vld [vmem:[%s3537_s0 + $0x244] ss:$12 sps:$4 sm:$0xff]   ;;  %888 = vmatprep.mubr.bf16.mxu0 %v2501_v6  ;;  %v2494_v14 = vld [vmem:[%s3536_s1 + $0x58] sm:$0xff]   ;;  %v2496_v16 = vld [vmem:[%s3536_s1 + $0x68] sm:$0xff]  }
   0x5   :  { %1080 = vmatprep.mubr.bf16.mxu1 %v2504_v8  ;;  %v2489_v9 = vld [vmem:[%s3536_s1 + $0x30] sm:$0xff]   ;;  %v2491_v11 = vld [vmem:[%s3536_s1 + $0x40] sm:$0xff]   ;;  %v2498_v18 = vld [vmem:[%s3536_s1 + $0x78] sm:$0xff]  }
   0x6   :  { %859 = vmatpush1.bf16.msra.mxu0 %v2484_v2  ;;  %2467 = vmatpush1.bf16.msra.mxu1 %v2484_v2  ;;  %v2493_v13 = vld [vmem:[%s3536_s1 + $0x50] sm:$0xff]   ;;  %v2495_v15 = vld [vmem:[%s3536_s1 + $0x60] sm:$0xff]   ;;  %v2506_v22 = vld [vmem:[%s3537_s0 + $0x1c] ss:$12 sps:$4 sm:$0xff]  }
   0x7   :  { %860 = vmatprep.subr.bf16.mxu0 %v2635_v0  ;;  %2452 = vmatprep.subr.bf16.mxu1 %v2635_v0  ;;  %v2497_v17 = vld [vmem:[%s3536_s1 + $0x70] sm:$0xff]   ;;  %v2505_v19 = vld [vmem:[%s3536_s1 + $0x80] sm:$0xff]   ;;  %v2508_v23 = vld [vmem:[%s3537_s0 + $0x25c] ss:$12 sps:$4 sm:$0xff]  }
   0x8   :  { %v2499_v20 = vld [vmem:[%s3537_s0] ss:$12 sps:$4 sm:$0xff]   ;;  %v2519_v25 = vld [vmem:[%s3536_s1 + $0x90] sm:$0xff]   ;;  %v2510_v26 = vld [vmem:[%s3537_s0 + $0x18] ss:$12 sps:$4 sm:$0xff]  }
   0x9   :  { %v2502_v21 = vld [vmem:[%s3537_s0 + $0x240] ss:$12 sps:$4 sm:$0xff]   ;;  %v2511_v27 = vld [vmem:[%s3537_s0 + $0x258] ss:$12 sps:$4 sm:$0xff]   ;;  %v2517_v31 = vld [vmem:[%s3537_s0 + $0x30] ss:$12 sps:$4 sm:$0xff]  }
   0xa   :  { %861 = vmatpush1.bf16.msra.mxu0 %v2485_v3  ;;  %2468 = vmatpush1.bf16.msra.mxu1 %v2485_v3  ;;  %v2512_v24 = vld [vmem:[%s3536_s1 + $0x88] sm:$0xff]   ;;  %v2513_v28 = vld [vmem:[%s3537_s0 + $0x34] ss:$12 sps:$4 sm:$0xff]   ;;  %v2526_v30 = vld [vmem:[%s3536_s1 + $0x98] sm:$0xff]  }
   0xb   :  { %862 = vmatprep.subr.bf16.mxu0 %v2635_v0  ;;  %2453 = vmatprep.subr.bf16.mxu1 %v2635_v0  ;;  %v2515_v29 = vld [vmem:[%s3537_s0 + $0x274] ss:$12 sps:$4 sm:$0xff]   ;;  %v2518_v33 = vld [vmem:[%s3537_s0 + $0x270] ss:$12 sps:$4 sm:$0xff]   ;;  %v2520_v34 = vld [vmem:[%s3537_s0 + $0x4c] ss:$12 sps:$4 sm:$0xff]  }
   0xc   :  { %v2533_v32 = vld [vmem:[%s3536_s1 + $0xa0] sm:$0xff]   ;;  %v2522_v35 = vld [vmem:[%s3537_s0 + $0x28c] ss:$12 sps:$4 sm:$0xff]   ;;  %v2524_v37 = vld [vmem:[%s3537_s0 + $0x48] ss:$12 sps:$4 sm:$0xff]  }
   0xd   :  { %v2540_v36 = vld [vmem:[%s3536_s1 + $0xa8] sm:$0xff]   ;;  %v2527_v39 = vld [vmem:[%s3537_s0 + $0x64] ss:$12 sps:$4 sm:$0xff]   ;;  %v2554_v42 = vld [vmem:[%s3536_s1 + $0xb8] sm:$0xff]  }
   0xe   :  { %863 = vmatpush1.bf16.msra.mxu0 %v2486_v4  ;;  %2469 = vmatpush1.bf16.msra.mxu1 %v2486_v4  ;;  %v2525_v38 = vld [vmem:[%s3537_s0 + $0x288] ss:$12 sps:$4 sm:$0xff]   ;;  %v2529_v40 = vld [vmem:[%s3537_s0 + $0x2a4] ss:$12 sps:$4 sm:$0xff]   ;;  %v2531_v43 = vld [vmem:[%s3537_s0 + $0x60] ss:$12 sps:$4 sm:$0xff]  }
   0xf   :  { %864 = vmatprep.subr.bf16.mxu0 %v2635_v0  ;;  %2454 = vmatprep.subr.bf16.mxu1 %v2635_v0  ;;  %v2547_v41 = vld [vmem:[%s3536_s1 + $0xb0] sm:$0xff]   ;;  %v2532_v44 = vld [vmem:[%s3537_s0 + $0x2a0] ss:$12 sps:$4 sm:$0xff]   ;;  %v2534_v45 = vld [vmem:[%s3537_s0 + $0x7c] ss:$12 sps:$4 sm:$0xff]  }
  0x10   :  { %v2536_v46 = vld [vmem:[%s3537_s0 + $0x2bc] ss:$12 sps:$4 sm:$0xff]   ;;  %v2538_v47 = vld [vmem:[%s3537_s0 + $0x78] ss:$12 sps:$4 sm:$0xff]   ;;  %v2541_v49 = vld [vmem:[%s3537_s0 + $0x94] ss:$12 sps:$4 sm:$0xff]  }
  0x11   :  { %v2539_v48 = vld [vmem:[%s3537_s0 + $0x2b8] ss:$12 sps:$4 sm:$0xff]   ;;  %v2543_v50 = vld [vmem:[%s3537_s0 + $0x2d4] ss:$12 sps:$4 sm:$0xff]   ;;  %v2545_v51 = vld [vmem:[%s3537_s0 + $0x90] ss:$12 sps:$4 sm:$0xff]  }
  0x12   :  { %865 = vmatpush1.bf16.msra.mxu0 %v2487_v5  ;;  %2470 = vmatpush1.bf16.msra.mxu1 %v2487_v5  ;;  %v2546_v52 = vld [vmem:[%s3537_s0 + $0x2d0] ss:$12 sps:$4 sm:$0xff]   ;;  %v2548_v53 = vld [vmem:[%s3537_s0 + $0xac] ss:$12 sps:$4 sm:$0xff]   ;;  %v2552_v55 = vld [vmem:[%s3537_s0 + $0xa8] ss:$12 sps:$4 sm:$0xff]  }
  0x13   :  { %866 = vmatprep.subr.bf16.mxu0 %v2635_v0  ;;  %2455 = vmatprep.subr.bf16.mxu1 %v2635_v0  ;;  %v2550_v54 = vld [vmem:[%s3537_s0 + $0x2ec] ss:$12 sps:$4 sm:$0xff]   ;;  %v2553_v56 = vld [vmem:[%s3537_s0 + $0x2e8] ss:$12 sps:$4 sm:$0xff]   ;;  %v2555_v57 = vld [vmem:[%s3537_s0 + $0xc4] ss:$12 sps:$4 sm:$0xff]  }
  0x14   :  { %v2557_v58 = vld [vmem:[%s3537_s0 + $0x8] ss:$12 sps:$4 sm:$0xff]   ;;  %v2558_v59 = vld [vmem:[%s3537_s0 + $0xc0] ss:$12 sps:$4 sm:$0xff]   ;;  %v2562_v62 = vld [vmem:[%s3537_s0 + $0x38] ss:$12 sps:$4 sm:$0xff]  }
  0x15   :  { %v2559_v60 = vld [vmem:[%s3537_s0 + $0x20] ss:$12 sps:$4 sm:$0xff]   ;;  %v2560_v61 = vld [vmem:[%s3537_s0 + $0xdc] ss:$12 sps:$4 sm:$0xff]   ;;  %v2563_v63 = vld [vmem:[%s3537_s0 + $0xd8] ss:$12 sps:$4 sm:$0xff]  }
  0x16   :  { %867 = vmatpush1.bf16.msra.mxu0 %v2488_v7  ;;  %2471 = vmatpush1.bf16.msra.mxu1 %v2488_v7  ;;  %v2565_v1 = vld [vmem:[%s3537_s0 + $0xf4] ss:$12 sps:$4 sm:$0xff]   ;;  %v2568_v3 = vld [vmem:[%s3537_s0 + $0xf0] ss:$12 sps:$4 sm:$0xff]   ;;  %v2570_v5 = vld [vmem:[%s3537_s0 + $0x10c] ss:$12 sps:$4 sm:$0xff]  }
  0x17   :  { %868 = vmatprep.subr.bf16.mxu0 %v2635_v0  ;;  %2456 = vmatprep.subr.bf16.mxu1 %v2635_v0  ;;  %v2567_v2 = vld [vmem:[%s3537_s0 + $0x68] ss:$12 sps:$4 sm:$0xff]   ;;  %v2569_v4 = vld [vmem:[%s3537_s0 + $0x80] ss:$12 sps:$4 sm:$0xff]   ;;  %v2572_v6 = vld [vmem:[%s3537_s0 + $0x98] ss:$12 sps:$4 sm:$0xff]  }
  0x18   :  { %v2573_v7 = vld [vmem:[%s3537_s0 + $0x108] ss:$12 sps:$4 sm:$0xff]   ;;  %v2574_v8 = vld [vmem:[%s3537_s0 + $0xb0] ss:$12 sps:$4 sm:$0xff]  }
  0x1a   :  { %869 = vmatpush1.bf16.msra.mxu0 %v2489_v9  ;;  %2472 = vmatpush1.bf16.msra.mxu1 %v2489_v9  ;;  %v2575_v9 = vld [vmem:[%s3537_s0 + $0x124] ss:$12 sps:$4 sm:$0xff]  }
  0x1b   :  { %870 = vmatprep.subr.bf16.mxu0 %v2635_v0  ;;  %2457 = vmatprep.subr.bf16.mxu1 %v2635_v0 }
  0x1e   :  { %871 = vmatpush1.bf16.msra.mxu0 %v2490_v10  ;;  %2473 = vmatpush1.bf16.msra.mxu1 %v2490_v10  ;;  %v2577_v10 = vld [vmem:[%s3537_s0 + $0xc8] ss:$12 sps:$4 sm:$0xff]  }
  0x1f   :  { %872 = vmatprep.subr.bf16.mxu0 %v2635_v0  ;;  %2458 = vmatprep.subr.bf16.mxu1 %v2635_v0 }
  0x22   :  { %873 = vmatpush1.bf16.msra.mxu0 %v2491_v11  ;;  %2474 = vmatpush1.bf16.msra.mxu1 %v2491_v11  ;;  %v2578_v11 = vld [vmem:[%s3537_s0 + $0x120] ss:$12 sps:$4 sm:$0xff]  }
  0x23   :  { %874 = vmatprep.subr.bf16.mxu0 %v2635_v0  ;;  %2459 = vmatprep.subr.bf16.mxu1 %v2635_v0 }
  0x26   :  { %875 = vmatpush1.bf16.msra.mxu0 %v2492_v12  ;;  %2475 = vmatpush1.bf16.msra.mxu1 %v2492_v12  ;;  %v2579_v12 = vld [vmem:[%s3537_s0 + $0xe0] ss:$12 sps:$4 sm:$0xff]  }
  0x27   :  { %876 = vmatprep.subr.bf16.mxu0 %v2635_v0  ;;  %2460 = vmatprep.subr.bf16.mxu1 %v2635_v0 }
  0x2a   :  { %877 = vmatpush1.bf16.msra.mxu0 %v2493_v13  ;;  %2476 = vmatpush1.bf16.msra.mxu1 %v2493_v13  ;;  %v2580_v13 = vld [vmem:[%s3537_s0 + $0x13c] ss:$12 sps:$4 sm:$0xff]  }
  0x2b   :  { %878 = vmatprep.subr.bf16.mxu0 %v2635_v0  ;;  %2461 = vmatprep.subr.bf16.mxu1 %v2635_v0 }
  0x2e   :  { %879 = vmatpush1.bf16.msra.mxu0 %v2494_v14  ;;  %2477 = vmatpush1.bf16.msra.mxu1 %v2494_v14  ;;  %v2582_v14 = vld [vmem:[%s3537_s0 + $0xf8] ss:$12 sps:$4 sm:$0xff]  }
  0x2f   :  { %880 = vmatprep.subr.bf16.mxu0 %v2635_v0  ;;  %2462 = vmatprep.subr.bf16.mxu1 %v2635_v0 }
  0x32   :  { %881 = vmatpush1.bf16.msra.mxu0 %v2495_v15  ;;  %2478 = vmatpush1.bf16.msra.mxu1 %v2495_v15  ;;  %v2583_v15 = vld [vmem:[%s3537_s0 + $0x138] ss:$12 sps:$4 sm:$0xff]  }
  0x33   :  { %882 = vmatprep.subr.bf16.mxu0 %v2635_v0  ;;  %2463 = vmatprep.subr.bf16.mxu1 %v2635_v0 }
  0x36   :  { %883 = vmatpush1.bf16.msra.mxu0 %v2496_v16  ;;  %2479 = vmatpush1.bf16.msra.mxu1 %v2496_v16  ;;  %v2584_v16 = vld [vmem:[%s3537_s0 + $0x110] ss:$12 sps:$4 sm:$0xff]  }
  0x37   :  { %884 = vmatprep.subr.bf16.mxu0 %v2635_v0  ;;  %2464 = vmatprep.subr.bf16.mxu1 %v2635_v0 }
  0x3a   :  { %885 = vmatpush1.bf16.msra.mxu0 %v2497_v17  ;;  %2480 = vmatpush1.bf16.msra.mxu1 %v2497_v17  ;;  %v2585_v17 = vld [vmem:[%s3537_s0 + $0x154] ss:$12 sps:$4 sm:$0xff]  }
  0x3b   :  { %886 = vmatprep.subr.bf16.mxu0 %v2635_v0  ;;  %2465 = vmatprep.subr.bf16.mxu1 %v2635_v0  ;;  %v2564_v0 = vld [vmem:[%s3537_s0 + $0x50] ss:$12 sps:$4 sm:$0xff]  }
  0x3e   :  { %887 = vmatpush1.bf16.msra.mxu0 %v2498_v18  ;;  %2481 = vmatpush1.bf16.msra.mxu1 %v2498_v18  ;;  %v2587_v18 = vld [vmem:[%s3537_s0 + $0x128] ss:$12 sps:$4 sm:$0xff]  }
  0x3f   :  { %2370 = vmatprep.subr.bf16.mxu1 %v2505_v19 }
  0x41   :  { %889 = vmatmul.mubr.bf16.vlgmr.msra.gmra.mrb[0].mxu0 %v2499_v20  ;;  %1081 = vmatmul.mubr.bf16.vlgmr.msra.gmra.mrb[0].mxu1 %v2502_v21  ;;  %v2589_v20 = vld [vmem:[%s3537_s0 + $0x140] ss:$12 sps:$4 sm:$0xff]  }
  0x42   :  { %2371 = vmatpush3.bf16.msra.mxu1 %v2505_v19  ;;  %896 = vmatprep.mubr.bf16.mxu0 %v2506_v22  ;;  %v2588_v19 = vld [vmem:[%s3537_s0 + $0x150] ss:$12 sps:$4 sm:$0xff]   ;;  %v2590_v21 = vld [vmem:[%s3537_s0 + $0x16c] ss:$12 sps:$4 sm:$0xff]  }
  0x43   :  { %1088 = vmatprep.mubr.bf16.mxu1 %v2508_v23  ;;  %2372 = vmatprep.subr.bf16.mxu1 %v2512_v24  ;;  %v2592_v22 = vld [vmem:[%s3537_s0 + $0x158] ss:$12 sps:$4 sm:$0xff]   ;;  %v2593_v23 = vld [vmem:[%s3537_s0 + $0x168] ss:$12 sps:$4 sm:$0xff]  }
  0x46   :  { %2373 = vmatpush3.bf16.msra.mxu1 %v2512_v24  ;;  %v2594_v24 = vld [vmem:[%s3537_s0 + $0x170] ss:$12 sps:$4 sm:$0xff]  }
  0x47   :  { %2374 = vmatprep.subr.bf16.mxu1 %v2519_v25 }
  0x49   :  { %897 = vmatmul.mubr.bf16.gmra.mrb[4].mxu0 %v2510_v26  ;;  %1089 = vmatmul.mubr.bf16.gmra.mrb[4].mxu1 %v2511_v27  ;;  %v2597_v26 = vld [vmem:[%s3537_s0 + $0x188] ss:$12 sps:$4 sm:$0xff]   ;;  %v2598_v27 = vld [vmem:[%s3537_s0 + $0x180] ss:$12 sps:$4 sm:$0xff]  }
  0x4a   :  { %904 = vmatprep.mubr.bf16.mxu0 %v2513_v28  ;;  %1096 = vmatprep.mubr.bf16.mxu1 %v2515_v29  ;;  %v2599_v28 = vld [vmem:[%s3537_s0 + $0x1a0] ss:$12 sps:$4 sm:$0xff]   ;;  %v2600_v29 = vld [vmem:[%s3537_s0 + $0x19c] ss:$12 sps:$4 sm:$0xff]  }
  0x4b   :  { %2375 = vmatpush3.bf16.msra.mxu1 %v2519_v25  ;;  %v2595_v25 = vld [vmem:[%s3537_s0 + $0x184] ss:$12 sps:$4 sm:$0xff]  }
  0x4c   :  { %2376 = vmatprep.subr.bf16.mxu1 %v2526_v30 }
  0x4f   :  { %2377 = vmatpush3.bf16.msra.mxu1 %v2526_v30  ;;  %v2602_v30 = vld [vmem:[%s3537_s0 + $0x1b8] ss:$12 sps:$4 sm:$0xff]  }
  0x50   :  { %2378 = vmatprep.subr.bf16.mxu1 %v2533_v32 }
  0x51   :  { %905 = vmatmul.mubr.bf16.gmra.mrb[8].mxu0 %v2517_v31  ;;  %1097 = vmatmul.mubr.bf16.gmra.mrb[8].mxu1 %v2518_v33  ;;  %v2603_v31 = vld [vmem:[%s3537_s0 + $0x198] ss:$12 sps:$4 sm:$0xff]   ;;  %v2605_v33 = vld [vmem:[%s3537_s0 + $0x1b4] ss:$12 sps:$4 sm:$0xff]  }
  0x52   :  { %912 = vmatprep.mubr.bf16.mxu0 %v2520_v34  ;;  %1104 = vmatprep.mubr.bf16.mxu1 %v2522_v35  ;;  %v2607_v34 = vld [vmem:[%s3537_s0 + $0x1e8] ss:$12 sps:$4 sm:$0xff]   ;;  %v2608_v35 = vld [vmem:[%s3537_s0 + $0x1b0] ss:$12 sps:$4 sm:$0xff]  }
  0x53   :  { %2379 = vmatpush3.bf16.msra.mxu1 %v2533_v32  ;;  %v2604_v32 = vld [vmem:[%s3537_s0 + $0x1d0] ss:$12 sps:$4 sm:$0xff]  }
  0x54   :  { %2380 = vmatprep.subr.bf16.mxu1 %v2540_v36 }
  0x57   :  { %2381 = vmatpush3.bf16.msra.mxu1 %v2540_v36  ;;  %v2609_v36 = vld [vmem:[%s3537_s0 + $0x200] ss:$12 sps:$4 sm:$0xff]  }
  0x58   :  { %2382 = vmatprep.subr.bf16.mxu1 %v2547_v41 }
  0x59   :  { %913 = vmatmul.mubr.bf16.gmra.mrb[12].mxu0 %v2524_v37  ;;  %1105 = vmatmul.mubr.bf16.gmra.mrb[12].mxu1 %v2525_v38  ;;  %v2610_v37 = vld [vmem:[%s3537_s0 + $0x1cc] ss:$12 sps:$4 sm:$0xff]  }
  0x5a   :  { %920 = vmatprep.mubr.bf16.mxu0 %v2527_v39  ;;  %1112 = vmatprep.mubr.bf16.mxu1 %v2529_v40  ;;  %v2612_v38 = vld [vmem:[%s3537_s0 + $0x218] ss:$12 sps:$4 sm:$0xff]   ;;  %v2613_v39 = vld [vmem:[%s3537_s0 + $0x1c8] ss:$12 sps:$4 sm:$0xff]   ;;  %v2614_v40 = vld [vmem:[%s3537_s0 + $0x230] ss:$12 sps:$4 sm:$0xff]  }
  0x5b   :  { %2383 = vmatpush3.bf16.msra.mxu1 %v2547_v41  ;;  %v2615_v41 = vld [vmem:[%s3537_s0 + $0x1e4] ss:$12 sps:$4 sm:$0xff]  }
  0x5c   :  { %2384 = vmatprep.subr.bf16.mxu1 %v2554_v42 }
  0x5f   :  { %2385 = vmatpush3.bf16.msra.mxu1 %v2554_v42  ;;  %v2617_v42 = vld [vmem:[%s3537_s0 + $0x248] ss:$12 sps:$4 sm:$0xff]  }
  0x61   :  { %921 = vmatmul.mubr.bf16.gmra.mrb[16].mxu0 %v2531_v43  ;;  %1113 = vmatmul.mubr.bf16.gmra.mrb[16].mxu1 %v2532_v44  ;;  %v2618_v43 = vld [vmem:[%s3537_s0 + $0x1e0] ss:$12 sps:$4 sm:$0xff]  }
  0x62   :  { %928 = vmatprep.mubr.bf16.mxu0 %v2534_v45  ;;  %1120 = vmatprep.mubr.bf16.mxu1 %v2536_v46  ;;  %v2619_v44 = vld [vmem:[%s3537_s0 + $0x260] ss:$12 sps:$4 sm:$0xff]   ;;  %v2620_v45 = vld [vmem:[%s3537_s0 + $0x1fc] ss:$12 sps:$4 sm:$0xff]   ;;  %v2622_v46 = vld [vmem:[%s3537_s0 + $0x278] ss:$12 sps:$4 sm:$0xff]  }
  0x69   :  { %929 = vmatmul.mubr.bf16.gmra.mrb[20].mxu0 %v2538_v47  ;;  %1121 = vmatmul.mubr.bf16.gmra.mrb[20].mxu1 %v2539_v48  ;;  %v2623_v47 = vld [vmem:[%s3537_s0 + $0x1f8] ss:$12 sps:$4 sm:$0xff]   ;;  %v2624_v48 = vld [vmem:[%s3537_s0 + $0x290] ss:$12 sps:$4 sm:$0xff]  }
  0x6a   :  { %936 = vmatprep.mubr.bf16.mxu0 %v2541_v49  ;;  %1128 = vmatprep.mubr.bf16.mxu1 %v2543_v50  ;;  %v2625_v49 = vld [vmem:[%s3537_s0 + $0x214] ss:$12 sps:$4 sm:$0xff]  }
  0x6b   :  { %v2627_v50 = vld [vmem:[%s3537_s0 + $0x2a8] ss:$12 sps:$4 sm:$0xff]  }
  0x71   :  { %937 = vmatmul.mubr.bf16.gmra.mrb[24].mxu0 %v2545_v51  ;;  %1129 = vmatmul.mubr.bf16.gmra.mrb[24].mxu1 %v2546_v52  ;;  %v2628_v51 = vld [vmem:[%s3537_s0 + $0x210] ss:$12 sps:$4 sm:$0xff]   ;;  %v2629_v52 = vld [vmem:[%s3537_s0 + $0x2c0] ss:$12 sps:$4 sm:$0xff]  }
  0x72   :  { %944 = vmatprep.mubr.bf16.mxu0 %v2548_v53  ;;  %1136 = vmatprep.mubr.bf16.mxu1 %v2550_v54  ;;  %v2630_v53 = vld [vmem:[%s3537_s0 + $0x22c] ss:$12 sps:$4 sm:$0xff]  }
  0x73   :  { %v2632_v54 = vld [vmem:[%s3537_s0 + $0x2d8] ss:$12 sps:$4 sm:$0xff]  }
  0x79   :  { %945 = vmatmul.mubr.bf16.gmra.mrb[28].mxu0 %v2552_v55  ;;  %1137 = vmatmul.mubr.bf16.gmra.mrb[28].mxu1 %v2553_v56  ;;  %v2633_v55 = vld [vmem:[%s3537_s0 + $0x228] ss:$12 sps:$4 sm:$0xff]   ;;  %v2634_v56 = vld [vmem:[%s3537_s0 + $0x2f0] ss:$12 sps:$4 sm:$0xff]  }
  0x7a   :  { %952 = vmatprep.mubr.bf16.mxu0 %v2555_v57  ;;  %2386 = vmatprep.mubr.bf16.mxu1 %v2557_v58 }
  0x81   :  { %953 = vmatmul.mubr.bf16.gmra.mrb[32].mxu0 %v2558_v59  ;;  %2387 = vmatmul.mubr.bf16.vlgmr.msra.gmra.mrb[32].mxu1 %v2559_v60 }
  0x82   :  { %960 = vmatprep.mubr.bf16.mxu0 %v2560_v61  ;;  %2390 = vmatprep.mubr.bf16.mxu1 %v2562_v62 }
  0x89   :  { %961 = vmatmul.mubr.bf16.gmra.mrb[36].mxu0 %v2563_v63  ;;  %2391 = vmatmul.mubr.bf16.gmra.mrb[36].mxu1 %v2564_v0 }
  0x8a   :  { %968 = vmatprep.mubr.bf16.mxu0 %v2565_v1  ;;  %2394 = vmatprep.mubr.bf16.mxu1 %v2567_v2 }
  0x91   :  { %969 = vmatmul.mubr.bf16.gmra.mrb[40].mxu0 %v2568_v3  ;;  %2395 = vmatmul.mubr.bf16.gmra.mrb[40].mxu1 %v2569_v4 }
  0x92   :  { %976 = vmatprep.mubr.bf16.mxu0 %v2570_v5  ;;  %2398 = vmatprep.mubr.bf16.mxu1 %v2572_v6 }
  0x99   :  { %977 = vmatmul.mubr.bf16.gmra.mrb[44].mxu0 %v2573_v7  ;;  %2399 = vmatmul.mubr.bf16.gmra.mrb[44].mxu1 %v2574_v8 }
  0x9a   :  { %984 = vmatprep.mubr.bf16.mxu0 %v2575_v9  ;;  %2402 = vmatprep.mubr.bf16.mxu1 %v2577_v10 }
  0xa1   :  { %985 = vmatmul.mubr.bf16.gmra.mrb[48].mxu0 %v2578_v11  ;;  %2403 = vmatmul.mubr.bf16.gmra.mrb[48].mxu1 %v2579_v12 }
  0xa2   :  { %992 = vmatprep.mubr.bf16.mxu0 %v2580_v13  ;;  %2406 = vmatprep.mubr.bf16.mxu1 %v2582_v14 }
  0xa9   :  { %993 = vmatmul.mubr.bf16.gmra.mrb[52].mxu0 %v2583_v15  ;;  %2407 = vmatmul.mubr.bf16.gmra.mrb[52].mxu1 %v2584_v16 }
  0xaa   :  { %1000 = vmatprep.mubr.bf16.mxu0 %v2585_v17  ;;  %2410 = vmatprep.mubr.bf16.mxu1 %v2587_v18 }
  0xb1   :  { %1001 = vmatmul.mubr.bf16.gmra.mrb[56].mxu0 %v2588_v19  ;;  %2411 = vmatmul.mubr.bf16.gmra.mrb[56].mxu1 %v2589_v20 }
  0xb2   :  { %1008 = vmatprep.mubr.bf16.mxu0 %v2590_v21  ;;  %2414 = vmatprep.mubr.bf16.mxu1 %v2592_v22 }
  0xb9   :  { %1009 = vmatmul.mubr.bf16.gmra.mrb[60].mxu0 %v2593_v23  ;;  %2415 = vmatmul.mubr.bf16.gmra.mrb[60].mxu1 %v2594_v24 }
  0xba   :  { %1016 = vmatprep.mubr.bf16.mxu0 %v2595_v25  ;;  %2418 = vmatprep.mubr.bf16.mxu1 %v2597_v26 }
  0xc1   :  { %1017 = vmatmul.mubr.bf16.gmra.mrb[64].mxu0 %v2598_v27  ;;  %2419 = vmatmul.mubr.bf16.gmra.mrb[64].mxu1 %v2599_v28 }
  0xc2   :  { %1024 = vmatprep.mubr.bf16.mxu0 %v2600_v29  ;;  %2422 = vmatprep.mubr.bf16.mxu1 %v2602_v30 }
  0xc9   :  { %1025 = vmatmul.mubr.bf16.gmra.mrb[68].mxu0 %v2603_v31  ;;  %2423 = vmatmul.mubr.bf16.gmra.mrb[68].mxu1 %v2604_v32 }
  0xca   :  { %1032 = vmatprep.mubr.bf16.mxu0 %v2605_v33  ;;  %2426 = vmatprep.mubr.bf16.mxu1 %v2607_v34 }
  0xd1   :  { %1033 = vmatmul.mubr.bf16.gmra.mrb[72].mxu0 %v2608_v35  ;;  %2427 = vmatmul.mubr.bf16.gmra.mrb[72].mxu1 %v2609_v36 }
  0xd2   :  { %1040 = vmatprep.mubr.bf16.mxu0 %v2610_v37  ;;  %2430 = vmatprep.mubr.bf16.mxu1 %v2612_v38 }
  0xd9   :  { %1041 = vmatmul.mubr.bf16.gmra.mrb[76].mxu0 %v2613_v39  ;;  %2431 = vmatmul.mubr.bf16.gmra.mrb[76].mxu1 %v2614_v40 }
  0xda   :  { %1048 = vmatprep.mubr.bf16.mxu0 %v2615_v41  ;;  %2434 = vmatprep.mubr.bf16.mxu1 %v2617_v42 }
  0xe1   :  { %1049 = vmatmul.mubr.bf16.gmra.mrb[80].mxu0 %v2618_v43  ;;  %2435 = vmatmul.mubr.bf16.gmra.mrb[80].mxu1 %v2619_v44 }
  0xe2   :  { %1056 = vmatprep.mubr.bf16.mxu0 %v2620_v45  ;;  %2438 = vmatprep.mubr.bf16.mxu1 %v2622_v46 }
  0xe9   :  { %1057 = vmatmul.mubr.bf16.gmra.mrb[84].mxu0 %v2623_v47  ;;  %2439 = vmatmul.mubr.bf16.gmra.mrb[84].mxu1 %v2624_v48 }
  0xea   :  { %1064 = vmatprep.mubr.bf16.mxu0 %v2625_v49  ;;  %2442 = vmatprep.mubr.bf16.mxu1 %v2627_v50 }
  0xf1   :  { %1065 = vmatmul.mubr.bf16.gmra.mrb[88].mxu0 %v2628_v51  ;;  %2443 = vmatmul.mubr.bf16.gmra.mrb[88].mxu1 %v2629_v52 }
  0xf2   :  { %1072 = vmatprep.mubr.bf16.mxu0 %v2630_v53  ;;  %2446 = vmatprep.mubr.bf16.mxu1 %v2632_v54 }
  0xf9   :  { %1073 = vmatmul.mubr.bf16.gmra.mrb[92].mxu0 %v2633_v55  ;;  %2447 = vmatmul.mubr.bf16.gmra.mrb[92].mxu1 %v2634_v56 }
 0x114   :  { %v3053_v57 = vpop.f32.mrb[0].mxu0  ;;  %v3055_v58 = vpop.f32.mrb[0].mxu1 }
 0x115   :  { %v892_v59 = vpop.f32.mrb[1].mxu0  ;;  %v1084_v60 = vpop.f32.mrb[1].mxu1 }
 0x116   :  { %v3057_v61 = vpop.f32.mrb[2].mxu0  ;;  %v3059_v62 = vpop.f32.mrb[2].mxu1  ;;  %v3116_v59 = vld [vmem:[%s3538_s2] ss:$0 sm:$0xff] }
 0x117   :  { %v895_v63 = vpop.f32.mrb[3].mxu0  ;;  %v1087_v0 = vpop.f32.mrb[3].mxu1 }
 0x118   :  { %v891_v63 = vadd.f32 %v3116_v59, %v3053_v57 }
 0x11c   :  { %v898_v1 = vpop.f32.mrb[4].mxu0  ;;  %v3061_v2 = vpop.f32.mrb[4].mxu1 }
 0x11d   :  { %v900_v3 = vpop.f32.mrb[5].mxu0  ;;  %v1092_v4 = vpop.f32.mrb[5].mxu1  ;;  %v899_v60 = vadd.f32 %v3116_v59, %v898_v1 }
 0x11e   :  { %v901_v5 = vpop.f32.mrb[6].mxu0  ;;  %v3063_v6 = vpop.f32.mrb[6].mxu1 }
 0x11f   :  { %v903_v7 = vpop.f32.mrb[7].mxu0  ;;  %v1095_v8 = vpop.f32.mrb[7].mxu1  ;;  %v902_v4 = vadd.f32 %v3116_v59, %v901_v5 }
 0x124   :  { %v3065_v9 = vpop.f32.mrb[8].mxu0  ;;  %v3067_v10 = vpop.f32.mrb[8].mxu1 }
 0x125   :  { %v908_v11 = vpop.f32.mrb[9].mxu0  ;;  %v1100_v12 = vpop.f32.mrb[9].mxu1 }
 0x126   :  { %v3069_v13 = vpop.f32.mrb[10].mxu0  ;;  %v3071_v14 = vpop.f32.mrb[10].mxu1  ;;  %v894_v12 = vadd.f32 %v3116_v59, %v3057_v61 }
 0x127   :  { %v911_v15 = vpop.f32.mrb[11].mxu0  ;;  %v1103_v16 = vpop.f32.mrb[11].mxu1 }
 0x12c   :  { %v3073_v17 = vpop.f32.mrb[12].mxu0  ;;  %v3075_v18 = vpop.f32.mrb[12].mxu1 }
 0x12d   :  { %v916_v19 = vpop.f32.mrb[13].mxu0  ;;  %v1108_v20 = vpop.f32.mrb[13].mxu1 }
 0x12e   :  { %v3077_v21 = vpop.f32.mrb[14].mxu0  ;;  %v3079_v22 = vpop.f32.mrb[14].mxu1 }
 0x12f   :  { %v919_v23 = vpop.f32.mrb[15].mxu0  ;;  %v1111_v24 = vpop.f32.mrb[15].mxu1 }
 0x134   :  { %v3081_v25 = vpop.f32.mrb[16].mxu0  ;;  %v3083_v26 = vpop.f32.mrb[16].mxu1 }
 0x135   :  { %v924_v27 = vpop.f32.mrb[17].mxu0  ;;  %v1116_v28 = vpop.f32.mrb[17].mxu1 }
 0x136   :  { %v3085_v29 = vpop.f32.mrb[18].mxu0  ;;  %v3087_v30 = vpop.f32.mrb[18].mxu1  ;;  %v915_v28 = vadd.f32 %v3116_v59, %v3073_v17 }
 0x137   :  { %v927_v31 = vpop.f32.mrb[19].mxu0  ;;  %v1119_v32 = vpop.f32.mrb[19].mxu1 }
 0x138   :  { %v907_v32 = vadd.f32 %v3116_v59, %v3065_v9  ;;  %v910_v9 = vadd.f32 %v3116_v59, %v3069_v13 }
 0x13c   :  { %v3089_v33 = vpop.f32.mrb[20].mxu0  ;;  %v3091_v34 = vpop.f32.mrb[20].mxu1 }
 0x13d   :  { %v932_v35 = vpop.f32.mrb[21].mxu0  ;;  %v1124_v36 = vpop.f32.mrb[21].mxu1 }
 0x13e   :  { %v3093_v37 = vpop.f32.mrb[22].mxu0  ;;  %v3095_v38 = vpop.f32.mrb[22].mxu1 }
 0x13f   :  { %v935_v39 = vpop.f32.mrb[23].mxu0  ;;  %v1127_v40 = vpop.f32.mrb[23].mxu1 }
 0x140   :  { %v918_v40 = vadd.f32 %v3116_v59, %v3077_v21 }
 0x144   :  { %v3097_v41 = vpop.f32.mrb[24].mxu0  ;;  %v3099_v42 = vpop.f32.mrb[24].mxu1 }
 0x145   :  { %v940_v43 = vpop.f32.mrb[25].mxu0  ;;  %v1132_v44 = vpop.f32.mrb[25].mxu1 }
 0x146   :  { %v3101_v45 = vpop.f32.mrb[26].mxu0  ;;  %v3103_v46 = vpop.f32.mrb[26].mxu1 }
 0x147   :  { %v943_v47 = vpop.f32.mrb[27].mxu0  ;;  %v1135_v48 = vpop.f32.mrb[27].mxu1 }
 0x14c   :  { %v3105_v49 = vpop.f32.mrb[28].mxu0  ;;  %v3107_v50 = vpop.f32.mrb[28].mxu1 }
 0x14d   :  { %v948_v51 = vpop.f32.mrb[29].mxu0  ;;  %v1140_v52 = vpop.f32.mrb[29].mxu1 }
 0x14e   :  { %v3109_v53 = vpop.f32.mrb[30].mxu0  ;;  %v3111_v54 = vpop.f32.mrb[30].mxu1 }
 0x14f   :  { %v951_v55 = vpop.f32.mrb[31].mxu0  ;;  %v1143_v56 = vpop.f32.mrb[31].mxu1 }
 0x154   :  { %v3121_v0 = vpop.f32.mrb[32].mxu0  ;;  %v2388_v3 = vpop.f32.mrb[32].mxu1 }
 0x155   :  { %v1188_v7 = vadd.f32 %v2388_v3, %v899_v60  ;;  %v956_v8 = vpop.f32.mrb[33].mxu0  ;;  %v1179_v11 = vpop.f32.mrb[33].mxu1 }
 0x156   :  { %v1180_v15 = vadd.f32 %v1179_v11, %v891_v63  ;;  %v3126_v16 = vpop.f32.mrb[34].mxu0  ;;  %v2389_v19 = vpop.f32.mrb[34].mxu1  ;;  %v923_v8 = vadd.f32 %v3116_v59, %v3081_v25  ;;  %v926_v25 = vadd.f32 %v3116_v59, %v3085_v29 }
 0x157   :  { %v1436_v20 = vmax.f32 %v1188_v7, 0.0  ;;  %v1191_v1 = vadd.f32 %v2389_v19, %v902_v4  ;;  %v959_v23 = vpop.f32.mrb[35].mxu0  ;;  %v1182_v24 = vpop.f32.mrb[35].mxu1  ;;  %v931_v4 = vadd.f32 %v3116_v59, %v3089_v33  ;;  %v934_v19 = vadd.f32 %v3116_v59, %v3093_v37 }
 0x158   :  { %v1434_v57 = vmax.f32 %v1180_v15, 0.0  ;;  %v1183_v27 = vadd.f32 %v1182_v24, %v894_v12 }
 0x159   :  { %1500 = vst [vmem:[%s3539_s3 + $0x10] sm:$0xff] %v1436_v20  ;;  %v1437_v5 = vmax.f32 %v1191_v1, 0.0 }
 0x15a   :  { %1498 = vst [vmem:[%s3539_s3] sm:$0xff] %v1434_v57  ;;  %v1435_v61 = vmax.f32 %v1183_v27, 0.0 }
 0x15b   :  { %1501 = vst [vmem:[%s3539_s3 + $0x18] sm:$0xff] %v1437_v5  ;;  %v2147_v31 = vpack.c.bf16 %v1437_v5, %v1436_v20 }
 0x15c   :  { %1499 = vst [vmem:[%s3539_s3 + $0x8] sm:$0xff] %v1435_v61  ;;  %v2142_v35 = vpack.c.bf16 %v1435_v61, %v1434_v57  ;;  %v3144_v36 = vpop.f32.mrb[36].mxu0  ;;  %v2392_v39 = vpop.f32.mrb[36].mxu1 }
 0x15d   :  { %2299 = vst [vmem:[%s3540_s4 + $0x8] sm:$0xff] %v2147_v31   ;;  %v1204_v17 = vadd.f32 %v2392_v39, %v915_v28  ;;  %v964_v43 = vpop.f32.mrb[37].mxu0  ;;  %v1195_v44 = vpop.f32.mrb[37].mxu1 }
 0x15e   :  { %2143 = vst [vmem:[%s3540_s4] sm:$0xff] %v2142_v35   ;;  %v1196_v47 = vadd.f32 %v1195_v44, %v907_v32  ;;  %v3156_v48 = vpop.f32.mrb[38].mxu0  ;;  %v2393_v51 = vpop.f32.mrb[38].mxu1  ;;  %v947_v35 = vadd.f32 %v3116_v59, %v3105_v49 }
 0x15f   :  { %v1440_v52 = vmax.f32 %v1204_v17, 0.0  ;;  %v1207_v21 = vadd.f32 %v2393_v51, %v918_v40  ;;  %v967_v55 = vpop.f32.mrb[39].mxu0  ;;  %v1198_v56 = vpop.f32.mrb[39].mxu1  ;;  %v939_v40 = vadd.f32 %v3116_v59, %v3097_v41  ;;  %v942_v41 = vadd.f32 %v3116_v59, %v3101_v45 }
 0x160   :  { %v1438_v60 = vmax.f32 %v1196_v47, 0.0  ;;  %v1199_v63 = vadd.f32 %v1198_v56, %v910_v9  ;;  %v950_v9 = vadd.f32 %v3116_v59, %v3109_v53 }
 0x161   :  { %1504 = vst [vmem:[%s3539_s3 + $0x30] sm:$0xff] %v1440_v52  ;;  %v1441_v3 = vmax.f32 %v1207_v21, 0.0 }
 0x162   :  { %1502 = vst [vmem:[%s3539_s3 + $0x20] sm:$0xff] %v1438_v60  ;;  %v1439_v13 = vmax.f32 %v1199_v63, 0.0 }
 0x163   :  { %1505 = vst [vmem:[%s3539_s3 + $0x38] sm:$0xff] %v1441_v3  ;;  %v2157_v7 = vpack.c.bf16 %v1441_v3, %v1440_v52 }
 0x164   :  { %1503 = vst [vmem:[%s3539_s3 + $0x28] sm:$0xff] %v1439_v13  ;;  %v2152_v11 = vpack.c.bf16 %v1439_v13, %v1438_v60  ;;  %v3174_v12 = vpop.f32.mrb[40].mxu0  ;;  %v2396_v15 = vpop.f32.mrb[40].mxu1 }
 0x165   :  { %2301 = vst [vmem:[%s3540_s4 + $0x18] sm:$0xff] %v2157_v7   ;;  %v1220_v33 = vadd.f32 %v2396_v15, %v931_v4  ;;  %v972_v20 = vpop.f32.mrb[41].mxu0  ;;  %v1211_v1 = vpop.f32.mrb[41].mxu1  ;;  %v963_v7 = vadd.f32 %v3116_v59, %v3144_v36 }
 0x166   :  { %2300 = vst [vmem:[%s3540_s4 + $0x10] sm:$0xff] %v2152_v11   ;;  %v1212_v23 = vadd.f32 %v1211_v1, %v923_v8  ;;  %v3186_v24 = vpop.f32.mrb[42].mxu0  ;;  %v2397_v57 = vpop.f32.mrb[42].mxu1  ;;  %v955_v11 = vadd.f32 %v3116_v59, %v3121_v0  ;;  %v966_v20 = vadd.f32 %v3116_v59, %v3156_v48  ;;  %v958_v0 = vadd.f32 %v3116_v59, %v3126_v16 }
 0x167   :  { %v1444_v27 = vmax.f32 %v1220_v33, 0.0  ;;  %v1223_v37 = vadd.f32 %v2397_v57, %v934_v19  ;;  %v975_v5 = vpop.f32.mrb[43].mxu0  ;;  %v1214_v61 = vpop.f32.mrb[43].mxu1 }
 0x168   :  { %v1442_v28 = vmax.f32 %v1212_v23, 0.0  ;;  %v1215_v31 = vadd.f32 %v1214_v61, %v926_v25 }
 0x169   :  { %1508 = vst [vmem:[%s3539_s3 + $0x50] sm:$0xff] %v1444_v27  ;;  %v1445_v32 = vmax.f32 %v1223_v37, 0.0 }
 0x16a   :  { %1506 = vst [vmem:[%s3539_s3 + $0x40] sm:$0xff] %v1442_v28  ;;  %v1443_v29 = vmax.f32 %v1215_v31, 0.0 }
 0x16b   :  { %1509 = vst [vmem:[%s3539_s3 + $0x58] sm:$0xff] %v1445_v32  ;;  %v2167_v39 = vpack.c.bf16 %v1445_v32, %v1444_v27 }
 0x16c   :  { %1507 = vst [vmem:[%s3539_s3 + $0x48] sm:$0xff] %v1443_v29  ;;  %v2162_v17 = vpack.c.bf16 %v1443_v29, %v1442_v28  ;;  %v978_v43 = vpop.f32.mrb[44].mxu0  ;;  %v2400_v44 = vpop.f32.mrb[44].mxu1 }
 0x16d   :  { %2303 = vst [vmem:[%s3540_s4 + $0x28] sm:$0xff] %v2167_v39   ;;  %v1236_v49 = vadd.f32 %v2400_v44, %v947_v35  ;;  %v980_v47 = vpop.f32.mrb[45].mxu0  ;;  %v1227_v51 = vpop.f32.mrb[45].mxu1  ;;  %v979_v29 = vadd.f32 %v3116_v59, %v978_v43  ;;  %v971_v39 = vadd.f32 %v3116_v59, %v3174_v12 }
 0x16e   :  { %2302 = vst [vmem:[%s3540_s4 + $0x20] sm:$0xff] %v2162_v17   ;;  %v1228_v52 = vadd.f32 %v1227_v51, %v939_v40  ;;  %v981_v21 = vpop.f32.mrb[46].mxu0  ;;  %v2401_v55 = vpop.f32.mrb[46].mxu1  ;;  %v974_v51 = vadd.f32 %v3116_v59, %v3186_v24 }
 0x16f   :  { %v1448_v56 = vmax.f32 %v1236_v49, 0.0  ;;  %v1239_v60 = vadd.f32 %v2401_v55, %v950_v9  ;;  %v983_v53 = vpop.f32.mrb[47].mxu0  ;;  %v1230_v63 = vpop.f32.mrb[47].mxu1  ;;  %v982_v9 = vadd.f32 %v3116_v59, %v981_v21 }
 0x170   :  { %v1446_v3 = vmax.f32 %v1228_v52, 0.0  ;;  %v1231_v13 = vadd.f32 %v1230_v63, %v942_v41 }
 0x171   :  { %1512 = vst [vmem:[%s3539_s3 + $0x70] sm:$0xff] %v1448_v56  ;;  %v1449_v4 = vmax.f32 %v1239_v60, 0.0 }
 0x172   :  { %1510 = vst [vmem:[%s3539_s3 + $0x60] sm:$0xff] %v1446_v3  ;;  %v1447_v45 = vmax.f32 %v1231_v13, 0.0 }
 0x173   :  { %1513 = vst [vmem:[%s3539_s3 + $0x78] sm:$0xff] %v1449_v4  ;;  %v2177_v8 = vpack.c.bf16 %v1449_v4, %v1448_v56 }
 0x174   :  { %1511 = vst [vmem:[%s3539_s3 + $0x68] sm:$0xff] %v1447_v45  ;;  %v2172_v15 = vpack.c.bf16 %v1447_v45, %v1446_v3  ;;  %v986_v19 = vpop.f32.mrb[48].mxu0  ;;  %v2404_v33 = vpop.f32.mrb[48].mxu1 }
 0x175   :  { %2305 = vst [vmem:[%s3540_s4 + $0x38] sm:$0xff] %v2177_v8   ;;  %v1252_v36 = vadd.f32 %v2404_v33, %v963_v7  ;;  %v988_v1 = vpop.f32.mrb[49].mxu0  ;;  %v1243_v25 = vpop.f32.mrb[49].mxu1  ;;  %v987_v45 = vadd.f32 %v3116_v59, %v986_v19 }
 0x176   :  { %2304 = vst [vmem:[%s3540_s4 + $0x30] sm:$0xff] %v2172_v15   ;;  %v1244_v23 = vadd.f32 %v1243_v25, %v955_v11  ;;  %v989_v57 = vpop.f32.mrb[50].mxu0  ;;  %v2405_v27 = vpop.f32.mrb[50].mxu1 }
 0x177   :  { %v1452_v37 = vmax.f32 %v1252_v36, 0.0  ;;  %v1255_v5 = vadd.f32 %v2405_v27, %v966_v20  ;;  %v991_v48 = vpop.f32.mrb[51].mxu0  ;;  %v1246_v61 = vpop.f32.mrb[51].mxu1  ;;  %v990_v1 = vadd.f32 %v3116_v59, %v989_v57 }
 0x178   :  { %v1450_v28 = vmax.f32 %v1244_v23, 0.0  ;;  %v1247_v31 = vadd.f32 %v1246_v61, %v958_v0 }
 0x179   :  { %1516 = vst [vmem:[%s3539_s3 + $0x90] sm:$0xff] %v1452_v37  ;;  %v1453_v32 = vmax.f32 %v1255_v5, 0.0 }
 0x17a   :  { %1514 = vst [vmem:[%s3539_s3 + $0x80] sm:$0xff] %v1450_v28  ;;  %v1451_v16 = vmax.f32 %v1247_v31, 0.0 }
 0x17b   :  { %1517 = vst [vmem:[%s3539_s3 + $0x98] sm:$0xff] %v1453_v32  ;;  %v2187_v35 = vpack.c.bf16 %v1453_v32, %v1452_v37 }
 0x17c   :  { %1515 = vst [vmem:[%s3539_s3 + $0x88] sm:$0xff] %v1451_v16  ;;  %v2182_v40 = vpack.c.bf16 %v1451_v16, %v1450_v28  ;;  %v994_v17 = vpop.f32.mrb[52].mxu0  ;;  %v2408_v44 = vpop.f32.mrb[52].mxu1 }
 0x17d   :  { %2307 = vst [vmem:[%s3540_s4 + $0x48] sm:$0xff] %v2187_v35   ;;  %v1268_v43 = vadd.f32 %v2408_v44, %v979_v29  ;;  %v996_v49 = vpop.f32.mrb[53].mxu0  ;;  %v1259_v47 = vpop.f32.mrb[53].mxu1  ;;  %v995_v13 = vadd.f32 %v3116_v59, %v994_v17 }
 0x17e   :  { %2306 = vst [vmem:[%s3540_s4 + $0x40] sm:$0xff] %v2182_v40   ;;  %v1260_v12 = vadd.f32 %v1259_v47, %v971_v39  ;;  %v997_v41 = vpop.f32.mrb[54].mxu0  ;;  %v2409_v52 = vpop.f32.mrb[54].mxu1 }
 0x17f   :  { %v1456_v55 = vmax.f32 %v1268_v43, 0.0  ;;  %v1271_v56 = vadd.f32 %v2409_v52, %v982_v9  ;;  %v999_v21 = vpop.f32.mrb[55].mxu0  ;;  %v1262_v60 = vpop.f32.mrb[55].mxu1  ;;  %v998_v15 = vadd.f32 %v3116_v59, %v997_v41 }
 0x180   :  { %v1454_v53 = vmax.f32 %v1260_v12, 0.0  ;;  %v1263_v63 = vadd.f32 %v1262_v60, %v974_v51 }
 0x181   :  { %1520 = vst [vmem:[%s3539_s3 + $0xb0] sm:$0xff] %v1456_v55  ;;  %v1457_v3 = vmax.f32 %v1271_v56, 0.0 }
 0x182   :  { %1518 = vst [vmem:[%s3539_s3 + $0xa0] sm:$0xff] %v1454_v53  ;;  %v1455_v24 = vmax.f32 %v1263_v63, 0.0 }
 0x183   :  { %1521 = vst [vmem:[%s3539_s3 + $0xb8] sm:$0xff] %v1457_v3  ;;  %v2197_v4 = vpack.c.bf16 %v1457_v3, %v1456_v55 }
 0x184   :  { %1519 = vst [vmem:[%s3539_s3 + $0xa8] sm:$0xff] %v1455_v24  ;;  %v2192_v7 = vpack.c.bf16 %v1455_v24, %v1454_v53  ;;  %v1002_v8 = vpop.f32.mrb[56].mxu0  ;;  %v2412_v11 = vpop.f32.mrb[56].mxu1 }
 0x185   :  { %2309 = vst [vmem:[%s3540_s4 + $0x58] sm:$0xff] %v2197_v4   ;;  %v1284_v33 = vadd.f32 %v2412_v11, %v995_v13  ;;  %v1004_v20 = vpop.f32.mrb[57].mxu0  ;;  %v1275_v36 = vpop.f32.mrb[57].mxu1  ;;  %v1003_v32 = vadd.f32 %v3116_v59, %v1002_v8 }
 0x186   :  { %2308 = vst [vmem:[%s3540_s4 + $0x50] sm:$0xff] %v2192_v7   ;;  %v1276_v19 = vadd.f32 %v1275_v36, %v987_v45  ;;  %v1005_v25 = vpop.f32.mrb[58].mxu0  ;;  %v2413_v0 = vpop.f32.mrb[58].mxu1 }
 0x187   :  { %v1460_v23 = vmax.f32 %v1284_v33, 0.0  ;;  %v1287_v27 = vadd.f32 %v2413_v0, %v998_v15  ;;  %v1007_v37 = vpop.f32.mrb[59].mxu0  ;;  %v1278_v5 = vpop.f32.mrb[59].mxu1  ;;  %v1006_v44 = vadd.f32 %v3116_v59, %v1005_v25 }
 0x188   :  { %v1458_v48 = vmax.f32 %v1276_v19, 0.0  ;;  %v1279_v61 = vadd.f32 %v1278_v5, %v990_v1 }
 0x189   :  { %1524 = vst [vmem:[%s3539_s3 + $0xd0] sm:$0xff] %v1460_v23  ;;  %v1461_v28 = vmax.f32 %v1287_v27, 0.0 }
 0x18a   :  { %1522 = vst [vmem:[%s3539_s3 + $0xc0] sm:$0xff] %v1458_v48  ;;  %v1459_v57 = vmax.f32 %v1279_v61, 0.0 }
 0x18b   :  { %1525 = vst [vmem:[%s3539_s3 + $0xd8] sm:$0xff] %v1461_v28  ;;  %v2207_v31 = vpack.c.bf16 %v1461_v28, %v1460_v23 }
 0x18c   :  { %1523 = vst [vmem:[%s3539_s3 + $0xc8] sm:$0xff] %v1459_v57  ;;  %v2202_v16 = vpack.c.bf16 %v1459_v57, %v1458_v48  ;;  %v1010_v29 = vpop.f32.mrb[60].mxu0  ;;  %v2416_v35 = vpop.f32.mrb[60].mxu1 }
 0x18d   :  { %2311 = vst [vmem:[%s3540_s4 + $0x68] sm:$0xff] %v2207_v31   ;;  %v1011_v39 = vadd.f32 %v3116_v59, %v1010_v29  ;;  %v1012_v40 = vpop.f32.mrb[61].mxu0  ;;  %v1291_v17 = vpop.f32.mrb[61].mxu1 }
 0x18e   :  { %2310 = vst [vmem:[%s3540_s4 + $0x60] sm:$0xff] %v2202_v16   ;;  %v1292_v9 = vadd.f32 %v1291_v17, %v1003_v32  ;;  %v1013_v43 = vpop.f32.mrb[62].mxu0  ;;  %v2417_v49 = vpop.f32.mrb[62].mxu1 }
 0x18f   :  { %v1300_v47 = vadd.f32 %v2416_v35, %v1011_v39  ;;  %v1014_v51 = vadd.f32 %v3116_v59, %v1013_v43  ;;  %v1015_v12 = vpop.f32.mrb[63].mxu0  ;;  %v1294_v41 = vpop.f32.mrb[63].mxu1 }
 0x190   :  { %v1462_v52 = vmax.f32 %v1292_v9, 0.0  ;;  %v1295_v55 = vadd.f32 %v1294_v41, %v1006_v44 }
 0x191   :  { %v1464_v56 = vmax.f32 %v1300_v47, 0.0  ;;  %v1303_v21 = vadd.f32 %v2417_v49, %v1014_v51 }
 0x192   :  { %1526 = vst [vmem:[%s3539_s3 + $0xe0] sm:$0xff] %v1462_v52  ;;  %v1463_v60 = vmax.f32 %v1295_v55, 0.0 }
 0x193   :  { %1528 = vst [vmem:[%s3539_s3 + $0xf0] sm:$0xff] %v1464_v56  ;;  %v1465_v53 = vmax.f32 %v1303_v21, 0.0 }
 0x194   :  { %1527 = vst [vmem:[%s3539_s3 + $0xe8] sm:$0xff] %v1463_v60  ;;  %v2212_v63 = vpack.c.bf16 %v1463_v60, %v1462_v52  ;;  %v1018_v3 = vpop.f32.mrb[64].mxu0  ;;  %v2420_v24 = vpop.f32.mrb[64].mxu1 }
 0x195   :  { %1529 = vst [vmem:[%s3539_s3 + $0xf8] sm:$0xff] %v1465_v53  ;;  %v2217_v13 = vpack.c.bf16 %v1465_v53, %v1464_v56  ;;  %v1019_v4 = vadd.f32 %v3116_v59, %v1018_v3  ;;  %v1020_v45 = vpop.f32.mrb[65].mxu0  ;;  %v1307_v7 = vpop.f32.mrb[65].mxu1 }
 0x196   :  { %2312 = vst [vmem:[%s3540_s4 + $0x70] sm:$0xff] %v2212_v63   ;;  %v1021_v8 = vpop.f32.mrb[66].mxu0  ;;  %v2421_v11 = vpop.f32.mrb[66].mxu1 }
 0x197   :  { %2313 = vst [vmem:[%s3540_s4 + $0x78] sm:$0xff] %v2217_v13   ;;  %v1308_v15 = vadd.f32 %v1307_v7, %v1019_v4  ;;  %v1022_v33 = vadd.f32 %v3116_v59, %v1021_v8  ;;  %v1023_v20 = vpop.f32.mrb[67].mxu0  ;;  %v1310_v36 = vpop.f32.mrb[67].mxu1 }
 0x199   :  { %v1466_v1 = vmax.f32 %v1308_v15, 0.0  ;;  %v1311_v19 = vadd.f32 %v1310_v36, %v1022_v33 }
 0x19b   :  { %1530 = vst [vmem:[%s3539_s3 + $0x100] sm:$0xff] %v1466_v1  ;;  %v1467_v25 = vmax.f32 %v1311_v19, 0.0 }
 0x19c   :  { %v1026_v0 = vpop.f32.mrb[68].mxu0  ;;  %v2424_v23 = vpop.f32.mrb[68].mxu1 }
 0x19d   :  { %1531 = vst [vmem:[%s3539_s3 + $0x108] sm:$0xff] %v1467_v25  ;;  %v2222_v27 = vpack.c.bf16 %v1467_v25, %v1466_v1  ;;  %v1027_v37 = vadd.f32 %v3116_v59, %v1026_v0  ;;  %v1028_v5 = vpop.f32.mrb[69].mxu0  ;;  %v1323_v48 = vpop.f32.mrb[69].mxu1  ;;  %v1091_v1 = vadd.f32 %v3116_v59, %v3061_v2  ;;  %v1083_v25 = vadd.f32 %v3116_v59, %v3055_v58 }
 0x19e   :  { %v1029_v61 = vpop.f32.mrb[70].mxu0  ;;  %v2425_v28 = vpop.f32.mrb[70].mxu1 }
 0x19f   :  { %2314 = vst [vmem:[%s3540_s4 + $0x80] sm:$0xff] %v2222_v27   ;;  %v1316_v57 = vadd.f32 %v2420_v24, %v1027_v37  ;;  %v1030_v31 = vadd.f32 %v3116_v59, %v1029_v61  ;;  %v1031_v32 = vpop.f32.mrb[71].mxu0  ;;  %v1326_v16 = vpop.f32.mrb[71].mxu1  ;;  %v1094_v27 = vadd.f32 %v3116_v59, %v3063_v6 }
 0x1a1   :  { %v1468_v29 = vmax.f32 %v1316_v57, 0.0  ;;  %v1319_v35 = vadd.f32 %v2421_v11, %v1030_v31 }
 0x1a3   :  { %1532 = vst [vmem:[%s3539_s3 + $0x110] sm:$0xff] %v1468_v29  ;;  %v1469_v39 = vmax.f32 %v1319_v35, 0.0 }
 0x1a4   :  { %v1034_v40 = vpop.f32.mrb[72].mxu0  ;;  %v3342_v17 = vpop.f32.mrb[72].mxu1 }
 0x1a5   :  { %1533 = vst [vmem:[%s3539_s3 + $0x118] sm:$0xff] %v1469_v39  ;;  %v2227_v44 = vpack.c.bf16 %v1469_v39, %v1468_v29  ;;  %v1035_v9 = vadd.f32 %v3116_v59, %v1034_v40  ;;  %v1036_v43 = vpop.f32.mrb[73].mxu0  ;;  %v1339_v49 = vpop.f32.mrb[73].mxu1 }
 0x1a6   :  { %v1037_v47 = vpop.f32.mrb[74].mxu0  ;;  %v3348_v51 = vpop.f32.mrb[74].mxu1 }
 0x1a7   :  { %2315 = vst [vmem:[%s3540_s4 + $0x88] sm:$0xff] %v2227_v44   ;;  %v1324_v12 = vadd.f32 %v1323_v48, %v1035_v9  ;;  %v1038_v41 = vadd.f32 %v3116_v59, %v1037_v47  ;;  %v1039_v52 = vpop.f32.mrb[75].mxu0  ;;  %v1342_v55 = vpop.f32.mrb[75].mxu1  ;;  %v1107_v47 = vadd.f32 %v3116_v59, %v3075_v18 }
 0x1a8   :  { %v1099_v52 = vadd.f32 %v3116_v59, %v3067_v10 }
 0x1a9   :  { %v1470_v56 = vmax.f32 %v1324_v12, 0.0  ;;  %v1327_v21 = vadd.f32 %v1326_v16, %v1038_v41 }
 0x1ab   :  { %1534 = vst [vmem:[%s3539_s3 + $0x120] sm:$0xff] %v1470_v56  ;;  %v1471_v60 = vmax.f32 %v1327_v21, 0.0  ;;  %v1110_v21 = vadd.f32 %v3116_v59, %v3079_v22 }
 0x1ac   :  { %v1042_v53 = vpop.f32.mrb[76].mxu0  ;;  %v3357_v63 = vpop.f32.mrb[76].mxu1 }
 0x1ad   :  { %1535 = vst [vmem:[%s3539_s3 + $0x128] sm:$0xff] %v1471_v60  ;;  %v2232_v3 = vpack.c.bf16 %v1471_v60, %v1470_v56  ;;  %v1043_v24 = vadd.f32 %v3116_v59, %v1042_v53  ;;  %v1044_v13 = vpop.f32.mrb[77].mxu0  ;;  %v3363_v4 = vpop.f32.mrb[77].mxu1 }
 0x1ae   :  { %v1045_v45 = vpop.f32.mrb[78].mxu0  ;;  %v3365_v7 = vpop.f32.mrb[78].mxu1  ;;  %v1102_v13 = vadd.f32 %v3116_v59, %v3071_v14 }
 0x1af   :  { %2316 = vst [vmem:[%s3540_s4 + $0x90] sm:$0xff] %v2232_v3   ;;  %v1332_v8 = vadd.f32 %v2424_v23, %v1043_v24  ;;  %v1046_v11 = vadd.f32 %v3116_v59, %v1045_v45  ;;  %v1047_v15 = vpop.f32.mrb[79].mxu0  ;;  %v3371_v33 = vpop.f32.mrb[79].mxu1 }
 0x1b1   :  { %v1472_v20 = vmax.f32 %v1332_v8, 0.0  ;;  %v1335_v36 = vadd.f32 %v2425_v28, %v1046_v11  ;;  %v1086_v28 = vadd.f32 %v3116_v59, %v3059_v62 }
 0x1b3   :  { %1536 = vst [vmem:[%s3539_s3 + $0x130] sm:$0xff] %v1472_v20  ;;  %v1473_v19 = vmax.f32 %v1335_v36, 0.0 }
 0x1b4   :  { %v1050_v0 = vpop.f32.mrb[80].mxu0  ;;  %v2436_v23 = vpop.f32.mrb[80].mxu1 }
 0x1b5   :  { %1537 = vst [vmem:[%s3539_s3 + $0x138] sm:$0xff] %v1473_v19  ;;  %v2237_v37 = vpack.c.bf16 %v1473_v19, %v1472_v20  ;;  %v1051_v2 = vadd.f32 %v3116_v59, %v1050_v0  ;;  %v1380_v5 = vadd.f32 %v2436_v23, %v1091_v1  ;;  %v1052_v48 = vpop.f32.mrb[81].mxu0  ;;  %v1371_v61 = vpop.f32.mrb[81].mxu1 }
 0x1b6   :  { %v1372_v57 = vadd.f32 %v1371_v61, %v1083_v25  ;;  %v1053_v58 = vpop.f32.mrb[82].mxu0  ;;  %v2437_v31 = vpop.f32.mrb[82].mxu1 }
 0x1b7   :  { %2317 = vst [vmem:[%s3540_s4 + $0x98] sm:$0xff] %v2237_v37   ;;  %v1340_v6 = vadd.f32 %v1339_v49, %v1051_v2  ;;  %v1484_v32 = vmax.f32 %v1380_v5, 0.0  ;;  %v1054_v16 = vadd.f32 %v3116_v59, %v1053_v58  ;;  %v1383_v29 = vadd.f32 %v2437_v31, %v1094_v27  ;;  %v1055_v35 = vpop.f32.mrb[83].mxu0  ;;  %v1374_v39 = vpop.f32.mrb[83].mxu1 }
 0x1b8   :  { %v1482_v40 = vmax.f32 %v1372_v57, 0.0  ;;  %v1375_v44 = vadd.f32 %v1374_v39, %v1086_v28  ;;  %v1123_v37 = vadd.f32 %v3116_v59, %v3091_v34  ;;  %v1126_v28 = vadd.f32 %v3116_v59, %v3095_v38 }
 0x1b9   :  { %v1474_v9 = vmax.f32 %v1340_v6, 0.0  ;;  %1548 = vst [vmem:[%s3539_s3 + $0x190] sm:$0xff] %v1484_v32  ;;  %v1343_v62 = vadd.f32 %v1342_v55, %v1054_v16  ;;  %v1485_v43 = vmax.f32 %v1383_v29, 0.0 }
 0x1ba   :  { %1546 = vst [vmem:[%s3539_s3 + $0x180] sm:$0xff] %v1482_v40  ;;  %v1483_v49 = vmax.f32 %v1375_v44, 0.0 }
 0x1bb   :  { %1538 = vst [vmem:[%s3539_s3 + $0x140] sm:$0xff] %v1474_v9  ;;  %v1475_v12 = vmax.f32 %v1343_v62, 0.0  ;;  %1549 = vst [vmem:[%s3539_s3 + $0x198] sm:$0xff] %v1485_v43  ;;  %v2267_v41 = vpack.c.bf16 %v1485_v43, %v1484_v32  ;;  %v1118_v32 = vadd.f32 %v3116_v59, %v3087_v30 }
 0x1bc   :  { %1547 = vst [vmem:[%s3539_s3 + $0x188] sm:$0xff] %v1483_v49  ;;  %v2262_v55 = vpack.c.bf16 %v1483_v49, %v1482_v40  ;;  %v1058_v56 = vpop.f32.mrb[84].mxu0  ;;  %v2440_v18 = vpop.f32.mrb[84].mxu1 }
 0x1bd   :  { %1539 = vst [vmem:[%s3539_s3 + $0x148] sm:$0xff] %v1475_v12  ;;  %v2242_v60 = vpack.c.bf16 %v1475_v12, %v1474_v9  ;;  %2323 = vst [vmem:[%s3540_s4 + $0xc8] sm:$0xff] %v2267_v41   ;;  %v1059_v10 = vadd.f32 %v3116_v59, %v1058_v56  ;;  %v1396_v53 = vadd.f32 %v2440_v18, %v1107_v47  ;;  %v1060_v3 = vpop.f32.mrb[85].mxu0  ;;  %v1387_v24 = vpop.f32.mrb[85].mxu1 }
 0x1be   :  { %2322 = vst [vmem:[%s3540_s4 + $0xc0] sm:$0xff] %v2262_v55   ;;  %v1388_v22 = vadd.f32 %v1387_v24, %v1099_v52  ;;  %v1061_v45 = vpop.f32.mrb[86].mxu0  ;;  %v2441_v8 = vpop.f32.mrb[86].mxu1  ;;  %v1139_v41 = vadd.f32 %v3116_v59, %v3107_v50  ;;  %v1134_v24 = vadd.f32 %v3116_v59, %v3103_v46 }
 0x1bf   :  { %2318 = vst [vmem:[%s3540_s4 + $0xa0] sm:$0xff] %v2242_v60   ;;  %v1348_v11 = vadd.f32 %v3342_v17, %v1059_v10  ;;  %v1488_v15 = vmax.f32 %v1396_v53, 0.0  ;;  %v1062_v20 = vadd.f32 %v3116_v59, %v1061_v45  ;;  %v1399_v36 = vadd.f32 %v2441_v8, %v1110_v21  ;;  %v1063_v1 = vpop.f32.mrb[87].mxu0  ;;  %v1390_v19 = vpop.f32.mrb[87].mxu1 }
 0x1c0   :  { %v1486_v14 = vmax.f32 %v1388_v22, 0.0  ;;  %v1391_v25 = vadd.f32 %v1390_v19, %v1102_v13  ;;  %v1142_v21 = vadd.f32 %v3116_v59, %v3111_v54 }
 0x1c1   :  { %v1476_v0 = vmax.f32 %v1348_v11, 0.0  ;;  %1552 = vst [vmem:[%s3539_s3 + $0x1b0] sm:$0xff] %v1488_v15  ;;  %v1351_v23 = vadd.f32 %v3348_v51, %v1062_v20  ;;  %v1489_v27 = vmax.f32 %v1399_v36, 0.0  ;;  %v1115_v51 = vadd.f32 %v3116_v59, %v3083_v26 }
 0x1c2   :  { %1550 = vst [vmem:[%s3539_s3 + $0x1a0] sm:$0xff] %v1486_v14  ;;  %v1487_v17 = vmax.f32 %v1391_v25, 0.0 }
 0x1c3   :  { %1540 = vst [vmem:[%s3539_s3 + $0x150] sm:$0xff] %v1476_v0  ;;  %v1477_v2 = vmax.f32 %v1351_v23, 0.0  ;;  %1553 = vst [vmem:[%s3539_s3 + $0x1b8] sm:$0xff] %v1489_v27  ;;  %v2277_v5 = vpack.c.bf16 %v1489_v27, %v1488_v15 }
 0x1c4   :  { %1551 = vst [vmem:[%s3539_s3 + $0x1a8] sm:$0xff] %v1487_v17  ;;  %v2272_v48 = vpack.c.bf16 %v1487_v17, %v1486_v14  ;;  %v1066_v61 = vpop.f32.mrb[88].mxu0  ;;  %v2444_v34 = vpop.f32.mrb[88].mxu1 }
 0x1c5   :  { %1541 = vst [vmem:[%s3539_s3 + $0x158] sm:$0xff] %v1477_v2  ;;  %v2247_v57 = vpack.c.bf16 %v1477_v2, %v1476_v0  ;;  %2325 = vst [vmem:[%s3540_s4 + $0xd8] sm:$0xff] %v2277_v5   ;;  %v1067_v26 = vadd.f32 %v3116_v59, %v1066_v61  ;;  %v1412_v58 = vadd.f32 %v2444_v34, %v1123_v37  ;;  %v1068_v31 = vpop.f32.mrb[89].mxu0  ;;  %v1403_v6 = vpop.f32.mrb[89].mxu1 }
 0x1c6   :  { %2324 = vst [vmem:[%s3540_s4 + $0xd0] sm:$0xff] %v2272_v48   ;;  %v1404_v38 = vadd.f32 %v1403_v6, %v1115_v51  ;;  %v1069_v16 = vpop.f32.mrb[90].mxu0  ;;  %v2445_v29 = vpop.f32.mrb[90].mxu1 }
 0x1c7   :  { %2319 = vst [vmem:[%s3540_s4 + $0xa8] sm:$0xff] %v2247_v57   ;;  %v1356_v35 = vadd.f32 %v3363_v4, %v1067_v26  ;;  %v1492_v39 = vmax.f32 %v1412_v58, 0.0  ;;  %v1070_v40 = vadd.f32 %v3116_v59, %v1069_v16  ;;  %v1415_v44 = vadd.f32 %v2445_v29, %v1126_v28  ;;  %v1071_v9 = vpop.f32.mrb[91].mxu0  ;;  %v1406_v62 = vpop.f32.mrb[91].mxu1 }
 0x1c8   :  { %v1490_v30 = vmax.f32 %v1404_v38, 0.0  ;;  %v1407_v43 = vadd.f32 %v1406_v62, %v1118_v32 }
 0x1c9   :  { %v1478_v49 = vmax.f32 %v1356_v35, 0.0  ;;  %1556 = vst [vmem:[%s3539_s3 + $0x1d0] sm:$0xff] %v1492_v39  ;;  %v1359_v47 = vadd.f32 %v3371_v33, %v1070_v40  ;;  %v1493_v12 = vmax.f32 %v1415_v44, 0.0  ;;  %v1131_v33 = vadd.f32 %v3116_v59, %v3099_v42 }
 0x1ca   :  { %1554 = vst [vmem:[%s3539_s3 + $0x1c0] sm:$0xff] %v1490_v30  ;;  %v1491_v4 = vmax.f32 %v1407_v43, 0.0 }
 0x1cb   :  { %1542 = vst [vmem:[%s3539_s3 + $0x160] sm:$0xff] %v1478_v49  ;;  %v1479_v52 = vmax.f32 %v1359_v47, 0.0  ;;  %1557 = vst [vmem:[%s3539_s3 + $0x1d8] sm:$0xff] %v1493_v12  ;;  %v2287_v55 = vpack.c.bf16 %v1493_v12, %v1492_v39 }
 0x1cc   :  { %1555 = vst [vmem:[%s3539_s3 + $0x1c8] sm:$0xff] %v1491_v4  ;;  %v2282_v56 = vpack.c.bf16 %v1491_v4, %v1490_v30  ;;  %v1074_v18 = vpop.f32.mrb[92].mxu0  ;;  %v2448_v50 = vpop.f32.mrb[92].mxu1 }
 0x1cd   :  { %1543 = vst [vmem:[%s3539_s3 + $0x168] sm:$0xff] %v1479_v52  ;;  %v2252_v60 = vpack.c.bf16 %v1479_v52, %v1478_v49  ;;  %2327 = vst [vmem:[%s3540_s4 + $0xe8] sm:$0xff] %v2287_v55   ;;  %v1075_v42 = vadd.f32 %v3116_v59, %v1074_v18  ;;  %v1428_v10 = vadd.f32 %v2448_v50, %v1139_v41  ;;  %v1076_v53 = vpop.f32.mrb[93].mxu0  ;;  %v1419_v3 = vpop.f32.mrb[93].mxu1 }
 0x1ce   :  { %2326 = vst [vmem:[%s3540_s4 + $0xe0] sm:$0xff] %v2282_v56   ;;  %v1420_v54 = vadd.f32 %v1419_v3, %v1131_v33  ;;  %v1077_v13 = vpop.f32.mrb[94].mxu0  ;;  %v2449_v22 = vpop.f32.mrb[94].mxu1 }
 0x1cf   :  { %2320 = vst [vmem:[%s3540_s4 + $0xb0] sm:$0xff] %v2252_v60   ;;  %v1364_v45 = vadd.f32 %v3357_v63, %v1075_v42  ;;  %v1496_v8 = vmax.f32 %v1428_v10, 0.0  ;;  %v1078_v11 = vadd.f32 %v3116_v59, %v1077_v13  ;;  %v1431_v15 = vadd.f32 %v2449_v22, %v1142_v21  ;;  %v1079_v20 = vpop.f32.mrb[95].mxu0  ;;  %v1422_v36 = vpop.f32.mrb[95].mxu1 }
 0x1d0   :  { %v1494_v46 = vmax.f32 %v1420_v54, 0.0  ;;  %v1423_v1 = vadd.f32 %v1422_v36, %v1134_v24 }
 0x1d1   :  { %v1480_v19 = vmax.f32 %v1364_v45, 0.0  ;;  %1560 = vst [vmem:[%s3539_s3 + $0x1f0] sm:$0xff] %v1496_v8  ;;  %v1367_v14 = vadd.f32 %v3365_v7, %v1078_v11  ;;  %v1497_v25 = vmax.f32 %v1431_v15, 0.0 }
 0x1d2   :  { %1558 = vst [vmem:[%s3539_s3 + $0x1e0] sm:$0xff] %v1494_v46  ;;  %v1495_v63 = vmax.f32 %v1423_v1, 0.0 }
 0x1d3   :  { %1544 = vst [vmem:[%s3539_s3 + $0x170] sm:$0xff] %v1480_v19  ;;  %v1481_v59 = vmax.f32 %v1367_v14, 0.0  ;;  %1561 = vst [vmem:[%s3539_s3 + $0x1f8] sm:$0xff] %v1497_v25  ;;  %v2297_v0 = vpack.c.bf16 %v1497_v25, %v1496_v8 }
 0x1d4   :  { %1559 = vst [vmem:[%s3539_s3 + $0x1e8] sm:$0xff] %v1495_v63  ;;  %v2292_v7 = vpack.c.bf16 %v1495_v63, %v1494_v46 }
 0x1d5   :  { %1545 = vst [vmem:[%s3539_s3 + $0x178] sm:$0xff] %v1481_v59  ;;  %v2257_v23 = vpack.c.bf16 %v1481_v59, %v1480_v19  ;;  %2329 = vst [vmem:[%s3540_s4 + $0xf8] sm:$0xff] %v2297_v0  }
 0x1d6   :  { %2328 = vst [vmem:[%s3540_s4 + $0xf0] sm:$0xff] %v2292_v7  }
 0x1d7   :  { %2321 = vst [vmem:[%s3540_s4 + $0xb8] sm:$0xff] %v2257_v23  }

// kernel: alexnet_forward.4
= control target key start
LH: loop header
LB: loop body
LE: loop exit
PB: predicated region body
PF: predicated region fallthrough
CT: control target
= control target key end

     0   :  { %s6364_s15 = smov 0   ;;  %s8430_s0 = inlined_call_operand.vmem [shape: bf16[2,15,8,256], index: 0, kind: input, shape index: {}]   ;;  %s8431_s1 = inlined_call_operand.vmem [shape: bf16[5,640,256], index: 1, kind: input, shape index: {}]   ;;  %s8432_s2 = inlined_call_operand.vmem [shape: f32[1,256], index: 2, kind: input, shape index: {}]   ;;  %s8433_s3 = inlined_call_operand.vmem [shape: f32[2,7,8,256], index: 3, kind: output, shape index: {0}]   ;;  %s8434_s4 = inlined_call_operand.vmem [shape: bf16[2,7,8,256], index: 4, kind: output, shape index: {1}]  }
   0x1 LB: > { %s4682_s16 = sadd.s32 4294967295, %s6336_s15   ;;  %p4686_p0 = scmp.ge.s32.totalorder %s6336_s15, 1  ;;  %s6336_s15 = sphi %s6364_s15, %s15_s15  }
   0x2   : > { %p165_p1 = scmp.lt.s32.totalorder %s6336_s15, 3 }
   0x4   : > { %p166_p2 = pnand %p4686_p0, %p165_p1 }
   0x6   : > { %169 = sbr.rel (%p166_p2) target bundleno = 692 (0x2b4), region = 32 }
   0xd   : > { %v5703_v0 = vld [vmem:[%s8431_s1 + $0x284] ss:$8 sps:$4 sm:$0xff]   ;;  %v5705_v1 = vld [vmem:[%s8431_s1 + $0x280] ss:$8 sps:$4 sm:$0xff]   ;;  %v8435_v2 = vmov 0   ;;  %p196_p3 = scmp.lt.s32.totalorder %s4682_s16, 1 }
   0xe   : > { %1601 = vmatprep.mubr.bf16.mxu0 %v8435_v2  ;;  %466 = vst [vmem:[#allocation2] sm:$0xf] %v8435_v2  ;;  %467 = vst [vmem:[#allocation2 + $0x4] sm:$0x3] %v8435_v2  ;;  %1427 = vmatprep.subr.bf16.mxu1 %v5703_v0  ;;  %v5706_v3 = vld [vmem:[%s8431_s1 + $0x294] ss:$8 sps:$4 sm:$0xff]  }
   0xf   : > { %468 = vst [vmem:[#allocation2 + $0x8] sm:$0xf] %v8435_v2  ;;  %469 = vst [vmem:[#allocation2 + $0xc] sm:$0x3] %v8435_v2  ;;  %v5708_v4 = vld [vmem:[%s8431_s1 + $0x290] ss:$8 sps:$4 sm:$0xff]   ;;  %1428 = vmatpush1.bf16.msra.mxu1 %v5705_v1 }
  0x10   : > { %471 = vst [vmem:[#allocation2 + $0x48] sm:$0xf] %v8435_v2  ;;  %472 = vst [vmem:[#allocation2 + $0x4c] sm:$0x3] %v8435_v2  ;;  %v5709_v5 = vld [vmem:[%s8431_s1 + $0x484] ss:$8 sps:$4 sm:$0xff]   ;;  %1429 = vmatprep.subr.bf16.mxu1 %v5706_v3 }
  0x11   : > { %473 = vst [vmem:[#allocation2 + $0x50] sm:$0xf] %v8435_v2  ;;  %474 = vst [vmem:[#allocation2 + $0x54] sm:$0x3] %v8435_v2  ;;  %v5711_v6 = vld [vmem:[%s8431_s1 + $0x480] ss:$8 sps:$4 sm:$0xff]   ;;  %1569 = vmatprep.subr.bf16.mxu0 %v5709_v5 }
  0x12   : > { %476 = vst [vmem:[#allocation2 + $0x10] sm:$0x1] %v8435_v2  ;;  %477 = vst [vmem:[#allocation2 + $0x18] sm:$0x1] %v8435_v2  ;;  %v5712_v7 = vld [vmem:[%s8431_s1 + $0x2a4] ss:$8 sps:$4 sm:$0xff]   ;;  %1570 = vmatpush1.bf16.msra.mxu0 %v5711_v6 }
  0x13   : > { %478 = vst [vmem:[#allocation2 + $0x20] sm:$0x1] %v8435_v2  ;;  %479 = vst [vmem:[#allocation2 + $0x28] sm:$0x1] %v8435_v2  ;;  %v5715_v8 = vld [vmem:[%s8431_s1 + $0x494] ss:$8 sps:$4 sm:$0xff]   ;;  %1430 = vmatpush1.bf16.msra.mxu1 %v5708_v4 }
  0x14   : > { %480 = vst [vmem:[#allocation2 + $0x30] sm:$0x1] %v8435_v2  ;;  %481 = vst [vmem:[#allocation2 + $0x38] sm:$0x1] %v8435_v2  ;;  %v5717_v9 = vld [vmem:[%s8431_s1 + $0x490] ss:$8 sps:$4 sm:$0xff]   ;;  %1431 = vmatprep.subr.bf16.mxu1 %v5712_v7  ;;  %1571 = vmatprep.subr.bf16.mxu0 %v5715_v8 }
  0x15   : > { %482 = vst [vmem:[#allocation2 + $0x40] sm:$0x1] %v8435_v2  ;;  %v5714_v10 = vld [vmem:[%s8431_s1 + $0x2a0] ss:$8 sps:$4 sm:$0xff]   ;;  %v5718_v11 = vld [vmem:[%s8431_s1 + $0x2b4] ss:$8 sps:$4 sm:$0xff]  }
  0x16   : > { %v5721_v12 = vld [vmem:[%s8431_s1 + $0x4a4] ss:$8 sps:$4 sm:$0xff]   ;;  %1572 = vmatpush1.bf16.msra.mxu0 %v5717_v9  ;;  %v5723_v13 = vld [vmem:[%s8431_s1 + $0x4a0] ss:$8 sps:$4 sm:$0xff]   ;;  %v5720_v14 = vld [vmem:[%s8431_s1 + $0x2b0] ss:$8 sps:$4 sm:$0xff]  }
  0x17   : > { %1432 = vmatpush1.bf16.msra.mxu1 %v5714_v10  ;;  %1573 = vmatprep.subr.bf16.mxu0 %v5721_v12  ;;  %v5727_v15 = vld [vmem:[%s8431_s1 + $0x4b4] ss:$8 sps:$4 sm:$0xff]   ;;  %v5724_v16 = vld [vmem:[%s8431_s1 + $0x2c4] ss:$8 sps:$4 sm:$0xff]   ;;  %v5729_v17 = vld [vmem:[%s8431_s1 + $0x4b0] ss:$8 sps:$4 sm:$0xff]  }
  0x18   : > { %1433 = vmatprep.subr.bf16.mxu1 %v5718_v11  ;;  %s8448_s16 = smov (!%p196_p3, %s4682_s16), 1  ;;  %v5726_v18 = vld [vmem:[%s8431_s1 + $0x2c0] ss:$8 sps:$4 sm:$0xff]   ;;  %v5733_v19 = vld [vmem:[%s8431_s1 + $0x4c4] ss:$8 sps:$4 sm:$0xff]   ;;  %vm483_vm0 = vcmask 1041408  }
  0x19   : > { %v5730_v20 = vld [vmem:[%s8431_s1 + $0x2d4] ss:$8 sps:$4 sm:$0xff]   ;;  %v5735_v21 = vld [vmem:[%s8431_s1 + $0x4c0] ss:$8 sps:$4 sm:$0xff]   ;;  %s5691_s9 = smul.u32 120, %s8448_s16  ;;  %vm543_vm4 = vcmask 1040384  }
  0x1a   : > { %1574 = vmatpush1.bf16.msra.mxu0 %v5723_v13  ;;  %v5732_v22 = vld [vmem:[%s8431_s1 + $0x2d0] ss:$8 sps:$4 sm:$0xff]   ;;  %v5739_v23 = vld [vmem:[%s8431_s1 + $0x4d4] ss:$8 sps:$4 sm:$0xff]   ;;  %v5736_v24 = vld [vmem:[%s8431_s1 + $0x2e4] ss:$8 sps:$4 sm:$0xff]  }
  0x1b   : > { %1434 = vmatpush1.bf16.msra.mxu1 %v5720_v14  ;;  %1575 = vmatprep.subr.bf16.mxu0 %v5727_v15  ;;  %v5738_v25 = vld [vmem:[%s8431_s1 + $0x2e0] ss:$8 sps:$4 sm:$0xff]   ;;  %v5741_v26 = vld [vmem:[%s8431_s1 + $0x4d0] ss:$8 sps:$4 sm:$0xff]   ;;  %s6476_s24 = scalar_lea.vmem %s8430_s0, %s5691_s9  ;;  %v5742_v27 = vld [vmem:[%s8431_s1 + $0x2f4] ss:$8 sps:$4 sm:$0xff]  }
  0x1c   : > { %1435 = vmatprep.subr.bf16.mxu1 %v5724_v16  ;;  %v5745_v28 = vld [vmem:[%s8431_s1 + $0x4e4] ss:$8 sps:$4 sm:$0xff]   ;;  %v5747_v29 = vld [vmem:[%s8431_s1 + $0x4e0] ss:$8 sps:$4 sm:$0xff]   ;;  %vm484_vm1 = vsmask.f32 7938 }
  0x1d   : > { %v5744_v30 = vld [vmem:[%s8431_s1 + $0x2f0] ss:$8 sps:$4 sm:$0xff]   ;;  %v5751_v31 = vld [vmem:[%s8431_s1 + $0x4f4] ss:$8 sps:$4 sm:$0xff]   ;;  %v212_v32 = vld [vmem:[%s6476_s24] sm:$0xff]  ;;  %s5692_s11 = smul.u32 112, %s8448_s16 }
  0x1e   : > { %1576 = vmatpush1.bf16.msra.mxu0 %v5729_v17  ;;  %v213_v33 = vld [vmem:[%s6476_s24 + $0x8] sm:$0xff]  ;;  %v214_v34 = vld [vmem:[%s6476_s24 + $0x10] sm:$0xff]  ;;  %v242_v35 = vrot.slane %v212_v32, 4  ;;  %v288_v36 = vshrl.u32 %v212_v32, 16  ;;  %v291_v37 = vshll.u32 %v212_v32, 16  ;;  %vm6498_vm2 = vmand %vm483_vm0, %vm484_vm1  ;;  %s5693_s12 = smul.u32 56, %s8448_s16 }
  0x1f   : > { %1436 = vmatpush1.bf16.msra.mxu1 %v5726_v18  ;;  %1577 = vmatprep.subr.bf16.mxu0 %v5733_v19  ;;  %v243_v38 = vrot.slane %v213_v33, 4  ;;  %v297_v39 = vshrl.u32 %v213_v33, 16  ;;  %v300_v40 = vshll.u32 %v213_v33, 16  ;;  %v306_v41 = vshrl.u32 %v214_v34, 16  ;;  %v486_v43 = vld [vmem:[#allocation2 + $0x14] sm:$0x3]  ;;  %s8376_s17 = scalar_lea.vmem %s8433_s3, %s5692_s11 }
  0x20   : > { %1437 = vmatprep.subr.bf16.mxu1 %v5730_v20  ;;  %v5748_v44 = vld [vmem:[%s8431_s1 + $0x304] ss:$8 sps:$4 sm:$0xff]   ;;  %v290_v45 = vrot.slane %v288_v36, 4  ;;  %v293_v46 = vrot.slane %v291_v37, 5  ;;  %v5750_v47 = vld [vmem:[%s8431_s1 + $0x300] ss:$8 sps:$4 sm:$0xff]   ;;  %v272_v49 = vmax.bf16 %v242_v35, %v212_v32  ;;  %s8386_s19 = scalar_lea.vmem %s8434_s4, %s5693_s12 }
  0x21   : > { %v244_v48 = vrot.slane %v214_v34, 4  ;;  %v299_v50 = vrot.slane %v297_v39, 4  ;;  %v302_v51 = vrot.slane %v300_v40, 5  ;;  %v5753_v52 = vld [vmem:[%s8431_s1 + $0x4f0] ss:$8 sps:$4 sm:$0xff]   ;;  %v308_v54 = vrot.slane %v306_v41, 4 }
  0x22   : > { %1578 = vmatpush1.bf16.msra.mxu0 %v5735_v21  ;;  %v294_v53 = vor.u32 %v293_v46, %v290_v45  ;;  %v309_v55 = vshll.u32 %v214_v34, 16  ;;  %v487_v56 = vsel %vm6498_vm2, 0, %v486_v43  ;;  %v5759_v57 = vld [vmem:[%s8431_s1 + $0x204] ss:$8 sps:$4 sm:$0xff]   ;;  %v273_v58 = vmax.bf16 %v243_v38, %v213_v33  ;;  %v5754_v60 = vld [vmem:[%s8431_s1 + $0x314] ss:$8 sps:$4 sm:$0xff]  }
  0x23   : > { %1438 = vmatpush1.bf16.msra.mxu1 %v5732_v22  ;;  %1579 = vmatprep.subr.bf16.mxu0 %v5739_v23  ;;  %v303_v59 = vor.u32 %v302_v51, %v299_v50  ;;  %488 = vst [vmem:[#allocation2 + $0x14] sm:$0x3] %v487_v56  ;;  %v274_v0 = vmax.bf16 %v244_v48, %v214_v34  ;;  %v6519_v4 = vld [vmem:[#allocation2 + $0x8] sm:$0xf]  ;;  %v576_v5 = vld [vmem:[#allocation2 + $0xc] sm:$0x3] }
  0x24   : > { %1439 = vmatprep.subr.bf16.mxu1 %v5736_v24  ;;  %v295_v61 = vrot.slane %v294_v53, 4  ;;  %v311_v62 = vrot.slane %v309_v55, 5  ;;  %v5756_v6 = vld [vmem:[%s8431_s1 + $0x310] ss:$8 sps:$4 sm:$0xff]   ;;  %vm544_vm3 = vsmask.f32 256  ;;  %v6530_v15 = vcombine.low %v6519_v4, %v576_v5 }
  0x25   : > { %v304_v63 = vrot.slane %v303_v59, 4  ;;  %v215_v8 = vld [vmem:[%s6476_s24 + $0x18] sm:$0xff]  ;;  %v5763_v10 = vld [vmem:[%s8431_s1 + $0x324] ss:$8 sps:$4 sm:$0xff]   ;;  %v5765_v16 = vld [vmem:[%s8431_s1 + $0x320] ss:$8 sps:$4 sm:$0xff]  }
  0x26   : > { %1580 = vmatpush1.bf16.msra.mxu0 %v5741_v26  ;;  %v312_v1 = vor.u32 %v311_v62, %v308_v54  ;;  %v437_v3 = vmax.bf16 %v295_v61, %v272_v49  ;;  %v216_v11 = vld [vmem:[%s6476_s24 + $0x20] sm:$0xff]  ;;  %v245_v12 = vrot.slane %v215_v8, 4  ;;  %v315_v13 = vshrl.u32 %v215_v8, 16  ;;  %v217_v17 = vld [vmem:[%s6476_s24 + $0x28] sm:$0xff]  ;;  %v5769_v20 = vld [vmem:[%s8431_s1 + $0x334] ss:$8 sps:$4 sm:$0xff]  }
  0x27   : > { %1440 = vmatpush1.bf16.msra.mxu1 %v5738_v25  ;;  %1581 = vmatprep.subr.bf16.mxu0 %v5745_v28  ;;  %v438_v7 = vmax.bf16 %v304_v63, %v273_v58  ;;  %v246_v18 = vrot.slane %v216_v11, 4  ;;  %v218_v21 = vld [vmem:[%s6476_s24 + $0x30] sm:$0xff]  ;;  %v247_v22 = vrot.slane %v217_v17, 4  ;;  %v318_v24 = vshll.u32 %v215_v8, 16  ;;  %v492_v38 = vld [vmem:[#allocation2 + $0x24] sm:$0x3]  ;;  %vm6545_vm5 = vmand %vm543_vm4, %vm544_vm3 }
  0x28   : > { %1441 = vmatprep.subr.bf16.mxu1 %v5742_v27  ;;  %v313_v9 = vrot.slane %v312_v1, 4  ;;  %v317_v23 = vrot.slane %v315_v13, 4  ;;  %v248_v25 = vrot.slane %v218_v21, 4  ;;  %v275_v26 = vmax.bf16 %v245_v12, %v215_v8  ;;  %v5771_v40 = vld [vmem:[%s8431_s1 + $0x330] ss:$8 sps:$4 sm:$0xff]  }
  0x29   : > { %v452_v14 = vmax.bf16 %v438_v7, %v437_v3  ;;  %v276_v27 = vmax.bf16 %v246_v18, %v216_v11  ;;  %v324_v28 = vshrl.u32 %v216_v11, 16  ;;  %v327_v32 = vshll.u32 %v216_v11, 16  ;;  %v5777_v55 = vld [vmem:[%s8431_s1 + $0x344] ss:$8 sps:$4 sm:$0xff]   ;;  %v219_v1 = vld [vmem:[%s6476_s24 + $0x38] sm:$0xff]  ;;  %v6569_v13 = vld [vmem:[%s6476_s24 + $0x50] sm:$0xff] }
  0x2a   : > { %1582 = vmatpush1.bf16.msra.mxu0 %v5747_v29  ;;  %v439_v19 = vmax.bf16 %v313_v9, %v274_v0  ;;  %v489_v29 = vld [vmem:[#allocation2 + $0x1c] sm:$0x3]  ;;  %v333_v33 = vshrl.u32 %v217_v17, 16  ;;  %v336_v35 = vshll.u32 %v217_v17, 16  ;;  %v342_v36 = vshrl.u32 %v218_v21, 16  ;;  %v220_v3 = vld [vmem:[%s6476_s24 + $0x40] sm:$0xff] }
  0x2b   : > { %1442 = vmatpush1.bf16.msra.mxu1 %v5744_v30  ;;  %1583 = vmatprep.subr.bf16.mxu0 %v5751_v31  ;;  %v320_v31 = vrot.slane %v318_v24, 5  ;;  %v326_v34 = vrot.slane %v324_v28, 4  ;;  %v345_v37 = vshll.u32 %v218_v21, 16  ;;  %v329_v43 = vrot.slane %v327_v32, 5  ;;  %v546_v46 = vld [vmem:[#allocation2 + $0x14] sm:$0x1] }
  0x2c   : > { %1443 = vmatprep.subr.bf16.mxu1 %v5748_v44  ;;  %v459_v30 = vmax.bf16 %v452_v14, %v439_v19  ;;  %v335_v44 = vrot.slane %v333_v33, 4  ;;  %v344_v48 = vrot.slane %v342_v36, 4  ;;  %v490_v50 = vsel %vm6498_vm2, 0, %v489_v29  ;;  %v5779_v0 = vld [vmem:[%s8431_s1 + $0x340] ss:$8 sps:$4 sm:$0xff]  }
  0x2d   : > { %v321_v41 = vor.u32 %v320_v31, %v317_v23  ;;  %v347_v49 = vrot.slane %v345_v37, 5  ;;  %v330_v53 = vor.u32 %v329_v43, %v326_v34  ;;  %491 = vst [vmem:[#allocation2 + $0x1c] sm:$0x3] %v490_v50  ;;  %v493_v54 = vsel %vm6498_vm2, 0, %v492_v38  ;;  %v221_v7 = vld [vmem:[%s6476_s24 + $0x48] sm:$0xff] }
  0x2e   : > { %1584 = vmatpush1.bf16.msra.mxu0 %v5753_v52  ;;  %v514_v39 = vrot.slane %v459_v30, 7  ;;  %v277_v56 = vmax.bf16 %v247_v22, %v217_v17  ;;  %494 = vst [vmem:[#allocation2 + $0x24] sm:$0x3] %v493_v54  ;;  %v772_v61 = vrot.slane %v6530_v15, 2  ;;  %v249_v8 = vrot.slane %v219_v1, 4 }
  0x2f   : > { %1444 = vmatpush1.bf16.msra.mxu1 %v5750_v47  ;;  %2222 = vmatprep.subr.bf16.mxu0 %v5759_v57  ;;  %v338_v47 = vrot.slane %v336_v35, 5  ;;  %v322_v52 = vrot.slane %v321_v41, 4  ;;  %v278_v57 = vmax.bf16 %v248_v25, %v218_v21  ;;  %v348_v59 = vor.u32 %v347_v49, %v344_v48  ;;  %v5783_v12 = vld [vmem:[%s8431_s1 + $0x354] ss:$8 sps:$4 sm:$0xff]   ;;  %v5791_v30 = vld [vmem:[%s8431_s1 + $0x364] ss:$8 sps:$4 sm:$0xff]  }
  0x30   : > { %1445 = vmatprep.subr.bf16.mxu1 %v5754_v60  ;;  %v515_v51 = vrot.slane %v514_v39, 4  ;;  %542 = vst [vmem:[#allocation2 + $0x10] sm:$0xe] %v514_v39  ;;  %v331_v62 = vrot.slane %v330_v53, 4  ;;  %v250_v9 = vrot.slane %v220_v3, 4  ;;  %v251_v14 = vrot.slane %v221_v7, 4 }
  0x31   : > { %v339_v58 = vor.u32 %v338_v47, %v335_v44  ;;  %v440_v63 = vmax.bf16 %v322_v52, %v275_v26  ;;  %v660_v21 = vshll.u32 %v6530_v15, 16  ;;  %v6576_v23 = vmax.bf16 %v249_v8, %v219_v1  ;;  %v5785_v26 = vld [vmem:[%s8431_s1 + $0x350] ss:$8 sps:$4 sm:$0xff]   ;;  %v495_v41 = vld [vmem:[#allocation2 + $0x2c] sm:$0x3] }
  0x32   : > { %v547_v60 = vsel %vm6545_vm5, %v515_v51, %v546_v46  ;;  %v351_v24 = vshrl.u32 %v219_v1, 16  ;;  %v354_v28 = vshll.u32 %v219_v1, 16  ;;  %v360_v29 = vshrl.u32 %v220_v3, 16  ;;  %v498_v43 = vld [vmem:[#allocation2 + $0x34] sm:$0x3] }
  0x33   : > { %1446 = vmatpush1.bf16.msra.mxu1 %v5756_v6  ;;  %548 = vst [vmem:[#allocation2 + $0x14] sm:$0x1] %v547_v60  ;;  %v340_v5 = vrot.slane %v339_v58, 4  ;;  %v349_v6 = vrot.slane %v348_v59, 4  ;;  %v453_v11 = vmax.bf16 %v440_v63, %v439_v19  ;;  %v6578_v19 = vmax.bf16 %v250_v9, %v220_v3  ;;  %v5793_v44 = vld [vmem:[%s8431_s1 + $0x360] ss:$8 sps:$4 sm:$0xff]  }
  0x34   : > { %1447 = vmatprep.subr.bf16.mxu1 %v5763_v10  ;;  %v441_v10 = vmax.bf16 %v331_v62, %v276_v27  ;;  %v6583_v27 = vmax.bf16 %v251_v14, %v221_v7  ;;  %v353_v33 = vrot.slane %v351_v24, 4  ;;  %v363_v34 = vshll.u32 %v220_v3, 16  ;;  %v550_v37 = vld [vmem:[#allocation2 + $0x1c] sm:$0x1]  ;;  %v224_v24 = vld [vmem:[%s6476_s24 + $0x60] sm:$0xff] }
  0x35   : > { %v442_v17 = vmax.bf16 %v340_v5, %v277_v56  ;;  %v6572_v18 = vmax.bf16 %v349_v6, %v278_v57  ;;  %v369_v35 = vshrl.u32 %v221_v7, 16  ;;  %v356_v38 = vrot.slane %v354_v28, 5  ;;  %v554_v53 = vld [vmem:[#allocation2 + $0x24] sm:$0x1]  ;;  %v5757_v56 = vld [vmem:[%s8431_s1 + $0x200] ss:$8 sps:$4 sm:$0xff]  }
  0x36   : > { %v460_v22 = vmax.bf16 %v453_v11, %v441_v10  ;;  %v362_v39 = vrot.slane %v360_v29, 4  ;;  %v365_v48 = vrot.slane %v363_v34, 5  ;;  %v378_v50 = vshrl.u32 %v6569_v13, 16  ;;  %v5797_v62 = vld [vmem:[%s8431_s1 + $0x374] ss:$8 sps:$4 sm:$0xff]  }
  0x37   : > { %1448 = vmatpush1.bf16.msra.mxu1 %v5765_v16  ;;  %v658_v16 = vshrl.u32 %v6530_v15, 16  ;;  %v454_v25 = vmax.bf16 %v442_v17, %v441_v10  ;;  %v6588_v31 = vld [vmem:[#allocation2 + $0x10] sm:$0xf]  ;;  %v371_v49 = vrot.slane %v369_v35, 4  ;;  %v357_v54 = vor.u32 %v356_v38, %v353_v33  ;;  %v223_v11 = vld [vmem:[%s6476_s24 + $0x58] sm:$0xff] }
  0x38   : > { %1449 = vmatprep.subr.bf16.mxu1 %v5769_v20  ;;  %v252_v20 = vrot.slane %v6569_v13, 4  ;;  %v516_v32 = vrot.slane %v460_v22, 7  ;;  %v366_v58 = vor.u32 %v365_v48, %v362_v39  ;;  %v380_v59 = vrot.slane %v378_v50, 4  ;;  %v5799_v6 = vld [vmem:[%s8431_s1 + $0x370] ss:$8 sps:$4 sm:$0xff]  }
  0x39   : > { %v461_v36 = vmax.bf16 %v454_v25, %v6572_v18  ;;  %v381_v60 = vshll.u32 %v6569_v13, 16  ;;  %v358_v3 = vrot.slane %v357_v54, 4  ;;  %v496_v9 = vsel %vm6498_vm2, 0, %v495_v41  ;;  %v5766_v25 = vld [vmem:[%s8431_s1 + $0x210] ss:$8 sps:$4 sm:$0xff]  }
  0x3a   : > { %v578_v46 = vld [vmem:[#allocation2 + $0x14] sm:$0x3]  ;;  %v517_v47 = vrot.slane %v516_v32, 4  ;;  %549 = vst [vmem:[#allocation2 + $0x18] sm:$0xe] %v516_v32  ;;  %v499_v10 = vsel %vm6498_vm2, 0, %v498_v43 }
  0x3b   : > { %1450 = vmatpush1.bf16.msra.mxu1 %v5771_v40  ;;  %v372_v40 = vshll.u32 %v221_v7, 16  ;;  %v6596_v51 = vcombine.low %v6588_v31, %v578_v46  ;;  %v518_v52 = vrot.slane %v461_v36, 7  ;;  %v367_v7 = vrot.slane %v366_v58, 4  ;;  %497 = vst [vmem:[#allocation2 + $0x2c] sm:$0x3] %v496_v9 }
  0x3c   : > { %1451 = vmatprep.subr.bf16.mxu1 %v5777_v55  ;;  %v551_v57 = vsel %vm6545_vm5, %v517_v47, %v550_v37  ;;  %v383_v8 = vrot.slane %v381_v60, 5  ;;  %v444_v22 = vmax.bf16 %v358_v3, %v6576_v23  ;;  %500 = vst [vmem:[#allocation2 + $0x34] sm:$0x3] %v499_v10  ;;  %v5806_v23 = vld [vmem:[%s8431_s1 + $0x384] ss:$8 sps:$4 sm:$0xff]   ;;  %v387_v34 = vshrl.u32 %v223_v11, 16 }
  0x3d   : > { %v374_v55 = vrot.slane %v372_v40, 5  ;;  %v773_v63 = vrot.slane %v6596_v51, 2  ;;  %v519_v1 = vrot.slane %v518_v52, 4  ;;  %552 = vst [vmem:[#allocation2 + $0x1c] sm:$0x1] %v551_v57  ;;  %v445_v29 = vmax.bf16 %v367_v7, %v6578_v19 }
  0x3e   : > { %553 = vst [vmem:[#allocation2 + $0x20] sm:$0xe] %v518_v52  ;;  %v384_v28 = vor.u32 %v383_v8, %v380_v59  ;;  %v455_v33 = vmax.bf16 %v444_v22, %v6572_v18  ;;  %v390_v35 = vshll.u32 %v223_v11, 16  ;;  %v501_v36 = vld [vmem:[#allocation2 + $0x3c] sm:$0x3]  ;;  %v254_v19 = vrot.slane %v224_v24, 4 }
  0x3f   : > { %1452 = vmatpush1.bf16.msra.mxu1 %v5779_v0  ;;  %v5768_v0 = vld [vmem:[%s8431_s1 + $0x214] ss:$8 sps:$4 sm:$0xff]   ;;  %v375_v5 = vor.u32 %v374_v55, %v371_v49  ;;  %v555_v14 = vsel %vm6545_vm5, %v519_v1, %v554_v53  ;;  %v396_v37 = vshrl.u32 %v224_v24, 16  ;;  %v662_v38 = vrot.slane %v660_v21, 1  ;;  %v5772_v43 = vld [vmem:[%s8431_s1 + $0x220] ss:$8 sps:$4 sm:$0xff]  }
  0x40   : > { %1453 = vmatprep.subr.bf16.mxu1 %v5783_v12  ;;  %v4785_v12 = vcombine.low %v772_v61, %v773_v63  ;;  %556 = vst [vmem:[#allocation2 + $0x24] sm:$0x1] %v555_v14  ;;  %v462_v39 = vmax.bf16 %v455_v33, %v445_v29  ;;  %v389_v40 = vrot.slane %v387_v34, 4  ;;  %v392_v41 = vrot.slane %v390_v35, 5  ;;  %v5786_v35 = vld [vmem:[%s8431_s1 + $0x240] ss:$8 sps:$4 sm:$0xff]  }
  0x41   : > { %v376_v17 = vrot.slane %v375_v5, 4  ;;  %v398_v48 = vrot.slane %v396_v37, 4  ;;  %v399_v49 = vshll.u32 %v224_v24, 16  ;;  %v502_v55 = vsel %vm6498_vm2, 0, %v501_v36  ;;  %v5900_v42 = vld [vmem:[%s8431_s1 + $0x474] ss:$8 sps:$4 sm:$0xff]  }
  0x42   : > { %1602 = vmatmul.mubr.bf16.vlgmr.msra.gmra.mrb[0].mxu0 %v4785_v12  ;;  %v520_v53 = vrot.slane %v462_v39, 7  ;;  %v393_v54 = vor.u32 %v392_v41, %v389_v40  ;;  %v558_v58 = vld [vmem:[#allocation2 + $0x2c] sm:$0x1]  ;;  %v284_v59 = vmax.bf16 %v254_v19, %v224_v24  ;;  %503 = vst [vmem:[#allocation2 + $0x3c] sm:$0x3] %v502_v55  ;;  %v665_v3 = vshrl.u32 %v6596_v51, 16 }
  0x43   : > { %1454 = vmatpush1.bf16.msra.mxu1 %v5785_v26  ;;  %v282_v26 = vmax.bf16 %v252_v20, %v6569_v13  ;;  %v446_v32 = vmax.bf16 %v376_v17, %v6583_v27  ;;  %2223 = vmatpush1.bf16.msra.mxu0 %v5757_v56  ;;  %v6640_v13 = vld [vmem:[#allocation2 + $0x18] sm:$0xf]  ;;  %v385_v20 = vrot.slane %v384_v28, 4  ;;  %v5774_v27 = vld [vmem:[%s8431_s1 + $0x224] ss:$8 sps:$4 sm:$0xff]   ;;  %v401_v60 = vrot.slane %v399_v49, 5 }
  0x44   : > { %1455 = vmatprep.subr.bf16.mxu1 %v5791_v30  ;;  %v253_v30 = vrot.slane %v223_v11, 4  ;;  %1611 = vmatprep.mubr.bf16.mxu0 %v8435_v2  ;;  %v5782_v56 = vld [vmem:[%s8431_s1 + $0x234] ss:$8 sps:$4 sm:$0xff]   ;;  %557 = vst [vmem:[#allocation2 + $0x28] sm:$0xe] %v520_v53  ;;  %v394_v1 = vrot.slane %v393_v54, 4  ;;  %v6670_v14 = vor.u32 %v662_v38, %v658_v16 }
  0x45   : > { %2224 = vmatprep.subr.bf16.mxu0 %v5768_v0  ;;  %v456_v18 = vmax.bf16 %v446_v32, %v445_v29  ;;  %v447_v46 = vmax.bf16 %v385_v20, %v282_v26  ;;  %v6650_v50 = vld [vmem:[#allocation2 + $0x20] sm:$0xf]  ;;  %v521_v0 = vrot.slane %v520_v53, 4  ;;  %v667_v5 = vshll.u32 %v6596_v51, 16  ;;  %v5780_v26 = vld [vmem:[%s8431_s1 + $0x230] ss:$8 sps:$4 sm:$0xff]  }
  0x46   : > { %v283_v47 = vmax.bf16 %v253_v30, %v223_v11  ;;  %v402_v9 = vor.u32 %v401_v60, %v398_v48  ;;  %v562_v11 = vld [vmem:[#allocation2 + $0x34] sm:$0x1]  ;;  %v4781_v20 = vcombine.low %v6519_v4, %v6588_v31  ;;  %v5804_v38 = vld [vmem:[%s8431_s1 + $0x380] ss:$8 sps:$4 sm:$0xff]  }
  0x47   : > { %1456 = vmatpush1.bf16.msra.mxu1 %v5793_v44  ;;  %v580_v44 = vld [vmem:[#allocation2 + $0x1c] sm:$0x3]  ;;  %2225 = vmatpush1.bf16.msra.mxu0 %v5766_v25  ;;  %v463_v57 = vmax.bf16 %v456_v18, %v447_v46  ;;  %v559_v10 = vsel %vm6545_vm5, %v521_v0, %v558_v58  ;;  %v669_v17 = vrot.slane %v667_v5, 1  ;;  %v5819_v58 = vld [vmem:[%s8431_s1 + $0x3a4] ss:$8 sps:$4 sm:$0xff]   ;;  %v6751_v0 = vcombine.low %v6640_v13, %v6650_v50 }
  0x48   : > { %1457 = vmatprep.subr.bf16.mxu1 %v5797_v62  ;;  %v6653_v52 = vcombine.low %v6640_v13, %v580_v44  ;;  %2226 = vmatprep.subr.bf16.mxu0 %v5774_v27  ;;  %v582_v62 = vld [vmem:[#allocation2 + $0x24] sm:$0x3]  ;;  %v448_v12 = vmax.bf16 %v394_v1, %v283_v47  ;;  %560 = vst [vmem:[#allocation2 + $0x2c] sm:$0x1] %v559_v10  ;;  %v403_v25 = vrot.slane %v402_v9, 4 }
  0x49   : > { %v522_v8 = vrot.slane %v463_v57, 7  ;;  %v6680_v29 = vor.u32 %v669_v17, %v665_v3  ;;  %v5813_v27 = vld [vmem:[%s8431_s1 + $0x394] ss:$8 sps:$4 sm:$0xff]   ;;  %v5802_v57 = vld [vmem:[%s8431_s1 + $0x264] ss:$8 sps:$4 sm:$0xff]  }
  0x4a   : > { %v774_v7 = vrot.slane %v6653_v52, 2  ;;  %v457_v28 = vmax.bf16 %v448_v12, %v447_v46  ;;  %v6693_v33 = vmax.bf16 %v403_v25, %v284_v59  ;;  %v674_v34 = vshll.u32 %v6653_v52, 16  ;;  %v5796_v41 = vld [vmem:[%s8431_s1 + $0x254] ss:$8 sps:$4 sm:$0xff]   ;;  %v5794_v46 = vld [vmem:[%s8431_s1 + $0x250] ss:$8 sps:$4 sm:$0xff]  }
  0x4b   : > { %1458 = vmatpush1.bf16.msra.mxu1 %v5799_v6  ;;  %v6663_v6 = vcombine.low %v6650_v50, %v582_v62  ;;  %2227 = vmatpush1.bf16.msra.mxu0 %v5772_v43  ;;  %v523_v24 = vrot.slane %v522_v8, 4  ;;  %561 = vst [vmem:[#allocation2 + $0x30] sm:$0xe] %v522_v8  ;;  %v4782_v36 = vcombine.low %v6670_v14, %v6680_v29  ;;  %v672_v19 = vshrl.u32 %v6653_v52, 16  ;;  %v6715_v4 = vld [vmem:[#allocation2 + $0x28] sm:$0xf] }
  0x4c   : > { %1498 = vmatprep.subr.bf16.mxu1 %v5806_v23  ;;  %2228 = vmatprep.subr.bf16.mxu0 %v5782_v56  ;;  %v5788_v23 = vld [vmem:[%s8431_s1 + $0x244] ss:$8 sps:$4 sm:$0xff]   ;;  %v464_v37 = vmax.bf16 %v457_v28, %v6693_v33  ;;  %v676_v18 = vrot.slane %v674_v34, 1  ;;  %v566_v47 = vld [vmem:[#allocation2 + $0x3c] sm:$0x1] }
  0x4d   : > { %v775_v22 = vrot.slane %v6663_v6, 2  ;;  %v563_v32 = vsel %vm6545_vm5, %v523_v24, %v562_v11  ;;  %v679_v39 = vshrl.u32 %v6663_v6, 16  ;;  %v681_v40 = vshll.u32 %v6663_v6, 16  ;;  %1459 = vmatprep.mubr.bf16.mxu1 %v4782_v36  ;;  %v5811_v56 = vld [vmem:[%s8431_s1 + $0x390] ss:$8 sps:$4 sm:$0xff]  }
  0x4e   : > { %564 = vst [vmem:[#allocation2 + $0x34] sm:$0x1] %v563_v32  ;;  %v524_v43 = vrot.slane %v464_v37, 7  ;;  %1460 = vmatmul.mubr.bf16.vlgmr.msra.gmra.mrb[0].mxu1 %v4781_v20  ;;  %v6727_v48 = vor.u32 %v676_v18, %v672_v19  ;;  %v5817_v11 = vld [vmem:[%s8431_s1 + $0x3a0] ss:$8 sps:$4 sm:$0xff]  }
  0x4f   : > { %v6686_v30 = vcombine.low %v774_v7, %v775_v22  ;;  %2229 = vmatpush1.bf16.msra.mxu0 %v5780_v26  ;;  %v584_v44 = vld [vmem:[#allocation2 + $0x2c] sm:$0x3]  ;;  %v683_v49 = vrot.slane %v681_v40, 1  ;;  %1499 = vmatpush1.bf16.msra.mxu1 %v5804_v38  ;;  %v5825_v24 = vld [vmem:[%s8431_s1 + $0x3b4] ss:$8 sps:$4 sm:$0xff]  }
  0x50   : > { %2230 = vmatprep.subr.bf16.mxu0 %v5788_v23  ;;  %v6732_v54 = vcombine.low %v6715_v4, %v584_v44  ;;  %v525_v55 = vrot.slane %v524_v43, 4  ;;  %565 = vst [vmem:[#allocation2 + $0x38] sm:$0xe] %v524_v43  ;;  %1500 = vmatprep.subr.bf16.mxu1 %v5813_v27  ;;  %v5800_v26 = vld [vmem:[%s8431_s1 + $0x260] ss:$8 sps:$4 sm:$0xff]  }
  0x51   : > { %1612 = vmatmul.mubr.bf16.gmra.mrb[4].mxu0 %v6686_v30  ;;  %v6745_v59 = vor.u32 %v683_v49, %v679_v39  ;;  %v5823_v36 = vld [vmem:[%s8431_s1 + $0x3b0] ss:$8 sps:$4 sm:$0xff]   ;;  %v573_v20 = vld [vmem:[#allocation2] sm:$0xf]  ;;  %v5831_v18 = vld [vmem:[%s8431_s1 + $0x3c4] ss:$8 sps:$4 sm:$0xff]  }
  0x52   : > { %1621 = vmatprep.mubr.bf16.mxu0 %v8435_v2  ;;  %v585_v53 = vld [vmem:[#allocation2 + $0x30] sm:$0xf]  ;;  %v567_v62 = vsel %vm6545_vm5, %v525_v55, %v566_v47  ;;  %v776_v8 = vrot.slane %v6732_v54, 2  ;;  %v688_v10 = vshll.u32 %v6732_v54, 16  ;;  %v686_v12 = vshrl.u32 %v6732_v54, 16 }
  0x53   : > { %2231 = vmatpush1.bf16.msra.mxu0 %v5786_v35  ;;  %568 = vst [vmem:[#allocation2 + $0x3c] sm:$0x1] %v567_v62  ;;  %v6758_v9 = vcombine.low %v6727_v48, %v6745_v59  ;;  %1501 = vmatpush1.bf16.msra.mxu1 %v5811_v56  ;;  %v5810_v35 = vld [vmem:[%s8431_s1 + $0x274] ss:$8 sps:$4 sm:$0xff]   ;;  %v5808_v44 = vld [vmem:[%s8431_s1 + $0x270] ss:$8 sps:$4 sm:$0xff]   ;;  %v6818_v55 = vcombine.low %v6715_v4, %v585_v53 }
  0x54   : > { %2232 = vmatprep.subr.bf16.mxu0 %v5796_v41  ;;  %1502 = vmatprep.subr.bf16.mxu1 %v5819_v58  ;;  %v690_v25 = vrot.slane %v688_v10, 1  ;;  %v574_v41 = vld [vmem:[#allocation2 + $0x4] sm:$0x3]  ;;  %v5829_v56 = vld [vmem:[%s8431_s1 + $0x3c0] ss:$8 sps:$4 sm:$0xff]   ;;  %v741_v62 = vrot.slane %v658_v16, 1 }
  0x55   : > { %v586_v60 = vld [vmem:[#allocation2 + $0x34] sm:$0x3]  ;;  %1469 = vmatprep.mubr.bf16.mxu1 %v6758_v9  ;;  %v5816_v49 = vld [vmem:[%s8431_s1 + $0x704] ss:$8 sps:$4 sm:$0xff]   ;;  %v6827_v58 = vcombine.low %v573_v20, %v574_v41  ;;  %v5835_v16 = vld [vmem:[%s8431_s1 + $0x3d0] ss:$8 sps:$4 sm:$0xff]  }
  0x56   : > { %v6753_v1 = vcombine.low %v585_v53, %v586_v60  ;;  %1470 = vmatmul.mubr.bf16.gmra.mrb[4].mxu1 %v6751_v0  ;;  %v6795_v38 = vor.u32 %v690_v25, %v686_v12  ;;  %v5837_v53 = vld [vmem:[%s8431_s1 + $0x3d4] ss:$8 sps:$4 sm:$0xff]   ;;  %v5843_v20 = vld [vmem:[%s8431_s1 + $0x3e4] ss:$8 sps:$4 sm:$0xff]  }
  0x57   : > { %2233 = vmatpush1.bf16.msra.mxu0 %v5794_v46  ;;  %v6791_v37 = vld [vmem:[#allocation2 + $0x38] sm:$0xf]  ;;  %1503 = vmatpush1.bf16.msra.mxu1 %v5817_v11  ;;  %v5897_v45 = vld [vmem:[%s8431_s1 + $0x7d4] ss:$8 sps:$4 sm:$0xff]  }
  0x58   : > { %v6766_v17 = vrot.slane %v6753_v1, 2  ;;  %2234 = vmatprep.subr.bf16.mxu0 %v5802_v57  ;;  %v693_v28 = vshrl.u32 %v6753_v1, 16  ;;  %v695_v23 = vshll.u32 %v6753_v1, 16  ;;  %1504 = vmatprep.subr.bf16.mxu1 %v5825_v24  ;;  %v744_v24 = vrot.slane %v665_v3, 1 }
  0x59   : > { %v771_v3 = vrot.slane %v6827_v58, 2 }
  0x5a   : > { %v6782_v32 = vcombine.low %v776_v8, %v6766_v17  ;;  %v697_v27 = vrot.slane %v695_v23, 1  ;;  %v588_v43 = vld [vmem:[#allocation2 + $0x3c] sm:$0x3] }
  0x5b   : > { %2235 = vmatpush1.bf16.msra.mxu0 %v5800_v26  ;;  %v6812_v47 = vcombine.low %v6791_v37, %v588_v43  ;;  %1505 = vmatpush1.bf16.msra.mxu1 %v5823_v36  ;;  %v745_v36 = vrot.slane %v667_v5, 2  ;;  %v4885_v43 = vcombine.low %v771_v3, %v772_v61  ;;  %v4796_v61 = vcombine.low %v6791_v37, %v6791_v37  ;;  %v5834_v3 = vld [vmem:[%s8431_s1 + $0x734] ss:$8 sps:$4 sm:$0xff]  }
  0x5c   : > { %1622 = vmatmul.mubr.bf16.gmra.mrb[8].mxu0 %v6782_v32  ;;  %v6809_v46 = vor.u32 %v697_v27, %v693_v28  ;;  %2236 = vmatprep.subr.bf16.mxu0 %v5810_v35  ;;  %v742_v35 = vrot.slane %v660_v21, 2  ;;  %v5841_v21 = vld [vmem:[%s8431_s1 + $0x3e0] ss:$8 sps:$4 sm:$0xff]   ;;  %v6899_v37 = vcombine.low %v6588_v31, %v6640_v13  ;;  %v6915_v31 = vcombine.low %v773_v63, %v774_v7  ;;  %v5861_v13 = vld [vmem:[%s8431_s1 + $0x414] ss:$8 sps:$4 sm:$0xff]  }
  0x5d   : > { %1631 = vmatprep.mubr.bf16.mxu0 %v8435_v2  ;;  %v6830_v60 = vrot.slane %v6812_v47, 2  ;;  %1506 = vmatprep.subr.bf16.mxu1 %v5831_v18  ;;  %v700_v25 = vshrl.u32 %v6812_v47, 16  ;;  %v702_v26 = vshll.u32 %v6812_v47, 16  ;;  %v6868_v41 = vor.u32 %v745_v36, %v744_v24  ;;  %v5826_v36 = vld [vmem:[%s8431_s1 + $0x720] ss:$8 sps:$4 sm:$0xff]  }
  0x5e   : > { %v6825_v57 = vcombine.low %v6795_v38, %v6809_v46  ;;  %v6866_v5 = vor.u32 %v742_v35, %v741_v62  ;;  %v5847_v62 = vld [vmem:[%s8431_s1 + $0x3f0] ss:$8 sps:$4 sm:$0xff]   ;;  %v6892_v24 = vcombine.low %v6680_v29, %v6727_v48  ;;  %v5828_v29 = vld [vmem:[%s8431_s1 + $0x724] ss:$8 sps:$4 sm:$0xff]   ;;  %v5853_v48 = vld [vmem:[%s8431_s1 + $0x400] ss:$8 sps:$4 sm:$0xff]   ;;  %v6931_v7 = vcombine.low %v6745_v59, %v6795_v38 }
  0x5f   : > { %2237 = vmatpush1.bf16.msra.mxu0 %v5808_v44  ;;  %v4800_v11 = vcombine.low %v6830_v60, %v6830_v60  ;;  %1507 = vmatpush1.bf16.msra.mxu1 %v5829_v56  ;;  %v704_v27 = vrot.slane %v702_v26, 1  ;;  %v5849_v44 = vld [vmem:[%s8431_s1 + $0x3f4] ss:$8 sps:$4 sm:$0xff]   ;;  %v5814_v56 = vld [vmem:[%s8431_s1 + $0x700] ss:$8 sps:$4 sm:$0xff]  }
  0x60   : > { %1479 = vmatprep.mubr.bf16.mxu1 %v6825_v57  ;;  %2936 = vmatprep.subr.bf16.mxu0 %v5816_v49  ;;  %v5820_v35 = vld [vmem:[%s8431_s1 + $0x710] ss:$8 sps:$4 sm:$0xff]   ;;  %v5840_v59 = vld [vmem:[%s8431_s1 + $0x744] ss:$8 sps:$4 sm:$0xff]   ;;  %v5866_v38 = vld [vmem:[%s8431_s1 + $0x420] ss:$8 sps:$4 sm:$0xff]  }
  0x61   : > { %1480 = vmatmul.mubr.bf16.gmra.mrb[8].mxu1 %v6818_v55  ;;  %1508 = vmatprep.subr.bf16.mxu1 %v5837_v53  ;;  %v6861_v18 = vor.u32 %v704_v27, %v700_v25  ;;  %v5822_v53 = vld [vmem:[%s8431_s1 + $0x714] ss:$8 sps:$4 sm:$0xff]   ;;  %v5859_v63 = vld [vmem:[%s8431_s1 + $0x410] ss:$8 sps:$4 sm:$0xff]   ;;  %v6939_v27 = vcombine.low %v6650_v50, %v6715_v4  ;;  %v6955_v50 = vcombine.low %v775_v22, %v776_v8  ;;  %v5881_v8 = vld [vmem:[%s8431_s1 + $0x444] ss:$8 sps:$4 sm:$0xff]  }
  0x62   : > { %v5874_v4 = vld [vmem:[%s8431_s1 + $0x434] ss:$8 sps:$4 sm:$0xff]   ;;  %v5872_v22 = vld [vmem:[%s8431_s1 + $0x430] ss:$8 sps:$4 sm:$0xff]  }
  0x63   : > { %1509 = vmatpush1.bf16.msra.mxu1 %v5835_v16  ;;  %v4797_v49 = vcombine.low %v6861_v18, %v6861_v18  ;;  %v5855_v16 = vld [vmem:[%s8431_s1 + $0x404] ss:$8 sps:$4 sm:$0xff]  }
  0x64   : > { %1632 = vmatmul.mubr.bf16.gmra.mrb[12].mxu0 %v4800_v11  ;;  %1510 = vmatprep.subr.bf16.mxu1 %v5843_v20  ;;  %v4784_v11 = vcombine.low %v6866_v5, %v6868_v41  ;;  %v5868_v20 = vld [vmem:[%s8431_s1 + $0x424] ss:$8 sps:$4 sm:$0xff]  }
  0x65   : > { %2254 = vmatprep.mubr.bf16.mxu0 %v8435_v2  ;;  %1489 = vmatprep.mubr.bf16.mxu1 %v4797_v49  ;;  %v5844_v49 = vld [vmem:[%s8431_s1 + $0x750] ss:$8 sps:$4 sm:$0xff]  }
  0x67   : > { %1511 = vmatpush1.bf16.msra.mxu1 %v5841_v21  ;;  %v5832_v21 = vld [vmem:[%s8431_s1 + $0x730] ss:$8 sps:$4 sm:$0xff]  }
  0x68   : > { %1512 = vmatprep.subr.bf16.mxu1 %v5849_v44  ;;  %v5846_v44 = vld [vmem:[%s8431_s1 + $0x754] ss:$8 sps:$4 sm:$0xff]  }
  0x69   : > { %1490 = vmatmul.mubr.bf16.gmra.mrb[12].mxu1 %v4796_v61  ;;  %v4900_v61 = vcombine.low %v6766_v17, %v6766_v17 }
  0x6a   : > { %1530 = vmatprep.mubr.bf16.mxu1 %v4784_v11  ;;  %v5850_v11 = vld [vmem:[%s8431_s1 + $0x760] ss:$8 sps:$4 sm:$0xff]  }
  0x6b   : > { %1513 = vmatpush1.bf16.msra.mxu1 %v5847_v62  ;;  %v5887_v62 = vld [vmem:[%s8431_s1 + $0x454] ss:$8 sps:$4 sm:$0xff]  }
  0x6c   : > { %2255 = vmatmul.mubr.bf16.vlgmr.msra.gmra.mrb[16].mxu0 %v4885_v43  ;;  %1514 = vmatprep.subr.bf16.mxu1 %v5855_v16  ;;  %v5838_v43 = vld [vmem:[%s8431_s1 + $0x740] ss:$8 sps:$4 sm:$0xff]   ;;  %v5858_v16 = vld [vmem:[%s8431_s1 + $0x774] ss:$8 sps:$4 sm:$0xff]  }
  0x6d   : > { %2937 = vmatpush1.bf16.msra.mxu0 %v5814_v56  ;;  %2264 = vmatprep.mubr.bf16.mxu0 %v8435_v2  ;;  %v5852_v56 = vld [vmem:[%s8431_s1 + $0x764] ss:$8 sps:$4 sm:$0xff]  }
  0x6e   : > { %2938 = vmatprep.subr.bf16.mxu0 %v5822_v53  ;;  %v5879_v53 = vld [vmem:[%s8431_s1 + $0x440] ss:$8 sps:$4 sm:$0xff]  }
  0x6f   : > { %1515 = vmatpush1.bf16.msra.mxu1 %v5853_v48  ;;  %v747_v48 = vrot.slane %v672_v19, 1 }
  0x70   : > { %1516 = vmatprep.subr.bf16.mxu1 %v5861_v13  ;;  %v5864_v13 = vld [vmem:[%s8431_s1 + $0x784] ss:$8 sps:$4 sm:$0xff]  }
  0x71   : > { %2939 = vmatpush1.bf16.msra.mxu0 %v5820_v35  ;;  %v5856_v35 = vld [vmem:[%s8431_s1 + $0x770] ss:$8 sps:$4 sm:$0xff]  }
  0x72   : > { %2940 = vmatprep.subr.bf16.mxu0 %v5828_v29  ;;  %v5885_v29 = vld [vmem:[%s8431_s1 + $0x450] ss:$8 sps:$4 sm:$0xff]  }
  0x73   : > { %1517 = vmatpush1.bf16.msra.mxu1 %v5859_v63  ;;  %v225_v63 = vld [vmem:[%s6476_s24 + $0x68] sm:$0xff] }
  0x74   : > { %2265 = vmatmul.mubr.bf16.gmra.mrb[20].mxu0 %v6915_v31  ;;  %1518 = vmatprep.subr.bf16.mxu1 %v5868_v20  ;;  %v226_v20 = vld [vmem:[%s6476_s24 + $0x70] sm:$0xff]  ;;  %v405_v19 = vshrl.u32 %v225_v63, 16 }
  0x75   : > { %2941 = vmatpush1.bf16.msra.mxu0 %v5826_v36  ;;  %2274 = vmatprep.mubr.bf16.mxu0 %v8435_v2  ;;  %v5894_v36 = vld [vmem:[%s8431_s1 + $0x464] ss:$8 sps:$4 sm:$0xff]  }
  0x76   : > { %2942 = vmatprep.subr.bf16.mxu0 %v5834_v3  ;;  %v748_v3 = vrot.slane %v674_v34, 2  ;;  %v5892_v34 = vld [vmem:[%s8431_s1 + $0x460] ss:$8 sps:$4 sm:$0xff]  }
  0x77   : > { %1519 = vmatpush1.bf16.msra.mxu1 %v5866_v38  ;;  %v504_v38 = vld [vmem:[#allocation2 + $0x44] sm:$0x3] }
  0x78   : > { %1520 = vmatprep.subr.bf16.mxu1 %v5874_v4  ;;  %v256_v4 = vrot.slane %v226_v20, 4 }
  0x79   : > { %2943 = vmatpush1.bf16.msra.mxu0 %v5832_v21  ;;  %v255_v21 = vrot.slane %v225_v63, 4 }
  0x7a   : > { %2944 = vmatprep.subr.bf16.mxu0 %v5840_v59  ;;  %v408_v59 = vshll.u32 %v225_v63, 16 }
  0x7b   : > { %1521 = vmatpush1.bf16.msra.mxu1 %v5872_v22  ;;  %v505_v22 = vsel %vm6498_vm2, 0, %v504_v38  ;;  %v7036_v38 = vor.u32 %v748_v3, %v747_v48  ;;  %v5877_v3 = vld [vmem:[%s8431_s1 + $0x7a4] ss:$8 sps:$4 sm:$0xff]  }
  0x7c   : > { %2275 = vmatmul.mubr.bf16.gmra.mrb[24].mxu0 %v6955_v50  ;;  %1522 = vmatprep.subr.bf16.mxu1 %v5881_v8  ;;  %v750_v8 = vrot.slane %v679_v39, 1  ;;  %506 = vst [vmem:[#allocation2 + $0x44] sm:$0x3] %v505_v22 }
  0x7d   : > { %2945 = vmatpush1.bf16.msra.mxu0 %v5838_v43  ;;  %2284 = vmatprep.mubr.bf16.mxu0 %v8435_v2  ;;  %v414_v43 = vshrl.u32 %v226_v20, 16 }
  0x7e   : > { %2946 = vmatprep.subr.bf16.mxu0 %v5846_v44  ;;  %v417_v44 = vshll.u32 %v226_v20, 16 }
  0x7f   : > { %1523 = vmatpush1.bf16.msra.mxu1 %v5879_v53  ;;  %v410_v53 = vrot.slane %v408_v59, 5 }
  0x80   : > { %1524 = vmatprep.subr.bf16.mxu1 %v5887_v62  ;;  %v419_v62 = vrot.slane %v417_v44, 5  ;;  %v754_v44 = vrot.slane %v688_v10, 2  ;;  %v5912_v10 = vld [vmem:[%s8431_s1 + $0x14] ss:$8 sps:$4 sm:$0xff]  }
  0x81   : > { %2947 = vmatpush1.bf16.msra.mxu0 %v5844_v49  ;;  %v751_v49 = vrot.slane %v681_v40, 2  ;;  %v5871_v40 = vld [vmem:[%s8431_s1 + $0x794] ss:$8 sps:$4 sm:$0xff]  }
  0x82   : > { %2948 = vmatprep.subr.bf16.mxu0 %v5852_v56  ;;  %v407_v56 = vrot.slane %v405_v19, 4  ;;  %v286_v19 = vmax.bf16 %v256_v4, %v226_v20  ;;  %v5869_v20 = vld [vmem:[%s8431_s1 + $0x790] ss:$8 sps:$4 sm:$0xff]   ;;  %v753_v4 = vrot.slane %v686_v12, 1 }
  0x83   : > { %1525 = vmatpush1.bf16.msra.mxu1 %v5885_v29  ;;  %v728_v29 = vrot.slane %v6530_v15, 1  ;;  %v6074_v15 = vld [vmem:[%s8431_s1 + $0x9a0] ss:$8 sps:$4 sm:$0xff]  }
  0x84   : > { %2285 = vmatmul.mubr.bf16.gmra.mrb[28].mxu0 %v4900_v61  ;;  %1526 = vmatprep.subr.bf16.mxu1 %v5894_v36  ;;  %v416_v61 = vrot.slane %v414_v43, 4  ;;  %v411_v39 = vor.u32 %v410_v53, %v407_v56  ;;  %v729_v36 = vrot.slane %v6596_v51, 1  ;;  %v757_v56 = vrot.slane %v695_v23, 2  ;;  %v5875_v53 = vld [vmem:[%s8431_s1 + $0x7a0] ss:$8 sps:$4 sm:$0xff]  }
  0x85   : > { %2949 = vmatpush1.bf16.msra.mxu0 %v5850_v11  ;;  %2968 = vmatprep.mubr.bf16.mxu0 %v8435_v2  ;;  %v5862_v11 = vld [vmem:[%s8431_s1 + $0x780] ss:$8 sps:$4 sm:$0xff]   ;;  %v731_v23 = vrot.slane %v6663_v6, 1  ;;  %v6121_v51 = vld [vmem:[%s8431_s1 + $0x534] ss:$8 sps:$4 sm:$0xff]  }
  0x86   : > { %2950 = vmatprep.subr.bf16.mxu0 %v5858_v16  ;;  %v285_v16 = vmax.bf16 %v255_v21, %v225_v63  ;;  %v420_v59 = vor.u32 %v419_v62, %v416_v61  ;;  %v7038_v63 = vor.u32 %v751_v49, %v750_v8  ;;  %v5906_v21 = vld [vmem:[%s8431_s1 + $0x4] ss:$8 sps:$4 sm:$0xff]   ;;  %v756_v49 = vrot.slane %v693_v28, 1  ;;  %v5884_v28 = vld [vmem:[%s8431_s1 + $0x7b4] ss:$8 sps:$4 sm:$0xff]  }
  0x87   : > { %1527 = vmatpush1.bf16.msra.mxu1 %v5892_v34  ;;  %v5904_v34 = vld [vmem:[%s8431_s1] ss:$8 sps:$4 sm:$0xff]   ;;  %v5918_v62 = vld [vmem:[%s8431_s1 + $0x24] ss:$8 sps:$4 sm:$0xff]  }
  0x88   : > { %1528 = vmatprep.subr.bf16.mxu1 %v5900_v42  ;;  %v421_v43 = vrot.slane %v420_v59, 4  ;;  %v7064_v8 = vcombine.low %v7036_v38, %v7038_v63  ;;  %v730_v42 = vrot.slane %v6653_v52, 1  ;;  %v6086_v52 = vld [vmem:[%s8431_s1 + $0x9c0] ss:$8 sps:$4 sm:$0xff]  }
  0x89   : > { %2951 = vmatpush1.bf16.msra.mxu0 %v5856_v35  ;;  %v5898_v35 = vld [vmem:[%s8431_s1 + $0x470] ss:$8 sps:$4 sm:$0xff]   ;;  %v6098_v6 = vld [vmem:[%s8431_s1 + $0x9e0] ss:$8 sps:$4 sm:$0xff]  }
  0x8a   : > { %3522 = vmatprep.subr.bf16.mxu0 %v5864_v13  ;;  %v412_v13 = vrot.slane %v411_v39, 4  ;;  %v451_v22 = vmax.bf16 %v421_v43, %v286_v19  ;;  %v5882_v19 = vld [vmem:[%s8431_s1 + $0x7b0] ss:$8 sps:$4 sm:$0xff]  }
  0x8b   : > { %1529 = vmatpush1.bf16.msra.mxu1 %v5898_v35  ;;  %v5890_v35 = vld [vmem:[%s8431_s1 + $0x7c4] ss:$8 sps:$4 sm:$0xff]  }
  0x8c   : > { %2969 = vmatmul.mubr.bf16.vlgmr.msra.gmra.mrb[32].mxu0 %v6915_v31  ;;  %v450_v48 = vmax.bf16 %v412_v13, %v285_v16  ;;  %v4783_v31 = vcombine.low %v728_v29, %v729_v36  ;;  %2080 = vmatprep.subr.bf16.mxu1 %v5906_v21  ;;  %v7091_v16 = vor.u32 %v757_v56, %v756_v49  ;;  %v5916_v21 = vld [vmem:[%s8431_s1 + $0x20] ss:$8 sps:$4 sm:$0xff]   ;;  %v5930_v49 = vld [vmem:[%s8431_s1 + $0x44] ss:$8 sps:$4 sm:$0xff]  }
  0x8d   : > { %3523 = vmatpush1.bf16.msra.mxu0 %v5862_v11  ;;  %2978 = vmatprep.mubr.bf16.mxu0 %v8435_v2  ;;  %v7089_v11 = vor.u32 %v754_v44, %v753_v4  ;;  %v7105_v13 = vcombine.low %v730_v42, %v731_v23  ;;  %v7125_v4 = vcombine.low %v6766_v17, %v6830_v60  ;;  %v7136_v44 = vrot.slane %v6753_v1, 1  ;;  %v5922_v17 = vld [vmem:[%s8431_s1 + $0x30] ss:$8 sps:$4 sm:$0xff]  }
  0x8e   : > { %3524 = vmatprep.subr.bf16.mxu0 %v5871_v40  ;;  %v458_v12 = vmax.bf16 %v450_v48, %v6693_v33  ;;  %1531 = vmatmul.mubr.bf16.vlgmr.msra.gmra.mrb[0].mxu1 %v4783_v31  ;;  %v5910_v33 = vld [vmem:[%s8431_s1 + $0x10] ss:$8 sps:$4 sm:$0xff]   ;;  %v570_v40 = vld [vmem:[#allocation2 + $0x44] sm:$0x1]  ;;  %v760_v48 = vrot.slane %v702_v26, 2  ;;  %v732_v26 = vrot.slane %v6732_v54, 1 }
  0x8f   : > { %2081 = vmatpush1.bf16.msra.mxu1 %v5904_v34  ;;  %1540 = vmatprep.mubr.bf16.mxu1 %v7064_v8  ;;  %v7112_v43 = vcombine.low %v7089_v11, %v7091_v16  ;;  %v5924_v31 = vld [vmem:[%s8431_s1 + $0x34] ss:$8 sps:$4 sm:$0xff]   ;;  %v653_v34 = vshll.u32 %v6827_v58, 16  ;;  %v5895_v1 = vld [vmem:[%s8431_s1 + $0x7d0] ss:$8 sps:$4 sm:$0xff]  }
  0x90   : > { %v465_v61 = vmax.bf16 %v458_v12, %v451_v22  ;;  %2082 = vmatprep.subr.bf16.mxu1 %v5912_v10  ;;  %v5903_v12 = vld [vmem:[%s8431_s1 + $0x7e4] ss:$8 sps:$4 sm:$0xff]   ;;  %v7161_v10 = vcombine.low %v732_v26, %v7136_v44  ;;  %v6133_v54 = vld [vmem:[%s8431_s1 + $0x554] ss:$8 sps:$4 sm:$0xff]  }
  0x91   : > { %3525 = vmatpush1.bf16.msra.mxu0 %v5869_v20  ;;  %v759_v20 = vrot.slane %v700_v25, 1  ;;  %v5888_v25 = vld [vmem:[%s8431_s1 + $0x7c0] ss:$8 sps:$4 sm:$0xff]  }
  0x92   : > { %3526 = vmatprep.subr.bf16.mxu0 %v5877_v3  ;;  %v526_v39 = vrot.slane %v465_v61, 7  ;;  %v5928_v61 = vld [vmem:[%s8431_s1 + $0x40] ss:$8 sps:$4 sm:$0xff]  }
  0x93   : > { %2083 = vmatpush1.bf16.msra.mxu1 %v5910_v33  ;;  %v7142_v22 = vor.u32 %v760_v48, %v759_v20  ;;  %v5934_v20 = vld [vmem:[%s8431_s1 + $0x50] ss:$8 sps:$4 sm:$0xff]  }
  0x94   : > { %2979 = vmatmul.mubr.bf16.gmra.mrb[36].mxu0 %v6955_v50  ;;  %v527_v59 = vrot.slane %v526_v39, 4  ;;  %569 = vst [vmem:[#allocation2 + $0x40] sm:$0xe] %v526_v39  ;;  %2084 = vmatprep.subr.bf16.mxu1 %v5918_v62  ;;  %v655_v62 = vrot.slane %v653_v34, 1  ;;  %v5936_v39 = vld [vmem:[%s8431_s1 + $0x54] ss:$8 sps:$4 sm:$0xff]  }
  0x95   : > { %3527 = vmatpush1.bf16.msra.mxu0 %v5875_v53  ;;  %2988 = vmatprep.mubr.bf16.mxu0 %v8435_v2  ;;  %v651_v53 = vshrl.u32 %v6827_v58, 16 }
  0x96   : > { %3528 = vmatprep.subr.bf16.mxu0 %v5884_v28  ;;  %v571_v3 = vsel %vm6545_vm5, %v527_v59, %v570_v40  ;;  %1541 = vmatmul.mubr.bf16.gmra.mrb[4].mxu1 %v7105_v13  ;;  %v4799_v28 = vcombine.low %v7142_v22, %v7142_v22  ;;  %v5909_v59 = vld [vmem:[%s8431_s1 + $0x7f4] ss:$8 sps:$4 sm:$0xff]  }
  0x97   : > { %572 = vst [vmem:[#allocation2 + $0x44] sm:$0x1] %v571_v3  ;;  %2085 = vmatpush1.bf16.msra.mxu1 %v5916_v21  ;;  %1550 = vmatprep.mubr.bf16.mxu1 %v7112_v43  ;;  %v656_v48 = vor.u32 %v655_v62, %v651_v53  ;;  %v5942_v3 = vld [vmem:[%s8431_s1 + $0x64] ss:$8 sps:$4 sm:$0xff]   ;;  %v5953_v62 = vld [vmem:[%s8431_s1 + $0x80] ss:$8 sps:$4 sm:$0xff]  }
  0x98   : > { %2086 = vmatprep.subr.bf16.mxu1 %v5924_v31  ;;  %v5907_v31 = vld [vmem:[%s8431_s1 + $0x7f0] ss:$8 sps:$4 sm:$0xff]  }
  0x99   : > { %3529 = vmatpush1.bf16.msra.mxu0 %v5882_v19  ;;  %v5901_v19 = vld [vmem:[%s8431_s1 + $0x7e0] ss:$8 sps:$4 sm:$0xff]  }
  0x9a   : > { %3530 = vmatprep.subr.bf16.mxu0 %v5890_v35  ;;  %v7185_v35 = vrot.slane %v6812_v47, 1 }
  0x9b   : > { %v7153_v56 = vld [vmem:[#allocation2 + $0x40] sm:$0xf]  ;;  %2087 = vmatpush1.bf16.msra.mxu1 %v5922_v17 }
  0x9c   : > { %2989 = vmatmul.mubr.bf16.gmra.mrb[40].mxu0 %v7125_v4  ;;  %2088 = vmatprep.subr.bf16.mxu1 %v5930_v49  ;;  %v5940_v17 = vld [vmem:[%s8431_s1 + $0x60] ss:$8 sps:$4 sm:$0xff]   ;;  %v4882_v49 = vcombine.low %v656_v48, %v6670_v14  ;;  %v5947_v14 = vld [vmem:[%s8431_s1 + $0x70] ss:$8 sps:$4 sm:$0xff]   ;;  %v5967_v48 = vld [vmem:[%s8431_s1 + $0xa4] ss:$8 sps:$4 sm:$0xff]  }
  0x9d   : > { %3531 = vmatpush1.bf16.msra.mxu0 %v5888_v25  ;;  %2998 = vmatprep.mubr.bf16.mxu0 %v8435_v2  ;;  %v5915_v25 = vld [vmem:[%s8431_s1 + $0x804] ss:$8 sps:$4 sm:$0xff]  }
  0x9e   : > { %3532 = vmatprep.subr.bf16.mxu0 %v5897_v45  ;;  %v590_v33 = vld [vmem:[#allocation2 + $0x44] sm:$0x3]  ;;  %1551 = vmatmul.mubr.bf16.gmra.mrb[8].mxu1 %v7161_v10  ;;  %v4798_v45 = vcombine.low %v7185_v35, %v7185_v35 }
  0x9f   : > { %v7175_v40 = vcombine.low %v7153_v56, %v590_v33  ;;  %2089 = vmatpush1.bf16.msra.mxu1 %v5928_v61  ;;  %1560 = vmatprep.mubr.bf16.mxu1 %v4799_v28  ;;  %v5921_v61 = vld [vmem:[%s8431_s1 + $0x814] ss:$8 sps:$4 sm:$0xff]   ;;  %v5919_v28 = vld [vmem:[%s8431_s1 + $0x810] ss:$8 sps:$4 sm:$0xff]   ;;  %v5927_v33 = vld [vmem:[%s8431_s1 + $0x824] ss:$8 sps:$4 sm:$0xff]  }
  0xa0   : > { %2090 = vmatprep.subr.bf16.mxu1 %v5936_v39  ;;  %v5961_v39 = vld [vmem:[%s8431_s1 + $0x94] ss:$8 sps:$4 sm:$0xff]  }
  0xa1   : > { %3533 = vmatpush1.bf16.msra.mxu0 %v5895_v1  ;;  %v7188_v21 = vrot.slane %v7175_v40, 2  ;;  %v5949_v1 = vld [vmem:[%s8431_s1 + $0x74] ss:$8 sps:$4 sm:$0xff]  }
  0xa2   : > { %3534 = vmatprep.subr.bf16.mxu0 %v5903_v12  ;;  %v5913_v12 = vld [vmem:[%s8431_s1 + $0x800] ss:$8 sps:$4 sm:$0xff]  }
  0xa3   : > { %v5070_v47 = vcombine.low %v7188_v21, %v7188_v21  ;;  %2091 = vmatpush1.bf16.msra.mxu1 %v5934_v20  ;;  %v5959_v20 = vld [vmem:[%s8431_s1 + $0x90] ss:$8 sps:$4 sm:$0xff]  }
  0xa4   : > { %2092 = vmatprep.subr.bf16.mxu1 %v5942_v3  ;;  %v5931_v3 = vld [vmem:[%s8431_s1 + $0x830] ss:$8 sps:$4 sm:$0xff]  }
  0xa5   : > { %3535 = vmatpush1.bf16.msra.mxu0 %v5901_v19  ;;  %v5925_v19 = vld [vmem:[%s8431_s1 + $0x820] ss:$8 sps:$4 sm:$0xff]  }
  0xa6   : > { %3536 = vmatprep.subr.bf16.mxu0 %v5909_v59  ;;  %2999 = vmatmul.mubr.bf16.gmra.mrb[44].mxu0 %v5070_v47  ;;  %v5933_v59 = vld [vmem:[%s8431_s1 + $0x834] ss:$8 sps:$4 sm:$0xff]   ;;  %v5939_v47 = vld [vmem:[%s8431_s1 + $0x844] ss:$8 sps:$4 sm:$0xff]  }
  0xa7   : > { %3554 = vmatprep.mubr.bf16.mxu0 %v6758_v9  ;;  %1561 = vmatmul.mubr.bf16.gmra.mrb[16].mxu1 %v4798_v45  ;;  %v5955_v9 = vld [vmem:[%s8431_s1 + $0x84] ss:$8 sps:$4 sm:$0xff]   ;;  %v5937_v45 = vld [vmem:[%s8431_s1 + $0x840] ss:$8 sps:$4 sm:$0xff]  }
  0xa8   : > { %2093 = vmatpush1.bf16.msra.mxu1 %v5940_v17  ;;  %2112 = vmatprep.mubr.bf16.mxu1 %v4882_v49  ;;  %v5945_v17 = vld [vmem:[%s8431_s1 + $0x854] ss:$8 sps:$4 sm:$0xff]   ;;  %v5971_v49 = vld [vmem:[%s8431_s1 + $0xb0] ss:$8 sps:$4 sm:$0xff]  }
  0xa9   : > { %3537 = vmatpush1.bf16.msra.mxu0 %v5907_v31  ;;  %2094 = vmatprep.subr.bf16.mxu1 %v5949_v1  ;;  %v5965_v31 = vld [vmem:[%s8431_s1 + $0xa0] ss:$8 sps:$4 sm:$0xff]   ;;  %v5943_v1 = vld [vmem:[%s8431_s1 + $0x850] ss:$8 sps:$4 sm:$0xff]  }
  0xaa   : > { %3538 = vmatprep.subr.bf16.mxu0 %v5915_v25  ;;  %v5973_v25 = vld [vmem:[%s8431_s1 + $0xb4] ss:$8 sps:$4 sm:$0xff]  }
  0xac   : > { %2095 = vmatpush1.bf16.msra.mxu1 %v5947_v14  ;;  %v592_v14 = vld [vmem:[#allocation2 + $0x4c] sm:$0x3] }
  0xad   : > { %3539 = vmatpush1.bf16.msra.mxu0 %v5913_v12  ;;  %2096 = vmatprep.subr.bf16.mxu1 %v5955_v9  ;;  %v5979_v12 = vld [vmem:[%s8431_s1 + $0xc4] ss:$8 sps:$4 sm:$0xff]  }
  0xae   : > { %3540 = vmatprep.subr.bf16.mxu0 %v5921_v61  ;;  %v7279_v61 = vld [vmem:[#allocation2 + $0x48] sm:$0xf]  ;;  %v5952_v9 = vld [vmem:[%s8431_s1 + $0x864] ss:$8 sps:$4 sm:$0xff]  }
  0xb0   : > { %2097 = vmatpush1.bf16.msra.mxu1 %v5953_v62  ;;  %v7291_v62 = vcombine.low %v7279_v61, %v592_v14  ;;  %v5970_v14 = vld [vmem:[%s8431_s1 + $0x894] ss:$8 sps:$4 sm:$0xff]  }
  0xb1   : > { %3541 = vmatpush1.bf16.msra.mxu0 %v5919_v28  ;;  %2098 = vmatprep.subr.bf16.mxu1 %v5961_v39  ;;  %v5977_v28 = vld [vmem:[%s8431_s1 + $0xc0] ss:$8 sps:$4 sm:$0xff]  }
  0xb2   : > { %3542 = vmatprep.subr.bf16.mxu0 %v5927_v33  ;;  %v5985_v33 = vld [vmem:[%s8431_s1 + $0xd4] ss:$8 sps:$4 sm:$0xff]   ;;  %v5950_v39 = vld [vmem:[%s8431_s1 + $0x860] ss:$8 sps:$4 sm:$0xff]  }
  0xb4   : > { %2099 = vmatpush1.bf16.msra.mxu1 %v5959_v20  ;;  %v5983_v20 = vld [vmem:[%s8431_s1 + $0xd0] ss:$8 sps:$4 sm:$0xff]  }
  0xb5   : > { %3543 = vmatpush1.bf16.msra.mxu0 %v5925_v19  ;;  %2100 = vmatprep.subr.bf16.mxu1 %v5967_v48  ;;  %v5958_v19 = vld [vmem:[%s8431_s1 + $0x874] ss:$8 sps:$4 sm:$0xff]   ;;  %v5991_v48 = vld [vmem:[%s8431_s1 + $0xe4] ss:$8 sps:$4 sm:$0xff]  }
  0xb6   : > { %3544 = vmatprep.subr.bf16.mxu0 %v5933_v59  ;;  %v7300_v59 = vrot.slane %v7291_v62, 2 }
  0xb8   : > { %2101 = vmatpush1.bf16.msra.mxu1 %v5965_v31  ;;  %v709_v31 = vshll.u32 %v7175_v40, 16 }
  0xb9   : > { %3545 = vmatpush1.bf16.msra.mxu0 %v5931_v3  ;;  %2102 = vmatprep.subr.bf16.mxu1 %v5973_v25  ;;  %v5964_v25 = vld [vmem:[%s8431_s1 + $0x884] ss:$8 sps:$4 sm:$0xff]   ;;  %v594_v3 = vld [vmem:[#allocation2 + $0x54] sm:$0x3] }
  0xba   : > { %3546 = vmatprep.subr.bf16.mxu0 %v5939_v47  ;;  %v5956_v47 = vld [vmem:[%s8431_s1 + $0x870] ss:$8 sps:$4 sm:$0xff]  }
  0xbc   : > { %2103 = vmatpush1.bf16.msra.mxu1 %v5971_v49  ;;  %v5962_v49 = vld [vmem:[%s8431_s1 + $0x880] ss:$8 sps:$4 sm:$0xff]  }
  0xbd   : > { %3547 = vmatpush1.bf16.msra.mxu0 %v5937_v45  ;;  %2104 = vmatprep.subr.bf16.mxu1 %v5979_v12  ;;  %v5989_v45 = vld [vmem:[%s8431_s1 + $0xe0] ss:$8 sps:$4 sm:$0xff]   ;;  %v711_v12 = vrot.slane %v709_v31, 1 }
  0xbe   : > { %3548 = vmatprep.subr.bf16.mxu0 %v5945_v17  ;;  %v5997_v17 = vld [vmem:[%s8431_s1 + $0xf4] ss:$8 sps:$4 sm:$0xff]  }
  0xc0   : > { %2105 = vmatpush1.bf16.msra.mxu1 %v5977_v28  ;;  %v6004_v28 = vld [vmem:[%s8431_s1 + $0x104] ss:$8 sps:$4 sm:$0xff]  }
  0xc1   : > { %3549 = vmatpush1.bf16.msra.mxu0 %v5943_v1  ;;  %2106 = vmatprep.subr.bf16.mxu1 %v5985_v33  ;;  %v707_v1 = vshrl.u32 %v7175_v40, 16  ;;  %v5968_v33 = vld [vmem:[%s8431_s1 + $0x890] ss:$8 sps:$4 sm:$0xff]  }
  0xc2   : > { %3550 = vmatprep.subr.bf16.mxu0 %v5952_v9  ;;  %v5995_v9 = vld [vmem:[%s8431_s1 + $0xf0] ss:$8 sps:$4 sm:$0xff]  }
  0xc4   : > { %2107 = vmatpush1.bf16.msra.mxu1 %v5983_v20  ;;  %v6324_v20 = vld [vmem:[#allocation2 + $0x8] sm:$0xf] }
  0xc5   : > { %3551 = vmatpush1.bf16.msra.mxu0 %v5950_v39  ;;  %2108 = vmatprep.subr.bf16.mxu1 %v5991_v48  ;;  %v7345_v39 = vor.u32 %v711_v12, %v707_v1  ;;  %v6325_v48 = vld [vmem:[#allocation2] sm:$0xf] }
  0xc6   : > { %3552 = vmatprep.subr.bf16.mxu0 %v5958_v19  ;;  %v716_v19 = vshll.u32 %v7291_v62, 16 }
  0xc8   : > { %2109 = vmatpush1.bf16.msra.mxu1 %v5989_v45  ;;  %v5974_v45 = vld [vmem:[%s8431_s1 + $0x8a0] ss:$8 sps:$4 sm:$0xff]   ;;  %v718_v12 = vrot.slane %v716_v19, 1 }
  0xc9   : > { %3553 = vmatpush1.bf16.msra.mxu0 %v5956_v47  ;;  %2110 = vmatprep.subr.bf16.mxu1 %v5997_v17  ;;  %v4881_v47 = vcombine.low %v6325_v48, %v6324_v20  ;;  %v5232_v17 = vcombine.low %v6861_v18, %v7345_v39  ;;  %v5988_v20 = vld [vmem:[%s8431_s1 + $0x8c4] ss:$8 sps:$4 sm:$0xff]   ;;  %v6022_v48 = vld [vmem:[%s8431_s1 + $0x134] ss:$8 sps:$4 sm:$0xff]  }
  0xca   : > { %3593 = vmatprep.subr.bf16.mxu0 %v5964_v25  ;;  %v6002_v25 = vld [vmem:[%s8431_s1 + $0x100] ss:$8 sps:$4 sm:$0xff]  }
  0xcc   : > { %3555 = vmatmul.mubr.bf16.vlgmr.msra.gmra.mrb[32].mxu0 %v6751_v0  ;;  %v5976_v0 = vld [vmem:[%s8431_s1 + $0x8a4] ss:$8 sps:$4 sm:$0xff]   ;;  %2111 = vmatpush1.bf16.msra.mxu1 %v5995_v9  ;;  %v6008_v9 = vld [vmem:[%s8431_s1 + $0x110] ss:$8 sps:$4 sm:$0xff]  }
  0xcd   : > { %3594 = vmatpush1.bf16.msra.mxu0 %v5962_v49  ;;  %3564 = vmatprep.mubr.bf16.mxu0 %v6825_v57  ;;  %v6010_v57 = vld [vmem:[%s8431_s1 + $0x114] ss:$8 sps:$4 sm:$0xff]   ;;  %v714_v49 = vshrl.u32 %v7291_v62, 16 }
  0xce   : > { %3595 = vmatprep.subr.bf16.mxu0 %v5970_v14  ;;  %2151 = vmatprep.subr.bf16.mxu1 %v6004_v28  ;;  %v5982_v14 = vld [vmem:[%s8431_s1 + $0x8b4] ss:$8 sps:$4 sm:$0xff]   ;;  %v6016_v28 = vld [vmem:[%s8431_s1 + $0x124] ss:$8 sps:$4 sm:$0xff]  }
  0xcf   : > { %2113 = vmatmul.mubr.bf16.vlgmr.msra.gmra.mrb[20].mxu1 %v4881_v47  ;;  %v7392_v47 = vld [vmem:[#allocation2 + $0x38] sm:$0xf] }
  0xd0   : > { %2152 = vmatpush1.bf16.msra.mxu1 %v6002_v25  ;;  %2122 = vmatprep.mubr.bf16.mxu1 %v6892_v24  ;;  %v5231_v25 = vcombine.low %v7392_v47, %v7153_v56  ;;  %v6020_v56 = vld [vmem:[%s8431_s1 + $0x130] ss:$8 sps:$4 sm:$0xff]  }
  0xd1   : > { %3596 = vmatpush1.bf16.msra.mxu0 %v5968_v33  ;;  %2153 = vmatprep.subr.bf16.mxu1 %v6010_v57  ;;  %v5980_v33 = vld [vmem:[%s8431_s1 + $0x8b0] ss:$8 sps:$4 sm:$0xff]   ;;  %v5986_v57 = vld [vmem:[%s8431_s1 + $0x8c0] ss:$8 sps:$4 sm:$0xff]  }
  0xd2   : > { %3597 = vmatprep.subr.bf16.mxu0 %v5976_v0  ;;  %v7381_v0 = vor.u32 %v718_v12, %v714_v49  ;;  %v6028_v12 = vld [vmem:[%s8431_s1 + $0x144] ss:$8 sps:$4 sm:$0xff]  }
  0xd4   : > { %3565 = vmatmul.mubr.bf16.gmra.mrb[36].mxu0 %v6818_v55  ;;  %2154 = vmatpush1.bf16.msra.mxu1 %v6008_v9  ;;  %v6014_v55 = vld [vmem:[%s8431_s1 + $0x120] ss:$8 sps:$4 sm:$0xff]   ;;  %v6000_v9 = vld [vmem:[%s8431_s1 + $0x8e4] ss:$8 sps:$4 sm:$0xff]  }
  0xd5   : > { %3598 = vmatpush1.bf16.msra.mxu0 %v5974_v45  ;;  %3574 = vmatprep.mubr.bf16.mxu0 %v5232_v17  ;;  %v5237_v45 = vcombine.low %v7381_v0, %v7381_v0  ;;  %v5994_v17 = vld [vmem:[%s8431_s1 + $0x8d4] ss:$8 sps:$4 sm:$0xff]  }
  0xd6   : > { %3599 = vmatprep.subr.bf16.mxu0 %v5982_v14  ;;  %2155 = vmatprep.subr.bf16.mxu1 %v6016_v28  ;;  %v5992_v14 = vld [vmem:[%s8431_s1 + $0x8d0] ss:$8 sps:$4 sm:$0xff]   ;;  %v6026_v28 = vld [vmem:[%s8431_s1 + $0x140] ss:$8 sps:$4 sm:$0xff]  }
  0xd7   : > { %2123 = vmatmul.mubr.bf16.gmra.mrb[24].mxu1 %v6899_v37 }
  0xd8   : > { %2156 = vmatpush1.bf16.msra.mxu1 %v6014_v55  ;;  %2132 = vmatprep.mubr.bf16.mxu1 %v6931_v7  ;;  %v739_v55 = vrot.slane %v653_v34, 2  ;;  %v6032_v34 = vld [vmem:[%s8431_s1 + $0x150] ss:$8 sps:$4 sm:$0xff]  }
  0xd9   : > { %3600 = vmatpush1.bf16.msra.mxu0 %v5980_v33  ;;  %2157 = vmatprep.subr.bf16.mxu1 %v6022_v48  ;;  %v4897_v33 = vcombine.low %v6809_v46, %v6809_v46  ;;  %v6034_v48 = vld [vmem:[%s8431_s1 + $0x154] ss:$8 sps:$4 sm:$0xff]  }
  0xda   : > { %3601 = vmatprep.subr.bf16.mxu0 %v5988_v20  ;;  %v738_v20 = vrot.slane %v651_v53, 1  ;;  %v6007_v53 = vld [vmem:[%s8431_s1 + $0x8f4] ss:$8 sps:$4 sm:$0xff]  }
  0xdc   : > { %3575 = vmatmul.mubr.bf16.gmra.mrb[40].mxu0 %v5231_v25  ;;  %2158 = vmatpush1.bf16.msra.mxu1 %v6020_v56  ;;  %v5236_v25 = vcombine.low %v7279_v61, %v7279_v61  ;;  %v6041_v61 = vld [vmem:[%s8431_s1 + $0x164] ss:$8 sps:$4 sm:$0xff]  }
  0xdd   : > { %3602 = vmatpush1.bf16.msra.mxu0 %v5986_v57  ;;  %3584 = vmatprep.mubr.bf16.mxu0 %v5237_v45  ;;  %v5998_v57 = vld [vmem:[%s8431_s1 + $0x8e0] ss:$8 sps:$4 sm:$0xff]   ;;  %v740_v45 = vor.u32 %v739_v55, %v738_v20  ;;  %v6013_v56 = vld [vmem:[%s8431_s1 + $0x904] ss:$8 sps:$4 sm:$0xff]   ;;  %v6019_v20 = vld [vmem:[%s8431_s1 + $0x914] ss:$8 sps:$4 sm:$0xff]  }
  0xde   : > { %3603 = vmatprep.subr.bf16.mxu0 %v5994_v17  ;;  %2159 = vmatprep.subr.bf16.mxu1 %v6028_v12  ;;  %v6005_v17 = vld [vmem:[%s8431_s1 + $0x8f0] ss:$8 sps:$4 sm:$0xff]   ;;  %v6055_v55 = vld [vmem:[%s8431_s1 + $0x184] ss:$8 sps:$4 sm:$0xff]  }
  0xdf   : > { %2133 = vmatmul.mubr.bf16.gmra.mrb[28].mxu1 %v6939_v27  ;;  %v7452_v12 = vld [vmem:[#allocation2 + $0x30] sm:$0xf] }
  0xe0   : > { %2160 = vmatpush1.bf16.msra.mxu1 %v6026_v28  ;;  %2142 = vmatprep.mubr.bf16.mxu1 %v4897_v33  ;;  %v4884_v28 = vcombine.low %v740_v45, %v6866_v5  ;;  %v6011_v33 = vld [vmem:[%s8431_s1 + $0x900] ss:$8 sps:$4 sm:$0xff]   ;;  %v6047_v5 = vld [vmem:[%s8431_s1 + $0x170] ss:$8 sps:$4 sm:$0xff]   ;;  %v6031_v45 = vld [vmem:[%s8431_s1 + $0x934] ss:$8 sps:$4 sm:$0xff]  }
  0xe1   : > { %3604 = vmatpush1.bf16.msra.mxu0 %v5992_v14  ;;  %2161 = vmatprep.subr.bf16.mxu1 %v6034_v48  ;;  %v4896_v14 = vcombine.low %v7452_v12, %v7452_v12  ;;  %v6017_v48 = vld [vmem:[%s8431_s1 + $0x910] ss:$8 sps:$4 sm:$0xff]  }
  0xe2   : > { %3605 = vmatprep.subr.bf16.mxu0 %v6000_v9  ;;  %v6039_v9 = vld [vmem:[%s8431_s1 + $0x160] ss:$8 sps:$4 sm:$0xff]  }
  0xe4   : > { %3585 = vmatmul.mubr.bf16.gmra.mrb[48].mxu0 %v5236_v25  ;;  %2162 = vmatpush1.bf16.msra.mxu1 %v6032_v34  ;;  %v6025_v25 = vld [vmem:[%s8431_s1 + $0x924] ss:$8 sps:$4 sm:$0xff]   ;;  %v6023_v34 = vld [vmem:[%s8431_s1 + $0x920] ss:$8 sps:$4 sm:$0xff]  }
  0xe5   : > { %3606 = vmatpush1.bf16.msra.mxu0 %v5998_v57  ;;  %3625 = vmatprep.mubr.bf16.mxu0 %v7064_v8  ;;  %v6049_v8 = vld [vmem:[%s8431_s1 + $0x174] ss:$8 sps:$4 sm:$0xff]   ;;  %v6053_v57 = vld [vmem:[%s8431_s1 + $0x180] ss:$8 sps:$4 sm:$0xff]  }
  0xe6   : > { %3607 = vmatprep.subr.bf16.mxu0 %v6007_v53  ;;  %2163 = vmatprep.subr.bf16.mxu1 %v6041_v61  ;;  %v6061_v53 = vld [vmem:[%s8431_s1 + $0x194] ss:$8 sps:$4 sm:$0xff]   ;;  %v6059_v61 = vld [vmem:[%s8431_s1 + $0x190] ss:$8 sps:$4 sm:$0xff]  }
  0xe7   : > { %2143 = vmatmul.mubr.bf16.gmra.mrb[32].mxu1 %v4896_v14  ;;  %v6037_v14 = vld [vmem:[%s8431_s1 + $0x944] ss:$8 sps:$4 sm:$0xff]  }
  0xe8   : > { %2164 = vmatpush1.bf16.msra.mxu1 %v6039_v9  ;;  %2183 = vmatprep.mubr.bf16.mxu1 %v4884_v28  ;;  %v6065_v9 = vld [vmem:[%s8431_s1 + $0x1a0] ss:$8 sps:$4 sm:$0xff]   ;;  %v6073_v28 = vld [vmem:[%s8431_s1 + $0x1b4] ss:$8 sps:$4 sm:$0xff]  }
  0xe9   : > { %3608 = vmatpush1.bf16.msra.mxu0 %v6005_v17  ;;  %2165 = vmatprep.subr.bf16.mxu1 %v6049_v8  ;;  %v6067_v17 = vld [vmem:[%s8431_s1 + $0x1a4] ss:$8 sps:$4 sm:$0xff]   ;;  %v6035_v8 = vld [vmem:[%s8431_s1 + $0x940] ss:$8 sps:$4 sm:$0xff]  }
  0xea   : > { %3609 = vmatprep.subr.bf16.mxu0 %v6013_v56  ;;  %v6029_v56 = vld [vmem:[%s8431_s1 + $0x930] ss:$8 sps:$4 sm:$0xff]  }
  0xec   : > { %2166 = vmatpush1.bf16.msra.mxu1 %v6047_v5  ;;  %v6079_v5 = vld [vmem:[%s8431_s1 + $0x1c4] ss:$8 sps:$4 sm:$0xff]  }
  0xed   : > { %3610 = vmatpush1.bf16.msra.mxu0 %v6011_v33  ;;  %2167 = vmatprep.subr.bf16.mxu1 %v6055_v55  ;;  %v6044_v33 = vld [vmem:[%s8431_s1 + $0x954] ss:$8 sps:$4 sm:$0xff]   ;;  %v6042_v55 = vld [vmem:[%s8431_s1 + $0x950] ss:$8 sps:$4 sm:$0xff]  }
  0xee   : > { %3611 = vmatprep.subr.bf16.mxu0 %v6019_v20  ;;  %v6071_v20 = vld [vmem:[%s8431_s1 + $0x1b0] ss:$8 sps:$4 sm:$0xff]  }
  0xf0   : > { %2168 = vmatpush1.bf16.msra.mxu1 %v6053_v57  ;;  %v6085_v57 = vld [vmem:[%s8431_s1 + $0x1d4] ss:$8 sps:$4 sm:$0xff]  }
  0xf1   : > { %3612 = vmatpush1.bf16.msra.mxu0 %v6017_v48  ;;  %2169 = vmatprep.subr.bf16.mxu1 %v6061_v53  ;;  %v6052_v48 = vld [vmem:[%s8431_s1 + $0x964] ss:$8 sps:$4 sm:$0xff]   ;;  %v6050_v53 = vld [vmem:[%s8431_s1 + $0x960] ss:$8 sps:$4 sm:$0xff]  }
  0xf2   : > { %3613 = vmatprep.subr.bf16.mxu0 %v6025_v25  ;;  %v6077_v25 = vld [vmem:[%s8431_s1 + $0x1c0] ss:$8 sps:$4 sm:$0xff]  }
  0xf4   : > { %2170 = vmatpush1.bf16.msra.mxu1 %v6059_v61  ;;  %v6091_v61 = vld [vmem:[%s8431_s1 + $0x1e4] ss:$8 sps:$4 sm:$0xff]  }
  0xf5   : > { %3614 = vmatpush1.bf16.msra.mxu0 %v6023_v34  ;;  %2171 = vmatprep.subr.bf16.mxu1 %v6067_v17  ;;  %v6058_v34 = vld [vmem:[%s8431_s1 + $0x974] ss:$8 sps:$4 sm:$0xff]   ;;  %v6056_v17 = vld [vmem:[%s8431_s1 + $0x970] ss:$8 sps:$4 sm:$0xff]  }
  0xf6   : > { %3615 = vmatprep.subr.bf16.mxu0 %v6031_v45  ;;  %v6083_v45 = vld [vmem:[%s8431_s1 + $0x1d0] ss:$8 sps:$4 sm:$0xff]  }
  0xf8   : > { %2172 = vmatpush1.bf16.msra.mxu1 %v6065_v9  ;;  %v6097_v9 = vld [vmem:[%s8431_s1 + $0x1f4] ss:$8 sps:$4 sm:$0xff]  }
  0xf9   : > { %3616 = vmatpush1.bf16.msra.mxu0 %v6029_v56  ;;  %2173 = vmatprep.subr.bf16.mxu1 %v6073_v28  ;;  %v6064_v56 = vld [vmem:[%s8431_s1 + $0x984] ss:$8 sps:$4 sm:$0xff]   ;;  %v6062_v28 = vld [vmem:[%s8431_s1 + $0x980] ss:$8 sps:$4 sm:$0xff]  }
  0xfa   : > { %3617 = vmatprep.subr.bf16.mxu0 %v6037_v14  ;;  %v6089_v14 = vld [vmem:[%s8431_s1 + $0x1e0] ss:$8 sps:$4 sm:$0xff]  }
  0xfc   : > { %2174 = vmatpush1.bf16.msra.mxu1 %v6071_v20  ;;  %v6070_v20 = vld [vmem:[%s8431_s1 + $0x994] ss:$8 sps:$4 sm:$0xff]  }
  0xfd   : > { %3618 = vmatpush1.bf16.msra.mxu0 %v6035_v8  ;;  %2175 = vmatprep.subr.bf16.mxu1 %v6079_v5  ;;  %v762_v8 = vrot.slane %v707_v1, 1  ;;  %v727_v5 = vrot.slane %v6827_v58, 1  ;;  %v6103_v1 = vld [vmem:[%s8431_s1 + $0x504] ss:$8 sps:$4 sm:$0xff]  }
  0xfe   : > { %3619 = vmatprep.subr.bf16.mxu0 %v6044_v33  ;;  %v763_v33 = vrot.slane %v709_v31, 2  ;;  %v6068_v31 = vld [vmem:[%s8431_s1 + $0x990] ss:$8 sps:$4 sm:$0xff]  }
 0x100   : > { %2176 = vmatpush1.bf16.msra.mxu1 %v6077_v25  ;;  %v7581_v58 = vor.u32 %v763_v33, %v762_v8  ;;  %v6101_v25 = vld [vmem:[%s8431_s1 + $0x500] ss:$8 sps:$4 sm:$0xff]  }
 0x101   : > { %3620 = vmatpush1.bf16.msra.mxu0 %v6042_v55  ;;  %2177 = vmatprep.subr.bf16.mxu1 %v6085_v57  ;;  %v6095_v55 = vld [vmem:[%s8431_s1 + $0x1f0] ss:$8 sps:$4 sm:$0xff]   ;;  %v7593_v57 = vcombine.low %v6868_v41, %v7036_v38  ;;  %v766_v41 = vrot.slane %v716_v19, 2  ;;  %v6082_v38 = vld [vmem:[%s8431_s1 + $0x9b4] ss:$8 sps:$4 sm:$0xff]  }
 0x102   : > { %3621 = vmatprep.subr.bf16.mxu0 %v6052_v48  ;;  %v6076_v48 = vld [vmem:[%s8431_s1 + $0x9a4] ss:$8 sps:$4 sm:$0xff]  }
 0x103   : > { %v6115_v19 = vld [vmem:[%s8431_s1 + $0x524] ss:$8 sps:$4 sm:$0xff]  }
 0x104   : > { %2178 = vmatpush1.bf16.msra.mxu1 %v6083_v45  ;;  %v6080_v45 = vld [vmem:[%s8431_s1 + $0x9b0] ss:$8 sps:$4 sm:$0xff]  }
 0x105   : > { %3622 = vmatpush1.bf16.msra.mxu0 %v6050_v53  ;;  %2179 = vmatprep.subr.bf16.mxu1 %v6091_v61  ;;  %v765_v53 = vrot.slane %v714_v49, 1  ;;  %v7616_v49 = vrot.slane %v7175_v40, 1 }
 0x106   : > { %3623 = vmatprep.subr.bf16.mxu0 %v6058_v34  ;;  %v6107_v34 = vld [vmem:[%s8431_s1 + $0x510] ss:$8 sps:$4 sm:$0xff]  }
 0x107   : > { %v5233_v8 = vcombine.low %v7185_v35, %v7616_v49 }
 0x108   : > { %2180 = vmatpush1.bf16.msra.mxu1 %v6089_v14 }
 0x109   : > { %3624 = vmatpush1.bf16.msra.mxu0 %v6056_v17  ;;  %2181 = vmatprep.subr.bf16.mxu1 %v6097_v9  ;;  %v7626_v17 = vor.u32 %v766_v41, %v765_v53  ;;  %v6113_v9 = vld [vmem:[%s8431_s1 + $0x520] ss:$8 sps:$4 sm:$0xff]   ;;  %v6112_v41 = vld [vmem:[%s8431_s1 + $0xa04] ss:$8 sps:$4 sm:$0xff]  }
 0x10a   : > { %3664 = vmatprep.subr.bf16.mxu0 %v6064_v56  ;;  %v7637_v56 = vcombine.low %v729_v36, %v730_v42  ;;  %v6119_v42 = vld [vmem:[%s8431_s1 + $0x530] ss:$8 sps:$4 sm:$0xff]  }
 0x10b   : > { %v5239_v36 = vcombine.low %v7626_v17, %v7626_v17 }
 0x10c   : > { %3626 = vmatmul.mubr.bf16.vlgmr.msra.gmra.mrb[32].mxu0 %v7105_v13  ;;  %v4883_v13 = vcombine.low %v727_v5, %v728_v29  ;;  %2182 = vmatpush1.bf16.msra.mxu1 %v6095_v55  ;;  %v5234_v29 = vcombine.low %v7142_v22, %v7581_v58  ;;  %v6092_v5 = vld [vmem:[%s8431_s1 + $0x9d0] ss:$8 sps:$4 sm:$0xff]   ;;  %v6100_v55 = vld [vmem:[%s8431_s1 + $0x9e4] ss:$8 sps:$4 sm:$0xff]  }
 0x10d   : > { %3665 = vmatpush1.bf16.msra.mxu0 %v6062_v28  ;;  %3635 = vmatprep.mubr.bf16.mxu0 %v7112_v43  ;;  %v6109_v43 = vld [vmem:[%s8431_s1 + $0x514] ss:$8 sps:$4 sm:$0xff]   ;;  %v7646_v28 = vcombine.low %v7038_v63, %v7089_v11  ;;  %v7669_v11 = vrot.slane %v7291_v62, 1  ;;  %v7684_v62 = vcombine.low %v731_v23, %v732_v26 }
 0x10e   : > { %3666 = vmatprep.subr.bf16.mxu0 %v6070_v20  ;;  %2794 = vmatprep.subr.bf16.mxu1 %v6103_v1  ;;  %v6094_v63 = vld [vmem:[%s8431_s1 + $0x9d4] ss:$8 sps:$4 sm:$0xff]   ;;  %v6127_v20 = vld [vmem:[%s8431_s1 + $0x544] ss:$8 sps:$4 sm:$0xff]   ;;  %v6125_v1 = vld [vmem:[%s8431_s1 + $0x540] ss:$8 sps:$4 sm:$0xff]  }
 0x10f   : > { %2184 = vmatmul.mubr.bf16.vlgmr.msra.gmra.mrb[20].mxu1 %v4883_v13  ;;  %v6106_v23 = vld [vmem:[%s8431_s1 + $0x9f4] ss:$8 sps:$4 sm:$0xff]   ;;  %v6131_v13 = vld [vmem:[%s8431_s1 + $0x550] ss:$8 sps:$4 sm:$0xff]  }
 0x110   : > { %2795 = vmatpush1.bf16.msra.mxu1 %v6101_v25  ;;  %2193 = vmatprep.mubr.bf16.mxu1 %v7593_v57 }
 0x111   : > { %3667 = vmatpush1.bf16.msra.mxu0 %v6068_v31  ;;  %2796 = vmatprep.subr.bf16.mxu1 %v6109_v43  ;;  %v4899_v31 = vcombine.low %v7091_v16, %v7091_v16 }
 0x112   : > { %3668 = vmatprep.subr.bf16.mxu0 %v6076_v48  ;;  %v5238_v48 = vcombine.low %v7669_v11, %v7669_v11 }
 0x114   : > { %3636 = vmatmul.mubr.bf16.gmra.mrb[36].mxu0 %v7161_v10  ;;  %v6088_v10 = vld [vmem:[%s8431_s1 + $0x9c4] ss:$8 sps:$4 sm:$0xff]   ;;  %2797 = vmatpush1.bf16.msra.mxu1 %v6107_v34  ;;  %v6137_v34 = vld [vmem:[%s8431_s1 + $0x560] ss:$8 sps:$4 sm:$0xff]  }
 0x115   : > { %3669 = vmatpush1.bf16.msra.mxu0 %v6074_v15  ;;  %3645 = vmatprep.mubr.bf16.mxu0 %v5234_v29  ;;  %v7624_v61 = vpop.f32.mrb[0].mxu0  ;;  %v6139_v15 = vld [vmem:[%s8431_s1 + $0x564] ss:$8 sps:$4 sm:$0xff]   ;;  %v6104_v29 = vld [vmem:[%s8431_s1 + $0x9f0] ss:$8 sps:$4 sm:$0xff]  }
 0x116   : > { %3670 = vmatprep.subr.bf16.mxu0 %v6082_v38  ;;  %v7631_v40 = vpop.f32.mrb[1].mxu0  ;;  %2798 = vmatprep.subr.bf16.mxu1 %v6115_v19  ;;  %v4898_v38 = vcombine.low %v7136_v44, %v7136_v44  ;;  %v6145_v19 = vld [vmem:[%s8431_s1 + $0x574] ss:$8 sps:$4 sm:$0xff]  }
 0x117   : > { %v7639_v14 = vpop.f32.mrb[2].mxu0  ;;  %2194 = vmatmul.mubr.bf16.gmra.mrb[24].mxu1 %v7637_v56 }
 0x118   : > { %v7650_v33 = vpop.f32.mrb[3].mxu0  ;;  %2799 = vmatpush1.bf16.msra.mxu1 %v6113_v9  ;;  %2203 = vmatprep.mubr.bf16.mxu1 %v7646_v28  ;;  %v6143_v9 = vld [vmem:[%s8431_s1 + $0x570] ss:$8 sps:$4 sm:$0xff]  }
 0x119   : > { %3671 = vmatpush1.bf16.msra.mxu0 %v6080_v45  ;;  %2800 = vmatprep.subr.bf16.mxu1 %v6121_v51  ;;  %v6110_v45 = vld [vmem:[%s8431_s1 + $0xa00] ss:$8 sps:$4 sm:$0xff]   ;;  %v6116_v51 = vld [vmem:[%s8431_s1 + $0xa10] ss:$8 sps:$4 sm:$0xff]  }
 0x11a   : > { %3672 = vmatprep.subr.bf16.mxu0 %v6088_v10  ;;  %v6118_v10 = vld [vmem:[%s8431_s1 + $0xa14] ss:$8 sps:$4 sm:$0xff]  }
 0x11c   : > { %3646 = vmatmul.mubr.bf16.gmra.mrb[40].mxu0 %v5233_v8  ;;  %2801 = vmatpush1.bf16.msra.mxu1 %v6119_v42  ;;  %v6151_v8 = vld [vmem:[%s8431_s1 + $0x584] ss:$8 sps:$4 sm:$0xff]  }
 0x11d   : > { %3673 = vmatpush1.bf16.msra.mxu0 %v6086_v52  ;;  %3655 = vmatprep.mubr.bf16.mxu0 %v5239_v36  ;;  %v6124_v52 = vld [vmem:[%s8431_s1 + $0xa24] ss:$8 sps:$4 sm:$0xff]  }
 0x11e   : > { %3674 = vmatprep.subr.bf16.mxu0 %v6094_v63  ;;  %2802 = vmatprep.subr.bf16.mxu1 %v6127_v20  ;;  %v6157_v63 = vld [vmem:[%s8431_s1 + $0x594] ss:$8 sps:$4 sm:$0xff]   ;;  %v6122_v20 = vld [vmem:[%s8431_s1 + $0xa20] ss:$8 sps:$4 sm:$0xff]  }
 0x11f   : > { %2204 = vmatmul.mubr.bf16.gmra.mrb[28].mxu1 %v7684_v62 }
 0x120   : > { %2803 = vmatpush1.bf16.msra.mxu1 %v6125_v1  ;;  %2213 = vmatprep.mubr.bf16.mxu1 %v4899_v31  ;;  %v6155_v1 = vld [vmem:[%s8431_s1 + $0x590] ss:$8 sps:$4 sm:$0xff]   ;;  %v6163_v31 = vld [vmem:[%s8431_s1 + $0x5a4] ss:$8 sps:$4 sm:$0xff]  }
 0x121   : > { %3675 = vmatpush1.bf16.msra.mxu0 %v6092_v5  ;;  %2804 = vmatprep.subr.bf16.mxu1 %v6133_v54  ;;  %v6136_v54 = vld [vmem:[%s8431_s1 + $0xa44] ss:$8 sps:$4 sm:$0xff]  }
 0x122   : > { %3676 = vmatprep.subr.bf16.mxu0 %v6100_v55  ;;  %v6130_v55 = vld [vmem:[%s8431_s1 + $0xa34] ss:$8 sps:$4 sm:$0xff]  }
 0x124   : > { %v7702_v26 = vpop.f32.mrb[4].mxu0  ;;  %3656 = vmatmul.mubr.bf16.gmra.mrb[52].mxu0 %v5238_v48  ;;  %2805 = vmatpush1.bf16.msra.mxu1 %v6131_v13  ;;  %v6128_v48 = vld [vmem:[%s8431_s1 + $0xa30] ss:$8 sps:$4 sm:$0xff]   ;;  %v5235_v13 = vcombine.low %v6830_v60, %v7188_v21 }
 0x125   : > { %v7708_v25 = vpop.f32.mrb[5].mxu0  ;;  %3677 = vmatpush1.bf16.msra.mxu0 %v6098_v6  ;;  %3696 = vmatprep.mubr.bf16.mxu0 %v8435_v2  ;;  %v6167_v60 = vld [vmem:[%s8431_s1 + $0x5b0] ss:$8 sps:$4 sm:$0xff]  }
 0x126   : > { %v7710_v43 = vpop.f32.mrb[6].mxu0  ;;  %3678 = vmatprep.subr.bf16.mxu0 %v6106_v23  ;;  %2806 = vmatprep.subr.bf16.mxu1 %v6139_v15  ;;  %v6169_v15 = vld [vmem:[%s8431_s1 + $0x5b4] ss:$8 sps:$4 sm:$0xff]  }
 0x127   : > { %v7718_v53 = vpop.f32.mrb[7].mxu0  ;;  %2214 = vmatmul.mubr.bf16.gmra.mrb[36].mxu1 %v4898_v38 }
 0x128   : > { %2807 = vmatpush1.bf16.msra.mxu1 %v6137_v34  ;;  %2826 = vmatprep.mubr.bf16.mxu1 %v6892_v24  ;;  %v6142_v34 = vld [vmem:[%s8431_s1 + $0xa54] ss:$8 sps:$4 sm:$0xff]  }
 0x129   : > { %3679 = vmatpush1.bf16.msra.mxu0 %v6104_v29  ;;  %2808 = vmatprep.subr.bf16.mxu1 %v6145_v19  ;;  %v6175_v19 = vld [vmem:[%s8431_s1 + $0x5c4] ss:$8 sps:$4 sm:$0xff]  }
 0x12a   : > { %4250 = vmatprep.subr.bf16.mxu0 %v6112_v41  ;;  %v6134_v41 = vld [vmem:[%s8431_s1 + $0xa40] ss:$8 sps:$4 sm:$0xff]  }
 0x12c   : > { %3697 = vmatmul.mubr.bf16.vlgmr.msra.gmra.mrb[32].mxu0 %v6686_v30  ;;  %2809 = vmatpush1.bf16.msra.mxu1 %v6143_v9  ;;  %v6149_v30 = vld [vmem:[%s8431_s1 + $0x580] ss:$8 sps:$4 sm:$0xff]  }
 0x12d   : > { %4251 = vmatpush1.bf16.msra.mxu0 %v6110_v45  ;;  %3706 = vmatprep.mubr.bf16.mxu0 %v8435_v2  ;;  %v6140_v45 = vld [vmem:[%s8431_s1 + $0xa50] ss:$8 sps:$4 sm:$0xff]  }
 0x12e   : > { %4252 = vmatprep.subr.bf16.mxu0 %v6118_v10  ;;  %2810 = vmatprep.subr.bf16.mxu1 %v6151_v8  ;;  %v6148_v10 = vld [vmem:[%s8431_s1 + $0xa64] ss:$8 sps:$4 sm:$0xff]   ;;  %v6173_v8 = vld [vmem:[%s8431_s1 + $0x5c0] ss:$8 sps:$4 sm:$0xff]  }
 0x12f   : > { %v7753_v24 = vpop.f32.mrb[8].mxu0 }
 0x130   : > { %v7758_v36 = vpop.f32.mrb[9].mxu0  ;;  %2811 = vmatpush1.bf16.msra.mxu1 %v6149_v30  ;;  %v6181_v30 = vld [vmem:[%s8431_s1 + $0x5d4] ss:$8 sps:$4 sm:$0xff]  }
 0x131   : > { %4253 = vmatpush1.bf16.msra.mxu0 %v6116_v51  ;;  %v7763_v42 = vpop.f32.mrb[10].mxu0  ;;  %2812 = vmatprep.subr.bf16.mxu1 %v6157_v63 }
 0x132   : > { %v7768_v5 = vpop.f32.mrb[11].mxu0  ;;  %4254 = vmatprep.subr.bf16.mxu0 %v6124_v52  ;;  %v5240_v52 = vcombine.low %v7300_v59, %v7300_v59 }
 0x134   : > { %3707 = vmatmul.mubr.bf16.gmra.mrb[36].mxu0 %v6782_v32  ;;  %2813 = vmatpush1.bf16.msra.mxu1 %v6155_v1  ;;  %v6161_v32 = vld [vmem:[%s8431_s1 + $0x5a0] ss:$8 sps:$4 sm:$0xff]  }
 0x135   : > { %4255 = vmatpush1.bf16.msra.mxu0 %v6122_v20  ;;  %3716 = vmatprep.mubr.bf16.mxu0 %v8435_v2  ;;  %v6146_v20 = vld [vmem:[%s8431_s1 + $0xa60] ss:$8 sps:$4 sm:$0xff]  }
 0x136   : > { %4256 = vmatprep.subr.bf16.mxu0 %v6130_v55  ;;  %2814 = vmatprep.subr.bf16.mxu1 %v6163_v31  ;;  %v6154_v31 = vld [vmem:[%s8431_s1 + $0xa74] ss:$8 sps:$4 sm:$0xff]  }
 0x137   : > { %v7787_v6 = vpop.f32.mrb[12].mxu0 }
 0x138   : > { %v7792_v23 = vpop.f32.mrb[13].mxu0  ;;  %2815 = vmatpush1.bf16.msra.mxu1 %v6161_v32 }
 0x139   : > { %4257 = vmatpush1.bf16.msra.mxu0 %v6128_v48  ;;  %v1637_v29 = vpop.f32.mrb[14].mxu0  ;;  %2816 = vmatprep.subr.bf16.mxu1 %v6169_v15 }
 0x13a   : > { %v1638_v38 = vpop.f32.mrb[15].mxu0  ;;  %4258 = vmatprep.subr.bf16.mxu0 %v6136_v54  ;;  %v6179_v54 = vld [vmem:[%s8431_s1 + $0x5d0] ss:$8 sps:$4 sm:$0xff]  }
 0x13b   : > { %v6152_v29 = vld [vmem:[%s8431_s1 + $0xa70] ss:$8 sps:$4 sm:$0xff]  }
 0x13c   : > { %3717 = vmatmul.mubr.bf16.gmra.mrb[40].mxu0 %v5235_v13  ;;  %2817 = vmatpush1.bf16.msra.mxu1 %v6167_v60  ;;  %v7835_v55 = vpop.f32.mrb[12].mxu1  ;;  %v6187_v13 = vld [vmem:[%s8431_s1 + $0x5e4] ss:$8 sps:$4 sm:$0xff]  }
 0x13d   : > { %4259 = vmatpush1.bf16.msra.mxu0 %v6134_v41  ;;  %3726 = vmatprep.mubr.bf16.mxu0 %v8435_v2  ;;  %v7842_v48 = vpop.f32.mrb[13].mxu1  ;;  %v6160_v41 = vld [vmem:[%s8431_s1 + $0xa84] ss:$8 sps:$4 sm:$0xff]  }
 0x13e   : > { %4260 = vmatprep.subr.bf16.mxu0 %v6142_v34  ;;  %2818 = vmatprep.subr.bf16.mxu1 %v6175_v19  ;;  %v1495_v32 = vpop.f32.mrb[14].mxu1  ;;  %v6185_v34 = vld [vmem:[%s8431_s1 + $0x5e0] ss:$8 sps:$4 sm:$0xff]   ;;  %v6193_v19 = vld [vmem:[%s8431_s1 + $0x5f4] ss:$8 sps:$4 sm:$0xff]  }
 0x13f   : > { %v7818_v9 = vpop.f32.mrb[16].mxu0  ;;  %v1496_v15 = vpop.f32.mrb[15].mxu1 }
 0x140   : > { %v7823_v51 = vpop.f32.mrb[17].mxu0  ;;  %2819 = vmatpush1.bf16.msra.mxu1 %v6173_v8 }
 0x141   : > { %4261 = vmatpush1.bf16.msra.mxu0 %v6140_v45  ;;  %v7830_v63 = vpop.f32.mrb[18].mxu0  ;;  %2820 = vmatprep.subr.bf16.mxu1 %v6181_v30  ;;  %v6191_v30 = vld [vmem:[%s8431_s1 + $0x5f0] ss:$8 sps:$4 sm:$0xff]  }
 0x142   : > { %v7837_v1 = vpop.f32.mrb[19].mxu0  ;;  %4262 = vmatprep.subr.bf16.mxu0 %v6148_v10  ;;  %v6158_v10 = vld [vmem:[%s8431_s1 + $0xa80] ss:$8 sps:$4 sm:$0xff]  }
 0x144   : > { %3727 = vmatmul.mubr.bf16.gmra.mrb[56].mxu0 %v5240_v52  ;;  %2821 = vmatpush1.bf16.msra.mxu1 %v6179_v54  ;;  %v6166_v52 = vld [vmem:[%s8431_s1 + $0xa94] ss:$8 sps:$4 sm:$0xff]   ;;  %v6172_v54 = vld [vmem:[%s8431_s1 + $0xaa4] ss:$8 sps:$4 sm:$0xff]  }
 0x145   : > { %4263 = vmatpush1.bf16.msra.mxu0 %v6146_v20  ;;  %4282 = vmatprep.mubr.bf16.mxu0 %v6931_v7  ;;  %v6199_v20 = vld [vmem:[%s8431_s1 + $0x604] ss:$8 sps:$4 sm:$0xff]  }
 0x146   : > { %4264 = vmatprep.subr.bf16.mxu0 %v6154_v31  ;;  %2822 = vmatprep.subr.bf16.mxu1 %v6187_v13  ;;  %v6164_v31 = vld [vmem:[%s8431_s1 + $0xa90] ss:$8 sps:$4 sm:$0xff]   ;;  %v6197_v13 = vld [vmem:[%s8431_s1 + $0x600] ss:$8 sps:$4 sm:$0xff]  }
 0x147   : > { %v7857_v38 = vpop.f32.mrb[20].mxu0 }
 0x148   : > { %v7862_v60 = vpop.f32.mrb[21].mxu0  ;;  %2823 = vmatpush1.bf16.msra.mxu1 %v6185_v34  ;;  %v6170_v34 = vld [vmem:[%s8431_s1 + $0xaa0] ss:$8 sps:$4 sm:$0xff]  }
 0x149   : > { %4265 = vmatpush1.bf16.msra.mxu0 %v6152_v29  ;;  %v7867_v45 = vpop.f32.mrb[22].mxu0  ;;  %2824 = vmatprep.subr.bf16.mxu1 %v6193_v19  ;;  %v6205_v29 = vld [vmem:[%s8431_s1 + $0x614] ss:$8 sps:$4 sm:$0xff]  }
 0x14a   : > { %v7872_v8 = vpop.f32.mrb[23].mxu0  ;;  %4266 = vmatprep.subr.bf16.mxu0 %v6160_v41 }
 0x14c   : > { %2825 = vmatpush1.bf16.msra.mxu1 %v6191_v30  ;;  %v6211_v30 = vld [vmem:[%s8431_s1 + $0x624] ss:$8 sps:$4 sm:$0xff]  }
 0x14d   : > { %4267 = vmatpush1.bf16.msra.mxu0 %v6158_v10  ;;  %2865 = vmatprep.subr.bf16.mxu1 %v6199_v20  ;;  %v6178_v10 = vld [vmem:[%s8431_s1 + $0xab4] ss:$8 sps:$4 sm:$0xff]   ;;  %v6176_v20 = vld [vmem:[%s8431_s1 + $0xab0] ss:$8 sps:$4 sm:$0xff]  }
 0x14e   : > { %4268 = vmatprep.subr.bf16.mxu0 %v6166_v52  ;;  %v6203_v52 = vld [vmem:[%s8431_s1 + $0x610] ss:$8 sps:$4 sm:$0xff]  }
 0x14f   : > { %v7889_v32 = vpop.f32.mrb[24].mxu0  ;;  %2827 = vmatmul.mubr.bf16.vlgmr.msra.gmra.mrb[40].mxu1 %v6899_v37  ;;  %v6184_v37 = vld [vmem:[%s8431_s1 + $0xac4] ss:$8 sps:$4 sm:$0xff]  }
 0x150   : > { %v7894_v15 = vpop.f32.mrb[25].mxu0  ;;  %2866 = vmatpush1.bf16.msra.mxu1 %v6197_v13  ;;  %2836 = vmatprep.mubr.bf16.mxu1 %v6931_v7  ;;  %v6209_v7 = vld [vmem:[%s8431_s1 + $0x620] ss:$8 sps:$4 sm:$0xff]   ;;  %v6217_v13 = vld [vmem:[%s8431_s1 + $0x634] ss:$8 sps:$4 sm:$0xff]  }
 0x151   : > { %4269 = vmatpush1.bf16.msra.mxu0 %v6164_v31  ;;  %v7899_v41 = vpop.f32.mrb[26].mxu0  ;;  %2867 = vmatprep.subr.bf16.mxu1 %v6205_v29 }
 0x152   : > { %v7904_v19 = vpop.f32.mrb[27].mxu0  ;;  %4270 = vmatprep.subr.bf16.mxu0 %v6172_v54 }
 0x154   : > { %2868 = vmatpush1.bf16.msra.mxu1 %v6203_v52 }
 0x155   : > { %4271 = vmatpush1.bf16.msra.mxu0 %v6170_v34  ;;  %2869 = vmatprep.subr.bf16.mxu1 %v6211_v30  ;;  %v6182_v34 = vld [vmem:[%s8431_s1 + $0xac0] ss:$8 sps:$4 sm:$0xff]   ;;  %v6190_v30 = vld [vmem:[%s8431_s1 + $0xad4] ss:$8 sps:$4 sm:$0xff]  }
 0x156   : > { %4272 = vmatprep.subr.bf16.mxu0 %v6178_v10  ;;  %v7938_v10 = vcombine.low %v6809_v46, %v6861_v18  ;;  %v6223_v46 = vld [vmem:[%s8431_s1 + $0x644] ss:$8 sps:$4 sm:$0xff]   ;;  %v6188_v18 = vld [vmem:[%s8431_s1 + $0xad0] ss:$8 sps:$4 sm:$0xff]  }
 0x157   : > { %v7923_v31 = vpop.f32.mrb[28].mxu0  ;;  %2837 = vmatmul.mubr.bf16.gmra.mrb[44].mxu1 %v6939_v27 }
 0x158   : > { %8441 = vst [vmem:[#allocation3_spill] sm:$0xff] %v7923_v31  ;;  %v7928_v54 = vpop.f32.mrb[29].mxu0  ;;  %2870 = vmatpush1.bf16.msra.mxu1 %v6209_v7  ;;  %2846 = vmatprep.mubr.bf16.mxu1 %v7938_v10  ;;  %v6221_v7 = vld [vmem:[%s8431_s1 + $0x640] ss:$8 sps:$4 sm:$0xff]   ;;  %v6241_v31 = vld [vmem:[%s8431_s1 + $0x674] ss:$8 sps:$4 sm:$0xff]  }
 0x159   : > { %8442 = vst [vmem:[#allocation4_spill] sm:$0xff] %v7928_v54  ;;  %4273 = vmatpush1.bf16.msra.mxu0 %v6176_v20  ;;  %v2290_v29 = vpop.f32.mrb[30].mxu0  ;;  %v6215_v20 = vld [vmem:[%s8431_s1 + $0x630] ss:$8 sps:$4 sm:$0xff]   ;;  %2871 = vmatprep.subr.bf16.mxu1 %v6217_v13  ;;  %v5067_v13 = vcombine.low %v7345_v39, %v7345_v39 }
 0x15a   : > { %v2291_v52 = vpop.f32.mrb[31].mxu0  ;;  %4274 = vmatprep.subr.bf16.mxu0 %v6184_v37  ;;  %v6196_v37 = vld [vmem:[%s8431_s1 + $0xae4] ss:$8 sps:$4 sm:$0xff]   ;;  %v6229_v29 = vld [vmem:[%s8431_s1 + $0x654] ss:$8 sps:$4 sm:$0xff]  }
 0x15b   : > { %v6194_v52 = vld [vmem:[%s8431_s1 + $0xae0] ss:$8 sps:$4 sm:$0xff]  }
 0x15c   : > { %2872 = vmatpush1.bf16.msra.mxu1 %v6215_v20  ;;  %v6227_v20 = vld [vmem:[%s8431_s1 + $0x650] ss:$8 sps:$4 sm:$0xff]  }
 0x15d   : > { %4275 = vmatpush1.bf16.msra.mxu0 %v6182_v34  ;;  %2873 = vmatprep.subr.bf16.mxu1 %v6223_v46  ;;  %v7967_v34 = vcombine.low %v7452_v12, %v7392_v47  ;;  %v6235_v47 = vld [vmem:[%s8431_s1 + $0x664] ss:$8 sps:$4 sm:$0xff]   ;;  %v6200_v12 = vld [vmem:[%s8431_s1 + $0xaf0] ss:$8 sps:$4 sm:$0xff]  }
 0x15e   : > { %4276 = vmatprep.subr.bf16.mxu0 %v6190_v30  ;;  %v6202_v30 = vld [vmem:[%s8431_s1 + $0xaf4] ss:$8 sps:$4 sm:$0xff]   ;;  %v6208_v46 = vld [vmem:[%s8431_s1 + $0xb04] ss:$8 sps:$4 sm:$0xff]  }
 0x15f   : > { %2847 = vmatmul.mubr.bf16.gmra.mrb[48].mxu1 %v7967_v34 }
 0x160   : > { %2874 = vmatpush1.bf16.msra.mxu1 %v6221_v7  ;;  %2856 = vmatprep.mubr.bf16.mxu1 %v5067_v13  ;;  %v7991_v13 = vld [vmem:[#allocation2 + $0x40] sm:$0xf] }
 0x161   : > { %4277 = vmatpush1.bf16.msra.mxu0 %v6188_v18  ;;  %2875 = vmatprep.subr.bf16.mxu1 %v6229_v29  ;;  %v1532_v18 = vpop.f32.mrb[0].mxu1  ;;  %v5066_v29 = vcombine.low %v7991_v13, %v7991_v13 }
 0x162   : > { %4278 = vmatprep.subr.bf16.mxu0 %v6196_v37  ;;  %v7989_v37 = vadd.f32 %v7624_v61, %v1532_v18  ;;  %v1534_v7 = vpop.f32.mrb[1].mxu1 }
 0x163   : > { %v7998_v2 = vadd.f32 %v7631_v40, %v1534_v7  ;;  %v1536_v54 = vpop.f32.mrb[2].mxu1  ;;  %v6206_v40 = vld [vmem:[%s8431_s1 + $0xb00] ss:$8 sps:$4 sm:$0xff]  }
 0x164   : > { %2876 = vmatpush1.bf16.msra.mxu1 %v6227_v20  ;;  %v8004_v61 = vadd.f32 %v7639_v14, %v1536_v54  ;;  %v1538_v18 = vpop.f32.mrb[3].mxu1  ;;  %v6214_v14 = vld [vmem:[%s8431_s1 + $0xb14] ss:$8 sps:$4 sm:$0xff]   ;;  %v6239_v54 = vld [vmem:[%s8431_s1 + $0x670] ss:$8 sps:$4 sm:$0xff]  }
 0x165   : > { %4279 = vmatpush1.bf16.msra.mxu0 %v6194_v52  ;;  %v7995_v52 = vld [vmem:[#allocation2 + $0x50] sm:$0xf]  ;;  %2877 = vmatprep.subr.bf16.mxu1 %v6235_v47  ;;  %v8013_v20 = vadd.f32 %v7650_v33, %v1538_v18 }
 0x166   : > { %4280 = vmatprep.subr.bf16.mxu0 %v6202_v30  ;;  %v6233_v30 = vld [vmem:[%s8431_s1 + $0x660] ss:$8 sps:$4 sm:$0xff]   ;;  %v8016_v7 = vcombine.low %v7995_v52, %v594_v3  ;;  %v6247_v3 = vld [vmem:[%s8431_s1 + $0x684] ss:$8 sps:$4 sm:$0xff]   ;;  %v6212_v33 = vld [vmem:[%s8431_s1 + $0xb10] ss:$8 sps:$4 sm:$0xff]  }
 0x167   : > { %2857 = vmatmul.mubr.bf16.gmra.mrb[52].mxu1 %v5066_v29 }
 0x168   : > { %2878 = vmatpush1.bf16.msra.mxu1 %v6233_v30  ;;  %2897 = vmatprep.mubr.bf16.mxu1 %v7593_v57 }
 0x169   : > { %4281 = vmatpush1.bf16.msra.mxu0 %v6200_v12  ;;  %2879 = vmatprep.subr.bf16.mxu1 %v6241_v31  ;;  %v1542_v47 = vpop.f32.mrb[4].mxu1  ;;  %v723_v12 = vshll.u32 %v8016_v7, 16 }
 0x16a   : > { %4321 = vmatprep.subr.bf16.mxu0 %v6208_v46  ;;  %v8038_v57 = vadd.f32 %v7702_v26, %v1542_v47  ;;  %v1544_v31 = vpop.f32.mrb[5].mxu1  ;;  %v6253_v26 = vld [vmem:[%s8431_s1 + $0x694] ss:$8 sps:$4 sm:$0xff]  }
 0x16b   : > { %v8041_v46 = vadd.f32 %v7708_v25, %v1544_v31  ;;  %v1546_v29 = vpop.f32.mrb[6].mxu1  ;;  %v6218_v25 = vld [vmem:[%s8431_s1 + $0xb20] ss:$8 sps:$4 sm:$0xff]  }
 0x16c   : > { %4283 = vmatmul.mubr.bf16.vlgmr.msra.gmra.mrb[32].mxu0 %v6939_v27  ;;  %v6220_v27 = vld [vmem:[%s8431_s1 + $0xb24] ss:$8 sps:$4 sm:$0xff]   ;;  %2880 = vmatpush1.bf16.msra.mxu1 %v6239_v54  ;;  %v8047_v30 = vadd.f32 %v7710_v43, %v1546_v29  ;;  %v1548_v18 = vpop.f32.mrb[7].mxu1  ;;  %v721_v43 = vshrl.u32 %v8016_v7, 16  ;;  %v725_v54 = vrot.slane %v723_v12, 1 }
 0x16d   : > { %4322 = vmatpush1.bf16.msra.mxu0 %v6206_v40  ;;  %4292 = vmatprep.mubr.bf16.mxu0 %v7938_v10  ;;  %v6245_v10 = vld [vmem:[%s8431_s1 + $0x680] ss:$8 sps:$4 sm:$0xff]   ;;  %v8056_v40 = vadd.f32 %v7718_v53, %v1548_v18 }
 0x16e   : > { %4323 = vmatprep.subr.bf16.mxu0 %v6214_v14  ;;  %2881 = vmatprep.subr.bf16.mxu1 %v6247_v3  ;;  %v5402_v14 = vcombine.low %v7345_v39, %v7381_v0  ;;  %v6226_v3 = vld [vmem:[%s8431_s1 + $0xb34] ss:$8 sps:$4 sm:$0xff]   ;;  %v6259_v39 = vld [vmem:[%s8431_s1 + $0x6a4] ss:$8 sps:$4 sm:$0xff]   ;;  %v6224_v0 = vld [vmem:[%s8431_s1 + $0xb30] ss:$8 sps:$4 sm:$0xff]   ;;  %v726_v47 = vor.u32 %v725_v54, %v721_v43 }
 0x16f   : > { %v6257_v18 = vld [vmem:[%s8431_s1 + $0x6a0] ss:$8 sps:$4 sm:$0xff]  }
 0x170   : > { %2882 = vmatpush1.bf16.msra.mxu1 %v6245_v10 }
 0x171   : > { %4324 = vmatpush1.bf16.msra.mxu0 %v6212_v33  ;;  %v6251_v33 = vld [vmem:[%s8431_s1 + $0x690] ss:$8 sps:$4 sm:$0xff]   ;;  %2883 = vmatprep.subr.bf16.mxu1 %v6253_v26  ;;  %v1552_v53 = vpop.f32.mrb[8].mxu1 }
 0x172   : > { %4325 = vmatprep.subr.bf16.mxu0 %v6220_v27  ;;  %v6232_v27 = vld [vmem:[%s8431_s1 + $0xb44] ss:$8 sps:$4 sm:$0xff]   ;;  %v8082_v31 = vadd.f32 %v7753_v24, %v1552_v53  ;;  %v1554_v29 = vpop.f32.mrb[9].mxu1  ;;  %v6265_v24 = vld [vmem:[%s8431_s1 + $0x6b4] ss:$8 sps:$4 sm:$0xff]  }
 0x173   : > { %v1556_v10 = vpop.f32.mrb[10].mxu1 }
 0x174   : > { %4293 = vmatmul.mubr.bf16.gmra.mrb[36].mxu0 %v7967_v34  ;;  %v8085_v34 = vadd.f32 %v7758_v36, %v1554_v29  ;;  %2884 = vmatpush1.bf16.msra.mxu1 %v6251_v33  ;;  %v8091_v26 = vadd.f32 %v7763_v42, %v1556_v10  ;;  %v6230_v36 = vld [vmem:[%s8431_s1 + $0xb40] ss:$8 sps:$4 sm:$0xff]   ;;  %v5407_v42 = vcombine.low %v726_v47, %v726_v47  ;;  %v6236_v47 = vld [vmem:[%s8431_s1 + $0xb50] ss:$8 sps:$4 sm:$0xff]   ;;  %v6244_v10 = vld [vmem:[%s8431_s1 + $0xb64] ss:$8 sps:$4 sm:$0xff]  }
 0x175   : > { %4326 = vmatpush1.bf16.msra.mxu0 %v6218_v25  ;;  %4302 = vmatprep.mubr.bf16.mxu0 %v5402_v14  ;;  %v1558_v25 = vpop.f32.mrb[11].mxu1  ;;  %v6329_v14 = vld [vmem:[#allocation2 + $0x48] sm:$0xf] }
 0x176   : > { %4327 = vmatprep.subr.bf16.mxu0 %v6226_v3  ;;  %2885 = vmatprep.subr.bf16.mxu1 %v6259_v39  ;;  %v5401_v54 = vcombine.low %v7991_v13, %v6329_v14  ;;  %v8101_v3 = vadd.f32 %v7768_v5, %v1558_v25  ;;  %v6238_v39 = vld [vmem:[%s8431_s1 + $0xb54] ss:$8 sps:$4 sm:$0xff]   ;;  %v6263_v13 = vld [vmem:[%s8431_s1 + $0x6b0] ss:$8 sps:$4 sm:$0xff]   ;;  %v6271_v5 = vld [vmem:[%s8431_s1 + $0x6c4] ss:$8 sps:$4 sm:$0xff]  }
 0x177   : > { %v6269_v14 = vld [vmem:[%s8431_s1 + $0x6c0] ss:$8 sps:$4 sm:$0xff]  }
 0x178   : > { %2886 = vmatpush1.bf16.msra.mxu1 %v6257_v18 }
 0x179   : > { %4328 = vmatpush1.bf16.msra.mxu0 %v6224_v0  ;;  %v8103_v33 = vpop.f32.mrb[44].mxu0  ;;  %2887 = vmatprep.subr.bf16.mxu1 %v6265_v24 }
 0x17a   : > { %4329 = vmatprep.subr.bf16.mxu0 %v6232_v27  ;;  %v8108_v53 = vpop.f32.mrb[45].mxu0  ;;  %v1562_v27 = vpop.f32.mrb[16].mxu1 }
 0x17b   : > { %v3004_v0 = vpop.f32.mrb[46].mxu0  ;;  %v1563_v18 = vadd.f32 %v1562_v27, %v7835_v55  ;;  %v1564_v25 = vpop.f32.mrb[17].mxu1  ;;  %v6254_v27 = vld [vmem:[%s8431_s1 + $0xb80] ss:$8 sps:$4 sm:$0xff]  }
 0x17c   : > { %v3005_v29 = vpop.f32.mrb[47].mxu0  ;;  %4303 = vmatmul.mubr.bf16.gmra.mrb[40].mxu0 %v5401_v54  ;;  %v1565_v24 = vadd.f32 %v1564_v25, %v7842_v48  ;;  %2888 = vmatpush1.bf16.msra.mxu1 %v6263_v13  ;;  %v1566_v54 = vpop.f32.mrb[18].mxu1  ;;  %v6242_v48 = vld [vmem:[%s8431_s1 + $0xb60] ss:$8 sps:$4 sm:$0xff]   ;;  %v6250_v0 = vld [vmem:[%s8431_s1 + $0xb74] ss:$8 sps:$4 sm:$0xff]  }
 0x17d   : > { %4330 = vmatpush1.bf16.msra.mxu0 %v6230_v36  ;;  %4312 = vmatprep.mubr.bf16.mxu0 %v5407_v42  ;;  %v6278_v36 = vld [vmem:[%s8431_s1 + $0x6d4] ss:$8 sps:$4 sm:$0xff]   ;;  %v5406_v42 = vcombine.low %v7995_v52, %v7995_v52  ;;  %v8133_v55 = vadd.f32 %v7787_v6, %v1563_v18  ;;  %v6276_v52 = vld [vmem:[%s8431_s1 + $0x6d0] ss:$8 sps:$4 sm:$0xff]   ;;  %v6285_v6 = vld [vmem:[%s8431_s1 + $0x6e4] ss:$8 sps:$4 sm:$0xff]  }
 0x17e   : > { %4331 = vmatprep.subr.bf16.mxu0 %v6238_v39  ;;  %2889 = vmatprep.subr.bf16.mxu1 %v6271_v5  ;;  %v1567_v39 = vpop.f32.mrb[19].mxu1  ;;  %v8139_v13 = vadd.f32 %v7792_v23, %v1565_v24  ;;  %v6248_v23 = vld [vmem:[%s8431_s1 + $0xb70] ss:$8 sps:$4 sm:$0xff]   ;;  %v6256_v5 = vld [vmem:[%s8431_s1 + $0xb84] ss:$8 sps:$4 sm:$0xff]  }
 0x17f   : > { %v6283_v29 = vld [vmem:[%s8431_s1 + $0x6e0] ss:$8 sps:$4 sm:$0xff]   ;;  %v6291_v18 = vld [vmem:[%s8431_s1 + $0x6f0] ss:$8 sps:$4 sm:$0xff]   ;;  %v8175_v25 = vld [vmem:[%s8431_s1 + $0xc04] ss:$8 sps:$4 sm:$0xff]  }
 0x180   : > { %2890 = vmatpush1.bf16.msra.mxu1 %v6269_v14  ;;  %v6260_v24 = vld [vmem:[%s8431_s1 + $0xb90] ss:$8 sps:$4 sm:$0xff]   ;;  %v6268_v14 = vld [vmem:[%s8431_s1 + $0xba4] ss:$8 sps:$4 sm:$0xff]   ;;  %v8186_v54 = vld [vmem:[%s8431_s1 + $0xc00] ss:$8 sps:$4 sm:$0xff]  }
 0x181   : > { %4332 = vmatpush1.bf16.msra.mxu0 %v6236_v47  ;;  %2891 = vmatprep.subr.bf16.mxu1 %v6278_v36  ;;  %v6293_v47 = vld [vmem:[%s8431_s1 + $0x6f4] ss:$8 sps:$4 sm:$0xff]  }
 0x182   : > { %4333 = vmatprep.subr.bf16.mxu0 %v6244_v10  ;;  %v6262_v10 = vld [vmem:[%s8431_s1 + $0xb94] ss:$8 sps:$4 sm:$0xff]  }
 0x183   : > { %v8192_v36 = vld [vmem:[%s8431_s1 + $0xc14] ss:$8 sps:$4 sm:$0xff]  }
 0x184   : > { %4313 = vmatmul.mubr.bf16.gmra.mrb[60].mxu0 %v5406_v42  ;;  %2892 = vmatpush1.bf16.msra.mxu1 %v6276_v52  ;;  %v6266_v42 = vld [vmem:[%s8431_s1 + $0xba0] ss:$8 sps:$4 sm:$0xff]   ;;  %v6274_v39 = vld [vmem:[%s8431_s1 + $0xbb4] ss:$8 sps:$4 sm:$0xff]   ;;  %v6281_v52 = vld [vmem:[%s8431_s1 + $0xbc4] ss:$8 sps:$4 sm:$0xff]  }
 0x185   : > { %4334 = vmatpush1.bf16.msra.mxu0 %v6242_v48  ;;  %4353 = vmatprep.mubr.bf16.mxu0 %v7646_v28  ;;  %v6303_v48 = vld [vmem:[%s8431_s1 + $0xc10] ss:$8 sps:$4 sm:$0xff]  }
 0x186   : > { %4335 = vmatprep.subr.bf16.mxu0 %v6250_v0  ;;  %2893 = vmatprep.subr.bf16.mxu1 %v6285_v6  ;;  %v8210_v0 = vld [vmem:[%s8431_s1 + $0xc24] ss:$8 sps:$4 sm:$0xff]   ;;  %v8225_v6 = vld [vmem:[%s8431_s1 + $0xc34] ss:$8 sps:$4 sm:$0xff]  }
 0x188   : > { %2894 = vmatpush1.bf16.msra.mxu1 %v6283_v29  ;;  %v6288_v29 = vld [vmem:[%s8431_s1 + $0xbd4] ss:$8 sps:$4 sm:$0xff]  }
 0x189   : > { %4336 = vmatpush1.bf16.msra.mxu0 %v6248_v23  ;;  %2895 = vmatprep.subr.bf16.mxu1 %v6293_v47  ;;  %v6279_v23 = vld [vmem:[%s8431_s1 + $0xbc0] ss:$8 sps:$4 sm:$0xff]   ;;  %v6309_v47 = vld [vmem:[%s8431_s1 + $0xc30] ss:$8 sps:$4 sm:$0xff]  }
 0x18a   : > { %4337 = vmatprep.subr.bf16.mxu0 %v6256_v5  ;;  %v5064_v5 = vcombine.low %v7091_v16, %v7142_v22  ;;  %v6286_v16 = vld [vmem:[%s8431_s1 + $0xbd0] ss:$8 sps:$4 sm:$0xff]   ;;  %v6296_v22 = vld [vmem:[%s8431_s1 + $0xbe4] ss:$8 sps:$4 sm:$0xff]  }
 0x18c   : > { %2896 = vmatpush1.bf16.msra.mxu1 %v6291_v18  ;;  %v5069_v18 = vcombine.low %v7581_v58, %v7581_v58 }
 0x18d   : > { %4338 = vmatpush1.bf16.msra.mxu0 %v6254_v27  ;;  %5507 = vmatprep.subr.bf16.mxu1 %v8175_v25  ;;  %v6314_v27 = vld [vmem:[%s8431_s1 + $0xc44] ss:$8 sps:$4 sm:$0xff]  }
 0x18e   : > { %4339 = vmatprep.subr.bf16.mxu0 %v6262_v10  ;;  %v6312_v10 = vld [vmem:[%s8431_s1 + $0xc40] ss:$8 sps:$4 sm:$0xff]  }
 0x18f   : > { %2898 = vmatmul.mubr.bf16.vlgmr.msra.gmra.mrb[40].mxu1 %v7637_v56  ;;  %v6272_v56 = vld [vmem:[%s8431_s1 + $0xbb0] ss:$8 sps:$4 sm:$0xff]  }
 0x190   : > { %5515 = vmatpush1.bf16.msra.mxu1 %v8186_v54  ;;  %2907 = vmatprep.mubr.bf16.mxu1 %v7646_v28  ;;  %v6306_v28 = vld [vmem:[%s8431_s1 + $0xc20] ss:$8 sps:$4 sm:$0xff]  }
 0x191   : > { %4340 = vmatpush1.bf16.msra.mxu0 %v6260_v24  ;;  %5508 = vmatprep.subr.bf16.mxu1 %v8192_v36  ;;  %v5063_v24 = vcombine.low %v7136_v44, %v7185_v35  ;;  %v6315_v44 = vld [vmem:[%s8431_s1 + $0xc50] ss:$8 sps:$4 sm:$0xff]   ;;  %v6320_v35 = vld [vmem:[%s8431_s1 + $0xc64] ss:$8 sps:$4 sm:$0xff]  }
 0x192   : > { %4341 = vmatprep.subr.bf16.mxu0 %v6268_v14  ;;  %v6317_v14 = vld [vmem:[%s8431_s1 + $0xc54] ss:$8 sps:$4 sm:$0xff]  }
 0x194   : > { %5516 = vmatpush1.bf16.msra.mxu1 %v6303_v48 }
 0x195   : > { %4342 = vmatpush1.bf16.msra.mxu0 %v6266_v42  ;;  %5509 = vmatprep.subr.bf16.mxu1 %v8210_v0  ;;  %v6294_v42 = vld [vmem:[%s8431_s1 + $0xbe0] ss:$8 sps:$4 sm:$0xff]  }
 0x196   : > { %4343 = vmatprep.subr.bf16.mxu0 %v6274_v39  ;;  %v6302_v39 = vld [vmem:[%s8431_s1 + $0xbf4] ss:$8 sps:$4 sm:$0xff]  }
 0x197   : > { %2908 = vmatmul.mubr.bf16.gmra.mrb[44].mxu1 %v7684_v62 }
 0x198   : > { %5517 = vmatpush1.bf16.msra.mxu1 %v6306_v28  ;;  %2917 = vmatprep.mubr.bf16.mxu1 %v5064_v5 }
 0x199   : > { %4344 = vmatpush1.bf16.msra.mxu0 %v6272_v56  ;;  %5510 = vmatprep.subr.bf16.mxu1 %v8225_v6  ;;  %v6300_v56 = vld [vmem:[%s8431_s1 + $0xbf0] ss:$8 sps:$4 sm:$0xff]  }
 0x19a   : > { %4345 = vmatprep.subr.bf16.mxu0 %v6281_v52  ;;  %v5068_v52 = vcombine.low %v7616_v49, %v7616_v49 }
 0x19c   : > { %5518 = vmatpush1.bf16.msra.mxu1 %v6309_v47 }
 0x19d   : > { %4346 = vmatpush1.bf16.msra.mxu0 %v6279_v23  ;;  %5511 = vmatprep.subr.bf16.mxu1 %v6314_v27  ;;  %v6318_v23 = vld [vmem:[%s8431_s1 + $0xc60] ss:$8 sps:$4 sm:$0xff]  }
 0x19e   : > { %4347 = vmatprep.subr.bf16.mxu0 %v6288_v29  ;;  %v6323_v29 = vld [vmem:[%s8431_s1 + $0xc74] ss:$8 sps:$4 sm:$0xff]  }
 0x19f   : > { %2918 = vmatmul.mubr.bf16.gmra.mrb[48].mxu1 %v5063_v24 }
 0x1a0   : > { %5519 = vmatpush1.bf16.msra.mxu1 %v6312_v10  ;;  %2927 = vmatprep.mubr.bf16.mxu1 %v5069_v18  ;;  %v768_v18 = vrot.slane %v721_v43, 1 }
 0x1a1   : > { %4348 = vmatpush1.bf16.msra.mxu0 %v6286_v16  ;;  %5512 = vmatprep.subr.bf16.mxu1 %v6317_v14  ;;  %v6321_v16 = vld [vmem:[%s8431_s1 + $0xc70] ss:$8 sps:$4 sm:$0xff]  }
 0x1a2   : > { %4349 = vmatprep.subr.bf16.mxu0 %v6296_v22  ;;  %v8443_v22 = vmov 0  }
 0x1a4   : > { %5520 = vmatpush1.bf16.msra.mxu1 %v6315_v44 }
 0x1a5   : > { %4350 = vmatpush1.bf16.msra.mxu0 %v6294_v42  ;;  %5513 = vmatprep.subr.bf16.mxu1 %v6320_v35  ;;  %v769_v42 = vrot.slane %v723_v12, 2  ;;  %v5403_v12 = vcombine.low %v7616_v49, %v7669_v11 }
 0x1a6   : > { %4351 = vmatprep.subr.bf16.mxu0 %v6302_v39 }
 0x1a7   : > { %2928 = vmatmul.mubr.bf16.gmra.mrb[56].mxu1 %v5068_v52 }
 0x1a8   : > { %5521 = vmatpush1.bf16.msra.mxu1 %v6318_v23  ;;  %4444 = vmatprep.mubr.bf16.mxu1 %v8443_v22 }
 0x1a9   : > { %4352 = vmatpush1.bf16.msra.mxu0 %v6300_v56  ;;  %5514 = vmatprep.subr.bf16.mxu1 %v6323_v29 }
 0x1aa   : > { %4392 = vmatprep.subr.bf16.mxu0 %v8175_v25  ;;  %v5404_v25 = vcombine.low %v7581_v58, %v7626_v17  ;;  %v770_v58 = vor.u32 %v769_v42, %v768_v18 }
 0x1ac   : > { %4354 = vmatmul.mubr.bf16.vlgmr.msra.gmra.mrb[32].mxu0 %v7684_v62  ;;  %5522 = vmatpush1.bf16.msra.mxu1 %v6321_v16  ;;  %v8444_v62 = vcombine.low %v7188_v21, %v7300_v59  ;;  %v5409_v21 = vcombine.low %v770_v58, %v770_v58 }
 0x1ad   : > { %4393 = vmatpush1.bf16.msra.mxu0 %v8186_v54  ;;  %4363 = vmatprep.mubr.bf16.mxu0 %v5064_v5  ;;  %v781_v54 = vrot.slane %v8016_v7, 2 }
 0x1ae   : > { %4394 = vmatprep.subr.bf16.mxu0 %v8192_v36 }
 0x1af   : > { %4445 = vmatmul.mubr.bf16.vlgmr.msra.gmra.mrb[60].mxu1 %v8444_v62  ;;  %v5410_v17 = vcombine.low %v781_v54, %v781_v54 }
 0x1b0   : > { %4454 = vmatprep.mubr.bf16.mxu1 %v8443_v22 }
 0x1b1   : > { %4395 = vmatpush1.bf16.msra.mxu0 %v6303_v48 }
 0x1b2   : > { %4396 = vmatprep.subr.bf16.mxu0 %v8210_v0  ;;  %v737_v0 = vrot.slane %v8016_v7, 1 }
 0x1b4   : > { %4364 = vmatmul.mubr.bf16.gmra.mrb[36].mxu0 %v5063_v24  ;;  %v5408_v24 = vcombine.low %v737_v0, %v737_v0 }
 0x1b5   : > { %4397 = vmatpush1.bf16.msra.mxu0 %v6306_v28  ;;  %4373 = vmatprep.mubr.bf16.mxu0 %v5404_v25 }
 0x1b6   : > { %4398 = vmatprep.subr.bf16.mxu0 %v8225_v6 }
 0x1b7   : > { %v3586_v43 = vpop.f32.mrb[48].mxu0  ;;  %4455 = vmatmul.mubr.bf16.gmra.mrb[64].mxu1 %v5410_v17 }
 0x1b8   : > { %v8305_v36 = vpop.f32.mrb[49].mxu0 }
 0x1b9   : > { %4399 = vmatpush1.bf16.msra.mxu0 %v6309_v47  ;;  %v3590_v59 = vpop.f32.mrb[50].mxu0 }
 0x1ba   : > { %4400 = vmatprep.subr.bf16.mxu0 %v6314_v27  ;;  %v3591_v48 = vpop.f32.mrb[51].mxu0  ;;  %v2144_v28 = vpop.f32.mrb[32].mxu1 }
 0x1bb   : > { %v2145_v6 = vadd.f32 %v2144_v28, %v8133_v55  ;;  %v2146_v5 = vpop.f32.mrb[33].mxu1  ;;  %v8445_v48 = vld [vmem:[#allocation3_spill] sm:$0xff]  ;;  %v8446_v28 = vld [vmem:[#allocation4_spill] sm:$0xff] }
 0x1bc   : > { %4374 = vmatmul.mubr.bf16.gmra.mrb[40].mxu0 %v5403_v12  ;;  %v2147_v49 = vadd.f32 %v2146_v5, %v8139_v13  ;;  %v2148_v11 = vpop.f32.mrb[34].mxu1 }
 0x1bd   : > { %4401 = vmatpush1.bf16.msra.mxu0 %v6312_v10  ;;  %4383 = vmatprep.mubr.bf16.mxu0 %v5409_v21  ;;  %v2149_v47 = vpop.f32.mrb[35].mxu1 }
 0x1be   : > { %4402 = vmatprep.subr.bf16.mxu0 %v6317_v14 }
 0x1c1   : > { %4403 = vmatpush1.bf16.msra.mxu0 %v6315_v44 }
 0x1c2   : > { %4404 = vmatprep.subr.bf16.mxu0 %v6320_v35 }
 0x1c4   : > { %4384 = vmatmul.mubr.bf16.gmra.mrb[64].mxu0 %v5408_v24 }
 0x1c5   : > { %4405 = vmatpush1.bf16.msra.mxu0 %v6318_v23  ;;  %4424 = vmatprep.mubr.bf16.mxu0 %v8443_v22 }
 0x1c6   : > { %4406 = vmatprep.subr.bf16.mxu0 %v6323_v29 }
 0x1c9   : > { %4407 = vmatpush1.bf16.msra.mxu0 %v6321_v16 }
 0x1cc   : > { %4425 = vmatmul.mubr.bf16.vlgmr.msra.gmra.mrb[32].mxu0 %v6955_v50 }
 0x1cd   : > { %4434 = vmatprep.mubr.bf16.mxu0 %v8443_v22 }
 0x1d4   : > { %4435 = vmatmul.mubr.bf16.gmra.mrb[36].mxu0 %v7125_v4 }
 0x1e2   : > { %v2185_v7 = vpop.f32.mrb[20].mxu1 }
 0x1e3   : > { %v5524_v55 = vadd.f32 %v7989_v37, %v2185_v7  ;;  %v2187_v13 = vpop.f32.mrb[21].mxu1 }
 0x1e4   : > { %v5529_v27 = vadd.f32 %v7998_v2, %v2187_v13  ;;  %v2189_v10 = vpop.f32.mrb[22].mxu1 }
 0x1e5   : > { %v5534_v14 = vadd.f32 %v8004_v61, %v2189_v10  ;;  %v2191_v39 = vpop.f32.mrb[23].mxu1  ;;  %v5525_v44 = vadd.f32 %v5524_v55, %v7818_v9 }
 0x1e6   : > { %v5539_v35 = vadd.f32 %v8013_v20, %v2191_v39  ;;  %v5530_v50 = vadd.f32 %v5529_v27, %v7823_v51 }
 0x1e7   : > { %v5535_v56 = vadd.f32 %v5534_v14, %v7830_v63 }
 0x1e8   : > { %v5540_v4 = vadd.f32 %v5539_v35, %v7837_v1 }
 0x1ea   : > { %v2195_v52 = vpop.f32.mrb[24].mxu1 }
 0x1eb   : > { %v5544_v37 = vadd.f32 %v8038_v57, %v2195_v52  ;;  %v2197_v23 = vpop.f32.mrb[25].mxu1 }
 0x1ec   : > { %v5549_v2 = vadd.f32 %v8041_v46, %v2197_v23  ;;  %v2199_v29 = vpop.f32.mrb[26].mxu1 }
 0x1ed   : > { %v5554_v61 = vadd.f32 %v8047_v30, %v2199_v29  ;;  %v2201_v16 = vpop.f32.mrb[27].mxu1  ;;  %v5545_v9 = vadd.f32 %v5544_v37, %v7857_v38 }
 0x1ee   : > { %v5559_v20 = vadd.f32 %v8056_v40, %v2201_v16  ;;  %v5550_v51 = vadd.f32 %v5549_v2, %v7862_v60 }
 0x1ef   : > { %v5555_v63 = vadd.f32 %v5554_v61, %v7867_v45 }
 0x1f0   : > { %v5560_v1 = vadd.f32 %v5559_v20, %v7872_v8 }
 0x1f2   : > { %v2205_v22 = vpop.f32.mrb[28].mxu1 }
 0x1f3   : > { %v5564_v57 = vadd.f32 %v8082_v31, %v2205_v22  ;;  %v2207_v25 = vpop.f32.mrb[29].mxu1 }
 0x1f4   : > { %v5570_v46 = vadd.f32 %v8085_v34, %v2207_v25  ;;  %v2209_v42 = vpop.f32.mrb[30].mxu1 }
 0x1f5   : > { %v5576_v38 = vadd.f32 %v8091_v26, %v2209_v42  ;;  %v2211_v54 = vpop.f32.mrb[31].mxu1  ;;  %v5565_v40 = vadd.f32 %v5564_v57, %v7889_v32 }
 0x1f6   : > { %v5582_v8 = vadd.f32 %v8101_v3, %v2211_v54  ;;  %v5571_v58 = vadd.f32 %v5570_v46, %v7894_v15 }
 0x1f7   : > { %v3657_v18 = vpop.f32.mrb[52].mxu0  ;;  %v5577_v17 = vadd.f32 %v5576_v38, %v7899_v41 }
 0x1f8   : > { %v3658_v30 = vadd.f32 %v3657_v18, %v3586_v43  ;;  %v3659_v62 = vpop.f32.mrb[53].mxu0  ;;  %v5583_v34 = vadd.f32 %v5582_v8, %v7904_v19 }
 0x1f9   : > { %v3660_v60 = vadd.f32 %v3659_v62, %v8305_v36  ;;  %v3661_v45 = vpop.f32.mrb[54].mxu0 }
 0x1fa   : > { %v3662_v31 = vpop.f32.mrb[55].mxu0  ;;  %v2215_v12 = vpop.f32.mrb[36].mxu1 }
 0x1fb   : > { %v2216_v43 = vadd.f32 %v2215_v12, %v2145_v6  ;;  %v2217_v21 = vpop.f32.mrb[37].mxu1  ;;  %v4479_v12 = vlaneseq }
 0x1fc   : > { %v2218_v59 = vadd.f32 %v2217_v21, %v2147_v49  ;;  %v2219_v26 = vpop.f32.mrb[38].mxu1 }
 0x1fd   : > { %v2287_v0 = vadd.f32 %v8445_v48, %v2216_v43  ;;  %v2220_v32 = vpop.f32.mrb[39].mxu1  ;;  %v4477_v48 = vld [vmem:[%s8432_s2] sm:$0x3] }
 0x1fe   : > { %v2289_v36 = vadd.f32 %v8446_v28, %v2218_v59 }
 0x217   : > { %v3728_v5 = vpop.f32.mrb[56].mxu0 }
 0x218   : > { %v3729_v11 = vadd.f32 %v3728_v5, %v3658_v30  ;;  %v3730_v3 = vpop.f32.mrb[57].mxu0 }
 0x219   : > { %v3731_v24 = vadd.f32 %v3730_v3, %v3660_v60  ;;  %v3732_v15 = vpop.f32.mrb[58].mxu0 }
 0x21a   : > { %v3733_v47 = vpop.f32.mrb[59].mxu0 }
 0x23a   : > { %v2858_v7 = vpop.f32.mrb[52].mxu1 }
 0x23b   : > { %v2860_v41 = vpop.f32.mrb[53].mxu1 }
 0x23c   : > { %v2862_v55 = vpop.f32.mrb[54].mxu1 }
 0x23d   : > { %v2863_v19 = vpop.f32.mrb[55].mxu1 }
 0x257   : > { %v8341_v13 = vpop.f32.mrb[60].mxu0 }
 0x258   : > { %v8343_v6 = vpop.f32.mrb[61].mxu0 }
 0x259   : > { %v4318_v49 = vpop.f32.mrb[62].mxu0 }
 0x25a   : > { %v4319_v27 = vpop.f32.mrb[63].mxu0 }
 0x262   : > { %v2899_v10 = vpop.f32.mrb[40].mxu1 }
 0x263   : > { %v8345_v14 = vadd.f32 %v5525_v44, %v2899_v10  ;;  %v2901_v39 = vpop.f32.mrb[41].mxu1 }
 0x264   : > { %v8347_v35 = vadd.f32 %v5530_v50, %v2901_v39  ;;  %v2903_v52 = vpop.f32.mrb[42].mxu1 }
 0x265   : > { %v8349_v37 = vadd.f32 %v5535_v56, %v2903_v52  ;;  %v2905_v23 = vpop.f32.mrb[43].mxu1 }
 0x266   : > { %v8351_v2 = vadd.f32 %v5540_v4, %v2905_v23 }
 0x26a   : > { %v2909_v29 = vpop.f32.mrb[44].mxu1 }
 0x26b   : > { %v8353_v61 = vadd.f32 %v5545_v9, %v2909_v29  ;;  %v2911_v16 = vpop.f32.mrb[45].mxu1 }
 0x26c   : > { %v8355_v20 = vadd.f32 %v5550_v51, %v2911_v16  ;;  %v2913_v22 = vpop.f32.mrb[46].mxu1 }
 0x26d   : > { %v8357_v57 = vadd.f32 %v5555_v63, %v2913_v22  ;;  %v2915_v44 = vpop.f32.mrb[47].mxu1 }
 0x26e   : > { %v8359_v25 = vadd.f32 %v5560_v1, %v2915_v44 }
 0x272   : > { %v2919_v50 = vpop.f32.mrb[48].mxu1 }
 0x273   : > { %v5566_v18 = vadd.f32 %v5565_v40, %v2919_v50  ;;  %v2921_v46 = vpop.f32.mrb[49].mxu1 }
 0x274   : > { %v5572_v56 = vadd.f32 %v5571_v58, %v2921_v46  ;;  %v2923_v42 = vpop.f32.mrb[50].mxu1 }
 0x275   : > { %v5578_v30 = vadd.f32 %v5577_v17, %v2923_v42  ;;  %v2925_v4 = vpop.f32.mrb[51].mxu1 }
 0x276   : > { %v5584_v62 = vadd.f32 %v5583_v34, %v2925_v4  ;;  %v4480_v34 = vshrl.u32 %v4479_v12, 7 }
 0x278   : > { %v4481_v26 = vsub.s32 0, %v4480_v34 }
 0x27a   : > { %v2929_v38 = vpop.f32.mrb[56].mxu1 }
 0x27b   : > { %v2930_v9 = vadd.f32 %v2929_v38, %v2858_v7  ;;  %v2931_v54 = vpop.f32.mrb[57].mxu1 }
 0x27c   : > { %v2932_v60 = vadd.f32 %v2931_v54, %v2860_v41  ;;  %v2933_v51 = vpop.f32.mrb[58].mxu1 }
 0x27d   : > { %v3001_v45 = vadd.f32 %v8103_v33, %v2930_v9  ;;  %v2934_v63 = vpop.f32.mrb[59].mxu1  ;;  %v4485_v33 = vsub.s32 1, %v4480_v34 }
 0x27e   : > { %v3003_v8 = vadd.f32 %v8108_v53, %v2932_v60 }
 0x27f   : > { %v3019_v1 = vadd.f32 %v3001_v45, %v2287_v0  ;;  %v8369_v47 = vrot.slane %v4477_v48, %v4485_v33 }
 0x280   : > { %v3020_v31 = vadd.f32 %v3003_v8, %v2289_v36 }
 0x281   : > { %v3747_v40 = vadd.f32 %v3729_v11, %v3019_v1  ;;  %v8366_v11 = vrot.slane %v4477_v48, %v4481_v26 }
 0x282   : > { %v4446_v43 = vpop.f32.mrb[60].mxu1  ;;  %v3748_v58 = vadd.f32 %v3731_v24, %v3020_v31 }
 0x283   : > { %v4448_v21 = vpop.f32.mrb[61].mxu1 }
 0x284   : > { %v4450_v17 = vpop.f32.mrb[62].mxu1 }
 0x285   : > { %v4452_v59 = vpop.f32.mrb[63].mxu1 }
 0x28a   : > { %v4456_v32 = vpop.f32.mrb[64].mxu1 }
 0x28b   : > { %v4458_v28 = vpop.f32.mrb[65].mxu1 }
 0x28c   : > { %v4460_v0 = vpop.f32.mrb[66].mxu1 }
 0x28d   : > { %v4461_v3 = vpop.f32.mrb[67].mxu1 }
 0x28f   : > { %v4375_v53 = vpop.f32.mrb[40].mxu0 }
 0x290   : > { %v5567_v36 = vadd.f32 %v5566_v18, %v4375_v53  ;;  %v4377_v5 = vpop.f32.mrb[41].mxu0 }
 0x291   : > { %v5573_v24 = vadd.f32 %v5572_v56, %v4377_v5  ;;  %v4379_v15 = vpop.f32.mrb[42].mxu0 }
 0x292   : > { %v5579_v7 = vadd.f32 %v5578_v30, %v4379_v15  ;;  %v4381_v41 = vpop.f32.mrb[43].mxu0  ;;  %v5568_v55 = vadd.f32 %v5567_v36, %v4446_v43 }
 0x293   : > { %v5585_v19 = vadd.f32 %v5584_v62, %v4381_v41  ;;  %v5574_v49 = vadd.f32 %v5573_v24, %v4448_v21 }
 0x294   : > { %v4497_v27 = vadd.f32 %v5568_v55, %v8366_v11  ;;  %v5580_v10 = vadd.f32 %v5579_v7, %v4450_v17 }
 0x295   : > { %v4498_v39 = vadd.f32 %v5574_v49, %v8369_v47  ;;  %v5586_v52 = vadd.f32 %v5585_v19, %v4452_v59 }
 0x296   : > { %v4511_v23 = vmax.f32 %v4497_v27, 0.0  ;;  %v4499_v29 = vadd.f32 %v5580_v10, %v8366_v11 }
 0x297   : > { %v4385_v16 = vpop.f32.mrb[64].mxu0  ;;  %v4512_v22 = vmax.f32 %v4498_v39, 0.0  ;;  %v4500_v44 = vadd.f32 %v5586_v52, %v8369_v47 }
 0x298   : > { %v4386_v50 = vadd.f32 %v4385_v16, %v8341_v13  ;;  %v4387_v18 = vpop.f32.mrb[65].mxu0  ;;  %4525 = vst [vmem:[%s8376_s17 + $0x40] sm:$0xff] %v4511_v23  ;;  %v4513_v46 = vmax.f32 %v4499_v29, 0.0 }
 0x299   : > { %v4388_v56 = vadd.f32 %v4387_v18, %v8343_v6  ;;  %v4389_v42 = vpop.f32.mrb[66].mxu0  ;;  %4526 = vst [vmem:[%s8376_s17 + $0x48] sm:$0xff] %v4512_v22  ;;  %v5504_v30 = vpack.c.bf16 %v4512_v22, %v4511_v23  ;;  %v4514_v4 = vmax.f32 %v4500_v44, 0.0 }
 0x29a   : > { %v4390_v62 = vpop.f32.mrb[67].mxu0  ;;  %4527 = vst [vmem:[%s8376_s17 + $0x50] sm:$0xff] %v4513_v46  ;;  %v4457_v38 = vadd.f32 %v4456_v32, %v4386_v50 }
 0x29b   : > { %4591 = vst [vmem:[%s8386_s19 + $0x20] sm:$0xff] %v5504_v30  ;;  %4528 = vst [vmem:[%s8376_s17 + $0x58] sm:$0xff] %v4514_v4  ;;  %v5505_v13 = vpack.c.bf16 %v4514_v4, %v4513_v46  ;;  %v4459_v9 = vadd.f32 %v4458_v28, %v4388_v56 }
 0x29c   : > { %v4475_v54 = vadd.f32 %v4457_v38, %v3747_v40 }
 0x29d   : > { %4592 = vst [vmem:[%s8386_s19 + $0x28] sm:$0xff] %v5505_v13  ;;  %v4476_v60 = vadd.f32 %v4459_v9, %v3748_v58 }
 0x29e   : > { %v4501_v51 = vadd.f32 %v8366_v11, %v4475_v54 }
 0x29f   : > { %v4426_v45 = vpop.f32.mrb[32].mxu0  ;;  %v4502_v6 = vadd.f32 %v8369_v47, %v4476_v60 }
 0x2a0   : > { %v5527_v63 = vadd.f32 %v8345_v14, %v4426_v45  ;;  %v4428_v8 = vpop.f32.mrb[33].mxu0  ;;  %v4515_v1 = vmax.f32 %v4501_v51, 0.0 }
 0x2a1   : > { %v5532_v31 = vadd.f32 %v8347_v35, %v4428_v8  ;;  %v4430_v12 = vpop.f32.mrb[34].mxu0  ;;  %v4516_v43 = vmax.f32 %v4502_v6, 0.0 }
 0x2a2   : > { %v4489_v40 = vadd.f32 %v5527_v63, %v8366_v11  ;;  %v5537_v58 = vadd.f32 %v8349_v37, %v4430_v12  ;;  %v4432_v21 = vpop.f32.mrb[35].mxu0  ;;  %4529 = vst [vmem:[%s8376_s17 + $0x60] sm:$0xff] %v4515_v1 }
 0x2a3   : > { %v4490_v17 = vadd.f32 %v5532_v31, %v8369_v47  ;;  %v5542_v14 = vadd.f32 %v8351_v2, %v4432_v21  ;;  %4530 = vst [vmem:[%s8376_s17 + $0x68] sm:$0xff] %v4516_v43  ;;  %v5506_v34 = vpack.c.bf16 %v4516_v43, %v4515_v1 }
 0x2a4   : > { %v4503_v35 = vmax.f32 %v4489_v40, 0.0  ;;  %v4491_v59 = vadd.f32 %v5537_v58, %v8366_v11 }
 0x2a5   : > { %v4504_v26 = vmax.f32 %v4490_v17, 0.0  ;;  %v4492_v48 = vadd.f32 %v5542_v14, %v8369_v47  ;;  %4593 = vst [vmem:[%s8386_s19 + $0x30] sm:$0xff] %v5506_v34 }
 0x2a6   : > { %4517 = vst [vmem:[%s8376_s17] sm:$0xff] %v4503_v35  ;;  %v4505_v37 = vmax.f32 %v4491_v59, 0.0 }
 0x2a7   : > { %4518 = vst [vmem:[%s8376_s17 + $0x8] sm:$0xff] %v4504_v26  ;;  %v5500_v33 = vpack.c.bf16 %v4504_v26, %v4503_v35  ;;  %v4506_v32 = vmax.f32 %v4492_v48, 0.0  ;;  %v4436_v28 = vpop.f32.mrb[36].mxu0 }
 0x2a8   : > { %4519 = vst [vmem:[%s8376_s17 + $0x10] sm:$0xff] %v4505_v37  ;;  %v5547_v2 = vadd.f32 %v8353_v61, %v4436_v28  ;;  %v4438_v53 = vpop.f32.mrb[37].mxu0 }
 0x2a9   : > { %4587 = vst [vmem:[%s8386_s19] sm:$0xff] %v5500_v33  ;;  %4520 = vst [vmem:[%s8376_s17 + $0x18] sm:$0xff] %v4506_v32  ;;  %v5501_v0 = vpack.c.bf16 %v4506_v32, %v4505_v37  ;;  %v5552_v36 = vadd.f32 %v8355_v20, %v4438_v53  ;;  %v4440_v5 = vpop.f32.mrb[38].mxu0 }
 0x2aa   : > { %v4493_v3 = vadd.f32 %v5547_v2, %v8366_v11  ;;  %v5557_v24 = vadd.f32 %v8357_v57, %v4440_v5  ;;  %v4442_v15 = vpop.f32.mrb[39].mxu0 }
 0x2ab   : > { %4588 = vst [vmem:[%s8386_s19 + $0x8] sm:$0xff] %v5501_v0  ;;  %v4494_v61 = vadd.f32 %v5552_v36, %v8369_v47  ;;  %v5562_v7 = vadd.f32 %v8359_v25, %v4442_v15 }
 0x2ac   : > { %v4507_v41 = vmax.f32 %v4493_v3, 0.0  ;;  %v4495_v55 = vadd.f32 %v5557_v24, %v8366_v11 }
 0x2ad   : > { %v4508_v19 = vmax.f32 %v4494_v61, 0.0  ;;  %v4496_v20 = vadd.f32 %v5562_v7, %v8369_v47 }
 0x2ae   : > { %4521 = vst [vmem:[%s8376_s17 + $0x20] sm:$0xff] %v4507_v41  ;;  %v4509_v49 = vmax.f32 %v4495_v55, 0.0 }
 0x2af   : > { %4522 = vst [vmem:[%s8376_s17 + $0x28] sm:$0xff] %v4508_v19  ;;  %v5502_v27 = vpack.c.bf16 %v4508_v19, %v4507_v41  ;;  %v4510_v10 = vmax.f32 %v4496_v20, 0.0 }
 0x2b0   : > { %4523 = vst [vmem:[%s8376_s17 + $0x30] sm:$0xff] %v4509_v49 }
 0x2b1   : > { %4589 = vst [vmem:[%s8386_s19 + $0x10] sm:$0xff] %v5502_v27  ;;  %4524 = vst [vmem:[%s8376_s17 + $0x38] sm:$0xff] %v4510_v10  ;;  %v5503_v57 = vpack.c.bf16 %v4510_v10, %v4509_v49 }
 0x2b3   : > { %4590 = vst [vmem:[%s8386_s19 + $0x18] sm:$0xff] %v5503_v57 }
 0x2b4 PF: > { %s15_s15 = sadd.s32 1, %s6336_s15  }
 0x2b5   : > { %p12_p4 = scmp.ge.s32.totalorder %s15_s15, 4  }
 0x2b7   :  { %14 = sbr.rel (!%p12_p4) target bundleno = 1 (0x1), region = 80 }

// kernel: alexnet_forward.5
= control target key start
LH: loop header
LB: loop body
LE: loop exit
PB: predicated region body
PF: predicated region fallthrough
CT: control target
= control target key end

     0   :  { %s15503_s30 = smov 0   ;;  %s19911_s0 = inlined_call_operand.vmem [shape: bf16[2,7,4,512], index: 0, kind: input, shape index: {}]   ;;  %s19912_s1 = inlined_call_operand.vmem [shape: bf16[3,768,384], index: 1, kind: input, shape index: {}]   ;;  %s19913_s2 = inlined_call_operand.vmem [shape: f32[1,384], index: 2, kind: input, shape index: {}]   ;;  %s19914_s3 = inlined_call_operand.vmem [shape: bf16[3,1152,256], index: 3, kind: input, shape index: {}]   ;;  %s19915_s4 = inlined_call_operand.vmem [shape: f32[1,256], index: 4, kind: input, shape index: {}]   ;;  %s19916_s5 = inlined_call_operand.vmem [shape: bf16[3,768,256], index: 5, kind: input, shape index: {}]   ;;  %s19917_s6 = inlined_call_operand.vmem [shape: f32[1,256], index: 6, kind: input, shape index: {}]   ;;  %s19918_s7 = inlined_call_operand.vmem [shape: f32[2,3,8,384], index: 7, kind: output, shape index: {0}]   ;;  %s19919_s8 = inlined_call_operand.vmem [shape: f32[2,3,8,256], index: 8, kind: output, shape index: {1}]   ;;  %s19920_s9 = inlined_call_operand.vmem [shape: f32[2,3,8,256], index: 9, kind: output, shape index: {2}]  }
   0x1 LB: > { %s11137_s10 = sadd.s32 4294967295, %s15449_s30   ;;  %p11141_p0 = scmp.ge.s32.totalorder %s15449_s30, 1  ;;  %s15449_s30 = sphi %s15503_s30, %s20_s30  }
   0x2   : > { %p292_p1 = scmp.lt.s32.totalorder %s15449_s30, 3 }
   0x4   : > { %p293_p2 = pnand %p11141_p0, %p292_p1 }
   0x5   : > { %v13728_v0 = vld [vmem:[%s19912_s1 + $0x484] ss:$12 sps:$4 sm:$0xff] (!%p293_p2)   ;;  %v13730_v1 = vld [vmem:[%s19912_s1 + $0x480] ss:$12 sps:$4 sm:$0xff] (!%p293_p2)   ;;  %v15451_v2 = vmov (!%p293_p2), 0   ;;  %p338_p3 = scmp.lt.s32.totalorder (!%p293_p2), %s11137_s10, 1  ;;  %v511_v15 = vlaneseq (!%p293_p2) }
   0x6   : > { %296 = sbr.rel (%p293_p2) target bundleno = 2602 (0xa2a), region = 48  ;;  %499 = vst [vmem:[#allocation2 + $0x10] sm:$0xcc] (!%p293_p2), %v15451_v2  ;;  %501 = vst [vmem:[#allocation2 + $0x20] sm:$0xcc] (!%p293_p2), %v15451_v2  ;;  %1896 = vmatprep.subr.bf16.mxu0 (!%p293_p2), %v13728_v0  ;;  %vm483_vm0 = vcmask (!%p293_p2), 1040384  }
   0x7   : > { %477 = vst [vmem:[#allocation2] sm:$0xff] (!%p293_p2), %v15451_v2  ;;  %478 = vst [vmem:[#allocation2 + $0x8] sm:$0x11] (!%p293_p2), %v15451_v2  ;;  %v13731_v3 = vld [vmem:[%s19912_s1 + $0x49c] ss:$12 sps:$4 sm:$0xff] (!%p293_p2)   ;;  %1897 = vmatpush1.bf16.msra.mxu0 (!%p293_p2), %v13730_v1  ;;  %vm486_vm1 = vcmask (!%p293_p2), 1044484  }
   0x8   : > { %481 = vst [vmem:[#allocation2 + $0x48] sm:$0x11] (!%p293_p2), %v15451_v2  ;;  %500 = vst [vmem:[#allocation2 + $0x18] sm:$0x11] (!%p293_p2), %v15451_v2  ;;  %v13733_v4 = vld [vmem:[%s19912_s1 + $0x498] ss:$12 sps:$4 sm:$0xff] (!%p293_p2)   ;;  %1898 = vmatprep.subr.bf16.mxu0 (!%p293_p2), %v13731_v3 }
   0x9   : > { %502 = vst [vmem:[#allocation2 + $0x28] sm:$0x11] (!%p293_p2), %v15451_v2  ;;  %503 = vst [vmem:[#allocation2 + $0x30] sm:$0xcc] (!%p293_p2), %v15451_v2  ;;  %v13734_v5 = vld [vmem:[%s19912_s1 + $0x4b4] ss:$12 sps:$4 sm:$0xff] (!%p293_p2)  }
   0xa   : > { %504 = vst [vmem:[#allocation2 + $0x38] sm:$0x11] (!%p293_p2), %v15451_v2  ;;  %4618 = vst [vmem:[#allocation3 + $0x8] sm:$0xf] (!%p293_p2), %v15451_v2  ;;  %v13736_v6 = vld [vmem:[%s19912_s1 + $0x4b0] ss:$12 sps:$4 sm:$0xff] (!%p293_p2)  }
   0xb   : > { %4619 = vst [vmem:[#allocation3 + $0xc] sm:$0x11] (!%p293_p2), %v15451_v2  ;;  %4620 = vst [vmem:[#allocation3 + $0x14] sm:$0x1] (!%p293_p2), %v15451_v2  ;;  %1899 = vmatpush1.bf16.msra.mxu0 (!%p293_p2), %v13733_v4  ;;  %v13737_v7 = vld [vmem:[%s19912_s1 + $0x4cc] ss:$12 sps:$4 sm:$0xff] (!%p293_p2)  }
   0xc   : > { %4623 = vst [vmem:[#allocation3 + $0x68] sm:$0xf] (!%p293_p2), %v15451_v2  ;;  %4624 = vst [vmem:[#allocation3 + $0x6c] sm:$0x11] (!%p293_p2), %v15451_v2  ;;  %1900 = vmatprep.subr.bf16.mxu0 (!%p293_p2), %v13734_v5  ;;  %v13739_v8 = vld [vmem:[%s19912_s1 + $0x4c8] ss:$12 sps:$4 sm:$0xff] (!%p293_p2)  }
   0xd   : > { %4625 = vst [vmem:[#allocation3 + $0x74] sm:$0x1] %v15451_v2  ;;  %4645 = vst [vmem:[#allocation3 + $0x18] sm:$0xcc] %v15451_v2  ;;  %s19934_s10 = smov (!%p338_p3, %s11137_s10), 1  ;;  %v15582_v31 = vshrl.u32 %v511_v15, 7 }
   0xe   : > { %4646 = vst [vmem:[#allocation3 + $0x20] sm:$0xc] %v15451_v2  ;;  %4647 = vst [vmem:[#allocation3 + $0x24] sm:$0x11] %v15451_v2  ;;  %v13740_v9 = vld [vmem:[%s19912_s1 + $0x4e4] ss:$12 sps:$4 sm:$0xff]  }
   0xf   : > { %4648 = vst [vmem:[#allocation3 + $0x2c] sm:$0x1] %v15451_v2  ;;  %4649 = vst [vmem:[#allocation3 + $0x30] sm:$0xcc] %v15451_v2  ;;  %1901 = vmatpush1.bf16.msra.mxu0 %v13736_v6  ;;  %s13715_s29 = smul.u32 56, %s19934_s10  ;;  %vm553_vm8 = vcmask 1041408  }
  0x10   : > { %4650 = vst [vmem:[#allocation3 + $0x38] sm:$0xc] %v15451_v2  ;;  %4651 = vst [vmem:[#allocation3 + $0x3c] sm:$0x11] %v15451_v2  ;;  %1902 = vmatprep.subr.bf16.mxu0 %v13737_v7  ;;  %v13742_v10 = vld [vmem:[%s19912_s1 + $0x4e0] ss:$12 sps:$4 sm:$0xff]  }
  0x11   : > { %4652 = vst [vmem:[#allocation3 + $0x44] sm:$0x1] %v15451_v2  ;;  %4653 = vst [vmem:[#allocation3 + $0x48] sm:$0xcc] %v15451_v2  ;;  %v13743_v11 = vld [vmem:[%s19912_s1 + $0x4fc] ss:$12 sps:$4 sm:$0xff]   ;;  %s15554_s17 = scalar_lea.vmem %s19911_s0, %s13715_s29 }
  0x12   : > { %4654 = vst [vmem:[#allocation3 + $0x50] sm:$0xc] %v15451_v2  ;;  %4655 = vst [vmem:[#allocation3 + $0x54] sm:$0x11] %v15451_v2  ;;  %v13745_v12 = vld [vmem:[%s19912_s1 + $0x4f8] ss:$12 sps:$4 sm:$0xff]  }
  0x13   : > { %4656 = vst [vmem:[#allocation3 + $0x5c] sm:$0x1] %v15451_v2  ;;  %8495 = vst [vmem:[#allocation4 + $0x8] sm:$0x11] %v15451_v2  ;;  %1903 = vmatpush1.bf16.msra.mxu0 %v13739_v8  ;;  %v15452_v13 = vmov 1983009808  }
  0x14   : > { %8498 = vst [vmem:[#allocation4 + $0x48] sm:$0x11] %v15451_v2  ;;  %8509 = vst [vmem:[#allocation4 + $0x10] sm:$0xcc] %v15451_v2  ;;  %1904 = vmatprep.subr.bf16.mxu0 %v13740_v9  ;;  %v15559_v14 = vunpack.c.l.s4 %v15452_v13  ;;  %v13746_v16 = vld [vmem:[%s19912_s1 + $0x514] ss:$12 sps:$4 sm:$0xff]  }
  0x15   : > { %8510 = vst [vmem:[#allocation4 + $0x18] sm:$0x11] %v15451_v2  ;;  %8511 = vst [vmem:[#allocation4 + $0x20] sm:$0xcc] %v15451_v2  ;;  %vm484_vm2 = vsmask.f32 256 }
  0x16   : > { %8512 = vst [vmem:[#allocation4 + $0x28] sm:$0x11] %v15451_v2  ;;  %8513 = vst [vmem:[#allocation4 + $0x30] sm:$0xcc] %v15451_v2  ;;  %v13748_v17 = vld [vmem:[%s19912_s1 + $0x510] ss:$12 sps:$4 sm:$0xff]   ;;  %v510_v30 = vunpack.c.0.s8 %v15559_v14 }
  0x17   : > { %8514 = vst [vmem:[#allocation4 + $0x38] sm:$0x11] %v15451_v2  ;;  %1905 = vmatpush1.bf16.msra.mxu0 %v13742_v10  ;;  %v359_v18 = vld [vmem:[%s15554_s17] sm:$0xff]  ;;  %v360_v19 = vld [vmem:[%s15554_s17 + $0x8] sm:$0xff]  ;;  %vm487_vm3 = vsmask.f32 4352  ;;  %vm15577_vm4 = vmand %vm483_vm0, %vm484_vm2 }
  0x18   : > { %1906 = vmatprep.subr.bf16.mxu0 %v13743_v11  ;;  %v13749_v20 = vld [vmem:[%s19912_s1 + $0x52c] ss:$12 sps:$4 sm:$0xff]   ;;  %v361_v21 = vld [vmem:[%s15554_s17 + $0x10] sm:$0xff]  ;;  %v373_v22 = vrot.slane %v359_v18, 4  ;;  %v374_v23 = vrot.slane %v360_v19, 4  ;;  %v395_v24 = vshrl.u32 %v359_v18, 16  ;;  %vm15586_vm5 = vmand %vm486_vm1, %vm487_vm3 }
  0x19   : > { %v362_v25 = vld [vmem:[%s15554_s17 + $0x18] sm:$0xff]  ;;  %v363_v26 = vld [vmem:[%s15554_s17 + $0x20] sm:$0xff]  ;;  %v375_v27 = vrot.slane %v361_v21, 4  ;;  %v398_v28 = vshll.u32 %v359_v18, 16  ;;  %v404_v35 = vshrl.u32 %v360_v19, 16  ;;  %v407_v44 = vshll.u32 %v360_v19, 16  ;;  %vm15600_vm6 = vmor %vm15586_vm5, %vm15577_vm4 }
  0x1a   : > { %v376_v32 = vrot.slane %v362_v25, 4  ;;  %v377_v33 = vrot.slane %v363_v26, 4  ;;  %v397_v34 = vrot.slane %v395_v24, 6  ;;  %v13751_v37 = vld [vmem:[%s19912_s1 + $0x528] ss:$12 sps:$4 sm:$0xff]   ;;  %v387_v38 = vmax.bf16 %v373_v22, %v359_v18  ;;  %s13716_s27 = smul.u32 72, %s19934_s10 }
  0x1b   : > { %1907 = vmatpush1.bf16.msra.mxu0 %v13745_v12  ;;  %v388_v39 = vmax.bf16 %v374_v23, %v360_v19  ;;  %v389_v40 = vmax.bf16 %v375_v27, %v361_v21  ;;  %v400_v41 = vrot.slane %v398_v28, 7  ;;  %v13752_v42 = vld [vmem:[%s19912_s1 + $0x544] ss:$12 sps:$4 sm:$0xff]   ;;  %v406_v43 = vrot.slane %v404_v35, 6  ;;  %v13754_v2 = vld [vmem:[%s19912_s1 + $0x540] ss:$12 sps:$4 sm:$0xff]  }
  0x1c   : > { %1908 = vmatprep.subr.bf16.mxu0 %v13746_v16  ;;  %v413_v45 = vshrl.u32 %v361_v21, 16  ;;  %v416_v46 = vshll.u32 %v361_v21, 16  ;;  %v490_v47 = vld [vmem:[#allocation2 + $0x10] sm:$0x11]  ;;  %v422_v49 = vshrl.u32 %v362_v25, 16  ;;  %v425_v50 = vshll.u32 %v362_v25, 16  ;;  %s17169_s14 = scalar_lea.vmem %s19918_s7, %s13716_s27 }
  0x1d   : > { %v401_v48 = vor.u32 %v400_v41, %v397_v34  ;;  %v431_v51 = vshrl.u32 %v363_v26, 16  ;;  %v409_v53 = vrot.slane %v407_v44, 7  ;;  %v434_v56 = vshll.u32 %v363_v26, 16  ;;  %v493_v57 = vld [vmem:[#allocation2 + $0x20] sm:$0x11]  ;;  %s13717_s20 = smul.u32 48, %s19934_s10 }
  0x1e   : > { %v415_v54 = vrot.slane %v413_v45, 6  ;;  %v418_v55 = vrot.slane %v416_v46, 7  ;;  %v424_v59 = vrot.slane %v422_v49, 6  ;;  %v427_v60 = vrot.slane %v425_v50, 7  ;;  %v13755_v7 = vld [vmem:[%s19912_s1 + $0x55c] ss:$12 sps:$4 sm:$0xff]  }
  0x1f   : > { %1909 = vmatpush1.bf16.msra.mxu0 %v13748_v17  ;;  %v402_v58 = vrot.slane %v401_v48, 2  ;;  %v433_v61 = vrot.slane %v431_v51, 6  ;;  %v410_v62 = vor.u32 %v409_v53, %v406_v43  ;;  %v436_v0 = vrot.slane %v434_v56, 7  ;;  %v13757_v13 = vld [vmem:[%s19912_s1 + $0x558] ss:$12 sps:$4 sm:$0xff]   ;;  %s18943_s23 = scalar_lea.vmem %s19919_s8, %s13717_s20  ;;  %s357_s13 = scalar_lea.vmem %s19920_s9, %s13717_s20 }
  0x20   : > { %1910 = vmatprep.subr.bf16.mxu0 %v13749_v20  ;;  %v419_v63 = vor.u32 %v418_v55, %v415_v54  ;;  %v491_v1 = vsel %vm15600_vm6, 0, %v490_v47  ;;  %v390_v3 = vmax.bf16 %v376_v32, %v362_v25  ;;  %v391_v4 = vmax.bf16 %v377_v33, %v363_v26  ;;  %v13758_v18 = vld [vmem:[%s19912_s1 + $0x574] ss:$12 sps:$4 sm:$0xff]   ;;  %v13760_v24 = vld [vmem:[%s19912_s1 + $0x570] ss:$12 sps:$4 sm:$0xff]  }
  0x21   : > { %v428_v5 = vor.u32 %v427_v60, %v424_v59  ;;  %492 = vst [vmem:[#allocation2 + $0x10] sm:$0x11] %v491_v1  ;;  %v494_v6 = vsel %vm15600_vm6, 0, %v493_v57  ;;  %v411_v8 = vrot.slane %v410_v62, 2  ;;  %v437_v10 = vor.u32 %v436_v0, %v433_v61  ;;  %v13796_v23 = vld [vmem:[%s19912_s1 + $0x548] ss:$12 sps:$4 sm:$0xff]  }
  0x22   : > { %v420_v9 = vrot.slane %v419_v63, 2  ;;  %v464_v11 = vmax.bf16 %v402_v58, %v387_v38  ;;  %495 = vst [vmem:[#allocation2 + $0x20] sm:$0x11] %v494_v6  ;;  %vm554_vm7 = vsmask.f32 7938  ;;  %v15625_v22 = vsub.s32 %v510_v30, %v15582_v31  ;;  %13343 = vmatprep.subr.bf16.mxu1 %v13796_v23 }
  0x23   : > { %1911 = vmatpush1.bf16.msra.mxu0 %v13751_v37  ;;  %v429_v12 = vrot.slane %v428_v5, 2  ;;  %v438_v15 = vrot.slane %v437_v10, 2  ;;  %v465_v16 = vmax.bf16 %v411_v8, %v388_v39  ;;  %vm557_vm9 = vsmask.f32 7954  ;;  %v13761_v26 = vld [vmem:[%s19912_s1 + $0x58c] ss:$12 sps:$4 sm:$0xff]   ;;  %vm15638_vm11 = vmand %vm553_vm8, %vm554_vm7 }
  0x24   : > { %1912 = vmatprep.subr.bf16.mxu0 %v13752_v42  ;;  %v466_v17 = vmax.bf16 %v420_v9, %v389_v40  ;;  %vm556_vm10 = vcmask 1045508   ;;  %v13800_v32 = vld [vmem:[%s19912_s1 + $0x488] ss:$12 sps:$4 sm:$0xff]   ;;  %v13801_v34 = vld [vmem:[%s19912_s1 + $0x560] ss:$12 sps:$4 sm:$0xff]  }
  0x25   : > { %v467_v19 = vmax.bf16 %v429_v12, %v390_v3  ;;  %v15620_v20 = vmax.bf16 %v438_v15, %v391_v4  ;;  %v471_v21 = vmax.bf16 %v465_v16, %v464_v11  ;;  %vm15644_vm12 = vmand %vm556_vm10, %vm557_vm9  ;;  %v13763_v35 = vld [vmem:[%s19912_s1 + $0x588] ss:$12 sps:$4 sm:$0xff]   ;;  %13344 = vmatpush3.bf16.msra.mxu1 %v13800_v32  ;;  %v13764_v37 = vld [vmem:[%s19912_s1 + $0x5a4] ss:$12 sps:$4 sm:$0xff]  }
  0x26   : > { %13345 = vmatprep.subr.bf16.mxu1 %v13801_v34  ;;  %vm15666_vm13 = vmor %vm15644_vm12, %vm15638_vm11  ;;  %v13805_v43 = vld [vmem:[%s19912_s1 + $0x4a0] ss:$12 sps:$4 sm:$0xff]   ;;  %v13806_v45 = vld [vmem:[%s19912_s1 + $0x578] ss:$12 sps:$4 sm:$0xff]  }
  0x27   : > { %1913 = vmatpush1.bf16.msra.mxu0 %v13754_v2  ;;  %v472_v25 = vmax.bf16 %v467_v19, %v466_v17  ;;  %v474_v27 = vmax.bf16 %v471_v21, %v466_v17  ;;  %v13766_v46 = vld [vmem:[%s19912_s1 + $0x5a0] ss:$12 sps:$4 sm:$0xff]   ;;  %v13810_v51 = vld [vmem:[%s19912_s1 + $0x4b8] ss:$12 sps:$4 sm:$0xff]   ;;  %v13811_v54 = vld [vmem:[%s19912_s1 + $0x590] ss:$12 sps:$4 sm:$0xff]  }
  0x28   : > { %1914 = vmatprep.subr.bf16.mxu0 %v13755_v7  ;;  %v560_v48 = vld [vmem:[#allocation2 + $0x10] sm:$0x33]  ;;  %v13767_v55 = vld [vmem:[%s19912_s1 + $0x5bc] ss:$12 sps:$4 sm:$0xff]   ;;  %v13769_v57 = vld [vmem:[%s19912_s1 + $0x5b8] ss:$12 sps:$4 sm:$0xff]  }
  0x29   : > { %v475_v28 = vmax.bf16 %v472_v25, %v15620_v20  ;;  %v514_v33 = vrot.slane %v474_v27, %v15625_v22  ;;  %v563_v49 = vld [vmem:[#allocation2 + $0x20] sm:$0x33]  ;;  %13346 = vmatpush3.bf16.msra.mxu1 %v13805_v43  ;;  %v13815_v59 = vld [vmem:[%s19912_s1 + $0x4d0] ss:$12 sps:$4 sm:$0xff]   ;;  %v13816_v60 = vld [vmem:[%s19912_s1 + $0x5a8] ss:$12 sps:$4 sm:$0xff]  }
  0x2a   : > { %13347 = vmatprep.subr.bf16.mxu1 %v13806_v45  ;;  %v13770_v61 = vld [vmem:[%s19912_s1 + $0x5d4] ss:$12 sps:$4 sm:$0xff]   ;;  %v13772_v0 = vld [vmem:[%s19912_s1 + $0x5d0] ss:$12 sps:$4 sm:$0xff]   ;;  %v13773_v1 = vld [vmem:[%s19912_s1 + $0x5ec] ss:$12 sps:$4 sm:$0xff]  }
  0x2b   : > { %1915 = vmatpush1.bf16.msra.mxu0 %v13757_v13  ;;  %v521_v36 = vrot.slane %v475_v28, %v15625_v22  ;;  %v530_v38 = vshrl.u32 %v514_v33, 16  ;;  %v533_v39 = vshll.u32 %v514_v33, 16  ;;  %v13820_v62 = vld [vmem:[%s19912_s1 + $0x4e8] ss:$12 sps:$4 sm:$0xff]   ;;  %v13821_v63 = vld [vmem:[%s19912_s1 + $0x5c0] ss:$12 sps:$4 sm:$0xff]  }
  0x2c   : > { %1916 = vmatprep.subr.bf16.mxu0 %v13758_v18  ;;  %v13825_v4 = vld [vmem:[%s19912_s1 + $0x500] ss:$12 sps:$4 sm:$0xff]   ;;  %v13826_v6 = vld [vmem:[%s19912_s1 + $0x5d8] ss:$12 sps:$4 sm:$0xff]   ;;  %v13775_v7 = vld [vmem:[%s19912_s1 + $0x5e8] ss:$12 sps:$4 sm:$0xff]  }
  0x2d   : > { %v537_v40 = vshrl.u32 %v521_v36, 16  ;;  %v540_v41 = vshll.u32 %v521_v36, 16  ;;  %v532_v44 = vrot.slane %v530_v38, 7  ;;  %13348 = vmatpush3.bf16.msra.mxu1 %v13810_v51  ;;  %v13779_v8 = vld [vmem:[%s19912_s1 + $0x604] ss:$12 sps:$4 sm:$0xff]   ;;  %v364_v16 = vld [vmem:[%s15554_s17 + $0x28] sm:$0xff] }
  0x2e   : > { %13349 = vmatprep.subr.bf16.mxu1 %v13811_v54  ;;  %v13777_v9 = vld [vmem:[%s19912_s1 + $0x600] ss:$12 sps:$4 sm:$0xff]   ;;  %v13830_v10 = vld [vmem:[%s19912_s1 + $0x518] ss:$12 sps:$4 sm:$0xff]   ;;  %v13831_v12 = vld [vmem:[%s19912_s1 + $0x5f0] ss:$12 sps:$4 sm:$0xff]  }
  0x2f   : > { %1917 = vmatpush1.bf16.msra.mxu0 %v13760_v24  ;;  %v539_v47 = vrot.slane %v537_v40, 7  ;;  %v535_v50 = vor.u32 %v533_v39, %v532_v44  ;;  %v13783_v13 = vld [vmem:[%s19912_s1 + $0x61c] ss:$12 sps:$4 sm:$0xff]   ;;  %v365_v17 = vld [vmem:[%s15554_s17 + $0x30] sm:$0xff]  ;;  %v13781_v18 = vld [vmem:[%s19912_s1 + $0x618] ss:$12 sps:$4 sm:$0xff]  }
  0x30   : > { %1918 = vmatprep.subr.bf16.mxu0 %v13761_v26  ;;  %v13835_v15 = vld [vmem:[%s19912_s1 + $0x530] ss:$12 sps:$4 sm:$0xff]   ;;  %v378_v19 = vrot.slane %v364_v16, 4  ;;  %v379_v21 = vrot.slane %v365_v17, 4  ;;  %v440_v23 = vshrl.u32 %v364_v16, 16  ;;  %v443_v24 = vshll.u32 %v364_v16, 16 }
  0x31   : > { %v542_v53 = vor.u32 %v540_v41, %v539_v47  ;;  %v561_v56 = vsel %vm15666_vm13, %v535_v50, %v560_v48  ;;  %13350 = vmatpush3.bf16.msra.mxu1 %v13815_v59  ;;  %v496_v25 = vld [vmem:[#allocation2 + $0x30] sm:$0x11]  ;;  %v449_v26 = vshrl.u32 %v365_v17, 16  ;;  %v452_v27 = vshll.u32 %v365_v17, 16  ;;  %v13843_v45 = vld [vmem:[%s19912_s1 + $0x6e0] ss:$12 sps:$4 sm:$0xff]  }
  0x32   : > { %562 = vst [vmem:[#allocation2 + $0x10] sm:$0x33] %v561_v56  ;;  %13351 = vmatprep.subr.bf16.mxu1 %v13816_v60  ;;  %v497_v28 = vsel %vm15600_vm6, 0, %v496_v25  ;;  %v442_v30 = vrot.slane %v440_v23, 6  ;;  %v445_v32 = vrot.slane %v443_v24, 7  ;;  %v393_v39 = vmax.bf16 %v379_v21, %v365_v17 }
  0x33   : > { %1919 = vmatpush1.bf16.msra.mxu0 %v13763_v35  ;;  %v564_v58 = vsel %vm15666_vm13, %v542_v53, %v563_v49  ;;  %498 = vst [vmem:[#allocation2 + $0x30] sm:$0x11] %v497_v28  ;;  %v13838_v33 = vld [vmem:[%s19912_s1 + $0x6c8] ss:$12 sps:$4 sm:$0xff]   ;;  %v451_v35 = vrot.slane %v449_v26, 6  ;;  %v454_v36 = vrot.slane %v452_v27, 7 }
  0x34   : > { %1920 = vmatprep.subr.bf16.mxu0 %v13764_v37  ;;  %565 = vst [vmem:[#allocation2 + $0x20] sm:$0x33] %v564_v58  ;;  %v13786_v34 = vld [vmem:[%s19912_s1 + $0x634] ss:$12 sps:$4 sm:$0xff]   ;;  %v392_v37 = vmax.bf16 %v378_v19, %v364_v16  ;;  %v446_v38 = vor.u32 %v445_v32, %v442_v30  ;;  %v13784_v43 = vld [vmem:[%s19912_s1 + $0x630] ss:$12 sps:$4 sm:$0xff]  }
  0x35   : > { %13352 = vmatpush3.bf16.msra.mxu1 %v13820_v62  ;;  %v455_v40 = vor.u32 %v454_v36, %v451_v35  ;;  %v13842_v41 = vld [vmem:[%s19912_s1 + $0x608] ss:$12 sps:$4 sm:$0xff]   ;;  %v13847_v49 = vld [vmem:[%s19912_s1 + $0x620] ss:$12 sps:$4 sm:$0xff]   ;;  %v13848_v54 = vld [vmem:[%s19912_s1 + $0x6f8] ss:$12 sps:$4 sm:$0xff]  }
  0x36   : > { %13353 = vmatprep.subr.bf16.mxu1 %v13821_v63  ;;  %v447_v44 = vrot.slane %v446_v38, 2  ;;  %v13787_v50 = vld [vmem:[%s19912_s1 + $0x648] ss:$12 sps:$4 sm:$0xff]   ;;  %v572_v56 = vld [vmem:[#allocation2 + $0x18] sm:$0x11] }
  0x37   : > { %1921 = vmatpush1.bf16.msra.mxu0 %v13766_v46  ;;  %v13789_v46 = vld [vmem:[%s19912_s1 + $0x64c] ss:$12 sps:$4 sm:$0xff]   ;;  %v456_v47 = vrot.slane %v455_v40, 2  ;;  %v13864_v16 = vld [vmem:[%s19912_s1 + $0x668] ss:$12 sps:$4 sm:$0xff]  }
  0x38   : > { %1922 = vmatprep.subr.bf16.mxu0 %v13767_v55  ;;  %v469_v48 = vmax.bf16 %v447_v44, %v392_v37  ;;  %v13792_v55 = vld [vmem:[%s19912_s1 + $0x664] ss:$12 sps:$4 sm:$0xff]   ;;  %v13790_v58 = vld [vmem:[%s19912_s1 + $0x660] ss:$12 sps:$4 sm:$0xff]   ;;  %v13802_v27 = vld [vmem:[%s19912_s1 + $0x6a8] ss:$12 sps:$4 sm:$0xff]  }
  0x39   : > { %v15716_v2 = vld [vmem:[#allocation2 + $0x10] sm:$0xff]  ;;  %13354 = vmatpush3.bf16.msra.mxu1 %v13825_v4  ;;  %v470_v51 = vmax.bf16 %v456_v47, %v393_v39  ;;  %v13852_v63 = vld [vmem:[%s19912_s1 + $0x638] ss:$12 sps:$4 sm:$0xff]   ;;  %v13865_v21 = vld [vmem:[%s19912_s1 + $0x740] ss:$12 sps:$4 sm:$0xff]  }
  0x3a   : > { %13355 = vmatprep.subr.bf16.mxu1 %v13826_v6  ;;  %v473_v53 = vmax.bf16 %v469_v48, %v15620_v20  ;;  %v13795_v20 = vld [vmem:[%s19912_s1 + $0x67c] ss:$12 sps:$4 sm:$0xff]   ;;  %v566_v6 = vld [vmem:[#allocation2 + $0x30] sm:$0x33]  ;;  %v13870_v28 = vld [vmem:[%s19912_s1 + $0x758] ss:$12 sps:$4 sm:$0xff]  }
  0x3b   : > { %1923 = vmatpush1.bf16.msra.mxu0 %v13769_v57  ;;  %v15718_v3 = vld [vmem:[#allocation2 + $0x20] sm:$0xff]  ;;  %v574_v57 = vld [vmem:[#allocation2 + $0x28] sm:$0x11]  ;;  %v15030_v52 = vld [vmem:[%s19916_s5 + $0x3f0] ss:$8 sps:$4 sm:$0xff]  }
  0x3c   : > { %1924 = vmatprep.subr.bf16.mxu0 %v13770_v61  ;;  %v11349_v5 = vcombine.high %v15716_v2, %v15718_v3  ;;  %v11348_v11 = vcombine.low %v15716_v2, %v15718_v3  ;;  %v476_v59 = vmax.bf16 %v473_v53, %v470_v51  ;;  %v15797_v61 = vcombine.high %v15716_v2, %v572_v56  ;;  %v13809_v30 = vld [vmem:[%s19912_s1 + $0x6c4] ss:$12 sps:$4 sm:$0xff]   ;;  %v13807_v35 = vld [vmem:[%s19912_s1 + $0x6c0] ss:$12 sps:$4 sm:$0xff]   ;;  %v13814_v39 = vld [vmem:[%s19912_s1 + $0x6dc] ss:$12 sps:$4 sm:$0xff]  }
  0x3d   : > { %13356 = vmatpush3.bf16.msra.mxu1 %v13830_v10  ;;  %v15800_v62 = vcombine.high %v15718_v3, %v574_v57  ;;  %v13857_v10 = vld [vmem:[%s19912_s1 + $0x650] ss:$12 sps:$4 sm:$0xff]   ;;  %v15837_v19 = vcombine.low %v15718_v3, %v574_v57  ;;  %v13869_v3 = vld [vmem:[%s19912_s1 + $0x680] ss:$12 sps:$4 sm:$0xff]   ;;  %v13874_v38 = vld [vmem:[%s19912_s1 + $0x698] ss:$12 sps:$4 sm:$0xff]  }
  0x3e   : > { %1928 = vmatprep.mubr.bf16.mxu0 %v11349_v5  ;;  %2081 = vmatprep.mubr.bf16.mxu1 %v11349_v5  ;;  %v528_v60 = vrot.slane %v476_v59, %v15625_v22  ;;  %v13853_v22 = vld [vmem:[%s19912_s1 + $0x710] ss:$12 sps:$4 sm:$0xff]   ;;  %v13799_v5 = vld [vmem:[%s19912_s1 + $0x694] ss:$12 sps:$4 sm:$0xff]   ;;  %v641_v23 = vshrl.u32 %v15797_v61, 16 }
  0x3f   : > { %1925 = vmatpush1.bf16.msra.mxu0 %v13772_v0  ;;  %13357 = vmatprep.subr.bf16.mxu1 %v13831_v12  ;;  %v13793_v0 = vld [vmem:[%s19912_s1 + $0x678] ss:$12 sps:$4 sm:$0xff]   ;;  %v13797_v12 = vld [vmem:[%s19912_s1 + $0x690] ss:$12 sps:$4 sm:$0xff]   ;;  %v655_v25 = vshrl.u32 %v15800_v62, 16  ;;  %v648_v44 = vshrl.u32 %v15837_v19, 16 }
  0x40   : > { %1926 = vmatprep.subr.bf16.mxu0 %v13773_v1  ;;  %v544_v1 = vshrl.u32 %v528_v60, 16  ;;  %v547_v4 = vshll.u32 %v528_v60, 16  ;;  %v13880_v59 = vld [vmem:[%s19912_s1 + $0x848] ss:$12 sps:$4 sm:$0xff]   ;;  %v4771_v14 = vld [vmem:[#allocation3 + $0x5c] sm:$0x1] }
  0x41   : > { %13358 = vmatpush3.bf16.msra.mxu1 %v13835_v15  ;;  %v13804_v15 = vld [vmem:[%s19912_s1 + $0x6ac] ss:$12 sps:$4 sm:$0xff]   ;;  %v14236_v29 = vld [vmem:[%s19912_s1 + $0xb14] ss:$12 sps:$4 sm:$0xff]  }
  0x42   : > { %13371 = vmatprep.subr.bf16.mxu1 %v13838_v33  ;;  %v650_v33 = vshll.u32 %v15837_v19, 16  ;;  %v15038_v42 = vld [vmem:[%s19916_s5 + $0x410] ss:$8 sps:$4 sm:$0xff]  }
  0x43   : > { %1927 = vmatpush1.bf16.msra.mxu0 %v13775_v7  ;;  %v546_v7 = vrot.slane %v544_v1, 7 }
  0x44   : > { %1947 = vmatprep.subr.bf16.mxu0 %v13779_v8  ;;  %2082 = vmatmul.mubr.bf16.vlgmr.msra.gmra.mrb[0].mxu1 %v11348_v11  ;;  %v643_v8 = vshll.u32 %v15797_v61, 16  ;;  %v652_v53 = vrot.slane %v650_v33, 1  ;;  %v13839_v33 = vld [vmem:[%s19912_s1 + $0x750] ss:$12 sps:$4 sm:$0xff]  }
  0x45   : > { %13372 = vmatpush3.bf16.msra.mxu1 %v13842_v41 }
  0x46   : > { %1929 = vmatmul.mubr.bf16.vlgmr.msra.gmra.mrb[0].mxu0 %v11348_v11  ;;  %13373 = vmatprep.subr.bf16.mxu1 %v13843_v45  ;;  %v13859_v11 = vld [vmem:[%s19912_s1 + $0x728] ss:$12 sps:$4 sm:$0xff]   ;;  %v645_v24 = vrot.slane %v643_v8, 1  ;;  %v15900_v1 = vor.u32 %v652_v53, %v648_v44  ;;  %v13849_v44 = vld [vmem:[%s19912_s1 + $0x780] ss:$12 sps:$4 sm:$0xff]   ;;  %v16010_v53 = vrot.slane %v15837_v19, 1 }
  0x47   : > { %1948 = vmatpush1.bf16.msra.mxu0 %v13777_v9  ;;  %v657_v9 = vshll.u32 %v15800_v62, 16  ;;  %v13884_v8 = vld [vmem:[%s19912_s1 + $0x788] ss:$12 sps:$4 sm:$0xff]   ;;  %v13861_v19 = vld [vmem:[%s19912_s1 + $0x7b0] ss:$12 sps:$4 sm:$0xff]  }
  0x48   : > { %1949 = vmatprep.subr.bf16.mxu0 %v13783_v13  ;;  %v549_v13 = vor.u32 %v547_v4, %v546_v7  ;;  %v15861_v36 = vor.u32 %v645_v24, %v641_v23  ;;  %v13817_v4 = vld [vmem:[%s19912_s1 + $0x6f0] ss:$12 sps:$4 sm:$0xff]   ;;  %v13827_v23 = vld [vmem:[%s19912_s1 + $0x720] ss:$12 sps:$4 sm:$0xff]  }
  0x49   : > { %13374 = vmatpush3.bf16.msra.mxu1 %v13847_v49  ;;  %v659_v26 = vrot.slane %v657_v9, 1  ;;  %v13875_v49 = vld [vmem:[%s19912_s1 + $0x770] ss:$12 sps:$4 sm:$0xff]  }
  0x4a   : > { %13375 = vmatprep.subr.bf16.mxu1 %v13848_v54  ;;  %v567_v17 = vsel %vm15666_vm13, %v549_v13, %v566_v6  ;;  %v13879_v54 = vld [vmem:[%s19912_s1 + $0x6b0] ss:$12 sps:$4 sm:$0xff]  }
  0x4b   : > { %1950 = vmatpush1.bf16.msra.mxu0 %v13781_v18  ;;  %v15834_v18 = vcombine.low %v15716_v2, %v572_v56  ;;  %568 = vst [vmem:[#allocation2 + $0x30] sm:$0x33] %v567_v17  ;;  %v15863_v37 = vor.u32 %v659_v26, %v655_v25  ;;  %v692_v17 = vrot.slane %v15797_v61, 1  ;;  %v13834_v24 = vld [vmem:[%s19912_s1 + $0x73c] ss:$12 sps:$4 sm:$0xff]  }
  0x4c   : > { %1951 = vmatprep.subr.bf16.mxu0 %v13786_v34  ;;  %v576_v34 = vld [vmem:[#allocation2 + $0x38] sm:$0x11]  ;;  %v14022_v61 = vld [vmem:[%s19912_s1 + $0x428] ss:$12 sps:$4 sm:$0xff]  }
  0x4d   : > { %13376 = vmatpush3.bf16.msra.mxu1 %v13852_v63  ;;  %v636_v32 = vshll.u32 %v15834_v18, 16  ;;  %v634_v41 = vshrl.u32 %v15834_v18, 16  ;;  %v11351_v51 = vcombine.low %v15861_v36, %v15863_v37  ;;  %v13894_v25 = vld [vmem:[%s19912_s1 + $0x7b8] ss:$12 sps:$4 sm:$0xff]  }
  0x4e   : > { %13377 = vmatprep.subr.bf16.mxu1 %v13853_v22 }
  0x4f   : > { %1952 = vmatpush1.bf16.msra.mxu0 %v13784_v43  ;;  %v638_v43 = vrot.slane %v636_v32, 1  ;;  %v13900_v32 = vld [vmem:[%s19912_s1 + $0x8a8] ss:$12 sps:$4 sm:$0xff]  }
  0x50   : > { %1953 = vmatprep.subr.bf16.mxu0 %v13789_v46 }
  0x51   : > { %13378 = vmatpush3.bf16.msra.mxu1 %v13857_v10  ;;  %v13885_v10 = vld [vmem:[%s19912_s1 + $0x860] ss:$12 sps:$4 sm:$0xff]  }
  0x52   : > { %13379 = vmatprep.subr.bf16.mxu1 %v13859_v11  ;;  %v575_v40 = vld [vmem:[#allocation2 + $0x30] sm:$0xff] }
  0x53   : > { %1954 = vmatpush1.bf16.msra.mxu0 %v13787_v50  ;;  %v11355_v45 = vcombine.high %v575_v40, %v575_v40  ;;  %v11354_v46 = vcombine.low %v575_v40, %v575_v40  ;;  %v15873_v47 = vcombine.high %v575_v40, %v576_v34  ;;  %v15875_v48 = vcombine.low %v575_v40, %v576_v34  ;;  %v13812_v50 = vld [vmem:[%s19912_s1 + $0x6d8] ss:$12 sps:$4 sm:$0xff]   ;;  %v13822_v11 = vld [vmem:[%s19912_s1 + $0x708] ss:$12 sps:$4 sm:$0xff]  }
  0x54   : > { %1955 = vmatprep.subr.bf16.mxu0 %v13792_v55  ;;  %v13846_v34 = vld [vmem:[%s19912_s1 + $0x76c] ss:$12 sps:$4 sm:$0xff]   ;;  %v13851_v40 = vld [vmem:[%s19912_s1 + $0x784] ss:$12 sps:$4 sm:$0xff]  }
  0x55   : > { %13380 = vmatpush3.bf16.msra.mxu1 %v13864_v16  ;;  %1938 = vmatprep.mubr.bf16.mxu0 %v11355_v45  ;;  %v671_v55 = vshll.u32 %v15873_v47, 16  ;;  %v662_v56 = vshrl.u32 %v15875_v48, 16  ;;  %v664_v57 = vshll.u32 %v15875_v48, 16  ;;  %v13890_v16 = vld [vmem:[%s19912_s1 + $0x878] ss:$12 sps:$4 sm:$0xff]  }
  0x56   : > { %13381 = vmatprep.subr.bf16.mxu1 %v13865_v21  ;;  %2089 = vmatprep.mubr.bf16.mxu1 %v11355_v45  ;;  %v15937_v21 = vrot.slane %v15800_v62, 1  ;;  %v13895_v62 = vld [vmem:[%s19912_s1 + $0x890] ss:$12 sps:$4 sm:$0xff]  }
  0x57   : > { %1956 = vmatpush1.bf16.msra.mxu0 %v13790_v58  ;;  %v669_v58 = vshrl.u32 %v15873_v47, 16  ;;  %2090 = vmatmul.mubr.bf16.gmra.mrb[4].mxu1 %v11354_v46  ;;  %v673_v60 = vrot.slane %v671_v55, 1  ;;  %v666_v63 = vrot.slane %v664_v57, 1  ;;  %v13856_v45 = vld [vmem:[%s19912_s1 + $0x79c] ss:$12 sps:$4 sm:$0xff]  }
  0x58   : > { %1957 = vmatprep.subr.bf16.mxu0 %v13795_v20  ;;  %v13819_v20 = vld [vmem:[%s19912_s1 + $0x6f4] ss:$12 sps:$4 sm:$0xff]   ;;  %1939 = vmatmul.mubr.bf16.gmra.mrb[4].mxu0 %v11354_v46  ;;  %v13914_v46 = vld [vmem:[%s19912_s1 + $0x818] ss:$12 sps:$4 sm:$0xff]   ;;  %v13919_v55 = vld [vmem:[%s19912_s1 + $0x830] ss:$12 sps:$4 sm:$0xff]  }
  0x59   : > { %13382 = vmatpush3.bf16.msra.mxu1 %v13869_v3  ;;  %1979 = vmatprep.mubr.bf16.mxu0 %v11351_v51  ;;  %v667_v22 = vor.u32 %v666_v63, %v662_v56  ;;  %v15908_v6 = vor.u32 %v673_v60, %v669_v58  ;;  %v13832_v3 = vld [vmem:[%s19912_s1 + $0x738] ss:$12 sps:$4 sm:$0xff]   ;;  %v13920_v56 = vld [vmem:[%s19912_s1 + $0xc8] ss:$12 sps:$4 sm:$0xff]   ;;  %v13925_v60 = vld [vmem:[%s19912_s1 + $0xe0] ss:$12 sps:$4 sm:$0xff]  }
  0x5a   : > { %13383 = vmatprep.subr.bf16.mxu1 %v13870_v28  ;;  %2129 = vmatprep.mubr.bf16.mxu1 %v11351_v51  ;;  %v13841_v28 = vld [vmem:[%s19912_s1 + $0x754] ss:$12 sps:$4 sm:$0xff]   ;;  %v691_v51 = vrot.slane %v15834_v18, 1  ;;  %v13868_v57 = vld [vmem:[%s19912_s1 + $0x7cc] ss:$12 sps:$4 sm:$0xff]  }
  0x5b   : > { %1958 = vmatpush1.bf16.msra.mxu0 %v13793_v0  ;;  %v15898_v0 = vor.u32 %v638_v43, %v634_v41  ;;  %v15911_v7 = vcombine.low %v15900_v1, %v667_v22  ;;  %v11357_v13 = vcombine.low %v15908_v6, %v15908_v6  ;;  %v11356_v26 = vcombine.low %v667_v22, %v667_v22  ;;  %v13909_v41 = vld [vmem:[%s19912_s1 + $0x800] ss:$12 sps:$4 sm:$0xff]   ;;  %v13910_v43 = vld [vmem:[%s19912_s1 + $0x8d8] ss:$12 sps:$4 sm:$0xff]   ;;  %v13866_v63 = vld [vmem:[%s19912_s1 + $0x7c8] ss:$12 sps:$4 sm:$0xff]  }
  0x5c   : > { %1959 = vmatprep.subr.bf16.mxu0 %v13799_v5  ;;  %v13824_v5 = vld [vmem:[%s19912_s1 + $0x70c] ss:$12 sps:$4 sm:$0xff]   ;;  %v16030_v58 = vcombine.low %v691_v51, %v16010_v53  ;;  %v13986_v18 = vld [vmem:[%s19912_s1 + $0x108] ss:$12 sps:$4 sm:$0xff]  }
  0x5d   : > { %13384 = vmatpush3.bf16.msra.mxu1 %v13874_v38  ;;  %v11350_v9 = vcombine.low %v15898_v0, %v15900_v1  ;;  %v13905_v38 = vld [vmem:[%s19912_s1 + $0x8c0] ss:$12 sps:$4 sm:$0xff]  }
  0x5e   : > { %13385 = vmatprep.subr.bf16.mxu1 %v13875_v49  ;;  %v13915_v49 = vld [vmem:[%s19912_s1 + $0x8f0] ss:$12 sps:$4 sm:$0xff]  }
  0x5f   : > { %1960 = vmatpush1.bf16.msra.mxu0 %v13797_v12  ;;  %v13829_v12 = vld [vmem:[%s19912_s1 + $0x724] ss:$12 sps:$4 sm:$0xff]  }
  0x60   : > { %1961 = vmatprep.subr.bf16.mxu0 %v13804_v15  ;;  %v13889_v15 = vld [vmem:[%s19912_s1 + $0x7a0] ss:$12 sps:$4 sm:$0xff]  }
  0x61   : > { %13386 = vmatpush3.bf16.msra.mxu1 %v13879_v54  ;;  %v13863_v54 = vld [vmem:[%s19912_s1 + $0x7b4] ss:$12 sps:$4 sm:$0xff]  }
  0x62   : > { %13399 = vmatprep.subr.bf16.mxu1 %v13880_v59  ;;  %v16033_v59 = vrot.slane %v15873_v47, 1  ;;  %v13873_v47 = vld [vmem:[%s19912_s1 + $0x7e4] ss:$12 sps:$4 sm:$0xff]  }
  0x63   : > { %1962 = vmatpush1.bf16.msra.mxu0 %v13802_v27  ;;  %v15954_v27 = vcombine.low %v692_v17, %v15937_v21 }
  0x64   : > { %1963 = vmatprep.subr.bf16.mxu0 %v13809_v30  ;;  %2130 = vmatmul.mubr.bf16.vlgmr.msra.gmra.mrb[8].mxu1 %v11350_v9  ;;  %v13899_v30 = vld [vmem:[%s19912_s1 + $0x7d0] ss:$12 sps:$4 sm:$0xff]   ;;  %v16053_v22 = vcombine.low %v16033_v59, %v16033_v59 }
  0x65   : > { %13400 = vmatpush3.bf16.msra.mxu1 %v13884_v8  ;;  %2137 = vmatprep.mubr.bf16.mxu1 %v11357_v13  ;;  %v16060_v8 = vrot.slane %v15875_v48, 1  ;;  %v13935_v48 = vld [vmem:[%s19912_s1 + $0x110] ss:$12 sps:$4 sm:$0xff]  }
  0x66   : > { %13401 = vmatprep.subr.bf16.mxu1 %v13885_v10  ;;  %v13878_v10 = vld [vmem:[%s19912_s1 + $0x7fc] ss:$12 sps:$4 sm:$0xff]  }
  0x67   : > { %1964 = vmatpush1.bf16.msra.mxu0 %v13807_v35  ;;  %v13904_v35 = vld [vmem:[%s19912_s1 + $0x7e8] ss:$12 sps:$4 sm:$0xff]  }
  0x68   : > { %1965 = vmatprep.subr.bf16.mxu0 %v13814_v39  ;;  %v13844_v39 = vld [vmem:[%s19912_s1 + $0x768] ss:$12 sps:$4 sm:$0xff]  }
  0x69   : > { %13402 = vmatpush3.bf16.msra.mxu1 %v13889_v15 }
  0x6a   : > { %13403 = vmatprep.subr.bf16.mxu1 %v13890_v16  ;;  %v13876_v16 = vld [vmem:[%s19912_s1 + $0x7f8] ss:$12 sps:$4 sm:$0xff]  }
  0x6b   : > { %1966 = vmatpush1.bf16.msra.mxu0 %v13812_v50  ;;  %v13854_v50 = vld [vmem:[%s19912_s1 + $0x798] ss:$12 sps:$4 sm:$0xff]  }
  0x6c   : > { %1967 = vmatprep.subr.bf16.mxu0 %v13819_v20  ;;  %2138 = vmatmul.mubr.bf16.gmra.mrb[12].mxu1 %v11356_v26  ;;  %v13924_v20 = vld [vmem:[%s19912_s1 + $0x8] ss:$12 sps:$4 sm:$0xff]  }
  0x6d   : > { %13404 = vmatpush3.bf16.msra.mxu1 %v13894_v25  ;;  %2177 = vmatprep.mubr.bf16.mxu1 %v15954_v27  ;;  %v13881_v25 = vld [vmem:[%s19912_s1 + $0x810] ss:$12 sps:$4 sm:$0xff]  }
  0x6e   : > { %13405 = vmatprep.subr.bf16.mxu1 %v13895_v62  ;;  %v13944_v62 = vld [vmem:[%s19912_s1 + $0x68] ss:$12 sps:$4 sm:$0xff]  }
  0x6f   : > { %1968 = vmatpush1.bf16.msra.mxu0 %v13817_v4  ;;  %v13929_v4 = vld [vmem:[%s19912_s1 + $0x20] ss:$12 sps:$4 sm:$0xff]  }
  0x70   : > { %1969 = vmatprep.subr.bf16.mxu0 %v13824_v5  ;;  %v13930_v5 = vld [vmem:[%s19912_s1 + $0xf8] ss:$12 sps:$4 sm:$0xff]  }
  0x71   : > { %13406 = vmatpush3.bf16.msra.mxu1 %v13899_v30  ;;  %v13949_v30 = vld [vmem:[%s19912_s1 + $0x80] ss:$12 sps:$4 sm:$0xff]  }
  0x72   : > { %13407 = vmatprep.subr.bf16.mxu1 %v13900_v32  ;;  %v13950_v32 = vld [vmem:[%s19912_s1 + $0x158] ss:$12 sps:$4 sm:$0xff]  }
  0x73   : > { %1970 = vmatpush1.bf16.msra.mxu0 %v13822_v11  ;;  %v13934_v11 = vld [vmem:[%s19912_s1 + $0x38] ss:$12 sps:$4 sm:$0xff]  }
  0x74   : > { %1971 = vmatprep.subr.bf16.mxu0 %v13829_v12  ;;  %v16077_v12 = vcombine.low %v16060_v8, %v16060_v8 }
  0x75   : > { %13408 = vmatpush3.bf16.msra.mxu1 %v13904_v35  ;;  %v13898_v35 = vld [vmem:[%s19912_s1 + $0x85c] ss:$12 sps:$4 sm:$0xff]  }
  0x76   : > { %13409 = vmatprep.subr.bf16.mxu1 %v13905_v38  ;;  %v13954_v38 = vld [vmem:[%s19912_s1 + $0x98] ss:$12 sps:$4 sm:$0xff]  }
  0x77   : > { %1972 = vmatpush1.bf16.msra.mxu0 %v13827_v23  ;;  %v13883_v23 = vld [vmem:[%s19912_s1 + $0x814] ss:$12 sps:$4 sm:$0xff]  }
  0x78   : > { %1973 = vmatprep.subr.bf16.mxu0 %v13834_v24  ;;  %v13939_v24 = vld [vmem:[%s19912_s1 + $0x50] ss:$12 sps:$4 sm:$0xff]  }
  0x79   : > { %13410 = vmatpush3.bf16.msra.mxu1 %v13909_v41  ;;  %v13896_v41 = vld [vmem:[%s19912_s1 + $0x858] ss:$12 sps:$4 sm:$0xff]  }
  0x7a   : > { %13411 = vmatprep.subr.bf16.mxu1 %v13910_v43  ;;  %v13903_v43 = vld [vmem:[%s19912_s1 + $0x874] ss:$12 sps:$4 sm:$0xff]  }
  0x7b   : > { %1974 = vmatpush1.bf16.msra.mxu0 %v13832_v3  ;;  %v13886_v3 = vld [vmem:[%s19912_s1 + $0x828] ss:$12 sps:$4 sm:$0xff]  }
  0x7c   : > { %1975 = vmatprep.subr.bf16.mxu0 %v13841_v28  ;;  %v13893_v28 = vld [vmem:[%s19912_s1 + $0x844] ss:$12 sps:$4 sm:$0xff]  }
  0x7d   : > { %13412 = vmatpush3.bf16.msra.mxu1 %v13914_v46 }
  0x7e   : > { %13413 = vmatprep.subr.bf16.mxu1 %v13915_v49  ;;  %v13901_v49 = vld [vmem:[%s19912_s1 + $0x870] ss:$12 sps:$4 sm:$0xff]  }
  0x7f   : > { %1976 = vmatpush1.bf16.msra.mxu0 %v13839_v33  ;;  %v16123_v33 = vld [vmem:[#allocation2 + $0x8] sm:$0x11] }
  0x80   : > { %1977 = vmatprep.subr.bf16.mxu0 %v13846_v34  ;;  %v13891_v34 = vld [vmem:[%s19912_s1 + $0x840] ss:$12 sps:$4 sm:$0xff]  }
  0x81   : > { %13414 = vmatpush3.bf16.msra.mxu1 %v13919_v55 }
  0x82   : > { %13427 = vmatprep.subr.bf16.mxu1 %v13920_v56  ;;  %v13964_v56 = vld [vmem:[%s19912_s1 + $0x188] ss:$12 sps:$4 sm:$0xff]  }
  0x83   : > { %1978 = vmatpush1.bf16.msra.mxu0 %v13844_v39  ;;  %v13955_v39 = vld [vmem:[%s19912_s1 + $0x170] ss:$12 sps:$4 sm:$0xff]  }
  0x84   : > { %1998 = vmatprep.subr.bf16.mxu0 %v13851_v40  ;;  %2178 = vmatmul.mubr.bf16.vlgmr.msra.gmra.mrb[16].mxu1 %v16030_v58 }
  0x85   : > { %13428 = vmatpush3.bf16.msra.mxu1 %v13924_v20  ;;  %2185 = vmatprep.mubr.bf16.mxu1 %v16053_v22 }
  0x86   : > { %1980 = vmatmul.mubr.bf16.vlgmr.msra.gmra.mrb[0].mxu0 %v11350_v9  ;;  %13429 = vmatprep.subr.bf16.mxu1 %v13925_v60  ;;  %v13871_v9 = vld [vmem:[%s19912_s1 + $0x7e0] ss:$12 sps:$4 sm:$0xff]  }
  0x87   : > { %1999 = vmatpush1.bf16.msra.mxu0 %v13849_v44  ;;  %1989 = vmatprep.mubr.bf16.mxu0 %v11357_v13  ;;  %v16079_v13 = vld [vmem:[#allocation2] sm:$0xff]  ;;  %v13959_v44 = vld [vmem:[%s19912_s1 + $0xb0] ss:$12 sps:$4 sm:$0xff]  }
  0x88   : > { %2000 = vmatprep.subr.bf16.mxu0 %v13856_v45  ;;  %v16083_v15 = vcombine.high %v16079_v13, %v15716_v2  ;;  %v13940_v2 = vld [vmem:[%s19912_s1 + $0x128] ss:$12 sps:$4 sm:$0xff]   ;;  %v16139_v40 = vcombine.high %v16079_v13, %v16123_v33 }
  0x89   : > { %13430 = vmatpush3.bf16.msra.mxu1 %v13929_v4  ;;  %v13960_v45 = vld [vmem:[%s19912_s1 + $0x248] ss:$12 sps:$4 sm:$0xff]   ;;  %v13913_v4 = vld [vmem:[%s19912_s1 + $0x8a4] ss:$12 sps:$4 sm:$0xff]  }
  0x8a   : > { %13431 = vmatprep.subr.bf16.mxu1 %v13930_v5  ;;  %v629_v46 = vshll.u32 %v16139_v40, 16  ;;  %v627_v60 = vshrl.u32 %v16139_v40, 16  ;;  %v13969_v5 = vld [vmem:[%s19912_s1 + $0x1a0] ss:$12 sps:$4 sm:$0xff]  }
  0x8b   : > { %2001 = vmatpush1.bf16.msra.mxu0 %v13854_v50  ;;  %v13908_v50 = vld [vmem:[%s19912_s1 + $0x88c] ss:$12 sps:$4 sm:$0xff]  }
  0x8c   : > { %2002 = vmatprep.subr.bf16.mxu0 %v13863_v54  ;;  %2186 = vmatmul.mubr.bf16.gmra.mrb[20].mxu1 %v16077_v12  ;;  %v15432_v54 = vld [vmem:[#allocation2 + $0x10] sm:$0xff] }
  0x8d   : > { %13432 = vmatpush3.bf16.msra.mxu1 %v13934_v11  ;;  %3170 = vmatprep.mubr.bf16.mxu1 %v16083_v15  ;;  %v16161_v55 = vcombine.low %v16079_v13, %v15432_v54  ;;  %v13911_v11 = vld [vmem:[%s19912_s1 + $0x8a0] ss:$12 sps:$4 sm:$0xff]  }
  0x8e   : > { %1990 = vmatmul.mubr.bf16.gmra.mrb[8].mxu0 %v11356_v26  ;;  %13433 = vmatprep.subr.bf16.mxu1 %v13935_v48  ;;  %v13888_v26 = vld [vmem:[%s19912_s1 + $0x82c] ss:$12 sps:$4 sm:$0xff]  }
  0x8f   : > { %2003 = vmatpush1.bf16.msra.mxu0 %v13861_v19  ;;  %2030 = vmatprep.mubr.bf16.mxu0 %v15954_v27  ;;  %v13945_v27 = vld [vmem:[%s19912_s1 + $0x140] ss:$12 sps:$4 sm:$0xff]  }
  0x90   : > { %2004 = vmatprep.subr.bf16.mxu0 %v13868_v57  ;;  %v13965_v19 = vld [vmem:[%s19912_s1 + $0x260] ss:$12 sps:$4 sm:$0xff]  }
  0x91   : > { %13434 = vmatpush3.bf16.msra.mxu1 %v13939_v24  ;;  %v16169_v57 = vld [vmem:[#allocation2 + $0x20] sm:$0xff]  ;;  %v13975_v24 = vld [vmem:[%s19912_s1 + $0x290] ss:$12 sps:$4 sm:$0xff]  }
  0x92   : > { %13435 = vmatprep.subr.bf16.mxu1 %v13940_v2  ;;  %v16173_v20 = vcombine.high %v16169_v57, %v16169_v57  ;;  %v16195_v48 = vcombine.low %v16169_v57, %v16169_v57 }
  0x93   : > { %2005 = vmatpush1.bf16.msra.mxu0 %v13866_v63  ;;  %v631_v63 = vrot.slane %v629_v46, 1  ;;  %v13996_v46 = vld [vmem:[%s19912_s1 + $0x218] ss:$12 sps:$4 sm:$0xff]  }
  0x94   : > { %2006 = vmatprep.subr.bf16.mxu0 %v13873_v47  ;;  %v13906_v47 = vld [vmem:[%s19912_s1 + $0x888] ss:$12 sps:$4 sm:$0xff]  }
  0x95   : > { %13436 = vmatpush3.bf16.msra.mxu1 %v13944_v62  ;;  %v13979_v62 = vld [vmem:[%s19912_s1 + $0x1d0] ss:$12 sps:$4 sm:$0xff]  }
  0x96   : > { %13437 = vmatprep.subr.bf16.mxu1 %v13945_v27  ;;  %v13921_v27 = vld [vmem:[%s19912_s1 + $0x8d0] ss:$12 sps:$4 sm:$0xff]  }
  0x97   : > { %2007 = vmatpush1.bf16.msra.mxu0 %v13871_v9  ;;  %v13970_v9 = vld [vmem:[%s19912_s1 + $0x278] ss:$12 sps:$4 sm:$0xff]  }
  0x98   : > { %2008 = vmatprep.subr.bf16.mxu0 %v13878_v10  ;;  %v632_v10 = vor.u32 %v631_v63, %v627_v60  ;;  %v13948_v60 = vld [vmem:[%s19912_s1 + $0x4c] ss:$12 sps:$4 sm:$0xff]  }
  0x99   : > { %13438 = vmatpush3.bf16.msra.mxu1 %v13949_v30  ;;  %v13984_v30 = vld [vmem:[%s19912_s1 + $0x1e8] ss:$12 sps:$4 sm:$0xff]  }
  0x9a   : > { %13439 = vmatprep.subr.bf16.mxu1 %v13950_v32  ;;  %v16207_v2 = vcombine.low %v632_v10, %v15861_v36  ;;  %v13980_v36 = vld [vmem:[%s19912_s1 + $0x2a8] ss:$12 sps:$4 sm:$0xff]   ;;  %v13985_v32 = vld [vmem:[%s19912_s1 + $0x2c0] ss:$12 sps:$4 sm:$0xff]   ;;  %v14012_v10 = vld [vmem:[%s19912_s1 + $0x3f8] ss:$12 sps:$4 sm:$0xff]  }
  0x9b   : > { %2009 = vmatpush1.bf16.msra.mxu0 %v13876_v16  ;;  %v13918_v16 = vld [vmem:[%s19912_s1 + $0x8bc] ss:$12 sps:$4 sm:$0xff]  }
  0x9c   : > { %2010 = vmatprep.subr.bf16.mxu0 %v13883_v23  ;;  %v13974_v23 = vld [vmem:[%s19912_s1 + $0x1b8] ss:$12 sps:$4 sm:$0xff]  }
  0x9d   : > { %13440 = vmatpush3.bf16.msra.mxu1 %v13954_v38  ;;  %v13989_v38 = vld [vmem:[%s19912_s1 + $0x200] ss:$12 sps:$4 sm:$0xff]  }
  0x9e   : > { %13441 = vmatprep.subr.bf16.mxu1 %v13955_v39  ;;  %v13931_v39 = vld [vmem:[%s19912_s1] ss:$12 sps:$4 sm:$0xff]  }
  0x9f   : > { %2011 = vmatpush1.bf16.msra.mxu0 %v13881_v25  ;;  %v13916_v25 = vld [vmem:[%s19912_s1 + $0x8b8] ss:$12 sps:$4 sm:$0xff]  }
  0xa0   : > { %2012 = vmatprep.subr.bf16.mxu0 %v13888_v26  ;;  %v13923_v26 = vld [vmem:[%s19912_s1 + $0x8d4] ss:$12 sps:$4 sm:$0xff]  }
  0xa1   : > { %13442 = vmatpush3.bf16.msra.mxu1 %v13959_v44 }
  0xa2   : > { %13455 = vmatprep.subr.bf16.mxu1 %v13960_v45 }
  0xa3   : > { %2013 = vmatpush1.bf16.msra.mxu0 %v13886_v3  ;;  %v13928_v3 = vld [vmem:[%s19912_s1 + $0x8ec] ss:$12 sps:$4 sm:$0xff]  }
  0xa4   : > { %2014 = vmatprep.subr.bf16.mxu0 %v13893_v28  ;;  %3171 = vmatmul.mubr.bf16.vlgmr.msra.gmra.mrb[24].mxu1 %v16161_v55  ;;  %v16231_v28 = vcombine.low %v16079_v13, %v16123_v33  ;;  %v13933_v33 = vld [vmem:[%s19912_s1 + $0x4] ss:$12 sps:$4 sm:$0xff]  }
  0xa5   : > { %13456 = vmatpush3.bf16.msra.mxu1 %v13964_v56  ;;  %3178 = vmatprep.mubr.bf16.mxu1 %v16173_v20  ;;  %v13943_v56 = vld [vmem:[%s19912_s1 + $0x34] ss:$12 sps:$4 sm:$0xff]  }
  0xa6   : > { %13457 = vmatprep.subr.bf16.mxu1 %v13965_v19  ;;  %v620_v44 = vshrl.u32 %v16231_v28, 16  ;;  %v14001_v19 = vld [vmem:[%s19912_s1 + $0x230] ss:$12 sps:$4 sm:$0xff]  }
  0xa7   : > { %2015 = vmatpush1.bf16.msra.mxu0 %v13891_v34  ;;  %v13926_v34 = vld [vmem:[%s19912_s1 + $0x8e8] ss:$12 sps:$4 sm:$0xff]  }
  0xa8   : > { %2016 = vmatprep.subr.bf16.mxu0 %v13898_v35  ;;  %v622_v35 = vshll.u32 %v16231_v28, 16 }
  0xa9   : > { %13458 = vmatpush3.bf16.msra.mxu1 %v13969_v5  ;;  %v13946_v5 = vld [vmem:[%s19912_s1 + $0x48] ss:$12 sps:$4 sm:$0xff]  }
  0xaa   : > { %13459 = vmatprep.subr.bf16.mxu1 %v13970_v9  ;;  %v624_v45 = vrot.slane %v622_v35, 1  ;;  %v13953_v9 = vld [vmem:[%s19912_s1 + $0x64] ss:$12 sps:$4 sm:$0xff]   ;;  %v13971_v35 = vld [vmem:[%s19912_s1 + $0xc0] ss:$12 sps:$4 sm:$0xff]  }
  0xab   : > { %2017 = vmatpush1.bf16.msra.mxu0 %v13896_v41  ;;  %v13991_v41 = vld [vmem:[%s19912_s1 + $0x2d8] ss:$12 sps:$4 sm:$0xff]  }
  0xac   : > { %2018 = vmatprep.subr.bf16.mxu0 %v13903_v43  ;;  %3179 = vmatmul.mubr.bf16.gmra.mrb[28].mxu1 %v16195_v48  ;;  %v13938_v43 = vld [vmem:[%s19912_s1 + $0x1c] ss:$12 sps:$4 sm:$0xff]   ;;  %v625_v54 = vor.u32 %v624_v45, %v620_v44  ;;  %v689_v44 = vrot.slane %v16231_v28, 1  ;;  %v13983_v45 = vld [vmem:[%s19912_s1 + $0xf4] ss:$12 sps:$4 sm:$0xff]  }
  0xad   : > { %13460 = vmatpush3.bf16.msra.mxu1 %v13974_v23  ;;  %3218 = vmatprep.mubr.bf16.mxu1 %v16207_v2  ;;  %v13958_v23 = vld [vmem:[%s19912_s1 + $0x7c] ss:$12 sps:$4 sm:$0xff]  }
  0xae   : > { %13461 = vmatprep.subr.bf16.mxu1 %v13975_v24  ;;  %v16286_v63 = vcombine.low %v625_v54, %v15898_v0  ;;  %v16300_v0 = vcombine.low %v15863_v37, %v15863_v37  ;;  %v14017_v24 = vld [vmem:[%s19912_s1 + $0x410] ss:$12 sps:$4 sm:$0xff]   ;;  %v16406_v54 = vcombine.low %v689_v44, %v691_v51  ;;  %v14086_v44 = vld [vmem:[%s19912_s1 + $0xa88] ss:$12 sps:$4 sm:$0xff]  }
  0xaf   : > { %2019 = vmatpush1.bf16.msra.mxu0 %v13901_v49  ;;  %v13997_v49 = vld [vmem:[%s19912_s1 + $0x2f0] ss:$12 sps:$4 sm:$0xff]  }
  0xb0   : > { %2020 = vmatprep.subr.bf16.mxu0 %v13908_v50  ;;  %v13936_v50 = vld [vmem:[%s19912_s1 + $0x18] ss:$12 sps:$4 sm:$0xff]   ;;  %v13981_v28 = vld [vmem:[%s19912_s1 + $0xf0] ss:$12 sps:$4 sm:$0xff]  }
  0xb1   : > { %13462 = vmatpush3.bf16.msra.mxu1 %v13979_v62  ;;  %v14021_v62 = vld [vmem:[%s19912_s1 + $0x350] ss:$12 sps:$4 sm:$0xff]  }
  0xb2   : > { %13463 = vmatprep.subr.bf16.mxu1 %v13980_v36  ;;  %v13968_v36 = vld [vmem:[%s19912_s1 + $0xac] ss:$12 sps:$4 sm:$0xff]   ;;  %v13994_v51 = vld [vmem:[%s19912_s1 + $0x124] ss:$12 sps:$4 sm:$0xff]  }
  0xb3   : > { %2021 = vmatpush1.bf16.msra.mxu0 %v13906_v47  ;;  %v14006_v47 = vld [vmem:[%s19912_s1 + $0x308] ss:$12 sps:$4 sm:$0xff]  }
  0xb4   : > { %2022 = vmatprep.subr.bf16.mxu0 %v13913_v4  ;;  %v14007_v4 = vld [vmem:[%s19912_s1 + $0x3e0] ss:$12 sps:$4 sm:$0xff]  }
  0xb5   : > { %13464 = vmatpush3.bf16.msra.mxu1 %v13984_v30  ;;  %v13966_v30 = vld [vmem:[%s19912_s1 + $0xa8] ss:$12 sps:$4 sm:$0xff]  }
  0xb6   : > { %13465 = vmatprep.subr.bf16.mxu1 %v13985_v32  ;;  %v13973_v32 = vld [vmem:[%s19912_s1 + $0xc4] ss:$12 sps:$4 sm:$0xff]  }
  0xb7   : > { %2023 = vmatpush1.bf16.msra.mxu0 %v13911_v11  ;;  %v690_v11 = vrot.slane %v16139_v40, 1  ;;  %v14016_v40 = vld [vmem:[%s19912_s1 + $0x338] ss:$12 sps:$4 sm:$0xff]  }
  0xb8   : > { %2024 = vmatprep.subr.bf16.mxu0 %v13918_v16  ;;  %v13951_v16 = vld [vmem:[%s19912_s1 + $0x60] ss:$12 sps:$4 sm:$0xff]  }
  0xb9   : > { %13466 = vmatpush3.bf16.msra.mxu1 %v13989_v38  ;;  %v13978_v38 = vld [vmem:[%s19912_s1 + $0xdc] ss:$12 sps:$4 sm:$0xff]  }
  0xba   : > { %13467 = vmatprep.subr.bf16.mxu1 %v13991_v41  ;;  %v14037_v41 = vld [vmem:[%s19912_s1 + $0x470] ss:$12 sps:$4 sm:$0xff]  }
  0xbb   : > { %2025 = vmatpush1.bf16.msra.mxu0 %v13916_v25  ;;  %v16333_v25 = vcombine.low %v690_v11, %v692_v17  ;;  %v13961_v17 = vld [vmem:[%s19912_s1 + $0x90] ss:$12 sps:$4 sm:$0xff]  }
  0xbc   : > { %2026 = vmatprep.subr.bf16.mxu0 %v13923_v26  ;;  %v13963_v26 = vld [vmem:[%s19912_s1 + $0x94] ss:$12 sps:$4 sm:$0xff]  }
  0xbd   : > { %13468 = vmatpush3.bf16.msra.mxu1 %v13996_v46  ;;  %v14041_v46 = vld [vmem:[%s19912_s1 + $0x3b0] ss:$12 sps:$4 sm:$0xff]  }
  0xbe   : > { %13469 = vmatprep.subr.bf16.mxu1 %v13997_v49  ;;  %v14042_v49 = vld [vmem:[%s19912_s1 + $0x9c8] ss:$12 sps:$4 sm:$0xff]  }
  0xbf   : > { %2027 = vmatpush1.bf16.msra.mxu0 %v13921_v27  ;;  %v14026_v27 = vld [vmem:[%s19912_s1 + $0x368] ss:$12 sps:$4 sm:$0xff]  }
  0xc0   : > { %2028 = vmatprep.subr.bf16.mxu0 %v13928_v3  ;;  %v14027_v3 = vld [vmem:[%s19912_s1 + $0x440] ss:$12 sps:$4 sm:$0xff]  }
  0xc1   : > { %13470 = vmatpush3.bf16.msra.mxu1 %v14001_v19  ;;  %v14047_v19 = vld [vmem:[%s19912_s1 + $0x9e0] ss:$12 sps:$4 sm:$0xff]  }
  0xc3   : > { %2029 = vmatpush1.bf16.msra.mxu0 %v13926_v34  ;;  %v14031_v34 = vld [vmem:[%s19912_s1 + $0x380] ss:$12 sps:$4 sm:$0xff]  }
  0xc4   : > { %2985 = vmatprep.subr.bf16.mxu0 %v13933_v33  ;;  %3219 = vmatmul.mubr.bf16.vlgmr.msra.gmra.mrb[32].mxu1 %v16286_v63  ;;  %v14032_v33 = vld [vmem:[%s19912_s1 + $0x458] ss:$12 sps:$4 sm:$0xff]  }
  0xc5   : > { %3226 = vmatprep.mubr.bf16.mxu1 %v16300_v0 }
  0xc6   : > { %2031 = vmatmul.mubr.bf16.vlgmr.msra.gmra.mrb[0].mxu0 %v16030_v58  ;;  %v14002_v58 = vld [vmem:[%s19912_s1 + $0x3c8] ss:$12 sps:$4 sm:$0xff]  }
  0xc7   : > { %2986 = vmatpush1.bf16.msra.mxu0 %v13931_v39  ;;  %2040 = vmatprep.mubr.bf16.mxu0 %v16053_v22  ;;  %v13941_v22 = vld [vmem:[%s19912_s1 + $0x30] ss:$12 sps:$4 sm:$0xff]   ;;  %v14036_v39 = vld [vmem:[%s19912_s1 + $0x398] ss:$12 sps:$4 sm:$0xff]  }
  0xc8   : > { %2987 = vmatprep.subr.bf16.mxu0 %v13938_v43  ;;  %13483 = vmatprep.subr.bf16.mxu1 %v14002_v58  ;;  %v13976_v43 = vld [vmem:[%s19912_s1 + $0xd8] ss:$12 sps:$4 sm:$0xff]   ;;  %v16416_v58 = vcombine.low %v15937_v21, %v15937_v21 }
  0xc9   : > { %13484 = vmatpush3.bf16.msra.mxu1 %v14006_v47  ;;  %v13992_v47 = vld [vmem:[%s19912_s1 + $0x120] ss:$12 sps:$4 sm:$0xff]  }
  0xca   : > { %13485 = vmatprep.subr.bf16.mxu1 %v14007_v4  ;;  %v14000_v4 = vld [vmem:[%s19912_s1 + $0x13c] ss:$12 sps:$4 sm:$0xff]  }
  0xcb   : > { %2988 = vmatpush1.bf16.msra.mxu0 %v13936_v50  ;;  %v13988_v50 = vld [vmem:[%s19912_s1 + $0x10c] ss:$12 sps:$4 sm:$0xff]  }
  0xcc   : > { %2989 = vmatprep.subr.bf16.mxu0 %v13943_v56  ;;  %v14046_v56 = vld [vmem:[%s19912_s1 + $0x908] ss:$12 sps:$4 sm:$0xff]  }
  0xce   : > { %2041 = vmatmul.mubr.bf16.gmra.mrb[12].mxu0 %v16077_v12  ;;  %v14011_v12 = vld [vmem:[%s19912_s1 + $0x320] ss:$12 sps:$4 sm:$0xff]  }
  0xcf   : > { %2990 = vmatpush1.bf16.msra.mxu0 %v13941_v22  ;;  %3017 = vmatprep.mubr.bf16.mxu0 %v16083_v15  ;;  %v16323_v15 = vcombine.low %v15900_v1, %v15900_v1  ;;  %v13956_v1 = vld [vmem:[%s19912_s1 + $0x78] ss:$12 sps:$4 sm:$0xff]   ;;  %v14051_v22 = vld [vmem:[%s19912_s1 + $0x920] ss:$12 sps:$4 sm:$0xff]  }
  0xd0   : > { %2991 = vmatprep.subr.bf16.mxu0 %v13948_v60  ;;  %13486 = vmatpush3.bf16.msra.mxu1 %v14011_v12  ;;  %v14052_v60 = vld [vmem:[%s19912_s1 + $0x9f8] ss:$12 sps:$4 sm:$0xff]   ;;  %v14057_v12 = vld [vmem:[%s19912_s1 + $0xa10] ss:$12 sps:$4 sm:$0xff]  }
  0xd1   : > { %13487 = vmatprep.subr.bf16.mxu1 %v14012_v10  ;;  %3227 = vmatmul.mubr.bf16.gmra.mrb[36].mxu1 %v16323_v15  ;;  %v15434_v10 = vld [vmem:[#allocation2 + $0x30] sm:$0xff] }
  0xd2   : > { %3266 = vmatprep.mubr.bf16.mxu1 %v16333_v25  ;;  %v16449_v11 = vcombine.high %v16169_v57, %v15434_v10 }
  0xd3   : > { %2992 = vmatpush1.bf16.msra.mxu0 %v13946_v5  ;;  %v16440_v5 = vcombine.low %v16010_v53, %v16010_v53 }
  0xd4   : > { %2993 = vmatprep.subr.bf16.mxu0 %v13953_v9  ;;  %13488 = vmatpush3.bf16.msra.mxu1 %v14016_v40  ;;  %v14056_v9 = vld [vmem:[%s19912_s1 + $0x938] ss:$12 sps:$4 sm:$0xff]   ;;  %v14061_v40 = vld [vmem:[%s19912_s1 + $0x950] ss:$12 sps:$4 sm:$0xff]  }
  0xd5   : > { %13489 = vmatprep.subr.bf16.mxu1 %v14017_v24  ;;  %v14062_v24 = vld [vmem:[%s19912_s1 + $0xa28] ss:$12 sps:$4 sm:$0xff]  }
  0xd7   : > { %2994 = vmatpush1.bf16.msra.mxu0 %v13951_v16  ;;  %v13998_v16 = vld [vmem:[%s19912_s1 + $0x138] ss:$12 sps:$4 sm:$0xff]  }
  0xd8   : > { %2995 = vmatprep.subr.bf16.mxu0 %v13958_v23  ;;  %13490 = vmatpush3.bf16.msra.mxu1 %v14021_v62  ;;  %v14005_v23 = vld [vmem:[%s19912_s1 + $0x154] ss:$12 sps:$4 sm:$0xff]  }
  0xd9   : > { %13491 = vmatprep.subr.bf16.mxu1 %v14022_v61  ;;  %v14066_v62 = vld [vmem:[%s19912_s1 + $0x968] ss:$12 sps:$4 sm:$0xff]   ;;  %v14067_v61 = vld [vmem:[%s19912_s1 + $0xa40] ss:$12 sps:$4 sm:$0xff]  }
  0xdb   : > { %2996 = vmatpush1.bf16.msra.mxu0 %v13956_v1  ;;  %v14003_v1 = vld [vmem:[%s19912_s1 + $0x150] ss:$12 sps:$4 sm:$0xff]  }
  0xdc   : > { %2997 = vmatprep.subr.bf16.mxu0 %v13963_v26  ;;  %13492 = vmatpush3.bf16.msra.mxu1 %v14026_v27  ;;  %v14010_v26 = vld [vmem:[%s19912_s1 + $0x16c] ss:$12 sps:$4 sm:$0xff]  }
  0xdd   : > { %13493 = vmatprep.subr.bf16.mxu1 %v14027_v3  ;;  %v14071_v27 = vld [vmem:[%s19912_s1 + $0x980] ss:$12 sps:$4 sm:$0xff]   ;;  %v14072_v3 = vld [vmem:[%s19912_s1 + $0xa58] ss:$12 sps:$4 sm:$0xff]  }
  0xdf   : > { %2998 = vmatpush1.bf16.msra.mxu0 %v13961_v17  ;;  %v14008_v17 = vld [vmem:[%s19912_s1 + $0x168] ss:$12 sps:$4 sm:$0xff]  }
  0xe0   : > { %2999 = vmatprep.subr.bf16.mxu0 %v13968_v36  ;;  %13494 = vmatpush3.bf16.msra.mxu1 %v14031_v34  ;;  %v14015_v36 = vld [vmem:[%s19912_s1 + $0x184] ss:$12 sps:$4 sm:$0xff]  }
  0xe1   : > { %13495 = vmatprep.subr.bf16.mxu1 %v14032_v33  ;;  %v14076_v34 = vld [vmem:[%s19912_s1 + $0x998] ss:$12 sps:$4 sm:$0xff]   ;;  %v14077_v33 = vld [vmem:[%s19912_s1 + $0xa70] ss:$12 sps:$4 sm:$0xff]  }
  0xe3   : > { %3000 = vmatpush1.bf16.msra.mxu0 %v13966_v30  ;;  %v14013_v30 = vld [vmem:[%s19912_s1 + $0x180] ss:$12 sps:$4 sm:$0xff]  }
  0xe4   : > { %3001 = vmatprep.subr.bf16.mxu0 %v13973_v32  ;;  %13496 = vmatpush3.bf16.msra.mxu1 %v14036_v39  ;;  %v14020_v32 = vld [vmem:[%s19912_s1 + $0x19c] ss:$12 sps:$4 sm:$0xff]  }
  0xe5   : > { %13497 = vmatprep.subr.bf16.mxu1 %v14037_v41  ;;  %v14081_v39 = vld [vmem:[%s19912_s1 + $0x9b0] ss:$12 sps:$4 sm:$0xff]  }
  0xe6   : > { %v14023_v41 = vld [vmem:[%s19912_s1 + $0x1b0] ss:$12 sps:$4 sm:$0xff]  }
  0xe7   : > { %3002 = vmatpush1.bf16.msra.mxu0 %v13971_v35  ;;  %v14018_v35 = vld [vmem:[%s19912_s1 + $0x198] ss:$12 sps:$4 sm:$0xff]  }
  0xe8   : > { %3003 = vmatprep.subr.bf16.mxu0 %v13978_v38  ;;  %13498 = vmatpush3.bf16.msra.mxu1 %v14041_v46  ;;  %v14025_v38 = vld [vmem:[%s19912_s1 + $0x1b4] ss:$12 sps:$4 sm:$0xff]  }
  0xe9   : > { %13511 = vmatprep.subr.bf16.mxu1 %v14042_v49  ;;  %v14028_v46 = vld [vmem:[%s19912_s1 + $0x1c8] ss:$12 sps:$4 sm:$0xff]   ;;  %v14035_v49 = vld [vmem:[%s19912_s1 + $0x1e4] ss:$12 sps:$4 sm:$0xff]  }
  0xeb   : > { %3004 = vmatpush1.bf16.msra.mxu0 %v13976_v43  ;;  %3267 = vmatmul.mubr.bf16.vlgmr.msra.gmra.mrb[40].mxu1 %v16406_v54  ;;  %v16522_v43 = vcombine.low %v16169_v57, %v15434_v10  ;;  %v16536_v57 = vcombine.high %v16079_v13, %v16079_v13  ;;  %v14092_v13 = vld [vmem:[%s19912_s1 + $0xb78] ss:$12 sps:$4 sm:$0xff]   ;;  %v14107_v10 = vld [vmem:[%s19912_s1 + $0xbc0] ss:$12 sps:$4 sm:$0xff]  }
  0xec   : > { %3005 = vmatprep.subr.bf16.mxu0 %v13983_v45  ;;  %13512 = vmatpush3.bf16.msra.mxu1 %v14046_v56  ;;  %v14087_v45 = vld [vmem:[%s19912_s1 + $0xb60] ss:$12 sps:$4 sm:$0xff]  }
  0xed   : > { %13513 = vmatprep.subr.bf16.mxu1 %v14047_v19  ;;  %3274 = vmatprep.mubr.bf16.mxu1 %v16416_v58  ;;  %v15435_v56 = vld [vmem:[#allocation2] sm:$0xff] }
  0xee   : > { %v16556_v19 = vcombine.low %v15435_v56, %v15435_v56 }
  0xef   : > { %3006 = vmatpush1.bf16.msra.mxu0 %v13981_v28  ;;  %v14033_v28 = vld [vmem:[%s19912_s1 + $0x1e0] ss:$12 sps:$4 sm:$0xff]  }
  0xf0   : > { %3007 = vmatprep.subr.bf16.mxu0 %v13988_v50  ;;  %13514 = vmatpush3.bf16.msra.mxu1 %v14051_v22  ;;  %v14040_v50 = vld [vmem:[%s19912_s1 + $0x1fc] ss:$12 sps:$4 sm:$0xff]   ;;  %v14038_v22 = vld [vmem:[%s19912_s1 + $0x1f8] ss:$12 sps:$4 sm:$0xff]  }
  0xf1   : > { %13515 = vmatprep.subr.bf16.mxu1 %v14052_v60  ;;  %v14045_v60 = vld [vmem:[%s19912_s1 + $0x214] ss:$12 sps:$4 sm:$0xff]  }
  0xf3   : > { %3008 = vmatpush1.bf16.msra.mxu0 %v13986_v18  ;;  %3275 = vmatmul.mubr.bf16.gmra.mrb[44].mxu1 %v16440_v5  ;;  %v14097_v18 = vld [vmem:[%s19912_s1 + $0xb90] ss:$12 sps:$4 sm:$0xff]  }
  0xf4   : > { %3009 = vmatprep.subr.bf16.mxu0 %v13994_v51  ;;  %13516 = vmatpush3.bf16.msra.mxu1 %v14056_v9  ;;  %v16566_v51 = vcombine.low %v15863_v37, %v15908_v6  ;;  %v14102_v37 = vld [vmem:[%s19912_s1 + $0xba8] ss:$12 sps:$4 sm:$0xff]   ;;  %v14050_v9 = vld [vmem:[%s19912_s1 + $0x22c] ss:$12 sps:$4 sm:$0xff]  }
  0xf5   : > { %13517 = vmatprep.subr.bf16.mxu1 %v14057_v12  ;;  %4452 = vmatprep.mubr.bf16.mxu1 %v16449_v11  ;;  %v578_v6 = vld [vmem:[#allocation2 + $0x48] sm:$0x11] }
  0xf6   : > { %v14106_v12 = vld [vmem:[%s19912_s1 + $0xae8] ss:$12 sps:$4 sm:$0xff]  }
  0xf7   : > { %3010 = vmatpush1.bf16.msra.mxu0 %v13992_v47  ;;  %v14101_v47 = vld [vmem:[%s19912_s1 + $0xad0] ss:$12 sps:$4 sm:$0xff]  }
  0xf8   : > { %3011 = vmatprep.subr.bf16.mxu0 %v14000_v4  ;;  %13518 = vmatpush3.bf16.msra.mxu1 %v14061_v40  ;;  %v14043_v4 = vld [vmem:[%s19912_s1 + $0x210] ss:$12 sps:$4 sm:$0xff]  }
  0xf9   : > { %13519 = vmatprep.subr.bf16.mxu1 %v14062_v24  ;;  %v14055_v40 = vld [vmem:[%s19912_s1 + $0x244] ss:$12 sps:$4 sm:$0xff]   ;;  %v14111_v24 = vld [vmem:[%s19912_s1 + $0xb00] ss:$12 sps:$4 sm:$0xff]  }
  0xfb   : > { %3012 = vmatpush1.bf16.msra.mxu0 %v13998_v16  ;;  %v16594_v16 = vcombine.high %v15435_v56, %v578_v6 }
  0xfc   : > { %3013 = vmatprep.subr.bf16.mxu0 %v14005_v23  ;;  %13520 = vmatpush3.bf16.msra.mxu1 %v14066_v62  ;;  %v14048_v23 = vld [vmem:[%s19912_s1 + $0x228] ss:$12 sps:$4 sm:$0xff]   ;;  %v14053_v62 = vld [vmem:[%s19912_s1 + $0x240] ss:$12 sps:$4 sm:$0xff]  }
  0xfd   : > { %13521 = vmatprep.subr.bf16.mxu1 %v14067_v61  ;;  %v14060_v61 = vld [vmem:[%s19912_s1 + $0x25c] ss:$12 sps:$4 sm:$0xff]  }
  0xff   : > { %3014 = vmatpush1.bf16.msra.mxu0 %v14003_v1  ;;  %v14112_v1 = vld [vmem:[%s19912_s1 + $0xbd8] ss:$12 sps:$4 sm:$0xff]  }
 0x100   : > { %3015 = vmatprep.subr.bf16.mxu0 %v14010_v26  ;;  %13522 = vmatpush3.bf16.msra.mxu1 %v14071_v27  ;;  %v685_v26 = vshll.u32 %v16594_v16, 16  ;;  %v14117_v27 = vld [vmem:[%s19912_s1 + $0xbf0] ss:$12 sps:$4 sm:$0xff]  }
 0x101   : > { %13523 = vmatprep.subr.bf16.mxu1 %v14072_v3  ;;  %v683_v3 = vshrl.u32 %v16594_v16, 16 }
 0x103   : > { %3016 = vmatpush1.bf16.msra.mxu0 %v14008_v17  ;;  %v16615_v17 = vcombine.low %v15435_v56, %v578_v6  ;;  %v14132_v56 = vld [vmem:[%s19912_s1 + $0xcf8] ss:$12 sps:$4 sm:$0xff]   ;;  %v16685_v6 = vcombine.low %v15937_v21, %v16033_v59  ;;  %v14083_v21 = vld [vmem:[%s19912_s1 + $0x2d0] ss:$12 sps:$4 sm:$0xff]  }
 0x104   : > { %3036 = vmatprep.subr.bf16.mxu0 %v14015_v36  ;;  %13524 = vmatpush3.bf16.msra.mxu1 %v14076_v34  ;;  %v14116_v36 = vld [vmem:[%s19912_s1 + $0xb18] ss:$12 sps:$4 sm:$0xff]   ;;  %v14065_v34 = vld [vmem:[%s19912_s1 + $0x274] ss:$12 sps:$4 sm:$0xff]  }
 0x105   : > { %13525 = vmatprep.subr.bf16.mxu1 %v14077_v33  ;;  %v678_v33 = vshll.u32 %v16615_v17, 16  ;;  %v14090_v59 = vld [vmem:[%s19912_s1 + $0x2ec] ss:$12 sps:$4 sm:$0xff]  }
 0x106   : > { %3018 = vmatmul.mubr.bf16.vlgmr.msra.gmra.mrb[0].mxu0 %v16161_v55  ;;  %v14082_v55 = vld [vmem:[%s19912_s1 + $0xb48] ss:$12 sps:$4 sm:$0xff]  }
 0x107   : > { %3037 = vmatpush1.bf16.msra.mxu0 %v14013_v30  ;;  %3027 = vmatprep.mubr.bf16.mxu0 %v16173_v20  ;;  %v14030_v20 = vld [vmem:[%s19912_s1 + $0x1cc] ss:$12 sps:$4 sm:$0xff]   ;;  %v687_v30 = vrot.slane %v685_v26, 1 }
 0x108   : > { %3038 = vmatprep.subr.bf16.mxu0 %v14020_v32  ;;  %13526 = vmatpush3.bf16.msra.mxu1 %v14081_v39  ;;  %v14058_v32 = vld [vmem:[%s19912_s1 + $0x258] ss:$12 sps:$4 sm:$0xff]  }
 0x109   : > { %13539 = vmatprep.subr.bf16.mxu1 %v14082_v55  ;;  %v688_v39 = vor.u32 %v687_v30, %v683_v3  ;;  %v14063_v55 = vld [vmem:[%s19912_s1 + $0x270] ss:$12 sps:$4 sm:$0xff]   ;;  %v14093_v3 = vld [vmem:[%s19912_s1 + $0x300] ss:$12 sps:$4 sm:$0xff]  }
 0x10a   : > { %v14100_v30 = vld [vmem:[%s19912_s1 + $0x31c] ss:$12 sps:$4 sm:$0xff]  }
 0x10b   : > { %3039 = vmatpush1.bf16.msra.mxu0 %v14018_v35  ;;  %4453 = vmatmul.mubr.bf16.vlgmr.msra.gmra.mrb[48].mxu1 %v16522_v43  ;;  %v14121_v35 = vld [vmem:[%s19912_s1 + $0xb30] ss:$12 sps:$4 sm:$0xff]  }
 0x10c   : > { %3040 = vmatprep.subr.bf16.mxu0 %v14025_v38  ;;  %13540 = vmatpush3.bf16.msra.mxu1 %v14086_v44  ;;  %v14122_v38 = vld [vmem:[%s19912_s1 + $0xcc8] ss:$12 sps:$4 sm:$0xff]   ;;  %v680_v44 = vrot.slane %v678_v33, 1  ;;  %v14098_v33 = vld [vmem:[%s19912_s1 + $0x318] ss:$12 sps:$4 sm:$0xff]  }
 0x10d   : > { %13541 = vmatprep.subr.bf16.mxu1 %v14087_v45  ;;  %4460 = vmatprep.mubr.bf16.mxu1 %v16536_v57  ;;  %v14126_v45 = vld [vmem:[%s19912_s1 + $0xc08] ss:$12 sps:$4 sm:$0xff]  }
 0x10e   : > { %3028 = vmatmul.mubr.bf16.gmra.mrb[16].mxu0 %v16195_v48  ;;  %v14091_v48 = vld [vmem:[%s19912_s1 + $0xaa0] ss:$12 sps:$4 sm:$0xff]  }
 0x10f   : > { %3041 = vmatpush1.bf16.msra.mxu0 %v14023_v41  ;;  %3068 = vmatprep.mubr.bf16.mxu0 %v16207_v2  ;;  %v14096_v2 = vld [vmem:[%s19912_s1 + $0xab8] ss:$12 sps:$4 sm:$0xff]  }
 0x110   : > { %3042 = vmatprep.subr.bf16.mxu0 %v14030_v20  ;;  %13542 = vmatpush3.bf16.msra.mxu1 %v14091_v48  ;;  %v14070_v41 = vld [vmem:[%s19912_s1 + $0x28c] ss:$12 sps:$4 sm:$0xff]   ;;  %v676_v20 = vshrl.u32 %v16615_v17, 16  ;;  %v14068_v48 = vld [vmem:[%s19912_s1 + $0x288] ss:$12 sps:$4 sm:$0xff]  }
 0x111   : > { %13543 = vmatprep.subr.bf16.mxu1 %v14092_v13  ;;  %v14075_v13 = vld [vmem:[%s19912_s1 + $0x2a4] ss:$12 sps:$4 sm:$0xff]  }
 0x113   : > { %3043 = vmatpush1.bf16.msra.mxu0 %v14028_v46  ;;  %4461 = vmatmul.mubr.bf16.gmra.mrb[52].mxu1 %v16556_v19  ;;  %v14127_v46 = vld [vmem:[%s19912_s1 + $0xce0] ss:$12 sps:$4 sm:$0xff]  }
 0x114   : > { %3044 = vmatprep.subr.bf16.mxu0 %v14035_v49  ;;  %13544 = vmatpush3.bf16.msra.mxu1 %v14096_v2  ;;  %v16650_v49 = vcombine.low %v688_v39, %v688_v39  ;;  %v14073_v2 = vld [vmem:[%s19912_s1 + $0x2a0] ss:$12 sps:$4 sm:$0xff]   ;;  %v698_v39 = vrot.slane %v16594_v16, 1  ;;  %v697_v16 = vrot.slane %v16615_v17, 1  ;;  %v14118_v17 = vld [vmem:[%s19912_s1 + $0x378] ss:$12 sps:$4 sm:$0xff]  }
 0x115   : > { %13545 = vmatprep.subr.bf16.mxu1 %v14097_v18  ;;  %4500 = vmatprep.mubr.bf16.mxu1 %v16566_v51  ;;  %v14080_v18 = vld [vmem:[%s19912_s1 + $0x2bc] ss:$12 sps:$4 sm:$0xff]  }
 0x117   : > { %3045 = vmatpush1.bf16.msra.mxu0 %v14033_v28  ;;  %v681_v28 = vor.u32 %v680_v44, %v676_v20  ;;  %v14120_v20 = vld [vmem:[%s19912_s1 + $0x37c] ss:$12 sps:$4 sm:$0xff]   ;;  %v16779_v44 = vcombine.low %v697_v16, %v697_v16 }
 0x118   : > { %3046 = vmatprep.subr.bf16.mxu0 %v14040_v50  ;;  %13546 = vmatpush3.bf16.msra.mxu1 %v14101_v47  ;;  %v14131_v50 = vld [vmem:[%s19912_s1 + $0xc20] ss:$12 sps:$4 sm:$0xff]   ;;  %v14078_v47 = vld [vmem:[%s19912_s1 + $0x2b8] ss:$12 sps:$4 sm:$0xff]  }
 0x119   : > { %13547 = vmatprep.subr.bf16.mxu1 %v14102_v37  ;;  %v14137_v37 = vld [vmem:[%s19912_s1 + $0xd10] ss:$12 sps:$4 sm:$0xff]  }
 0x11b   : > { %3047 = vmatpush1.bf16.msra.mxu0 %v14038_v22  ;;  %v16672_v22 = vcombine.low %v681_v28, %v681_v28 }
 0x11c   : > { %3048 = vmatprep.subr.bf16.mxu0 %v14045_v60  ;;  %13548 = vmatpush3.bf16.msra.mxu1 %v14106_v12  ;;  %v14136_v60 = vld [vmem:[%s19912_s1 + $0xc38] ss:$12 sps:$4 sm:$0xff]   ;;  %v14142_v12 = vld [vmem:[%s19912_s1 + $0xd28] ss:$12 sps:$4 sm:$0xff]  }
 0x11d   : > { %13549 = vmatprep.subr.bf16.mxu1 %v14107_v10 }
 0x11f   : > { %3049 = vmatpush1.bf16.msra.mxu0 %v14043_v4  ;;  %v14085_v4 = vld [vmem:[%s19912_s1 + $0x2d4] ss:$12 sps:$4 sm:$0xff]  }
 0x120   : > { %3050 = vmatprep.subr.bf16.mxu0 %v14050_v9  ;;  %13550 = vmatpush3.bf16.msra.mxu1 %v14111_v24  ;;  %v14141_v9 = vld [vmem:[%s19912_s1 + $0xc50] ss:$12 sps:$4 sm:$0xff]  }
 0x121   : > { %13551 = vmatprep.subr.bf16.mxu1 %v14112_v1  ;;  %v14088_v1 = vld [vmem:[%s19912_s1 + $0x2e8] ss:$12 sps:$4 sm:$0xff]  }
 0x123   : > { %3051 = vmatpush1.bf16.msra.mxu0 %v14048_v23  ;;  %v14146_v23 = vld [vmem:[%s19912_s1 + $0xc68] ss:$12 sps:$4 sm:$0xff]  }
 0x124   : > { %3052 = vmatprep.subr.bf16.mxu0 %v14055_v40  ;;  %13552 = vmatpush3.bf16.msra.mxu1 %v14116_v36  ;;  %v14147_v40 = vld [vmem:[%s19912_s1 + $0xd40] ss:$12 sps:$4 sm:$0xff]  }
 0x125   : > { %13553 = vmatprep.subr.bf16.mxu1 %v14117_v27  ;;  %v14151_v36 = vld [vmem:[%s19912_s1 + $0xc80] ss:$12 sps:$4 sm:$0xff]   ;;  %v14152_v27 = vld [vmem:[%s19912_s1 + $0xd58] ss:$12 sps:$4 sm:$0xff]  }
 0x127   : > { %3053 = vmatpush1.bf16.msra.mxu0 %v14053_v62  ;;  %v14095_v62 = vld [vmem:[%s19912_s1 + $0x304] ss:$12 sps:$4 sm:$0xff]  }
 0x128   : > { %3054 = vmatprep.subr.bf16.mxu0 %v14060_v61  ;;  %13554 = vmatpush3.bf16.msra.mxu1 %v14121_v35  ;;  %v14105_v35 = vld [vmem:[%s19912_s1 + $0x334] ss:$12 sps:$4 sm:$0xff]  }
 0x129   : > { %13567 = vmatprep.subr.bf16.mxu1 %v14122_v38  ;;  %v14161_v38 = vld [vmem:[%s19912_s1 + $0xcb0] ss:$12 sps:$4 sm:$0xff]  }
 0x12b   : > { %3055 = vmatpush1.bf16.msra.mxu0 %v14058_v32  ;;  %4501 = vmatmul.mubr.bf16.vlgmr.msra.gmra.mrb[56].mxu1 %v15911_v7  ;;  %v16704_v10 = vpop.f32.mrb[4].mxu0  ;;  %v14156_v32 = vld [vmem:[%s19912_s1 + $0xc98] ss:$12 sps:$4 sm:$0xff]  }
 0x12c   : > { %3056 = vmatprep.subr.bf16.mxu0 %v14065_v34  ;;  %13568 = vmatpush3.bf16.msra.mxu1 %v14126_v45  ;;  %v16712_v24 = vpop.f32.mrb[5].mxu0  ;;  %v14157_v34 = vld [vmem:[%s19912_s1 + $0xd70] ss:$12 sps:$4 sm:$0xff]  }
 0x12d   : > { %13569 = vmatprep.subr.bf16.mxu1 %v14127_v46  ;;  %4508 = vmatprep.mubr.bf16.mxu1 %v16650_v49  ;;  %v1944_v26 = vpop.f32.mrb[6].mxu0  ;;  %v14123_v45 = vld [vmem:[%s19912_s1 + $0x390] ss:$12 sps:$4 sm:$0xff]   ;;  %v14130_v46 = vld [vmem:[%s19912_s1 + $0x3ac] ss:$12 sps:$4 sm:$0xff]  }
 0x12e   : > { %v1945_v61 = vpop.f32.mrb[7].mxu0  ;;  %v14162_v26 = vld [vmem:[%s19912_s1 + $0x450] ss:$12 sps:$4 sm:$0xff]  }
 0x12f   : > { %3057 = vmatpush1.bf16.msra.mxu0 %v14063_v55  ;;  %v16752_v55 = vcombine.low %v16010_v53, %v16060_v8  ;;  %v14108_v53 = vld [vmem:[%s19912_s1 + $0x348] ss:$12 sps:$4 sm:$0xff]   ;;  %v14115_v8 = vld [vmem:[%s19912_s1 + $0x364] ss:$12 sps:$4 sm:$0xff]  }
 0x130   : > { %3058 = vmatprep.subr.bf16.mxu0 %v14070_v41  ;;  %13570 = vmatpush3.bf16.msra.mxu1 %v14131_v50  ;;  %v16760_v41 = vcombine.low %v698_v39, %v698_v39  ;;  %v14165_v61 = vld [vmem:[%s19912_s1 + $0x468] ss:$12 sps:$4 sm:$0xff]  }
 0x131   : > { %13571 = vmatprep.subr.bf16.mxu1 %v14132_v56 }
 0x133   : > { %3059 = vmatpush1.bf16.msra.mxu0 %v14068_v48  ;;  %4509 = vmatmul.mubr.bf16.gmra.mrb[60].mxu1 %v16672_v22  ;;  %v14128_v48 = vld [vmem:[%s19912_s1 + $0x3a8] ss:$12 sps:$4 sm:$0xff]  }
 0x134   : > { %3060 = vmatprep.subr.bf16.mxu0 %v14075_v13  ;;  %13572 = vmatpush3.bf16.msra.mxu1 %v14136_v60  ;;  %v14135_v13 = vld [vmem:[%s19912_s1 + $0x3c4] ss:$12 sps:$4 sm:$0xff]   ;;  %v14140_v60 = vld [vmem:[%s19912_s1 + $0x3dc] ss:$12 sps:$4 sm:$0xff]  }
 0x135   : > { %13573 = vmatprep.subr.bf16.mxu1 %v14137_v37  ;;  %4548 = vmatprep.mubr.bf16.mxu1 %v16685_v6 }
 0x137   : > { %3061 = vmatpush1.bf16.msra.mxu0 %v14073_v2 }
 0x138   : > { %3062 = vmatprep.subr.bf16.mxu0 %v14080_v18  ;;  %13574 = vmatpush3.bf16.msra.mxu1 %v14141_v9  ;;  %v14133_v18 = vld [vmem:[%s19912_s1 + $0x3c0] ss:$12 sps:$4 sm:$0xff]  }
 0x139   : > { %13575 = vmatprep.subr.bf16.mxu1 %v14142_v12  ;;  %v14145_v9 = vld [vmem:[%s19912_s1 + $0x3f4] ss:$12 sps:$4 sm:$0xff]   ;;  %v14143_v12 = vld [vmem:[%s19912_s1 + $0x3f0] ss:$12 sps:$4 sm:$0xff]  }
 0x13b   : > { %3063 = vmatpush1.bf16.msra.mxu0 %v14078_v47 }
 0x13c   : > { %3064 = vmatprep.subr.bf16.mxu0 %v14085_v4  ;;  %13576 = vmatpush3.bf16.msra.mxu1 %v14146_v23  ;;  %v14138_v4 = vld [vmem:[%s19912_s1 + $0x3d8] ss:$12 sps:$4 sm:$0xff]   ;;  %v14153_v23 = vld [vmem:[%s19912_s1 + $0x420] ss:$12 sps:$4 sm:$0xff]  }
 0x13d   : > { %13577 = vmatprep.subr.bf16.mxu1 %v14147_v40  ;;  %v14160_v40 = vld [vmem:[%s19912_s1 + $0x43c] ss:$12 sps:$4 sm:$0xff]  }
 0x13f   : > { %3065 = vmatpush1.bf16.msra.mxu0 %v14083_v21  ;;  %v14150_v21 = vld [vmem:[%s19912_s1 + $0x40c] ss:$12 sps:$4 sm:$0xff]  }
 0x140   : > { %3066 = vmatprep.subr.bf16.mxu0 %v14090_v59  ;;  %13578 = vmatpush3.bf16.msra.mxu1 %v14151_v36  ;;  %v14148_v59 = vld [vmem:[%s19912_s1 + $0x408] ss:$12 sps:$4 sm:$0xff]   ;;  %v14170_v36 = vld [vmem:[%s19912_s1 + $0x904] ss:$12 sps:$4 sm:$0xff]  }
 0x141   : > { %13579 = vmatprep.subr.bf16.mxu1 %v14152_v27  ;;  %v14168_v27 = vld [vmem:[%s19912_s1 + $0x900] ss:$12 sps:$4 sm:$0xff]  }
 0x143   : > { %3067 = vmatpush1.bf16.msra.mxu0 %v14088_v1  ;;  %v14164_v1 = vld [vmem:[%s19912_s1 + $0x454] ss:$12 sps:$4 sm:$0xff]  }
 0x144   : > { %3087 = vmatprep.subr.bf16.mxu0 %v14095_v62  ;;  %13580 = vmatpush3.bf16.msra.mxu1 %v14156_v32  ;;  %v14167_v62 = vld [vmem:[%s19912_s1 + $0x46c] ss:$12 sps:$4 sm:$0xff]   ;;  %v14176_v32 = vld [vmem:[%s19912_s1 + $0x934] ss:$12 sps:$4 sm:$0xff]  }
 0x145   : > { %13581 = vmatprep.subr.bf16.mxu1 %v14157_v34  ;;  %v14174_v34 = vld [vmem:[%s19912_s1 + $0x930] ss:$12 sps:$4 sm:$0xff]  }
 0x146   : > { %3069 = vmatmul.mubr.bf16.vlgmr.msra.gmra.mrb[0].mxu0 %v16286_v63  ;;  %v14103_v63 = vld [vmem:[%s19912_s1 + $0x330] ss:$12 sps:$4 sm:$0xff]  }
 0x147   : > { %3088 = vmatpush1.bf16.msra.mxu0 %v14093_v3  ;;  %3078 = vmatprep.mubr.bf16.mxu0 %v16300_v0  ;;  %v14110_v0 = vld [vmem:[%s19912_s1 + $0x34c] ss:$12 sps:$4 sm:$0xff]   ;;  %v14173_v3 = vld [vmem:[%s19912_s1 + $0x91c] ss:$12 sps:$4 sm:$0xff]  }
 0x148   : > { %3089 = vmatprep.subr.bf16.mxu0 %v14100_v30  ;;  %13582 = vmatpush3.bf16.msra.mxu1 %v14161_v38  ;;  %v14171_v30 = vld [vmem:[%s19912_s1 + $0x918] ss:$12 sps:$4 sm:$0xff]   ;;  %v13359_v38 = vpop.f32.mrb[0].mxu1 }
 0x149   : > { %v13360_v39 = vpop.f32.mrb[1].mxu1 }
 0x14b   : > { %3090 = vmatpush1.bf16.msra.mxu0 %v14098_v33  ;;  %4549 = vmatmul.mubr.bf16.vlgmr.msra.gmra.mrb[64].mxu1 %v16752_v55  ;;  %v14182_v33 = vld [vmem:[%s19912_s1 + $0x964] ss:$12 sps:$4 sm:$0xff]  }
 0x14c   : > { %3091 = vmatprep.subr.bf16.mxu0 %v14105_v35  ;;  %4556 = vmatprep.mubr.bf16.mxu1 %v16760_v41  ;;  %v14180_v35 = vld [vmem:[%s19912_s1 + $0x960] ss:$12 sps:$4 sm:$0xff]  }
 0x14e   : > { %3079 = vmatmul.mubr.bf16.gmra.mrb[20].mxu0 %v16323_v15  ;;  %v14113_v15 = vld [vmem:[%s19912_s1 + $0x360] ss:$12 sps:$4 sm:$0xff]  }
 0x14f   : > { %3092 = vmatpush1.bf16.msra.mxu0 %v14103_v63  ;;  %3119 = vmatprep.mubr.bf16.mxu0 %v16333_v25  ;;  %v14125_v25 = vld [vmem:[%s19912_s1 + $0x394] ss:$12 sps:$4 sm:$0xff]   ;;  %v13361_v63 = vadd.f32 %v13360_v39, %v13359_v38 }
 0x150   : > { %3093 = vmatprep.subr.bf16.mxu0 %v14110_v0  ;;  %v13362_v0 = vpop.f32.mrb[2].mxu1 }
 0x153   : > { %3094 = vmatpush1.bf16.msra.mxu0 %v14108_v53  ;;  %4557 = vmatmul.mubr.bf16.gmra.mrb[68].mxu1 %v16779_v44  ;;  %v13363_v53 = vpop.f32.mrb[3].mxu1 }
 0x154   : > { %3095 = vmatprep.subr.bf16.mxu0 %v14115_v8  ;;  %v14188_v8 = vld [vmem:[%s19912_s1 + $0x994] ss:$12 sps:$4 sm:$0xff]   ;;  %v13364_v16 = vadd.f32 %v13363_v53, %v13362_v0 }
 0x157   : > { %3096 = vmatpush1.bf16.msra.mxu0 %v14113_v15  ;;  %v13365_v15 = vpop.f32.mrb[4].mxu1 }
 0x158   : > { %3097 = vmatprep.subr.bf16.mxu0 %v14120_v20  ;;  %v13366_v20 = vpop.f32.mrb[5].mxu1 }
 0x15b   : > { %3098 = vmatpush1.bf16.msra.mxu0 %v14118_v17  ;;  %v13367_v17 = vadd.f32 %v13366_v20, %v13365_v15 }
 0x15c   : > { %3099 = vmatprep.subr.bf16.mxu0 %v14125_v25  ;;  %v13368_v25 = vpop.f32.mrb[6].mxu1 }
 0x15f   : > { %3100 = vmatpush1.bf16.msra.mxu0 %v14123_v45  ;;  %v13369_v45 = vpop.f32.mrb[7].mxu1 }
 0x160   : > { %3101 = vmatprep.subr.bf16.mxu0 %v14130_v46  ;;  %v14186_v46 = vld [vmem:[%s19912_s1 + $0x990] ss:$12 sps:$4 sm:$0xff]  }
 0x161   : > { %v1991_v28 = vpop.f32.mrb[8].mxu0 }
 0x162   : > { %v16801_v50 = vadd.f32 %v1991_v28, %v16704_v10  ;;  %v1993_v56 = vpop.f32.mrb[9].mxu0  ;;  %v14155_v10 = vld [vmem:[%s19912_s1 + $0x424] ss:$12 sps:$4 sm:$0xff]  }
 0x163   : > { %v16804_v2 = vadd.f32 %v1993_v56, %v16712_v24  ;;  %3102 = vmatpush1.bf16.msra.mxu0 %v14128_v48  ;;  %v1995_v47 = vpop.f32.mrb[10].mxu0  ;;  %v14158_v24 = vld [vmem:[%s19912_s1 + $0x438] ss:$12 sps:$4 sm:$0xff]   ;;  %v14189_v56 = vld [vmem:[%s19912_s1 + $0x9a8] ss:$12 sps:$4 sm:$0xff]  }
 0x164   : > { %3103 = vmatprep.subr.bf16.mxu0 %v14135_v13  ;;  %v1996_v37 = vpop.f32.mrb[11].mxu0  ;;  %v14191_v48 = vld [vmem:[%s19912_s1 + $0x9ac] ss:$12 sps:$4 sm:$0xff]   ;;  %v13387_v13 = vpop.f32.mrb[8].mxu1 }
 0x165   : > { %v13388_v28 = vpop.f32.mrb[9].mxu1 }
 0x167   : > { %3104 = vmatpush1.bf16.msra.mxu0 %v14133_v18  ;;  %v13389_v18 = vadd.f32 %v13388_v28, %v13387_v13  ;;  %v14206_v13 = vld [vmem:[%s19912_s1 + $0xa24] ss:$12 sps:$4 sm:$0xff]  }
 0x168   : > { %3105 = vmatprep.subr.bf16.mxu0 %v14140_v60  ;;  %v13390_v60 = vpop.f32.mrb[10].mxu1 }
 0x169   : > { %v13391_v47 = vpop.f32.mrb[11].mxu1  ;;  %v2132_v37 = vadd.f32 %v13389_v18, %v13361_v63 }
 0x16b   : > { %3106 = vmatpush1.bf16.msra.mxu0 %v14138_v4  ;;  %v13392_v4 = vadd.f32 %v13391_v47, %v13390_v60 }
 0x16c   : > { %3107 = vmatprep.subr.bf16.mxu0 %v14145_v9  ;;  %v13393_v9 = vpop.f32.mrb[12].mxu1 }
 0x16f   : > { %3108 = vmatpush1.bf16.msra.mxu0 %v14143_v12  ;;  %v14194_v12 = vld [vmem:[%s19912_s1 + $0x9c4] ss:$12 sps:$4 sm:$0xff]  }
 0x170   : > { %3109 = vmatprep.subr.bf16.mxu0 %v14150_v21  ;;  %v13394_v21 = vpop.f32.mrb[13].mxu1 }
 0x173   : > { %3110 = vmatpush1.bf16.msra.mxu0 %v14148_v59 }
 0x174   : > { %3111 = vmatprep.subr.bf16.mxu0 %v14155_v10  ;;  %v2135_v10 = vadd.f32 %v13392_v4, %v13364_v16  ;;  %v14203_v16 = vld [vmem:[%s19912_s1 + $0xa0c] ss:$12 sps:$4 sm:$0xff]  }
 0x177   : > { %3112 = vmatpush1.bf16.msra.mxu0 %v14153_v23  ;;  %v13395_v23 = vadd.f32 %v13394_v21, %v13393_v9  ;;  %v14209_v21 = vld [vmem:[%s19912_s1 + $0xa3c] ss:$12 sps:$4 sm:$0xff]  }
 0x178   : > { %3113 = vmatprep.subr.bf16.mxu0 %v14160_v40  ;;  %v13396_v40 = vpop.f32.mrb[14].mxu1 }
 0x17b   : > { %3114 = vmatpush1.bf16.msra.mxu0 %v14158_v24 }
 0x17c   : > { %3115 = vmatprep.subr.bf16.mxu0 %v14164_v1 }
 0x17f   : > { %3116 = vmatpush1.bf16.msra.mxu0 %v14162_v26  ;;  %v13397_v26 = vpop.f32.mrb[15].mxu1 }
 0x180   : > { %3117 = vmatprep.subr.bf16.mxu0 %v14167_v62 }
 0x183   : > { %3118 = vmatpush1.bf16.msra.mxu0 %v14165_v61  ;;  %v14192_v61 = vld [vmem:[%s19912_s1 + $0x9c0] ss:$12 sps:$4 sm:$0xff]  }
 0x184   : > { %4267 = vmatprep.subr.bf16.mxu0 %v14170_v36  ;;  %v14197_v36 = vld [vmem:[%s19912_s1 + $0x9dc] ss:$12 sps:$4 sm:$0xff]  }
 0x186   : > { %3120 = vmatmul.mubr.bf16.vlgmr.msra.gmra.mrb[0].mxu0 %v16406_v54  ;;  %v14179_v54 = vld [vmem:[%s19912_s1 + $0x94c] ss:$12 sps:$4 sm:$0xff]  }
 0x187   : > { %4268 = vmatpush1.bf16.msra.mxu0 %v14168_v27  ;;  %3129 = vmatprep.mubr.bf16.mxu0 %v16416_v58  ;;  %v14177_v58 = vld [vmem:[%s19912_s1 + $0x948] ss:$12 sps:$4 sm:$0xff]  }
 0x188   : > { %4269 = vmatprep.subr.bf16.mxu0 %v14173_v3  ;;  %v2140_v3 = vadd.f32 %v13395_v23, %v13367_v17 }
 0x18b   : > { %4270 = vmatpush1.bf16.msra.mxu0 %v14171_v30  ;;  %v13415_v30 = vpop.f32.mrb[16].mxu1 }
 0x18c   : > { %4271 = vmatprep.subr.bf16.mxu0 %v14176_v32  ;;  %v13416_v32 = vpop.f32.mrb[17].mxu1 }
 0x18e   : > { %3130 = vmatmul.mubr.bf16.gmra.mrb[24].mxu0 %v16440_v5  ;;  %v14185_v5 = vld [vmem:[%s19912_s1 + $0x97c] ss:$12 sps:$4 sm:$0xff]  }
 0x18f   : > { %4272 = vmatpush1.bf16.msra.mxu0 %v14174_v34  ;;  %4299 = vmatprep.mubr.bf16.mxu0 %v16449_v11  ;;  %v14183_v11 = vld [vmem:[%s19912_s1 + $0x978] ss:$12 sps:$4 sm:$0xff]   ;;  %v13417_v34 = vadd.f32 %v13416_v32, %v13415_v30 }
 0x190   : > { %4273 = vmatprep.subr.bf16.mxu0 %v14179_v54  ;;  %v13418_v54 = vpop.f32.mrb[18].mxu1 }
 0x193   : > { %4274 = vmatpush1.bf16.msra.mxu0 %v14177_v58  ;;  %v13419_v58 = vpop.f32.mrb[19].mxu1 }
 0x194   : > { %4275 = vmatprep.subr.bf16.mxu0 %v14182_v33  ;;  %v14200_v33 = vld [vmem:[%s19912_s1 + $0x9f4] ss:$12 sps:$4 sm:$0xff]   ;;  %v13421_v38 = vpop.f32.mrb[20].mxu1 }
 0x195   : > { %v13422_v39 = vpop.f32.mrb[21].mxu1 }
 0x196   : > { %v13423_v0 = vadd.f32 %v13422_v39, %v13421_v38  ;;  %v13424_v53 = vpop.f32.mrb[22].mxu1  ;;  %v14218_v38 = vld [vmem:[%s19912_s1 + $0xa84] ss:$12 sps:$4 sm:$0xff]   ;;  %v14216_v39 = vld [vmem:[%s19912_s1 + $0xa80] ss:$12 sps:$4 sm:$0xff]  }
 0x197   : > { %4276 = vmatpush1.bf16.msra.mxu0 %v14180_v35  ;;  %v2180_v35 = vadd.f32 %v13417_v34, %v2132_v37 }
 0x198   : > { %4277 = vmatprep.subr.bf16.mxu0 %v14185_v5  ;;  %v13420_v5 = vadd.f32 %v13419_v58, %v13418_v54  ;;  %v2188_v15 = vadd.f32 %v13423_v0, %v2140_v3 }
 0x19a   : > { %v2183_v63 = vadd.f32 %v13420_v5, %v2135_v10  ;;  %v14213_v5 = vld [vmem:[%s19912_s1 + $0xa68] ss:$12 sps:$4 sm:$0xff]  }
 0x19b   : > { %4278 = vmatpush1.bf16.msra.mxu0 %v14183_v11  ;;  %v13425_v11 = vpop.f32.mrb[23].mxu1 }
 0x19c   : > { %4279 = vmatprep.subr.bf16.mxu0 %v14188_v8  ;;  %v14198_v8 = vld [vmem:[%s19912_s1 + $0x9f0] ss:$12 sps:$4 sm:$0xff]   ;;  %v13443_v20 = vpop.f32.mrb[24].mxu1 }
 0x19d   : > { %v13444_v17 = vpop.f32.mrb[25].mxu1 }
 0x19e   : > { %v13445_v25 = vadd.f32 %v13444_v17, %v13443_v20  ;;  %v13446_v45 = vpop.f32.mrb[26].mxu1  ;;  %v14224_v20 = vld [vmem:[%s19912_s1 + $0xab4] ss:$12 sps:$4 sm:$0xff]  }
 0x19f   : > { %4280 = vmatpush1.bf16.msra.mxu0 %v14186_v46  ;;  %v13447_v46 = vpop.f32.mrb[27].mxu1 }
 0x1a0   : > { %4281 = vmatprep.subr.bf16.mxu0 %v14191_v48  ;;  %v14201_v48 = vld [vmem:[%s19912_s1 + $0xa08] ss:$12 sps:$4 sm:$0xff]   ;;  %v3173_v28 = vadd.f32 %v13445_v25, %v2180_v35  ;;  %v13449_v18 = vpop.f32.mrb[28].mxu1 }
 0x1a1   : > { %v2042_v59 = vpop.f32.mrb[12].mxu0  ;;  %v13450_v60 = vpop.f32.mrb[29].mxu1 }
 0x1a2   : > { %v16907_v24 = vadd.f32 %v2042_v59, %v16801_v50  ;;  %v2044_v1 = vpop.f32.mrb[13].mxu0  ;;  %v13451_v37 = vadd.f32 %v13450_v60, %v13449_v18  ;;  %v13452_v4 = vpop.f32.mrb[30].mxu1  ;;  %v14230_v60 = vld [vmem:[%s19912_s1 + $0xae4] ss:$12 sps:$4 sm:$0xff]  }
 0x1a3   : > { %v16910_v62 = vadd.f32 %v2044_v1, %v16804_v2  ;;  %4282 = vmatpush1.bf16.msra.mxu0 %v14189_v56  ;;  %v2046_v27 = vpop.f32.mrb[14].mxu0  ;;  %v14195_v2 = vld [vmem:[%s19912_s1 + $0x9d8] ss:$12 sps:$4 sm:$0xff]   ;;  %v13448_v56 = vadd.f32 %v13447_v46, %v13446_v45  ;;  %v13453_v9 = vpop.f32.mrb[31].mxu1  ;;  %v14222_v46 = vld [vmem:[%s19912_s1 + $0xab0] ss:$12 sps:$4 sm:$0xff]  }
 0x1a4   : > { %4283 = vmatprep.subr.bf16.mxu0 %v14194_v12  ;;  %v2047_v50 = vpop.f32.mrb[15].mxu0  ;;  %v14204_v12 = vld [vmem:[%s19912_s1 + $0xa20] ss:$12 sps:$4 sm:$0xff]   ;;  %v3181_v59 = vadd.f32 %v13451_v37, %v2188_v15  ;;  %v13471_v10 = vpop.f32.mrb[32].mxu1  ;;  %v4630_v37 = vld [vmem:[#allocation3 + $0x20] sm:$0x1] }
 0x1a5   : > { %v3176_v47 = vadd.f32 %v13448_v56, %v2183_v63  ;;  %v13472_v23 = vpop.f32.mrb[33].mxu1  ;;  %v14221_v63 = vld [vmem:[%s19912_s1 + $0xa9c] ss:$12 sps:$4 sm:$0xff]   ;;  %v4631_v4 = vsel %vm15577_vm4, 0, %v4630_v37 }
 0x1a6   : > { %v13473_v40 = vadd.f32 %v13472_v23, %v13471_v10  ;;  %v13474_v1 = vpop.f32.mrb[34].mxu1  ;;  %v4636_v9 = vld [vmem:[#allocation3 + $0x38] sm:$0x1]  ;;  %4632 = vst [vmem:[#allocation3 + $0x20] sm:$0x1] %v4631_v4 }
 0x1a7   : > { %4284 = vmatpush1.bf16.msra.mxu0 %v14192_v61  ;;  %v13475_v26 = vpop.f32.mrb[35].mxu1  ;;  %v14207_v61 = vld [vmem:[%s19912_s1 + $0xa38] ss:$12 sps:$4 sm:$0xff]   ;;  %v14234_v23 = vld [vmem:[%s19912_s1 + $0xb10] ss:$12 sps:$4 sm:$0xff]  }
 0x1a8   : > { %4285 = vmatprep.subr.bf16.mxu0 %v14197_v36  ;;  %v14212_v36 = vld [vmem:[%s19912_s1 + $0xa54] ss:$12 sps:$4 sm:$0xff]   ;;  %v3221_v27 = vadd.f32 %v13473_v40, %v3173_v28  ;;  %v13476_v3 = vadd.f32 %v13475_v26, %v13474_v1  ;;  %v13477_v30 = vpop.f32.mrb[36].mxu1  ;;  %v14231_v10 = vld [vmem:[%s19912_s1 + $0xaf8] ss:$12 sps:$4 sm:$0xff]  }
 0x1a9   : > { %v13478_v50 = vpop.f32.mrb[37].mxu1  ;;  %v14239_v40 = vld [vmem:[%s19912_s1 + $0xb2c] ss:$12 sps:$4 sm:$0xff]   ;;  %v14237_v1 = vld [vmem:[%s19912_s1 + $0xb28] ss:$12 sps:$4 sm:$0xff]  }
 0x1aa   : > { %v3224_v32 = vadd.f32 %v13476_v3, %v3176_v47  ;;  %v13479_v34 = vadd.f32 %v13478_v50, %v13477_v30  ;;  %v13480_v54 = vpop.f32.mrb[38].mxu1  ;;  %v14242_v26 = vld [vmem:[%s19912_s1 + $0xb44] ss:$12 sps:$4 sm:$0xff]   ;;  %v14245_v30 = vld [vmem:[%s19912_s1 + $0xb5c] ss:$12 sps:$4 sm:$0xff]  }
 0x1ab   : > { %4286 = vmatpush1.bf16.msra.mxu0 %v14195_v2  ;;  %v13481_v58 = vpop.f32.mrb[39].mxu1  ;;  %v14210_v2 = vld [vmem:[%s19912_s1 + $0xa50] ss:$12 sps:$4 sm:$0xff]  }
 0x1ac   : > { %4287 = vmatprep.subr.bf16.mxu0 %v14200_v33  ;;  %v14215_v33 = vld [vmem:[%s19912_s1 + $0xa6c] ss:$12 sps:$4 sm:$0xff]   ;;  %v3229_v35 = vadd.f32 %v13479_v34, %v3181_v59 }
 0x1af   : > { %4288 = vmatpush1.bf16.msra.mxu0 %v14198_v8 }
 0x1b0   : > { %4289 = vmatprep.subr.bf16.mxu0 %v14203_v16  ;;  %v14219_v16 = vld [vmem:[%s19912_s1 + $0xa98] ss:$12 sps:$4 sm:$0xff]  }
 0x1b3   : > { %4290 = vmatpush1.bf16.msra.mxu0 %v14201_v48 }
 0x1b4   : > { %4291 = vmatprep.subr.bf16.mxu0 %v14206_v13 }
 0x1b7   : > { %4292 = vmatpush1.bf16.msra.mxu0 %v14204_v12  ;;  %v4642_v12 = vld [vmem:[#allocation3 + $0x50] sm:$0x1] }
 0x1b8   : > { %4293 = vmatprep.subr.bf16.mxu0 %v14209_v21  ;;  %v4637_v21 = vsel %vm15577_vm4, 0, %v4636_v9  ;;  %v4643_v59 = vsel %vm15577_vm4, 0, %v4642_v12  ;;  %v14267_v12 = vld [vmem:[%s19912_s1 + $0xc18] ss:$12 sps:$4 sm:$0xff]  }
 0x1b9   : > { %4638 = vst [vmem:[#allocation3 + $0x38] sm:$0x1] %v4637_v21  ;;  %4644 = vst [vmem:[#allocation3 + $0x50] sm:$0x1] %v4643_v59  ;;  %v14272_v59 = vld [vmem:[%s19912_s1 + $0xc34] ss:$12 sps:$4 sm:$0xff]  }
 0x1bb   : > { %4294 = vmatpush1.bf16.msra.mxu0 %v14207_v61 }
 0x1bc   : > { %4295 = vmatprep.subr.bf16.mxu0 %v14212_v36  ;;  %v14240_v36 = vld [vmem:[%s19912_s1 + $0xb40] ss:$12 sps:$4 sm:$0xff]  }
 0x1be   : > { %v13499_v0 = vpop.f32.mrb[40].mxu1 }
 0x1bf   : > { %4296 = vmatpush1.bf16.msra.mxu0 %v14210_v2  ;;  %v13500_v53 = vpop.f32.mrb[41].mxu1 }
 0x1c0   : > { %4297 = vmatprep.subr.bf16.mxu0 %v14215_v33  ;;  %v13501_v11 = vadd.f32 %v13500_v53, %v13499_v0  ;;  %v13502_v8 = vpop.f32.mrb[42].mxu1 }
 0x1c1   : > { %v13503_v15 = vpop.f32.mrb[43].mxu1 }
 0x1c2   : > { %v16973_v17 = vadd.f32 %v13501_v11, %v3221_v27  ;;  %v13504_v25 = vadd.f32 %v13503_v15, %v13502_v8  ;;  %v14249_v8 = vld [vmem:[%s19912_s1 + $0xb88] ss:$12 sps:$4 sm:$0xff]   ;;  %v14254_v15 = vld [vmem:[%s19912_s1 + $0xba4] ss:$12 sps:$4 sm:$0xff]  }
 0x1c3   : > { %4298 = vmatpush1.bf16.msra.mxu0 %v14213_v5  ;;  %v14248_v5 = vld [vmem:[%s19912_s1 + $0xb74] ss:$12 sps:$4 sm:$0xff]  }
 0x1c4   : > { %4318 = vmatprep.subr.bf16.mxu0 %v14218_v38  ;;  %v16976_v45 = vadd.f32 %v13504_v25, %v3224_v32  ;;  %v14257_v25 = vld [vmem:[%s19912_s1 + $0xbbc] ss:$12 sps:$4 sm:$0xff]  }
 0x1c6   : > { %4300 = vmatmul.mubr.bf16.vlgmr.msra.gmra.mrb[0].mxu0 %v16522_v43  ;;  %v14227_v43 = vld [vmem:[%s19912_s1 + $0xacc] ss:$12 sps:$4 sm:$0xff]   ;;  %v13505_v48 = vpop.f32.mrb[44].mxu1 }
 0x1c7   : > { %4319 = vmatpush1.bf16.msra.mxu0 %v14216_v39  ;;  %4309 = vmatprep.mubr.bf16.mxu0 %v16536_v57  ;;  %v13506_v13 = vpop.f32.mrb[45].mxu1  ;;  %v14225_v57 = vld [vmem:[%s19912_s1 + $0xac8] ss:$12 sps:$4 sm:$0xff]   ;;  %v14251_v39 = vld [vmem:[%s19912_s1 + $0xb8c] ss:$12 sps:$4 sm:$0xff]  }
 0x1c8   : > { %4320 = vmatprep.subr.bf16.mxu0 %v14221_v63  ;;  %v13507_v28 = vadd.f32 %v13506_v13, %v13505_v48  ;;  %v13508_v56 = vpop.f32.mrb[46].mxu1  ;;  %v14258_v48 = vld [vmem:[%s19912_s1 + $0xbd0] ss:$12 sps:$4 sm:$0xff]   ;;  %v14263_v13 = vld [vmem:[%s19912_s1 + $0xbec] ss:$12 sps:$4 sm:$0xff]  }
 0x1c9   : > { %v13509_v18 = vpop.f32.mrb[47].mxu1  ;;  %v14266_v56 = vld [vmem:[%s19912_s1 + $0xc04] ss:$12 sps:$4 sm:$0xff]  }
 0x1ca   : > { %v16991_v47 = vadd.f32 %v13507_v28, %v3229_v35  ;;  %v14261_v28 = vld [vmem:[%s19912_s1 + $0xbe8] ss:$12 sps:$4 sm:$0xff]   ;;  %v14264_v18 = vld [vmem:[%s19912_s1 + $0xc00] ss:$12 sps:$4 sm:$0xff]  }
 0x1cb   : > { %4321 = vmatpush1.bf16.msra.mxu0 %v14219_v16 }
 0x1cc   : > { %4322 = vmatprep.subr.bf16.mxu0 %v14224_v20  ;;  %v14252_v20 = vld [vmem:[%s19912_s1 + $0xba0] ss:$12 sps:$4 sm:$0xff]  }
 0x1ce   : > { %4310 = vmatmul.mubr.bf16.gmra.mrb[28].mxu0 %v16556_v19  ;;  %v14228_v19 = vld [vmem:[%s19912_s1 + $0xae0] ss:$12 sps:$4 sm:$0xff]  }
 0x1cf   : > { %4323 = vmatpush1.bf16.msra.mxu0 %v14222_v46  ;;  %4350 = vmatprep.mubr.bf16.mxu0 %v16566_v51  ;;  %v14233_v51 = vld [vmem:[%s19912_s1 + $0xafc] ss:$12 sps:$4 sm:$0xff]   ;;  %v14255_v46 = vld [vmem:[%s19912_s1 + $0xbb8] ss:$12 sps:$4 sm:$0xff]  }
 0x1d0   : > { %4324 = vmatprep.subr.bf16.mxu0 %v14227_v43  ;;  %v14260_v43 = vld [vmem:[%s19912_s1 + $0xbd4] ss:$12 sps:$4 sm:$0xff]  }
 0x1d3   : > { %4325 = vmatpush1.bf16.msra.mxu0 %v14225_v57  ;;  %v14269_v57 = vld [vmem:[%s19912_s1 + $0xc1c] ss:$12 sps:$4 sm:$0xff]  }
 0x1d4   : > { %4326 = vmatprep.subr.bf16.mxu0 %v14230_v60 }
 0x1d7   : > { %4327 = vmatpush1.bf16.msra.mxu0 %v14228_v19 }
 0x1d8   : > { %4328 = vmatprep.subr.bf16.mxu0 %v14233_v51 }
 0x1db   : > { %4329 = vmatpush1.bf16.msra.mxu0 %v14231_v10 }
 0x1dc   : > { %4330 = vmatprep.subr.bf16.mxu0 %v14236_v29  ;;  %v14270_v29 = vld [vmem:[%s19912_s1 + $0xc30] ss:$12 sps:$4 sm:$0xff]  }
 0x1de   : > { %v13527_v50 = vpop.f32.mrb[48].mxu1 }
 0x1df   : > { %4331 = vmatpush1.bf16.msra.mxu0 %v14234_v23  ;;  %v13528_v54 = vpop.f32.mrb[49].mxu1  ;;  %v14275_v23 = vld [vmem:[%s19912_s1 + $0xc4c] ss:$12 sps:$4 sm:$0xff]  }
 0x1e0   : > { %4332 = vmatprep.subr.bf16.mxu0 %v14239_v40  ;;  %v13529_v2 = vadd.f32 %v13528_v54, %v13527_v50  ;;  %v13530_v33 = vpop.f32.mrb[50].mxu1  ;;  %v14281_v50 = vld [vmem:[%s19912_s1 + $0xc7c] ss:$12 sps:$4 sm:$0xff]   ;;  %v14287_v54 = vld [vmem:[%s19912_s1 + $0xcac] ss:$12 sps:$4 sm:$0xff]  }
 0x1e1   : > { %v3029_v61 = vpop.f32.mrb[16].mxu0  ;;  %v13531_v35 = vpop.f32.mrb[51].mxu1 }
 0x1e2   : > { %v17028_v27 = vadd.f32 %v3029_v61, %v16907_v24  ;;  %v3031_v3 = vpop.f32.mrb[17].mxu0  ;;  %v14243_v24 = vld [vmem:[%s19912_s1 + $0xb58] ss:$12 sps:$4 sm:$0xff]   ;;  %v13532_v38 = vadd.f32 %v13531_v35, %v13530_v33  ;;  %v17138_v35 = vld [vmem:[%s19913_s2] sm:$0x7] }
 0x1e3   : > { %v17034_v32 = vadd.f32 %v3031_v3, %v16910_v62  ;;  %4333 = vmatpush1.bf16.msra.mxu0 %v14237_v1  ;;  %v3033_v34 = vpop.f32.mrb[18].mxu0  ;;  %v14246_v62 = vld [vmem:[%s19912_s1 + $0xb70] ss:$12 sps:$4 sm:$0xff]  }
 0x1e4   : > { %4334 = vmatprep.subr.bf16.mxu0 %v14242_v26  ;;  %v3034_v58 = vpop.f32.mrb[19].mxu0  ;;  %v14284_v34 = vld [vmem:[%s19912_s1 + $0xc94] ss:$12 sps:$4 sm:$0xff]  }
 0x1e5   : > { %v14285_v58 = vld [vmem:[%s19912_s1 + $0xca8] ss:$12 sps:$4 sm:$0xff]  }
 0x1e6   : > { %v13533_v63 = vpop.f32.mrb[52].mxu1 }
 0x1e7   : > { %4335 = vmatpush1.bf16.msra.mxu0 %v14240_v36  ;;  %v13534_v0 = vpop.f32.mrb[53].mxu1  ;;  %v14278_v36 = vld [vmem:[%s19912_s1 + $0xc64] ss:$12 sps:$4 sm:$0xff]  }
 0x1e8   : > { %4336 = vmatprep.subr.bf16.mxu0 %v14245_v30  ;;  %v13535_v53 = vadd.f32 %v13534_v0, %v13533_v63  ;;  %v13536_v11 = vpop.f32.mrb[54].mxu1  ;;  %v14276_v30 = vld [vmem:[%s19912_s1 + $0xc60] ss:$12 sps:$4 sm:$0xff]   ;;  %v4585_v63 = vsub.s32 2, %v15582_v31 }
 0x1e9   : > { %v13537_v16 = vpop.f32.mrb[55].mxu1 }
 0x1eb   : > { %4337 = vmatpush1.bf16.msra.mxu0 %v14243_v24  ;;  %v14288_v24 = vld [vmem:[%s19912_s1 + $0xcc0] ss:$12 sps:$4 sm:$0xff]  }
 0x1ec   : > { %4338 = vmatprep.subr.bf16.mxu0 %v14248_v5 }
 0x1ef   : > { %4339 = vmatpush1.bf16.msra.mxu0 %v14246_v62  ;;  %v14293_v62 = vld [vmem:[%s19912_s1 + $0xcdc] ss:$12 sps:$4 sm:$0xff]  }
 0x1f0   : > { %4340 = vmatprep.subr.bf16.mxu0 %v14251_v39 }
 0x1f3   : > { %4341 = vmatpush1.bf16.msra.mxu0 %v14249_v8 }
 0x1f4   : > { %4342 = vmatprep.subr.bf16.mxu0 %v14254_v15  ;;  %v14291_v15 = vld [vmem:[%s19912_s1 + $0xcd8] ss:$12 sps:$4 sm:$0xff]  }
 0x1f7   : > { %4343 = vmatpush1.bf16.msra.mxu0 %v14252_v20 }
 0x1f8   : > { %4344 = vmatprep.subr.bf16.mxu0 %v14257_v25  ;;  %v14296_v25 = vld [vmem:[%s19912_s1 + $0xcf4] ss:$12 sps:$4 sm:$0xff]  }
 0x1fb   : > { %4345 = vmatpush1.bf16.msra.mxu0 %v14255_v46 }
 0x1fc   : > { %4346 = vmatprep.subr.bf16.mxu0 %v14260_v43 }
 0x1fe   : > { %v13555_v60 = vpop.f32.mrb[56].mxu1 }
 0x1ff   : > { %4347 = vmatpush1.bf16.msra.mxu0 %v14258_v48  ;;  %v13556_v37 = vpop.f32.mrb[57].mxu1 }
 0x200   : > { %4348 = vmatprep.subr.bf16.mxu0 %v14263_v13  ;;  %v13557_v4 = vadd.f32 %v13556_v37, %v13555_v60  ;;  %v13558_v9 = vpop.f32.mrb[58].mxu1 }
 0x201   : > { %v13559_v21 = vpop.f32.mrb[59].mxu1 }
 0x202   : > { %v4503_v19 = vadd.f32 %v13557_v4, %v13529_v2  ;;  %v13560_v51 = vadd.f32 %v13559_v21, %v13558_v9  ;;  %v14290_v2 = vld [vmem:[%s19912_s1 + $0xcc4] ss:$12 sps:$4 sm:$0xff]   ;;  %v14297_v21 = vld [vmem:[%s19912_s1 + $0xd08] ss:$12 sps:$4 sm:$0xff]  }
 0x203   : > { %4349 = vmatpush1.bf16.msra.mxu0 %v14261_v28  ;;  %v14294_v28 = vld [vmem:[%s19912_s1 + $0xcf0] ss:$12 sps:$4 sm:$0xff]  }
 0x204   : > { %4369 = vmatprep.subr.bf16.mxu0 %v14266_v56  ;;  %v4506_v10 = vadd.f32 %v13560_v51, %v13532_v38  ;;  %v14299_v56 = vld [vmem:[%s19912_s1 + $0xd0c] ss:$12 sps:$4 sm:$0xff]  }
 0x206   : > { %4351 = vmatmul.mubr.bf16.vlgmr.msra.gmra.mrb[0].mxu0 %v15911_v7  ;;  %v13561_v7 = vpop.f32.mrb[60].mxu1 }
 0x207   : > { %4370 = vmatpush1.bf16.msra.mxu0 %v14264_v18  ;;  %4360 = vmatprep.mubr.bf16.mxu0 %v16650_v49  ;;  %v13562_v40 = vpop.f32.mrb[61].mxu1  ;;  %v14273_v49 = vld [vmem:[%s19912_s1 + $0xc48] ss:$12 sps:$4 sm:$0xff]  }
 0x208   : > { %4371 = vmatprep.subr.bf16.mxu0 %v14269_v57  ;;  %v13563_v1 = vadd.f32 %v13562_v40, %v13561_v7  ;;  %v13564_v26 = vpop.f32.mrb[62].mxu1 }
 0x209   : > { %v13565_v61 = vpop.f32.mrb[63].mxu1  ;;  %v4741_v26 = vld [vmem:[#allocation3 + $0x20] sm:$0x3] }
 0x20a   : > { %v17105_v3 = vadd.f32 %v13563_v1, %v13535_v53  ;;  %v14300_v1 = vld [vmem:[%s19912_s1 + $0xd20] ss:$12 sps:$4 sm:$0xff]  }
 0x20b   : > { %4372 = vmatpush1.bf16.msra.mxu0 %v14267_v12 }
 0x20c   : > { %4373 = vmatprep.subr.bf16.mxu0 %v14272_v59  ;;  %v14302_v59 = vld [vmem:[%s19912_s1 + $0xd24] ss:$12 sps:$4 sm:$0xff]  }
 0x20e   : > { %4361 = vmatmul.mubr.bf16.gmra.mrb[32].mxu0 %v16672_v22  ;;  %v14279_v22 = vld [vmem:[%s19912_s1 + $0xc78] ss:$12 sps:$4 sm:$0xff]  }
 0x20f   : > { %4374 = vmatpush1.bf16.msra.mxu0 %v14270_v29  ;;  %4401 = vmatprep.mubr.bf16.mxu0 %v16685_v6  ;;  %v14282_v6 = vld [vmem:[%s19912_s1 + $0xc90] ss:$12 sps:$4 sm:$0xff]  }
 0x210   : > { %4375 = vmatprep.subr.bf16.mxu0 %v14275_v23 }
 0x213   : > { %4376 = vmatpush1.bf16.msra.mxu0 %v14273_v49  ;;  %v14305_v49 = vld [vmem:[%s19912_s1 + $0xd3c] ss:$12 sps:$4 sm:$0xff]  }
 0x214   : > { %4377 = vmatprep.subr.bf16.mxu0 %v14278_v36 }
 0x217   : > { %4378 = vmatpush1.bf16.msra.mxu0 %v14276_v30 }
 0x218   : > { %4379 = vmatprep.subr.bf16.mxu0 %v14281_v50  ;;  %v4747_v50 = vld [vmem:[#allocation3 + $0x38] sm:$0x3] }
 0x21b   : > { %4380 = vmatpush1.bf16.msra.mxu0 %v14279_v22 }
 0x21c   : > { %4381 = vmatprep.subr.bf16.mxu0 %v14284_v34 }
 0x21e   : > { %v13583_v39 = vpop.f32.mrb[64].mxu1 }
 0x21f   : > { %4382 = vmatpush1.bf16.msra.mxu0 %v14282_v6  ;;  %v13584_v11 = vpop.f32.mrb[65].mxu1  ;;  %v14303_v6 = vld [vmem:[%s19912_s1 + $0xd38] ss:$12 sps:$4 sm:$0xff]  }
 0x220   : > { %4383 = vmatprep.subr.bf16.mxu0 %v14287_v54  ;;  %v13585_v16 = vadd.f32 %v13584_v11, %v13583_v39  ;;  %v14308_v54 = vld [vmem:[%s19912_s1 + $0xd54] ss:$12 sps:$4 sm:$0xff]   ;;  %v14306_v39 = vld [vmem:[%s19912_s1 + $0xd50] ss:$12 sps:$4 sm:$0xff]   ;;  %v4759_v11 = vld [vmem:[#allocation3 + $0x14] sm:$0x1] }
 0x221   : > { %v3080_v33 = vpop.f32.mrb[20].mxu0 }
 0x222   : > { %v17141_v5 = vadd.f32 %v3080_v33, %v17028_v27  ;;  %v3082_v38 = vpop.f32.mrb[21].mxu0  ;;  %v13586_v27 = vpop.f32.mrb[66].mxu1  ;;  %v4551_v46 = vadd.f32 %v13585_v16, %v4503_v19 }
 0x223   : > { %v17148_v0 = vadd.f32 %v3082_v38, %v17034_v32  ;;  %4384 = vmatpush1.bf16.msra.mxu0 %v14285_v58  ;;  %v3084_v53 = vpop.f32.mrb[22].mxu0  ;;  %v13587_v20 = vpop.f32.mrb[67].mxu1  ;;  %v4586_v32 = vrot.slane %v17138_v35, %v4585_v63  ;;  %v4753_v63 = vld [vmem:[#allocation3 + $0x50] sm:$0x3] }
 0x224   : > { %4385 = vmatprep.subr.bf16.mxu0 %v14290_v2  ;;  %v3085_v8 = vpop.f32.mrb[23].mxu0  ;;  %v13588_v43 = vadd.f32 %v13587_v20, %v13586_v27  ;;  %v4566_v48 = vadd.f32 %v4551_v46, %v16973_v17  ;;  %v4757_v53 = vld [vmem:[#allocation3 + $0x8] sm:$0xf]  ;;  %v4763_v27 = vld [vmem:[#allocation3 + $0x2c] sm:$0x1] }
 0x225   : > { %v14311_v8 = vld [vmem:[%s19912_s1 + $0xd6c] ss:$12 sps:$4 sm:$0xff]   ;;  %v4767_v20 = vld [vmem:[#allocation3 + $0x44] sm:$0x1] }
 0x226   : > { %v4554_v13 = vadd.f32 %v13588_v43, %v4506_v10  ;;  %v4592_v18 = vadd.f32 %v4586_v32, %v4566_v48  ;;  %v13589_v60 = vpop.f32.mrb[68].mxu1  ;;  %v17211_v43 = vcombine.low %v4757_v53, %v4759_v11  ;;  %v14344_v53 = vld [vmem:[%s19914_s3 + $0x524] ss:$8 sps:$4 sm:$0xff]   ;;  %v14342_v11 = vld [vmem:[%s19914_s3 + $0x520] ss:$8 sps:$4 sm:$0xff]  }
 0x227   : > { %4386 = vmatpush1.bf16.msra.mxu0 %v14288_v24  ;;  %v13590_v17 = vpop.f32.mrb[69].mxu1 }
 0x228   : > { %4387 = vmatprep.subr.bf16.mxu0 %v14293_v62  ;;  %v4569_v57 = vadd.f32 %v4554_v13, %v16976_v45  ;;  %v4601_v37 = vmax.f32 %v4592_v18, 0.0  ;;  %v13591_v9 = vadd.f32 %v13590_v17, %v13589_v60  ;;  %v13592_v12 = vpop.f32.mrb[70].mxu1 }
 0x229   : > { %v13593_v45 = vpop.f32.mrb[71].mxu1 }
 0x22a   : > { %v4595_v4 = vadd.f32 %v4586_v32, %v4569_v57  ;;  %4610 = vst [vmem:[%s17169_s14 + $0x10] sm:$0xff] %v4601_v37  ;;  %v13335_v19 = vpack.c.bf16 %v4601_v37, %v4601_v37  ;;  %v4559_v10 = vadd.f32 %v13591_v9, %v17105_v3 }
 0x22b   : > { %4388 = vmatpush1.bf16.msra.mxu0 %v14291_v15 }
 0x22c   : > { %4389 = vmatprep.subr.bf16.mxu0 %v14296_v25  ;;  %v4604_v51 = vmax.f32 %v4595_v4, 0.0  ;;  %v4698_v29 = vshrl.u32 %v13335_v19, 16  ;;  %v4701_v23 = vshll.u32 %v13335_v19, 16  ;;  %v4572_v40 = vadd.f32 %v4559_v10, %v16991_v47  ;;  %v14309_v25 = vld [vmem:[%s19912_s1 + $0xd68] ss:$12 sps:$4 sm:$0xff]  }
 0x22e   : > { %4613 = vst [vmem:[%s17169_s14 + $0x28] sm:$0xff] %v4604_v51  ;;  %v13337_v7 = vpack.c.bf16 %v4604_v51, %v4604_v51  ;;  %v4700_v61 = vrot.slane %v4698_v29, 7  ;;  %v4598_v30 = vadd.f32 %v4586_v32, %v4572_v40 }
 0x22f   : > { %4390 = vmatpush1.bf16.msra.mxu0 %v14294_v28  ;;  %v4948_v28 = vrot.slane %v17211_v43, 1 }
 0x230   : > { %4391 = vmatprep.subr.bf16.mxu0 %v14299_v56  ;;  %v4712_v36 = vshrl.u32 %v13337_v7, 16  ;;  %v4715_v3 = vshll.u32 %v13337_v7, 16  ;;  %v4703_v22 = vor.u32 %v4701_v23, %v4700_v61  ;;  %v4607_v47 = vmax.f32 %v4598_v30, 0.0  ;;  %v14312_v61 = vld [vmem:[%s19914_s3 + $0x480] ss:$8 sps:$4 sm:$0xff]  }
 0x231   : > { %v14318_v30 = vld [vmem:[%s19914_s3 + $0x4a0] ss:$8 sps:$4 sm:$0xff]  }
 0x232   : > { %v4714_v34 = vrot.slane %v4712_v36, 7  ;;  %v4742_v58 = vsel %vm15638_vm11, %v4703_v22, %v4741_v26  ;;  %4616 = vst [vmem:[%s17169_s14 + $0x40] sm:$0xff] %v4607_v47  ;;  %v13339_v33 = vpack.c.bf16 %v4607_v47, %v4607_v47  ;;  %v14321_v22 = vld [vmem:[%s19914_s3 + $0x4b0] ss:$8 sps:$4 sm:$0xff]   ;;  %v14324_v47 = vld [vmem:[%s19914_s3 + $0x4c0] ss:$8 sps:$4 sm:$0xff]  }
 0x233   : > { %4392 = vmatpush1.bf16.msra.mxu0 %v14297_v21  ;;  %4743 = vst [vmem:[#allocation3 + $0x20] sm:$0x3] %v4742_v58  ;;  %v14332_v58 = vld [vmem:[%s19914_s3 + $0x4e4] ss:$8 sps:$4 sm:$0xff]  }
 0x234   : > { %4393 = vmatprep.subr.bf16.mxu0 %v14302_v59  ;;  %v4717_v2 = vor.u32 %v4715_v3, %v4714_v34  ;;  %v4726_v38 = vshrl.u32 %v13339_v33, 16  ;;  %v4729_v62 = vshll.u32 %v13339_v33, 16  ;;  %v14317_v3 = vld [vmem:[%s19914_s3 + $0x494] ss:$8 sps:$4 sm:$0xff]   ;;  %v14326_v34 = vld [vmem:[%s19914_s3 + $0x4c4] ss:$8 sps:$4 sm:$0xff]  }
 0x235   : > { %v14335_v33 = vld [vmem:[%s19914_s3 + $0x4f4] ss:$8 sps:$4 sm:$0xff]  }
 0x236   : > { %v4748_v24 = vsel %vm15638_vm11, %v4717_v2, %v4747_v50  ;;  %v4728_v16 = vrot.slane %v4726_v38, 7  ;;  %v14323_v50 = vld [vmem:[%s19914_s3 + $0x4b4] ss:$8 sps:$4 sm:$0xff]   ;;  %v14330_v2 = vld [vmem:[%s19914_s3 + $0x4e0] ss:$8 sps:$4 sm:$0xff]  }
 0x237   : > { %4394 = vmatpush1.bf16.msra.mxu0 %v14300_v1  ;;  %4749 = vst [vmem:[#allocation3 + $0x38] sm:$0x3] %v4748_v24  ;;  %v14333_v24 = vld [vmem:[%s19914_s3 + $0x4f0] ss:$8 sps:$4 sm:$0xff]   ;;  %v14338_v38 = vld [vmem:[%s19914_s3 + $0x504] ss:$8 sps:$4 sm:$0xff]  }
 0x238   : > { %4395 = vmatprep.subr.bf16.mxu0 %v14305_v49  ;;  %v4731_v15 = vor.u32 %v4729_v62, %v4728_v16  ;;  %v14336_v62 = vld [vmem:[%s19914_s3 + $0x500] ss:$8 sps:$4 sm:$0xff]  }
 0x23a   : > { %v4754_v46 = vsel %vm15638_vm11, %v4731_v15, %v4753_v63  ;;  %v17209_v32 = vld [vmem:[#allocation3 + $0x20] sm:$0xf]  ;;  %v4633_v15 = vld [vmem:[#allocation3 + $0x30] sm:$0x11] }
 0x23b   : > { %4396 = vmatpush1.bf16.msra.mxu0 %v14303_v6  ;;  %4755 = vst [vmem:[#allocation3 + $0x50] sm:$0x3] %v4754_v46  ;;  %v17216_v13 = vcombine.low %v17209_v32, %v4763_v27  ;;  %v14329_v6 = vld [vmem:[%s19914_s3 + $0x4d4] ss:$8 sps:$4 sm:$0xff]   ;;  %v14339_v63 = vld [vmem:[%s19914_s3 + $0x510] ss:$8 sps:$4 sm:$0xff]  }
 0x23c   : > { %4397 = vmatprep.subr.bf16.mxu0 %v14308_v54  ;;  %v14327_v54 = vld [vmem:[%s19914_s3 + $0x4d0] ss:$8 sps:$4 sm:$0xff]   ;;  %v14347_v27 = vld [vmem:[%s19914_s3 + $0x534] ss:$8 sps:$4 sm:$0xff]  }
 0x23d   : > { %v4951_v18 = vrot.slane %v17216_v13, 1 }
 0x23e   : > { %v17213_v48 = vld [vmem:[#allocation3 + $0x38] sm:$0xf] }
 0x23f   : > { %4398 = vmatpush1.bf16.msra.mxu0 %v14306_v39  ;;  %v12022_v56 = vcombine.low %v17213_v48, %v4767_v20  ;;  %v17223_v17 = vcombine.low %v4948_v28, %v4951_v18  ;;  %v14341_v39 = vld [vmem:[%s19914_s3 + $0x514] ss:$8 sps:$4 sm:$0xff]   ;;  %v14345_v20 = vld [vmem:[%s19914_s3 + $0x530] ss:$8 sps:$4 sm:$0xff]  }
 0x240   : > { %4399 = vmatprep.subr.bf16.mxu0 %v14311_v8  ;;  %v4627_v8 = vld [vmem:[#allocation3 + $0x18] sm:$0x11] }
 0x241   : > { %v4900_v57 = vshll.u32 %v12022_v56, 16  ;;  %v17221_v60 = vrot.slane %v12022_v56, 1  ;;  %v4898_v21 = vshrl.u32 %v12022_v56, 16  ;;  %v4628_v16 = vsel %vm15600_vm6, 0, %v4627_v8  ;;  %v14350_v56 = vld [vmem:[%s19914_s3 + $0x544] ss:$8 sps:$4 sm:$0xff]  }
 0x242   : > { %v17229_v4 = vld [vmem:[#allocation3 + $0x50] sm:$0xf]  ;;  %4629 = vst [vmem:[#allocation3 + $0x18] sm:$0x11] %v4628_v16 }
 0x243   : > { %4400 = vmatpush1.bf16.msra.mxu0 %v14309_v25  ;;  %v17226_v37 = vcombine.low %v4951_v18, %v17221_v60  ;;  %v12025_v9 = vcombine.low %v17229_v4, %v4771_v14  ;;  %v12643_v12 = vcombine.low %v17213_v48, %v17229_v4  ;;  %v4902_v45 = vrot.slane %v4900_v57, 1  ;;  %v14348_v14 = vld [vmem:[%s19914_s3 + $0x540] ss:$8 sps:$4 sm:$0xff]  }
 0x244   : > { %v4634_v25 = vsel %vm15600_vm6, 0, %v4633_v15 }
 0x245   : > { %v4919_v59 = vshrl.u32 %v12025_v9, 16  ;;  %v4921_v19 = vshll.u32 %v12025_v9, 16  ;;  %v17235_v51 = vrot.slane %v12025_v9, 1  ;;  %v17237_v10 = vor.u32 %v4902_v45, %v4898_v21  ;;  %4635 = vst [vmem:[#allocation3 + $0x30] sm:$0x11] %v4634_v25 }
 0x246   : > { %4402 = vmatmul.mubr.bf16.vlgmr.msra.gmra.mrb[0].mxu0 %v16752_v55  ;;  %v14353_v9 = vld [vmem:[%s19914_s3 + $0x554] ss:$8 sps:$4 sm:$0xff]   ;;  %v14351_v21 = vld [vmem:[%s19914_s3 + $0x550] ss:$8 sps:$4 sm:$0xff]  }
 0x247   : > { %4411 = vmatprep.mubr.bf16.mxu0 %v16760_v41  ;;  %v4923_v29 = vrot.slane %v4921_v19, 1  ;;  %v12649_v55 = vcombine.low %v17221_v60, %v17235_v51  ;;  %v4639_v45 = vld [vmem:[#allocation3 + $0x48] sm:$0x11]  ;;  %v14356_v19 = vld [vmem:[%s19914_s3 + $0x564] ss:$8 sps:$4 sm:$0xff]  }
 0x249   : > { %v17241_v23 = vor.u32 %v4923_v29, %v4919_v59  ;;  %v4640_v59 = vsel %vm15600_vm6, 0, %v4639_v45  ;;  %v14354_v29 = vld [vmem:[%s19914_s3 + $0x560] ss:$8 sps:$4 sm:$0xff]  }
 0x24a   : > { %4641 = vst [vmem:[#allocation3 + $0x48] sm:$0x11] %v4640_v59 }
 0x24b   : > { %v12646_v41 = vcombine.low %v17237_v10, %v17241_v23 }
 0x24c   : > { %v4744_v59 = vld [vmem:[#allocation3 + $0x30] sm:$0x33] }
 0x24e   : > { %4412 = vmatmul.mubr.bf16.gmra.mrb[36].mxu0 %v16779_v44  ;;  %v14314_v44 = vld [vmem:[%s19914_s3 + $0x484] ss:$8 sps:$4 sm:$0xff]  }
 0x24f   : > { %6036 = vmatprep.subr.bf16.mxu1 %v14314_v44 }
 0x250   : > { %6037 = vmatpush1.bf16.msra.mxu1 %v14312_v61 }
 0x251   : > { %6038 = vmatprep.subr.bf16.mxu1 %v14317_v3 }
 0x261   : > { %v3131_v7 = vpop.f32.mrb[24].mxu0 }
 0x262   : > { %v17247_v40 = vadd.f32 %v3131_v7, %v17141_v5  ;;  %v3133_v1 = vpop.f32.mrb[25].mxu0  ;;  %v14315_v5 = vld [vmem:[%s19914_s3 + $0x490] ss:$8 sps:$4 sm:$0xff]   ;;  %v14359_v7 = vld [vmem:[%s19914_s3 + $0x574] ss:$8 sps:$4 sm:$0xff]  }
 0x263   : > { %v17250_v26 = vadd.f32 %v3133_v1, %v17148_v0  ;;  %v3135_v49 = vpop.f32.mrb[26].mxu0  ;;  %v14320_v0 = vld [vmem:[%s19914_s3 + $0x4a4] ss:$8 sps:$4 sm:$0xff]   ;;  %6039 = vmatpush1.bf16.msra.mxu1 %v14315_v5  ;;  %v14357_v1 = vld [vmem:[%s19914_s3 + $0x570] ss:$8 sps:$4 sm:$0xff]  }
 0x264   : > { %v3136_v36 = vpop.f32.mrb[27].mxu0  ;;  %6040 = vmatprep.subr.bf16.mxu1 %v14320_v0  ;;  %v14363_v49 = vld [vmem:[%s19914_s3 + $0x584] ss:$8 sps:$4 sm:$0xff]  }
 0x267   : > { %6041 = vmatpush1.bf16.msra.mxu1 %v14318_v30  ;;  %v17358_v30 = vsub.s32 0, %v15582_v31 }
 0x268   : > { %6042 = vmatprep.subr.bf16.mxu1 %v14323_v50  ;;  %v17361_v50 = vsub.s32 1, %v15582_v31 }
 0x26b   : > { %6043 = vmatpush1.bf16.msra.mxu1 %v14321_v22  ;;  %v4578_v22 = vrot.slane %v17138_v35, %v17358_v30 }
 0x26c   : > { %6044 = vmatprep.subr.bf16.mxu1 %v14326_v34  ;;  %v4582_v34 = vrot.slane %v17138_v35, %v17361_v50 }
 0x26f   : > { %6045 = vmatpush1.bf16.msra.mxu1 %v14324_v47 }
 0x270   : > { %6046 = vmatprep.subr.bf16.mxu1 %v14329_v6 }
 0x273   : > { %6047 = vmatpush1.bf16.msra.mxu1 %v14327_v54 }
 0x274   : > { %6048 = vmatprep.subr.bf16.mxu1 %v14332_v58 }
 0x277   : > { %6049 = vmatpush1.bf16.msra.mxu1 %v14330_v2 }
 0x278   : > { %6050 = vmatprep.subr.bf16.mxu1 %v14335_v33 }
 0x27b   : > { %6051 = vmatpush1.bf16.msra.mxu1 %v14333_v24 }
 0x27c   : > { %6052 = vmatprep.subr.bf16.mxu1 %v14338_v38 }
 0x27f   : > { %6053 = vmatpush1.bf16.msra.mxu1 %v14336_v62 }
 0x280   : > { %6054 = vmatprep.subr.bf16.mxu1 %v14341_v39 }
 0x283   : > { %6055 = vmatpush1.bf16.msra.mxu1 %v14339_v63 }
 0x284   : > { %6056 = vmatprep.subr.bf16.mxu1 %v14344_v53 }
 0x287   : > { %6057 = vmatpush1.bf16.msra.mxu1 %v14342_v11 }
 0x288   : > { %6058 = vmatprep.subr.bf16.mxu1 %v14347_v27 }
 0x28b   : > { %6059 = vmatpush1.bf16.msra.mxu1 %v14345_v20 }
 0x28c   : > { %6060 = vmatprep.subr.bf16.mxu1 %v14350_v56  ;;  %v4738_v56 = vld [vmem:[#allocation3 + $0x18] sm:$0x33] }
 0x28f   : > { %6061 = vmatpush1.bf16.msra.mxu1 %v14348_v14 }
 0x290   : > { %6062 = vmatprep.subr.bf16.mxu1 %v14353_v9 }
 0x293   : > { %6063 = vmatpush1.bf16.msra.mxu1 %v14351_v21 }
 0x294   : > { %6064 = vmatprep.subr.bf16.mxu1 %v14356_v19 }
 0x297   : > { %6065 = vmatpush1.bf16.msra.mxu1 %v14354_v29  ;;  %v4758_v29 = vld [vmem:[#allocation3 + $0xc] sm:$0x11] }
 0x298   : > { %6066 = vmatprep.subr.bf16.mxu1 %v14359_v7 }
 0x29b   : > { %6067 = vmatpush1.bf16.msra.mxu1 %v14357_v1 }
 0x29c   : > { %6087 = vmatprep.subr.bf16.mxu1 %v14363_v49 }
 0x2a1   : > { %v4311_v46 = vpop.f32.mrb[28].mxu0 }
 0x2a2   : > { %v4313_v28 = vpop.f32.mrb[29].mxu0 }
 0x2a3   : > { %v4315_v18 = vpop.f32.mrb[30].mxu0 }
 0x2a4   : > { %v4316_v57 = vpop.f32.mrb[31].mxu0 }
 0x2e1   : > { %v4362_v61 = vpop.f32.mrb[32].mxu0 }
 0x2e2   : > { %v4363_v44 = vadd.f32 %v4362_v61, %v4311_v46  ;;  %v4364_v36 = vpop.f32.mrb[33].mxu0 }
 0x2e3   : > { %v4365_v3 = vadd.f32 %v4364_v36, %v4313_v28  ;;  %v4366_v5 = vpop.f32.mrb[34].mxu0  ;;  %v17377_v36 = vld [vmem:[#allocation2] sm:$0xff] }
 0x2e4   : > { %v4367_v0 = vpop.f32.mrb[35].mxu0 }
 0x2e5   : > { %v4762_v0 = vld [vmem:[#allocation3 + $0x24] sm:$0x11] }
 0x319   : > { %v4403_v47 = vpop.f32.mrb[0].mxu0 }
 0x31a   : > { %v4590_v6 = vadd.f32 %v4578_v22, %v4403_v47  ;;  %v4405_v54 = vpop.f32.mrb[1].mxu0 }
 0x31b   : > { %v4591_v58 = vadd.f32 %v4582_v34, %v4405_v54  ;;  %v4407_v2 = vpop.f32.mrb[2].mxu0  ;;  %v4766_v54 = vld [vmem:[#allocation3 + $0x3c] sm:$0x11] }
 0x31c   : > { %v4599_v33 = vmax.f32 %v4590_v6, 0.0  ;;  %v4593_v24 = vadd.f32 %v4578_v22, %v4407_v2  ;;  %v4409_v38 = vpop.f32.mrb[3].mxu0 }
 0x31d   : > { %v4600_v62 = vmax.f32 %v4591_v58, 0.0  ;;  %v4594_v39 = vadd.f32 %v4582_v34, %v4409_v38  ;;  %v4750_v58 = vld [vmem:[#allocation3 + $0x48] sm:$0x33] }
 0x31e   : > { %4608 = vst [vmem:[%s17169_s14] sm:$0xff] %v4599_v33  ;;  %v4602_v31 = vmax.f32 %v4593_v24, 0.0  ;;  %v17387_v24 = vcombine.low %v17377_v36, %v4758_v29 }
 0x31f   : > { %4609 = vst [vmem:[%s17169_s14 + $0x8] sm:$0xff] %v4600_v62  ;;  %v13334_v63 = vpack.c.bf16 %v4600_v62, %v4599_v33  ;;  %v4603_v53 = vmax.f32 %v4594_v39, 0.0 }
 0x320   : > { %4611 = vst [vmem:[%s17169_s14 + $0x18] sm:$0xff] %v4602_v31 }
 0x321   : > { %v4691_v11 = vshrl.u32 %v13334_v63, 16  ;;  %4612 = vst [vmem:[%s17169_s14 + $0x20] sm:$0xff] %v4603_v53  ;;  %v13336_v35 = vpack.c.bf16 %v4603_v53, %v4602_v31  ;;  %v4413_v8 = vpop.f32.mrb[36].mxu0  ;;  %v4694_v20 = vshll.u32 %v13334_v63, 16  ;;  %v14361_v53 = vld [vmem:[%s19914_s3 + $0x580] ss:$8 sps:$4 sm:$0xff]  }
 0x322   : > { %v4414_v16 = vadd.f32 %v4413_v8, %v4363_v44  ;;  %v4415_v27 = vpop.f32.mrb[37].mxu0 }
 0x323   : > { %v4693_v15 = vrot.slane %v4691_v11, 7  ;;  %v4705_v25 = vshrl.u32 %v13336_v35, 16  ;;  %v4416_v46 = vadd.f32 %v4415_v27, %v4365_v3  ;;  %v4417_v28 = vpop.f32.mrb[38].mxu0  ;;  %v4708_v21 = vshll.u32 %v13336_v35, 16  ;;  %v14367_v27 = vld [vmem:[%s19914_s3 + $0x594] ss:$8 sps:$4 sm:$0xff]  }
 0x324   : > { %v4570_v18 = vadd.f32 %v4414_v16, %v17247_v40  ;;  %v4418_v14 = vpop.f32.mrb[39].mxu0  ;;  %v12015_v3 = vcombine.high %v17377_v36, %v4758_v29  ;;  %v4946_v28 = vrot.slane %v17387_v24, 1  ;;  %v14370_v29 = vld [vmem:[%s19914_s3 + $0x5a4] ss:$8 sps:$4 sm:$0xff]  }
 0x325   : > { %v4696_v57 = vor.u32 %v4694_v20, %v4693_v15  ;;  %v4707_v9 = vrot.slane %v4705_v25, 7  ;;  %v4571_v45 = vadd.f32 %v4416_v46, %v17250_v26 }
 0x326   : > { %v4596_v19 = vadd.f32 %v4578_v22, %v4570_v18  ;;  %v4851_v22 = vshll.u32 %v12015_v3, 16  ;;  %v4849_v39 = vshrl.u32 %v12015_v3, 16  ;;  %v4947_v46 = vrot.slane %v12015_v3, 1 }
 0x327   : > { %v4739_v7 = vsel %vm15666_vm13, %v4696_v57, %v4738_v56  ;;  %v4710_v1 = vor.u32 %v4708_v21, %v4707_v9  ;;  %v4597_v49 = vadd.f32 %v4582_v34, %v4571_v45  ;;  %v14365_v9 = vld [vmem:[%s19914_s3 + $0x590] ss:$8 sps:$4 sm:$0xff]  }
 0x328   : > { %4740 = vst [vmem:[#allocation3 + $0x18] sm:$0x33] %v4739_v7  ;;  %v4605_v61 = vmax.f32 %v4596_v19, 0.0  ;;  %v4853_v31 = vrot.slane %v4851_v22, 1 }
 0x329   : > { %v4745_v40 = vsel %vm15666_vm13, %v4710_v1, %v4744_v59  ;;  %v4606_v44 = vmax.f32 %v4597_v49, 0.0 }
 0x32a   : > { %4746 = vst [vmem:[#allocation3 + $0x30] sm:$0x33] %v4745_v40  ;;  %4614 = vst [vmem:[%s17169_s14 + $0x30] sm:$0xff] %v4605_v61  ;;  %v17408_v57 = vor.u32 %v4853_v31, %v4849_v39 }
 0x32b   : > { %4615 = vst [vmem:[%s17169_s14 + $0x38] sm:$0xff] %v4606_v44  ;;  %v13338_v26 = vpack.c.bf16 %v4606_v44, %v4605_v61 }
 0x32d   : > { %v4719_v5 = vshrl.u32 %v13338_v26, 16  ;;  %v4722_v6 = vshll.u32 %v13338_v26, 16 }
 0x32f   : > { %v4721_v47 = vrot.slane %v4719_v5, 7  ;;  %v17382_v34 = vld [vmem:[#allocation3 + $0x18] sm:$0xff] }
 0x330   : > { %v12017_v2 = vcombine.low %v17382_v34, %v4762_v0  ;;  %v12018_v33 = vcombine.high %v17382_v34, %v4762_v0  ;;  %v4770_v0 = vld [vmem:[#allocation3 + $0x54] sm:$0x11] }
 0x331   : > { %v4724_v38 = vor.u32 %v4722_v6, %v4721_v47  ;;  %v17389_v62 = vld [vmem:[#allocation3 + $0x30] sm:$0xff] }
 0x332   : > { %v12174_v63 = vcombine.high %v17382_v34, %v17389_v62  ;;  %v12173_v11 = vcombine.low %v17382_v34, %v17389_v62  ;;  %v12020_v35 = vcombine.low %v17389_v62, %v4766_v54  ;;  %v12021_v8 = vcombine.high %v17389_v62, %v4766_v54  ;;  %v14368_v6 = vld [vmem:[%s19914_s3 + $0x5a0] ss:$8 sps:$4 sm:$0xff]  }
 0x333   : > { %v4751_v16 = vsel %vm15666_vm13, %v4724_v38, %v4750_v58  ;;  %v4865_v15 = vshll.u32 %v12017_v2, 16  ;;  %v4872_v25 = vshll.u32 %v12018_v33, 16  ;;  %v4950_v18 = vrot.slane %v12018_v33, 1  ;;  %v14375_v38 = vld [vmem:[%s19914_s3 + $0x5b4] ss:$8 sps:$4 sm:$0xff]  }
 0x334   : > { %4752 = vst [vmem:[#allocation3 + $0x48] sm:$0x33] %v4751_v16  ;;  %6068 = vmatprep.mubr.bf16.mxu1 %v12174_v63  ;;  %v4886_v20 = vshll.u32 %v12020_v35, 16  ;;  %v4893_v56 = vshll.u32 %v12021_v8, 16  ;;  %v17406_v14 = vrot.slane %v12021_v8, 1  ;;  %v4870_v45 = vshrl.u32 %v12018_v33, 16 }
 0x335   : > { %6069 = vmatmul.mubr.bf16.vlgmr.msra.gmra.mrb[72].mxu1 %v12173_v11  ;;  %v4874_v59 = vrot.slane %v4872_v25, 1  ;;  %v4891_v19 = vshrl.u32 %v12021_v8, 16  ;;  %v4867_v7 = vrot.slane %v4865_v15, 1  ;;  %v4949_v61 = vrot.slane %v12017_v2, 1 }
 0x336   : > { %6088 = vmatpush1.bf16.msra.mxu1 %v14361_v53  ;;  %v4888_v21 = vrot.slane %v4886_v20, 1  ;;  %v4895_v1 = vrot.slane %v4893_v56, 1  ;;  %v17417_v49 = vcombine.low %v4950_v18, %v17406_v14  ;;  %v4884_v40 = vshrl.u32 %v12020_v35, 16 }
 0x337   : > { %6089 = vmatprep.subr.bf16.mxu1 %v14367_v27  ;;  %v17419_v44 = vor.u32 %v4874_v59, %v4870_v45  ;;  %v17421_v3 = vrot.slane %v12020_v35, 1  ;;  %v17423_v26 = vcombine.low %v4947_v46, %v4950_v18  ;;  %v4863_v5 = vshrl.u32 %v12017_v2, 16  ;;  %v14373_v27 = vld [vmem:[%s19914_s3 + $0x5b0] ss:$8 sps:$4 sm:$0xff]   ;;  %v14382_v46 = vld [vmem:[%s19914_s3 + $0x5c4] ss:$8 sps:$4 sm:$0xff]  }
 0x338   : > { %v17425_v22 = vor.u32 %v4895_v1, %v4891_v19  ;;  %v17427_v47 = vcombine.low %v4946_v28, %v4949_v61  ;;  %v17432_v54 = vor.u32 %v4888_v21, %v4884_v40 }
 0x339   : > { %v17435_v58 = vcombine.low %v4949_v61, %v17421_v3  ;;  %v12339_v33 = vcombine.low %v17408_v57, %v17419_v44  ;;  %v17444_v39 = vor.u32 %v4867_v7, %v4863_v5  ;;  %v14385_v61 = vld [vmem:[%s19914_s3 + $0x5d4] ss:$8 sps:$4 sm:$0xff]  }
 0x33a   : > { %6090 = vmatpush1.bf16.msra.mxu1 %v14365_v9  ;;  %v12177_v31 = vcombine.low %v17419_v44, %v17425_v22  ;;  %v12348_v57 = vcombine.low %v17425_v22, %v17425_v22  ;;  %v14704_v44 = vld [vmem:[%s19914_s3 + $0x334] ss:$8 sps:$4 sm:$0xff]  }
 0x33b   : > { %6091 = vmatprep.subr.bf16.mxu1 %v14370_v29  ;;  %v17439_v2 = vld [vmem:[#allocation3 + $0x48] sm:$0xff]  ;;  %v12176_v15 = vcombine.low %v17444_v39, %v17432_v54  ;;  %v14380_v29 = vld [vmem:[%s19914_s3 + $0x5c0] ss:$8 sps:$4 sm:$0xff]  }
 0x33c   : > { %v12183_v63 = vcombine.high %v17439_v2, %v17439_v2  ;;  %v12182_v53 = vcombine.low %v17439_v2, %v17439_v2  ;;  %v12023_v11 = vcombine.low %v17439_v2, %v4770_v0  ;;  %v12024_v35 = vcombine.high %v17439_v2, %v4770_v0  ;;  %v14383_v0 = vld [vmem:[%s19914_s3 + $0x5d0] ss:$8 sps:$4 sm:$0xff]  }
 0x33d   : > { %v12642_v8 = vcombine.high %v17389_v62, %v17439_v2  ;;  %v12641_v16 = vcombine.low %v17389_v62, %v17439_v2  ;;  %v14826_v2 = vld [vmem:[%s19914_s3 + $0xa34] ss:$8 sps:$4 sm:$0xff]  }
 0x33e   : > { %6092 = vmatpush1.bf16.msra.mxu1 %v14368_v6  ;;  %6078 = vmatprep.mubr.bf16.mxu1 %v12183_v63  ;;  %v4907_v20 = vshll.u32 %v12023_v11, 16  ;;  %v4914_v25 = vshll.u32 %v12024_v35, 16  ;;  %v17466_v28 = vrot.slane %v12024_v35, 1  ;;  %v17468_v56 = vrot.slane %v12023_v11, 1  ;;  %v14388_v6 = vld [vmem:[%s19914_s3 + $0x5e4] ss:$8 sps:$4 sm:$0xff]  }
 0x33f   : > { %6079 = vmatmul.mubr.bf16.gmra.mrb[76].mxu1 %v12182_v53  ;;  %6093 = vmatprep.subr.bf16.mxu1 %v14375_v38  ;;  %v4905_v18 = vshrl.u32 %v12023_v11, 16  ;;  %v4912_v21 = vshrl.u32 %v12024_v35, 16  ;;  %v14386_v38 = vld [vmem:[%s19914_s3 + $0x5e0] ss:$8 sps:$4 sm:$0xff]   ;;  %v14391_v63 = vld [vmem:[%s19914_s3 + $0x5f4] ss:$8 sps:$4 sm:$0xff]  }
 0x340   : > { %6119 = vmatprep.mubr.bf16.mxu1 %v12176_v15  ;;  %v4909_v9 = vrot.slane %v4907_v20, 1  ;;  %v4916_v45 = vrot.slane %v4914_v25, 1  ;;  %v12647_v59 = vcombine.low %v17421_v3, %v17468_v56  ;;  %v12648_v19 = vcombine.low %v17406_v14, %v17466_v28  ;;  %v14389_v53 = vld [vmem:[%s19914_s3 + $0x5f0] ss:$8 sps:$4 sm:$0xff]   ;;  %v14394_v11 = vld [vmem:[%s19914_s3 + $0x604] ss:$8 sps:$4 sm:$0xff]  }
 0x341   : > { %v14392_v35 = vld [vmem:[%s19914_s3 + $0x600] ss:$8 sps:$4 sm:$0xff]   ;;  %v14395_v15 = vld [vmem:[%s19914_s3 + $0x610] ss:$8 sps:$4 sm:$0xff]   ;;  %v14400_v20 = vld [vmem:[%s19914_s3 + $0x624] ss:$8 sps:$4 sm:$0xff]  }
 0x342   : > { %6094 = vmatpush1.bf16.msra.mxu1 %v14373_v27  ;;  %v17477_v7 = vor.u32 %v4909_v9, %v4905_v18  ;;  %v17479_v1 = vor.u32 %v4916_v45, %v4912_v21  ;;  %v14397_v27 = vld [vmem:[%s19914_s3 + $0x614] ss:$8 sps:$4 sm:$0xff]   ;;  %v14398_v25 = vld [vmem:[%s19914_s3 + $0x620] ss:$8 sps:$4 sm:$0xff]   ;;  %v14401_v18 = vld [vmem:[%s19914_s3 + $0x630] ss:$8 sps:$4 sm:$0xff]  }
 0x343   : > { %6095 = vmatprep.subr.bf16.mxu1 %v14382_v46  ;;  %v14403_v46 = vld [vmem:[%s19914_s3 + $0x634] ss:$8 sps:$4 sm:$0xff]   ;;  %v14406_v9 = vld [vmem:[%s19914_s3 + $0x644] ss:$8 sps:$4 sm:$0xff]   ;;  %v14404_v21 = vld [vmem:[%s19914_s3 + $0x640] ss:$8 sps:$4 sm:$0xff]  }
 0x344   : > { %v12645_v40 = vcombine.low %v17425_v22, %v17479_v1  ;;  %v12644_v5 = vcombine.low %v17432_v54, %v17477_v7  ;;  %v14409_v45 = vld [vmem:[%s19914_s3 + $0x654] ss:$8 sps:$4 sm:$0xff]  }
 0x345   : > { %v14924_v22 = vld [vmem:[%s19914_s3 + $0xc34] ss:$8 sps:$4 sm:$0xff]  }
 0x346   : > { %6096 = vmatpush1.bf16.msra.mxu1 %v14380_v29  ;;  %v14407_v29 = vld [vmem:[%s19914_s3 + $0x650] ss:$8 sps:$4 sm:$0xff]  }
 0x347   : > { %6097 = vmatprep.subr.bf16.mxu1 %v14385_v61  ;;  %v14412_v61 = vld [vmem:[%s19914_s3 + $0x664] ss:$8 sps:$4 sm:$0xff]  }
 0x34a   : > { %6098 = vmatpush1.bf16.msra.mxu1 %v14383_v0  ;;  %v14410_v0 = vld [vmem:[%s19914_s3 + $0x660] ss:$8 sps:$4 sm:$0xff]  }
 0x34b   : > { %6099 = vmatprep.subr.bf16.mxu1 %v14388_v6  ;;  %v14415_v6 = vld [vmem:[%s19914_s3 + $0x674] ss:$8 sps:$4 sm:$0xff]  }
 0x34e   : > { %6100 = vmatpush1.bf16.msra.mxu1 %v14386_v38  ;;  %v14413_v38 = vld [vmem:[%s19914_s3 + $0x670] ss:$8 sps:$4 sm:$0xff]  }
 0x34f   : > { %6101 = vmatprep.subr.bf16.mxu1 %v14391_v63  ;;  %v14419_v63 = vld [vmem:[%s19914_s3 + $0x684] ss:$8 sps:$4 sm:$0xff]  }
 0x352   : > { %6102 = vmatpush1.bf16.msra.mxu1 %v14389_v53  ;;  %v4879_v53 = vshll.u32 %v17216_v13, 16 }
 0x353   : > { %6103 = vmatprep.subr.bf16.mxu1 %v14394_v11  ;;  %v14417_v11 = vld [vmem:[%s19914_s3 + $0x680] ss:$8 sps:$4 sm:$0xff]  }
 0x356   : > { %6104 = vmatpush1.bf16.msra.mxu1 %v14392_v35  ;;  %v12175_v35 = vcombine.low %v17209_v32, %v17213_v48  ;;  %v14429_v32 = vld [vmem:[%s19914_s3 + $0x6a4] ss:$8 sps:$4 sm:$0xff]   ;;  %v14876_v48 = vld [vmem:[%s19914_s3 + $0xb34] ss:$8 sps:$4 sm:$0xff]  }
 0x357   : > { %6105 = vmatprep.subr.bf16.mxu1 %v14397_v27  ;;  %v14423_v27 = vld [vmem:[%s19914_s3 + $0x694] ss:$8 sps:$4 sm:$0xff]  }
 0x35a   : > { %6106 = vmatpush1.bf16.msra.mxu1 %v14395_v15  ;;  %v12185_v15 = vcombine.low %v17477_v7, %v17477_v7  ;;  %v14830_v7 = vld [vmem:[%s19914_s3 + $0xa50] ss:$8 sps:$4 sm:$0xff]  }
 0x35b   : > { %6107 = vmatprep.subr.bf16.mxu1 %v14400_v20  ;;  %v4877_v20 = vshrl.u32 %v17216_v13, 16  ;;  %v14427_v13 = vld [vmem:[%s19914_s3 + $0x6a0] ss:$8 sps:$4 sm:$0xff]  }
 0x35e   : > { %6108 = vmatpush1.bf16.msra.mxu1 %v14398_v25  ;;  %v4881_v25 = vrot.slane %v4879_v53, 1  ;;  %v14441_v53 = vld [vmem:[%s19914_s3 + $0x6e0] ss:$8 sps:$4 sm:$0xff]  }
 0x35f   : > { %6109 = vmatprep.subr.bf16.mxu1 %v14403_v46  ;;  %v14421_v46 = vld [vmem:[%s19914_s3 + $0x690] ss:$8 sps:$4 sm:$0xff]  }
 0x362   : > { %6110 = vmatpush1.bf16.msra.mxu1 %v14401_v18  ;;  %v17572_v18 = vor.u32 %v4881_v25, %v4877_v20  ;;  %v14452_v20 = vld [vmem:[%s19914_s3 + $0x714] ss:$8 sps:$4 sm:$0xff]   ;;  %v14450_v25 = vld [vmem:[%s19914_s3 + $0x710] ss:$8 sps:$4 sm:$0xff]  }
 0x363   : > { %6111 = vmatprep.subr.bf16.mxu1 %v14406_v9  ;;  %v12184_v9 = vcombine.low %v17229_v4, %v17229_v4  ;;  %v14874_v4 = vld [vmem:[%s19914_s3 + $0xb30] ss:$8 sps:$4 sm:$0xff]  }
 0x366   : > { %6112 = vmatpush1.bf16.msra.mxu1 %v14404_v21  ;;  %v14434_v21 = vld [vmem:[%s19914_s3 + $0x6b4] ss:$8 sps:$4 sm:$0xff]  }
 0x367   : > { %6113 = vmatprep.subr.bf16.mxu1 %v14409_v45  ;;  %v12178_v45 = vcombine.low %v17572_v18, %v17237_v10 }
 0x36a   : > { %6114 = vmatpush1.bf16.msra.mxu1 %v14407_v29  ;;  %v14432_v29 = vld [vmem:[%s19914_s3 + $0x6b0] ss:$8 sps:$4 sm:$0xff]  }
 0x36b   : > { %6115 = vmatprep.subr.bf16.mxu1 %v14412_v61  ;;  %v14437_v61 = vld [vmem:[%s19914_s3 + $0x6c4] ss:$8 sps:$4 sm:$0xff]  }
 0x36e   : > { %6116 = vmatpush1.bf16.msra.mxu1 %v14410_v0  ;;  %v14435_v0 = vld [vmem:[%s19914_s3 + $0x6c0] ss:$8 sps:$4 sm:$0xff]  }
 0x36f   : > { %6117 = vmatprep.subr.bf16.mxu1 %v14415_v6  ;;  %v14440_v6 = vld [vmem:[%s19914_s3 + $0x6d4] ss:$8 sps:$4 sm:$0xff]  }
 0x372   : > { %6118 = vmatpush1.bf16.msra.mxu1 %v14413_v38  ;;  %v14438_v38 = vld [vmem:[%s19914_s3 + $0x6d0] ss:$8 sps:$4 sm:$0xff]  }
 0x373   : > { %6138 = vmatprep.subr.bf16.mxu1 %v14419_v63  ;;  %v14443_v63 = vld [vmem:[%s19914_s3 + $0x6e4] ss:$8 sps:$4 sm:$0xff]  }
 0x375   : > { %6120 = vmatmul.mubr.bf16.vlgmr.msra.gmra.mrb[72].mxu1 %v12175_v35  ;;  %v14444_v35 = vld [vmem:[%s19914_s3 + $0x6f0] ss:$8 sps:$4 sm:$0xff]  }
 0x376   : > { %6129 = vmatprep.mubr.bf16.mxu1 %v12185_v15  ;;  %6139 = vmatpush1.bf16.msra.mxu1 %v14417_v11  ;;  %v14446_v11 = vld [vmem:[%s19914_s3 + $0x6f4] ss:$8 sps:$4 sm:$0xff]   ;;  %v14447_v15 = vld [vmem:[%s19914_s3 + $0x700] ss:$8 sps:$4 sm:$0xff]  }
 0x377   : > { %6140 = vmatprep.subr.bf16.mxu1 %v14423_v27  ;;  %v14449_v27 = vld [vmem:[%s19914_s3 + $0x704] ss:$8 sps:$4 sm:$0xff]  }
 0x37a   : > { %6141 = vmatpush1.bf16.msra.mxu1 %v14421_v46  ;;  %v14455_v46 = vld [vmem:[%s19914_s3 + $0x724] ss:$8 sps:$4 sm:$0xff]  }
 0x37b   : > { %6142 = vmatprep.subr.bf16.mxu1 %v14429_v32  ;;  %v14453_v32 = vld [vmem:[%s19914_s3 + $0x720] ss:$8 sps:$4 sm:$0xff]  }
 0x37d   : > { %6130 = vmatmul.mubr.bf16.gmra.mrb[80].mxu1 %v12184_v9  ;;  %v14456_v9 = vld [vmem:[%s19914_s3 + $0x730] ss:$8 sps:$4 sm:$0xff]  }
 0x37e   : > { %6143 = vmatpush1.bf16.msra.mxu1 %v14427_v13  ;;  %6170 = vmatprep.mubr.bf16.mxu1 %v12178_v45  ;;  %v14458_v13 = vld [vmem:[%s19914_s3 + $0x734] ss:$8 sps:$4 sm:$0xff]   ;;  %v14459_v45 = vld [vmem:[%s19914_s3 + $0x740] ss:$8 sps:$4 sm:$0xff]  }
 0x37f   : > { %6144 = vmatprep.subr.bf16.mxu1 %v14434_v21  ;;  %v14461_v21 = vld [vmem:[%s19914_s3 + $0x744] ss:$8 sps:$4 sm:$0xff]  }
 0x382   : > { %6145 = vmatpush1.bf16.msra.mxu1 %v14432_v29  ;;  %v14464_v29 = vld [vmem:[%s19914_s3 + $0x754] ss:$8 sps:$4 sm:$0xff]  }
 0x383   : > { %6146 = vmatprep.subr.bf16.mxu1 %v14437_v61  ;;  %v14462_v61 = vld [vmem:[%s19914_s3 + $0x750] ss:$8 sps:$4 sm:$0xff]  }
 0x386   : > { %6147 = vmatpush1.bf16.msra.mxu1 %v14435_v0  ;;  %v14467_v0 = vld [vmem:[%s19914_s3 + $0x764] ss:$8 sps:$4 sm:$0xff]  }
 0x387   : > { %6148 = vmatprep.subr.bf16.mxu1 %v14440_v6  ;;  %v14465_v6 = vld [vmem:[%s19914_s3 + $0x760] ss:$8 sps:$4 sm:$0xff]  }
 0x38a   : > { %6149 = vmatpush1.bf16.msra.mxu1 %v14438_v38  ;;  %v14470_v38 = vld [vmem:[%s19914_s3 + $0x774] ss:$8 sps:$4 sm:$0xff]  }
 0x38b   : > { %6150 = vmatprep.subr.bf16.mxu1 %v14443_v63  ;;  %v14468_v63 = vld [vmem:[%s19914_s3 + $0x770] ss:$8 sps:$4 sm:$0xff]  }
 0x38e   : > { %6151 = vmatpush1.bf16.msra.mxu1 %v14441_v53  ;;  %v14473_v53 = vld [vmem:[%s19914_s3 + $0x784] ss:$8 sps:$4 sm:$0xff]  }
 0x38f   : > { %6152 = vmatprep.subr.bf16.mxu1 %v14446_v11  ;;  %v14471_v11 = vld [vmem:[%s19914_s3 + $0x780] ss:$8 sps:$4 sm:$0xff]  }
 0x392   : > { %6153 = vmatpush1.bf16.msra.mxu1 %v14444_v35  ;;  %v14476_v35 = vld [vmem:[%s19914_s3 + $0x794] ss:$8 sps:$4 sm:$0xff]  }
 0x393   : > { %6154 = vmatprep.subr.bf16.mxu1 %v14449_v27  ;;  %v12187_v27 = vcombine.low %v17241_v23, %v17241_v23  ;;  %v14880_v23 = vld [vmem:[%s19914_s3 + $0xb50] ss:$8 sps:$4 sm:$0xff]  }
 0x396   : > { %6155 = vmatpush1.bf16.msra.mxu1 %v14447_v15  ;;  %v14474_v15 = vld [vmem:[%s19914_s3 + $0x790] ss:$8 sps:$4 sm:$0xff]  }
 0x397   : > { %6156 = vmatprep.subr.bf16.mxu1 %v14452_v20  ;;  %v14480_v20 = vld [vmem:[%s19914_s3 + $0x7a4] ss:$8 sps:$4 sm:$0xff]  }
 0x39a   : > { %6157 = vmatpush1.bf16.msra.mxu1 %v14450_v25  ;;  %v14478_v25 = vld [vmem:[%s19914_s3 + $0x7a0] ss:$8 sps:$4 sm:$0xff]  }
 0x39b   : > { %6158 = vmatprep.subr.bf16.mxu1 %v14455_v46  ;;  %v12186_v46 = vcombine.low %v17479_v1, %v17479_v1  ;;  %v14922_v1 = vld [vmem:[%s19914_s3 + $0xc30] ss:$8 sps:$4 sm:$0xff]  }
 0x39e   : > { %6159 = vmatpush1.bf16.msra.mxu1 %v14453_v32  ;;  %v14481_v32 = vld [vmem:[%s19914_s3 + $0x7b0] ss:$8 sps:$4 sm:$0xff]  }
 0x39f   : > { %6160 = vmatprep.subr.bf16.mxu1 %v14458_v13  ;;  %v14486_v13 = vld [vmem:[%s19914_s3 + $0x7c4] ss:$8 sps:$4 sm:$0xff]  }
 0x3a2   : > { %6161 = vmatpush1.bf16.msra.mxu1 %v14456_v9  ;;  %v14484_v9 = vld [vmem:[%s19914_s3 + $0x7c0] ss:$8 sps:$4 sm:$0xff]  }
 0x3a3   : > { %6162 = vmatprep.subr.bf16.mxu1 %v14461_v21  ;;  %v14489_v21 = vld [vmem:[%s19914_s3 + $0x7d4] ss:$8 sps:$4 sm:$0xff]  }
 0x3a6   : > { %6163 = vmatpush1.bf16.msra.mxu1 %v14459_v45  ;;  %v14492_v45 = vld [vmem:[%s19914_s3 + $0x7e4] ss:$8 sps:$4 sm:$0xff]  }
 0x3a7   : > { %6164 = vmatprep.subr.bf16.mxu1 %v14464_v29  ;;  %v14490_v29 = vld [vmem:[%s19914_s3 + $0x7e0] ss:$8 sps:$4 sm:$0xff]  }
 0x3aa   : > { %6165 = vmatpush1.bf16.msra.mxu1 %v14462_v61  ;;  %v14495_v61 = vld [vmem:[%s19914_s3 + $0x7f4] ss:$8 sps:$4 sm:$0xff]  }
 0x3ab   : > { %6166 = vmatprep.subr.bf16.mxu1 %v14467_v0  ;;  %v14493_v0 = vld [vmem:[%s19914_s3 + $0x7f0] ss:$8 sps:$4 sm:$0xff]  }
 0x3ae   : > { %6167 = vmatpush1.bf16.msra.mxu1 %v14465_v6  ;;  %v14498_v6 = vld [vmem:[%s19914_s3 + $0x804] ss:$8 sps:$4 sm:$0xff]  }
 0x3af   : > { %6168 = vmatprep.subr.bf16.mxu1 %v14470_v38  ;;  %v14496_v38 = vld [vmem:[%s19914_s3 + $0x800] ss:$8 sps:$4 sm:$0xff]  }
 0x3b2   : > { %6169 = vmatpush1.bf16.msra.mxu1 %v14468_v63  ;;  %v14501_v63 = vld [vmem:[%s19914_s3 + $0x814] ss:$8 sps:$4 sm:$0xff]  }
 0x3b3   : > { %6189 = vmatprep.subr.bf16.mxu1 %v14473_v53  ;;  %v14499_v53 = vld [vmem:[%s19914_s3 + $0x810] ss:$8 sps:$4 sm:$0xff]  }
 0x3b5   : > { %6171 = vmatmul.mubr.bf16.vlgmr.msra.gmra.mrb[72].mxu1 %v12177_v31  ;;  %v14483_v31 = vld [vmem:[%s19914_s3 + $0x7b4] ss:$8 sps:$4 sm:$0xff]  }
 0x3b6   : > { %6180 = vmatprep.mubr.bf16.mxu1 %v12187_v27  ;;  %6190 = vmatpush1.bf16.msra.mxu1 %v14471_v11  ;;  %v14504_v11 = vld [vmem:[%s19914_s3 + $0x824] ss:$8 sps:$4 sm:$0xff]   ;;  %v14507_v27 = vld [vmem:[%s19914_s3 + $0x834] ss:$8 sps:$4 sm:$0xff]  }
 0x3b7   : > { %6191 = vmatprep.subr.bf16.mxu1 %v14476_v35  ;;  %v14502_v35 = vld [vmem:[%s19914_s3 + $0x820] ss:$8 sps:$4 sm:$0xff]  }
 0x3ba   : > { %6192 = vmatpush1.bf16.msra.mxu1 %v14474_v15  ;;  %v14505_v15 = vld [vmem:[%s19914_s3 + $0x830] ss:$8 sps:$4 sm:$0xff]  }
 0x3bb   : > { %6193 = vmatprep.subr.bf16.mxu1 %v14480_v20  ;;  %v14510_v20 = vld [vmem:[%s19914_s3 + $0x844] ss:$8 sps:$4 sm:$0xff]  }
 0x3bd   : > { %6181 = vmatmul.mubr.bf16.gmra.mrb[84].mxu1 %v12186_v46  ;;  %v14513_v46 = vld [vmem:[%s19914_s3 + $0x854] ss:$8 sps:$4 sm:$0xff]  }
 0x3be   : > { %6194 = vmatpush1.bf16.msra.mxu1 %v14478_v25  ;;  %6221 = vmatprep.mubr.bf16.mxu1 %v17417_v49  ;;  %v14487_v49 = vld [vmem:[%s19914_s3 + $0x7d0] ss:$8 sps:$4 sm:$0xff]   ;;  %v14508_v25 = vld [vmem:[%s19914_s3 + $0x840] ss:$8 sps:$4 sm:$0xff]  }
 0x3bf   : > { %6195 = vmatprep.subr.bf16.mxu1 %v14483_v31  ;;  %v14511_v31 = vld [vmem:[%s19914_s3 + $0x850] ss:$8 sps:$4 sm:$0xff]  }
 0x3c2   : > { %6196 = vmatpush1.bf16.msra.mxu1 %v14481_v32  ;;  %v14516_v32 = vld [vmem:[%s19914_s3 + $0x864] ss:$8 sps:$4 sm:$0xff]  }
 0x3c3   : > { %6197 = vmatprep.subr.bf16.mxu1 %v14486_v13  ;;  %v14514_v13 = vld [vmem:[%s19914_s3 + $0x860] ss:$8 sps:$4 sm:$0xff]  }
 0x3c6   : > { %6198 = vmatpush1.bf16.msra.mxu1 %v14484_v9  ;;  %v14519_v9 = vld [vmem:[%s19914_s3 + $0x874] ss:$8 sps:$4 sm:$0xff]  }
 0x3c7   : > { %6199 = vmatprep.subr.bf16.mxu1 %v14489_v21  ;;  %v14517_v21 = vld [vmem:[%s19914_s3 + $0x870] ss:$8 sps:$4 sm:$0xff]  }
 0x3ca   : > { %6200 = vmatpush1.bf16.msra.mxu1 %v14487_v49  ;;  %v14522_v49 = vld [vmem:[%s19914_s3 + $0x884] ss:$8 sps:$4 sm:$0xff]  }
 0x3cb   : > { %6201 = vmatprep.subr.bf16.mxu1 %v14492_v45  ;;  %v14520_v45 = vld [vmem:[%s19914_s3 + $0x880] ss:$8 sps:$4 sm:$0xff]  }
 0x3ce   : > { %6202 = vmatpush1.bf16.msra.mxu1 %v14490_v29  ;;  %v14525_v29 = vld [vmem:[%s19914_s3 + $0x894] ss:$8 sps:$4 sm:$0xff]  }
 0x3cf   : > { %6203 = vmatprep.subr.bf16.mxu1 %v14495_v61  ;;  %v12189_v61 = vcombine.low %v17466_v28, %v17466_v28  ;;  %v14928_v28 = vld [vmem:[%s19914_s3 + $0xc50] ss:$8 sps:$4 sm:$0xff]  }
 0x3d2   : > { %6204 = vmatpush1.bf16.msra.mxu1 %v14493_v0  ;;  %v14523_v0 = vld [vmem:[%s19914_s3 + $0x890] ss:$8 sps:$4 sm:$0xff]  }
 0x3d3   : > { %6205 = vmatprep.subr.bf16.mxu1 %v14498_v6  ;;  %v14528_v6 = vld [vmem:[%s19914_s3 + $0x8a4] ss:$8 sps:$4 sm:$0xff]  }
 0x3d6   : > { %6206 = vmatpush1.bf16.msra.mxu1 %v14496_v38  ;;  %v14526_v38 = vld [vmem:[%s19914_s3 + $0x8a0] ss:$8 sps:$4 sm:$0xff]  }
 0x3d7   : > { %6207 = vmatprep.subr.bf16.mxu1 %v14501_v63  ;;  %v12188_v63 = vcombine.low %v17468_v56, %v17468_v56  ;;  %v14972_v56 = vld [vmem:[%s19914_s3 + $0xd34] ss:$8 sps:$4 sm:$0xff]  }
 0x3da   : > { %6208 = vmatpush1.bf16.msra.mxu1 %v14499_v53  ;;  %v14529_v53 = vld [vmem:[%s19914_s3 + $0x8b0] ss:$8 sps:$4 sm:$0xff]  }
 0x3db   : > { %6209 = vmatprep.subr.bf16.mxu1 %v14504_v11  ;;  %v14534_v11 = vld [vmem:[%s19914_s3 + $0x8c4] ss:$8 sps:$4 sm:$0xff]  }
 0x3de   : > { %6210 = vmatpush1.bf16.msra.mxu1 %v14502_v35  ;;  %v14532_v35 = vld [vmem:[%s19914_s3 + $0x8c0] ss:$8 sps:$4 sm:$0xff]  }
 0x3df   : > { %6211 = vmatprep.subr.bf16.mxu1 %v14507_v27  ;;  %v14537_v27 = vld [vmem:[%s19914_s3 + $0x8d4] ss:$8 sps:$4 sm:$0xff]  }
 0x3e2   : > { %6212 = vmatpush1.bf16.msra.mxu1 %v14505_v15  ;;  %v14535_v15 = vld [vmem:[%s19914_s3 + $0x8d0] ss:$8 sps:$4 sm:$0xff]  }
 0x3e3   : > { %6213 = vmatprep.subr.bf16.mxu1 %v14510_v20  ;;  %v14540_v20 = vld [vmem:[%s19914_s3 + $0x8e4] ss:$8 sps:$4 sm:$0xff]  }
 0x3e6   : > { %6214 = vmatpush1.bf16.msra.mxu1 %v14508_v25  ;;  %v14538_v25 = vld [vmem:[%s19914_s3 + $0x8e0] ss:$8 sps:$4 sm:$0xff]  }
 0x3e7   : > { %6215 = vmatprep.subr.bf16.mxu1 %v14513_v46  ;;  %v14543_v46 = vld [vmem:[%s19914_s3 + $0x8f4] ss:$8 sps:$4 sm:$0xff]  }
 0x3ea   : > { %6216 = vmatpush1.bf16.msra.mxu1 %v14511_v31  ;;  %v14541_v31 = vld [vmem:[%s19914_s3 + $0x8f0] ss:$8 sps:$4 sm:$0xff]  }
 0x3eb   : > { %6217 = vmatprep.subr.bf16.mxu1 %v14516_v32  ;;  %v14546_v32 = vld [vmem:[%s19914_s3 + $0x4] ss:$8 sps:$4 sm:$0xff]  }
 0x3ee   : > { %6218 = vmatpush1.bf16.msra.mxu1 %v14514_v13 }
 0x3ef   : > { %6219 = vmatprep.subr.bf16.mxu1 %v14519_v9  ;;  %v14544_v9 = vld [vmem:[%s19914_s3] ss:$8 sps:$4 sm:$0xff]  }
 0x3f2   : > { %6220 = vmatpush1.bf16.msra.mxu1 %v14517_v21 }
 0x3f3   : > { %6240 = vmatprep.subr.bf16.mxu1 %v14522_v49  ;;  %v14549_v49 = vld [vmem:[%s19914_s3 + $0x14] ss:$8 sps:$4 sm:$0xff]  }
 0x3f5   : > { %6222 = vmatmul.mubr.bf16.vlgmr.msra.gmra.mrb[72].mxu1 %v17435_v58  ;;  %v14531_v58 = vld [vmem:[%s19914_s3 + $0x8b4] ss:$8 sps:$4 sm:$0xff]  }
 0x3f6   : > { %6231 = vmatprep.mubr.bf16.mxu1 %v12189_v61  ;;  %6241 = vmatpush1.bf16.msra.mxu1 %v14520_v45  ;;  %v14547_v61 = vld [vmem:[%s19914_s3 + $0x10] ss:$8 sps:$4 sm:$0xff]  }
 0x3f7   : > { %6242 = vmatprep.subr.bf16.mxu1 %v14525_v29 }
 0x3fa   : > { %6243 = vmatpush1.bf16.msra.mxu1 %v14523_v0  ;;  %v14552_v0 = vld [vmem:[%s19914_s3 + $0x24] ss:$8 sps:$4 sm:$0xff]  }
 0x3fb   : > { %6244 = vmatprep.subr.bf16.mxu1 %v14528_v6  ;;  %v14550_v6 = vld [vmem:[%s19914_s3 + $0x20] ss:$8 sps:$4 sm:$0xff]  }
 0x3fd   : > { %6232 = vmatmul.mubr.bf16.gmra.mrb[88].mxu1 %v12188_v63  ;;  %v12336_v63 = vcombine.high %v17377_v36, %v17382_v34 }
 0x3fe   : > { %6245 = vmatpush1.bf16.msra.mxu1 %v14526_v38  ;;  %6272 = vmatprep.mubr.bf16.mxu1 %v17377_v36  ;;  %v14555_v38 = vld [vmem:[%s19914_s3 + $0x34] ss:$8 sps:$4 sm:$0xff]  }
 0x3ff   : > { %6246 = vmatprep.subr.bf16.mxu1 %v14531_v58  ;;  %v14553_v58 = vld [vmem:[%s19914_s3 + $0x30] ss:$8 sps:$4 sm:$0xff]  }
 0x402   : > { %6247 = vmatpush1.bf16.msra.mxu1 %v14529_v53  ;;  %v14558_v53 = vld [vmem:[%s19914_s3 + $0x44] ss:$8 sps:$4 sm:$0xff]  }
 0x403   : > { %6248 = vmatprep.subr.bf16.mxu1 %v14534_v11  ;;  %v14556_v11 = vld [vmem:[%s19914_s3 + $0x40] ss:$8 sps:$4 sm:$0xff]  }
 0x406   : > { %6249 = vmatpush1.bf16.msra.mxu1 %v14532_v35  ;;  %v14561_v35 = vld [vmem:[%s19914_s3 + $0x54] ss:$8 sps:$4 sm:$0xff]  }
 0x407   : > { %6250 = vmatprep.subr.bf16.mxu1 %v14537_v27  ;;  %v14559_v27 = vld [vmem:[%s19914_s3 + $0x50] ss:$8 sps:$4 sm:$0xff]  }
 0x40a   : > { %6251 = vmatpush1.bf16.msra.mxu1 %v14535_v15  ;;  %v14564_v15 = vld [vmem:[%s19914_s3 + $0x64] ss:$8 sps:$4 sm:$0xff]  }
 0x40b   : > { %6252 = vmatprep.subr.bf16.mxu1 %v14540_v20  ;;  %v14562_v20 = vld [vmem:[%s19914_s3 + $0x60] ss:$8 sps:$4 sm:$0xff]  }
 0x40e   : > { %6253 = vmatpush1.bf16.msra.mxu1 %v14538_v25  ;;  %v14567_v25 = vld [vmem:[%s19914_s3 + $0x74] ss:$8 sps:$4 sm:$0xff]  }
 0x40f   : > { %6254 = vmatprep.subr.bf16.mxu1 %v14543_v46  ;;  %v14565_v46 = vld [vmem:[%s19914_s3 + $0x70] ss:$8 sps:$4 sm:$0xff]  }
 0x412   : > { %6255 = vmatpush1.bf16.msra.mxu1 %v14541_v31  ;;  %v17820_v13 = vpop.f32.mrb[76].mxu1  ;;  %v14570_v31 = vld [vmem:[%s19914_s3 + $0x84] ss:$8 sps:$4 sm:$0xff]  }
 0x413   : > { %v17825_v21 = vpop.f32.mrb[77].mxu1  ;;  %7047 = vmatprep.subr.bf16.mxu1 %v14546_v32  ;;  %v14568_v32 = vld [vmem:[%s19914_s3 + $0x80] ss:$8 sps:$4 sm:$0xff]  }
 0x414   : > { %v6084_v45 = vpop.f32.mrb[78].mxu1 }
 0x415   : > { %6273 = vmatmul.mubr.bf16.vlgmr.msra.gmra.mrb[72].mxu1 %v17226_v37  ;;  %v6085_v29 = vpop.f32.mrb[79].mxu1  ;;  %v12190_v37 = vcombine.low %v17235_v51, %v17235_v51  ;;  %v14576_v45 = vld [vmem:[%s19914_s3 + $0xa4] ss:$8 sps:$4 sm:$0xff]   ;;  %v14996_v51 = vld [vmem:[%s19916_s5 + $0x334] ss:$8 sps:$4 sm:$0xff]  }
 0x416   : > { %7048 = vmatpush1.bf16.msra.mxu1 %v14544_v9  ;;  %6282 = vmatprep.mubr.bf16.mxu1 %v17377_v36  ;;  %v14573_v9 = vld [vmem:[%s19914_s3 + $0x94] ss:$8 sps:$4 sm:$0xff]   ;;  %v14574_v29 = vld [vmem:[%s19914_s3 + $0xa0] ss:$8 sps:$4 sm:$0xff]  }
 0x417   : > { %7049 = vmatprep.subr.bf16.mxu1 %v14549_v49  ;;  %v14571_v49 = vld [vmem:[%s19914_s3 + $0x90] ss:$8 sps:$4 sm:$0xff]  }
 0x41a   : > { %7050 = vmatpush1.bf16.msra.mxu1 %v14547_v61  ;;  %v14579_v61 = vld [vmem:[%s19914_s3 + $0xb4] ss:$8 sps:$4 sm:$0xff]  }
 0x41b   : > { %7051 = vmatprep.subr.bf16.mxu1 %v14552_v0  ;;  %v14577_v0 = vld [vmem:[%s19914_s3 + $0xb0] ss:$8 sps:$4 sm:$0xff]  }
 0x41d   : > { %6283 = vmatmul.mubr.bf16.gmra.mrb[92].mxu1 %v12190_v37  ;;  %v14580_v37 = vld [vmem:[%s19914_s3 + $0xc0] ss:$8 sps:$4 sm:$0xff]  }
 0x41e   : > { %7052 = vmatpush1.bf16.msra.mxu1 %v14550_v6  ;;  %7079 = vmatprep.mubr.bf16.mxu1 %v12336_v63  ;;  %v14582_v6 = vld [vmem:[%s19914_s3 + $0xc4] ss:$8 sps:$4 sm:$0xff]   ;;  %v14583_v63 = vld [vmem:[%s19914_s3 + $0xd0] ss:$8 sps:$4 sm:$0xff]  }
 0x41f   : > { %7053 = vmatprep.subr.bf16.mxu1 %v14555_v38  ;;  %v14585_v38 = vld [vmem:[%s19914_s3 + $0xd4] ss:$8 sps:$4 sm:$0xff]  }
 0x422   : > { %7054 = vmatpush1.bf16.msra.mxu1 %v14553_v58  ;;  %v14588_v58 = vld [vmem:[%s19914_s3 + $0xe4] ss:$8 sps:$4 sm:$0xff]  }
 0x423   : > { %7055 = vmatprep.subr.bf16.mxu1 %v14558_v53  ;;  %v14586_v53 = vld [vmem:[%s19914_s3 + $0xe0] ss:$8 sps:$4 sm:$0xff]  }
 0x426   : > { %7056 = vmatpush1.bf16.msra.mxu1 %v14556_v11  ;;  %v14591_v11 = vld [vmem:[%s19914_s3 + $0xf4] ss:$8 sps:$4 sm:$0xff]  }
 0x427   : > { %7057 = vmatprep.subr.bf16.mxu1 %v14561_v35  ;;  %v14589_v35 = vld [vmem:[%s19914_s3 + $0xf0] ss:$8 sps:$4 sm:$0xff]  }
 0x42a   : > { %7058 = vmatpush1.bf16.msra.mxu1 %v14559_v27  ;;  %v14594_v27 = vld [vmem:[%s19914_s3 + $0x104] ss:$8 sps:$4 sm:$0xff]  }
 0x42b   : > { %7059 = vmatprep.subr.bf16.mxu1 %v14564_v15 }
 0x42e   : > { %7060 = vmatpush1.bf16.msra.mxu1 %v14562_v20  ;;  %v4844_v20 = vshll.u32 %v17387_v24, 16 }
 0x42f   : > { %7061 = vmatprep.subr.bf16.mxu1 %v14567_v25 }
 0x432   : > { %7062 = vmatpush1.bf16.msra.mxu1 %v14565_v46 }
 0x433   : > { %7063 = vmatprep.subr.bf16.mxu1 %v14570_v31 }
 0x436   : > { %7064 = vmatpush1.bf16.msra.mxu1 %v14568_v32 }
 0x437   : > { %7065 = vmatprep.subr.bf16.mxu1 %v14573_v9  ;;  %v14592_v9 = vld [vmem:[%s19914_s3 + $0x100] ss:$8 sps:$4 sm:$0xff]  }
 0x43a   : > { %7066 = vmatpush1.bf16.msra.mxu1 %v14571_v49 }
 0x43b   : > { %7067 = vmatprep.subr.bf16.mxu1 %v14576_v45  ;;  %v12335_v45 = vcombine.low %v17377_v36, %v17382_v34  ;;  %v14602_v36 = vld [vmem:[%s19914_s3 + $0x124] ss:$8 sps:$4 sm:$0xff]  }
 0x43e   : > { %7068 = vmatpush1.bf16.msra.mxu1 %v14574_v29  ;;  %v12345_v29 = vcombine.high %v17389_v62, %v17389_v62 }
 0x43f   : > { %7069 = vmatprep.subr.bf16.mxu1 %v14579_v61  ;;  %v4846_v61 = vrot.slane %v4844_v20, 1  ;;  %v14615_v20 = vld [vmem:[%s19914_s3 + $0x170] ss:$8 sps:$4 sm:$0xff]  }
 0x442   : > { %7070 = vmatpush1.bf16.msra.mxu1 %v14577_v0  ;;  %v14596_v0 = vld [vmem:[%s19914_s3 + $0x110] ss:$8 sps:$4 sm:$0xff]  }
 0x443   : > { %7071 = vmatprep.subr.bf16.mxu1 %v14582_v6  ;;  %v14600_v6 = vld [vmem:[%s19914_s3 + $0x120] ss:$8 sps:$4 sm:$0xff]  }
 0x446   : > { %7072 = vmatpush1.bf16.msra.mxu1 %v14580_v37  ;;  %v14605_v37 = vld [vmem:[%s19914_s3 + $0x134] ss:$8 sps:$4 sm:$0xff]  }
 0x447   : > { %7073 = vmatprep.subr.bf16.mxu1 %v14585_v38 }
 0x44a   : > { %7074 = vmatpush1.bf16.msra.mxu1 %v14583_v63  ;;  %v14603_v63 = vld [vmem:[%s19914_s3 + $0x130] ss:$8 sps:$4 sm:$0xff]  }
 0x44b   : > { %7075 = vmatprep.subr.bf16.mxu1 %v14588_v58  ;;  %v14608_v58 = vld [vmem:[%s19914_s3 + $0x144] ss:$8 sps:$4 sm:$0xff]  }
 0x44e   : > { %7076 = vmatpush1.bf16.msra.mxu1 %v14586_v53  ;;  %v14606_v53 = vld [vmem:[%s19914_s3 + $0x140] ss:$8 sps:$4 sm:$0xff]  }
 0x44f   : > { %7077 = vmatprep.subr.bf16.mxu1 %v14591_v11  ;;  %v14609_v11 = vld [vmem:[%s19914_s3 + $0x150] ss:$8 sps:$4 sm:$0xff]  }
 0x450   : > { %v6131_v15 = vpop.f32.mrb[80].mxu1 }
 0x451   : > { %v17928_v25 = vadd.f32 %v6131_v15, %v17820_v13  ;;  %v6133_v46 = vpop.f32.mrb[81].mxu1  ;;  %v14598_v13 = vld [vmem:[%s19914_s3 + $0x114] ss:$8 sps:$4 sm:$0xff]  }
 0x452   : > { %v17931_v31 = vadd.f32 %v6133_v46, %v17825_v21  ;;  %v6135_v32 = vpop.f32.mrb[82].mxu1  ;;  %7078 = vmatpush1.bf16.msra.mxu1 %v14589_v35  ;;  %v4842_v21 = vshrl.u32 %v17387_v24, 16  ;;  %v12344_v24 = vcombine.low %v17389_v62, %v17389_v62  ;;  %v14614_v35 = vld [vmem:[%s19914_s3 + $0x164] ss:$8 sps:$4 sm:$0xff]   ;;  %v14617_v15 = vld [vmem:[%s19914_s3 + $0x174] ss:$8 sps:$4 sm:$0xff]  }
 0x453   : > { %v6136_v49 = vpop.f32.mrb[83].mxu1  ;;  %7098 = vmatprep.subr.bf16.mxu1 %v14594_v27  ;;  %v14612_v27 = vld [vmem:[%s19914_s3 + $0x160] ss:$8 sps:$4 sm:$0xff]   ;;  %v14620_v46 = vld [vmem:[%s19914_s3 + $0x184] ss:$8 sps:$4 sm:$0xff]  }
 0x454   : > { %v4847_v34 = vor.u32 %v4846_v61, %v4842_v21  ;;  %v14618_v32 = vld [vmem:[%s19914_s3 + $0x180] ss:$8 sps:$4 sm:$0xff]   ;;  %v14621_v49 = vld [vmem:[%s19914_s3 + $0x190] ss:$8 sps:$4 sm:$0xff]   ;;  %v14632_v61 = vld [vmem:[%s19914_s3 + $0x1c4] ss:$8 sps:$4 sm:$0xff]  }
 0x455   : > { %7080 = vmatmul.mubr.bf16.vlgmr.msra.gmra.mrb[72].mxu1 %v12335_v45  ;;  %v14626_v45 = vld [vmem:[%s19914_s3 + $0x1a4] ss:$8 sps:$4 sm:$0xff]   ;;  %v14627_v21 = vld [vmem:[%s19914_s3 + $0x1b0] ss:$8 sps:$4 sm:$0xff]   ;;  %v14821_v62 = vld [vmem:[%s19914_s3 + $0xa20] ss:$8 sps:$4 sm:$0xff]  }
 0x456   : > { %7089 = vmatprep.mubr.bf16.mxu1 %v12345_v29  ;;  %7099 = vmatpush1.bf16.msra.mxu1 %v14592_v9  ;;  %v12338_v38 = vcombine.low %v4847_v34, %v17444_v39  ;;  %v14611_v39 = vld [vmem:[%s19914_s3 + $0x154] ss:$8 sps:$4 sm:$0xff]   ;;  %v14633_v34 = vld [vmem:[%s19914_s3 + $0x1d0] ss:$8 sps:$4 sm:$0xff]  }
 0x457   : > { %7100 = vmatprep.subr.bf16.mxu1 %v14598_v13  ;;  %v14623_v9 = vld [vmem:[%s19914_s3 + $0x194] ss:$8 sps:$4 sm:$0xff]   ;;  %v14624_v13 = vld [vmem:[%s19914_s3 + $0x1a0] ss:$8 sps:$4 sm:$0xff]  }
 0x458   : > { %v14629_v29 = vld [vmem:[%s19914_s3 + $0x1b4] ss:$8 sps:$4 sm:$0xff]  }
 0x45a   : > { %7101 = vmatpush1.bf16.msra.mxu1 %v14596_v0  ;;  %v14630_v0 = vld [vmem:[%s19914_s3 + $0x1c0] ss:$8 sps:$4 sm:$0xff]  }
 0x45b   : > { %7102 = vmatprep.subr.bf16.mxu1 %v14602_v36  ;;  %v14635_v36 = vld [vmem:[%s19914_s3 + $0x1d4] ss:$8 sps:$4 sm:$0xff]  }
 0x45d   : > { %7090 = vmatmul.mubr.bf16.gmra.mrb[96].mxu1 %v12344_v24  ;;  %v14636_v24 = vld [vmem:[%s19914_s3 + $0x1e0] ss:$8 sps:$4 sm:$0xff]  }
 0x45e   : > { %7103 = vmatpush1.bf16.msra.mxu1 %v14600_v6  ;;  %7130 = vmatprep.mubr.bf16.mxu1 %v12338_v38  ;;  %v14638_v6 = vld [vmem:[%s19914_s3 + $0x1e4] ss:$8 sps:$4 sm:$0xff]   ;;  %v14639_v38 = vld [vmem:[%s19914_s3 + $0x1f0] ss:$8 sps:$4 sm:$0xff]  }
 0x45f   : > { %7104 = vmatprep.subr.bf16.mxu1 %v14605_v37  ;;  %v14641_v37 = vld [vmem:[%s19914_s3 + $0x1f4] ss:$8 sps:$4 sm:$0xff]  }
 0x462   : > { %7105 = vmatpush1.bf16.msra.mxu1 %v14603_v63  ;;  %v14645_v63 = vld [vmem:[%s19914_s3 + $0x204] ss:$8 sps:$4 sm:$0xff]  }
 0x463   : > { %7106 = vmatprep.subr.bf16.mxu1 %v14608_v58 }
 0x466   : > { %7107 = vmatpush1.bf16.msra.mxu1 %v14606_v53  ;;  %v4858_v53 = vshll.u32 %v17211_v43, 16 }
 0x467   : > { %7108 = vmatprep.subr.bf16.mxu1 %v14611_v39 }
 0x46a   : > { %7109 = vmatpush1.bf16.msra.mxu1 %v14609_v11 }
 0x46b   : > { %7110 = vmatprep.subr.bf16.mxu1 %v14614_v35 }
 0x46e   : > { %7111 = vmatpush1.bf16.msra.mxu1 %v14612_v27 }
 0x46f   : > { %7112 = vmatprep.subr.bf16.mxu1 %v14617_v15  ;;  %v14643_v15 = vld [vmem:[%s19914_s3 + $0x200] ss:$8 sps:$4 sm:$0xff]  }
 0x472   : > { %7113 = vmatpush1.bf16.msra.mxu1 %v14615_v20 }
 0x473   : > { %7114 = vmatprep.subr.bf16.mxu1 %v14620_v46  ;;  %v15437_v46 = vld [vmem:[#allocation3 + $0x8] sm:$0xf] }
 0x476   : > { %7115 = vmatpush1.bf16.msra.mxu1 %v14618_v32  ;;  %v15438_v32 = vld [vmem:[#allocation3 + $0x20] sm:$0xf] }
 0x477   : > { %7116 = vmatprep.subr.bf16.mxu1 %v14623_v9  ;;  %v12337_v9 = vcombine.low %v15437_v46, %v15438_v32  ;;  %v14672_v46 = vld [vmem:[%s19914_s3 + $0x290] ss:$8 sps:$4 sm:$0xff]   ;;  %v14677_v32 = vld [vmem:[%s19914_s3 + $0x2a4] ss:$8 sps:$4 sm:$0xff]  }
 0x47a   : > { %7117 = vmatpush1.bf16.msra.mxu1 %v14621_v49  ;;  %v12347_v49 = vcombine.low %v17432_v54, %v17432_v54  ;;  %v14832_v54 = vld [vmem:[%s19914_s3 + $0xa54] ss:$8 sps:$4 sm:$0xff]  }
 0x47b   : > { %7118 = vmatprep.subr.bf16.mxu1 %v14626_v45  ;;  %v4860_v45 = vrot.slane %v4858_v53, 1  ;;  %v14668_v53 = vld [vmem:[%s19914_s3 + $0x274] ss:$8 sps:$4 sm:$0xff]  }
 0x47e   : > { %7119 = vmatpush1.bf16.msra.mxu1 %v14624_v13  ;;  %v14646_v13 = vld [vmem:[%s19914_s3 + $0x210] ss:$8 sps:$4 sm:$0xff]  }
 0x47f   : > { %7120 = vmatprep.subr.bf16.mxu1 %v14629_v29  ;;  %v14652_v29 = vld [vmem:[%s19914_s3 + $0x224] ss:$8 sps:$4 sm:$0xff]  }
 0x482   : > { %7121 = vmatpush1.bf16.msra.mxu1 %v14627_v21 }
 0x483   : > { %7122 = vmatprep.subr.bf16.mxu1 %v14632_v61  ;;  %v14650_v61 = vld [vmem:[%s19914_s3 + $0x220] ss:$8 sps:$4 sm:$0xff]  }
 0x486   : > { %7123 = vmatpush1.bf16.msra.mxu1 %v14630_v0 }
 0x487   : > { %7124 = vmatprep.subr.bf16.mxu1 %v14635_v36  ;;  %v14656_v36 = vld [vmem:[%s19914_s3 + $0x234] ss:$8 sps:$4 sm:$0xff]  }
 0x48a   : > { %7125 = vmatpush1.bf16.msra.mxu1 %v14633_v34 }
 0x48b   : > { %7126 = vmatprep.subr.bf16.mxu1 %v14638_v6  ;;  %v14654_v6 = vld [vmem:[%s19914_s3 + $0x230] ss:$8 sps:$4 sm:$0xff]  }
 0x48e   : > { %7127 = vmatpush1.bf16.msra.mxu1 %v14636_v24  ;;  %v14659_v24 = vld [vmem:[%s19914_s3 + $0x244] ss:$8 sps:$4 sm:$0xff]  }
 0x48f   : > { %7128 = vmatprep.subr.bf16.mxu1 %v14641_v37  ;;  %v14657_v37 = vld [vmem:[%s19914_s3 + $0x240] ss:$8 sps:$4 sm:$0xff]  }
 0x490   : > { %v6182_v58 = vpop.f32.mrb[84].mxu1 }
 0x491   : > { %v18039_v39 = vadd.f32 %v6182_v58, %v17928_v25  ;;  %v6184_v11 = vpop.f32.mrb[85].mxu1  ;;  %v14648_v25 = vld [vmem:[%s19914_s3 + $0x214] ss:$8 sps:$4 sm:$0xff]   ;;  %v14663_v58 = vld [vmem:[%s19914_s3 + $0x260] ss:$8 sps:$4 sm:$0xff]  }
 0x492   : > { %v18042_v35 = vadd.f32 %v6184_v11, %v17931_v31  ;;  %v6186_v27 = vpop.f32.mrb[86].mxu1  ;;  %7129 = vmatpush1.bf16.msra.mxu1 %v14639_v38  ;;  %v4856_v31 = vshrl.u32 %v17211_v43, 16  ;;  %v15439_v43 = vld [vmem:[#allocation3 + $0x38] sm:$0xf]  ;;  %v14660_v38 = vld [vmem:[%s19914_s3 + $0x250] ss:$8 sps:$4 sm:$0xff]  }
 0x493   : > { %v6187_v20 = vpop.f32.mrb[87].mxu1  ;;  %7149 = vmatprep.subr.bf16.mxu1 %v14645_v63  ;;  %v12346_v0 = vcombine.low %v15439_v43, %v15439_v43  ;;  %v14665_v63 = vld [vmem:[%s19914_s3 + $0x264] ss:$8 sps:$4 sm:$0xff]   ;;  %v14666_v11 = vld [vmem:[%s19914_s3 + $0x270] ss:$8 sps:$4 sm:$0xff]  }
 0x494   : > { %v4861_v21 = vor.u32 %v4860_v45, %v4856_v31  ;;  %v14671_v27 = vld [vmem:[%s19914_s3 + $0x284] ss:$8 sps:$4 sm:$0xff]   ;;  %v14674_v20 = vld [vmem:[%s19914_s3 + $0x294] ss:$8 sps:$4 sm:$0xff]   ;;  %v14681_v45 = vld [vmem:[%s19914_s3 + $0x2c0] ss:$8 sps:$4 sm:$0xff]  }
 0x495   : > { %7131 = vmatmul.mubr.bf16.vlgmr.msra.gmra.mrb[72].mxu1 %v12337_v9  ;;  %v14675_v9 = vld [vmem:[%s19914_s3 + $0x2a0] ss:$8 sps:$4 sm:$0xff]   ;;  %v14683_v31 = vld [vmem:[%s19914_s3 + $0x2c4] ss:$8 sps:$4 sm:$0xff]   ;;  %v14692_v43 = vld [vmem:[%s19914_s3 + $0x2f4] ss:$8 sps:$4 sm:$0xff]  }
 0x496   : > { %7140 = vmatprep.mubr.bf16.mxu1 %v12347_v49  ;;  %7150 = vmatpush1.bf16.msra.mxu1 %v14643_v15  ;;  %v12340_v34 = vcombine.low %v4861_v21, %v17572_v18  ;;  %v14662_v18 = vld [vmem:[%s19914_s3 + $0x254] ss:$8 sps:$4 sm:$0xff]   ;;  %v14669_v15 = vld [vmem:[%s19914_s3 + $0x280] ss:$8 sps:$4 sm:$0xff]   ;;  %v14678_v49 = vld [vmem:[%s19914_s3 + $0x2b0] ss:$8 sps:$4 sm:$0xff]  }
 0x497   : > { %7151 = vmatprep.subr.bf16.mxu1 %v14648_v25  ;;  %v14680_v25 = vld [vmem:[%s19914_s3 + $0x2b4] ss:$8 sps:$4 sm:$0xff]   ;;  %v14689_v21 = vld [vmem:[%s19914_s3 + $0x2e4] ss:$8 sps:$4 sm:$0xff]  }
 0x49a   : > { %7152 = vmatpush1.bf16.msra.mxu1 %v14646_v13  ;;  %v14686_v13 = vld [vmem:[%s19914_s3 + $0x2d4] ss:$8 sps:$4 sm:$0xff]  }
 0x49b   : > { %7153 = vmatprep.subr.bf16.mxu1 %v14652_v29  ;;  %v14684_v29 = vld [vmem:[%s19914_s3 + $0x2d0] ss:$8 sps:$4 sm:$0xff]  }
 0x49d   : > { %7141 = vmatmul.mubr.bf16.gmra.mrb[100].mxu1 %v12346_v0  ;;  %v14690_v0 = vld [vmem:[%s19914_s3 + $0x2f0] ss:$8 sps:$4 sm:$0xff]  }
 0x49e   : > { %7154 = vmatpush1.bf16.msra.mxu1 %v14650_v61  ;;  %7181 = vmatprep.mubr.bf16.mxu1 %v12340_v34  ;;  %v14687_v61 = vld [vmem:[%s19914_s3 + $0x2e0] ss:$8 sps:$4 sm:$0xff]  }
 0x49f   : > { %7155 = vmatprep.subr.bf16.mxu1 %v14656_v36  ;;  %v14695_v36 = vld [vmem:[%s19914_s3 + $0x304] ss:$8 sps:$4 sm:$0xff]  }
 0x4a2   : > { %7156 = vmatpush1.bf16.msra.mxu1 %v14654_v6 }
 0x4a3   : > { %7157 = vmatprep.subr.bf16.mxu1 %v14659_v24 }
 0x4a6   : > { %7158 = vmatpush1.bf16.msra.mxu1 %v14657_v37 }
 0x4a7   : > { %7159 = vmatprep.subr.bf16.mxu1 %v14662_v18 }
 0x4aa   : > { %7160 = vmatpush1.bf16.msra.mxu1 %v14660_v38  ;;  %v14693_v38 = vld [vmem:[%s19914_s3 + $0x300] ss:$8 sps:$4 sm:$0xff]  }
 0x4ab   : > { %7161 = vmatprep.subr.bf16.mxu1 %v14665_v63 }
 0x4ae   : > { %7162 = vmatpush1.bf16.msra.mxu1 %v14663_v58  ;;  %v14698_v58 = vld [vmem:[%s19914_s3 + $0x314] ss:$8 sps:$4 sm:$0xff]  }
 0x4af   : > { %7163 = vmatprep.subr.bf16.mxu1 %v14668_v53  ;;  %v12349_v53 = vcombine.low %v17237_v10, %v17237_v10  ;;  %v14882_v10 = vld [vmem:[%s19914_s3 + $0xb54] ss:$8 sps:$4 sm:$0xff]  }
 0x4b2   : > { %7164 = vmatpush1.bf16.msra.mxu1 %v14666_v11  ;;  %v14699_v11 = vld [vmem:[%s19914_s3 + $0x320] ss:$8 sps:$4 sm:$0xff]  }
 0x4b3   : > { %7165 = vmatprep.subr.bf16.mxu1 %v14671_v27  ;;  %v14707_v27 = vld [vmem:[%s19914_s3 + $0x344] ss:$8 sps:$4 sm:$0xff]  }
 0x4b6   : > { %7166 = vmatpush1.bf16.msra.mxu1 %v14669_v15  ;;  %v14705_v15 = vld [vmem:[%s19914_s3 + $0x340] ss:$8 sps:$4 sm:$0xff]  }
 0x4b7   : > { %7167 = vmatprep.subr.bf16.mxu1 %v14674_v20  ;;  %v14710_v20 = vld [vmem:[%s19914_s3 + $0x354] ss:$8 sps:$4 sm:$0xff]  }
 0x4ba   : > { %7168 = vmatpush1.bf16.msra.mxu1 %v14672_v46  ;;  %v14713_v46 = vld [vmem:[%s19914_s3 + $0x364] ss:$8 sps:$4 sm:$0xff]  }
 0x4bb   : > { %7169 = vmatprep.subr.bf16.mxu1 %v14677_v32  ;;  %v14711_v32 = vld [vmem:[%s19914_s3 + $0x360] ss:$8 sps:$4 sm:$0xff]  }
 0x4be   : > { %7170 = vmatpush1.bf16.msra.mxu1 %v14675_v9  ;;  %v14716_v9 = vld [vmem:[%s19914_s3 + $0x374] ss:$8 sps:$4 sm:$0xff]  }
 0x4bf   : > { %7171 = vmatprep.subr.bf16.mxu1 %v14680_v25  ;;  %v14714_v25 = vld [vmem:[%s19914_s3 + $0x370] ss:$8 sps:$4 sm:$0xff]  }
 0x4c2   : > { %7172 = vmatpush1.bf16.msra.mxu1 %v14678_v49  ;;  %v14719_v49 = vld [vmem:[%s19914_s3 + $0x384] ss:$8 sps:$4 sm:$0xff]  }
 0x4c3   : > { %7173 = vmatprep.subr.bf16.mxu1 %v14683_v31 }
 0x4c6   : > { %7174 = vmatpush1.bf16.msra.mxu1 %v14681_v45 }
 0x4c7   : > { %7175 = vmatprep.subr.bf16.mxu1 %v14686_v13 }
 0x4ca   : > { %7176 = vmatpush1.bf16.msra.mxu1 %v14684_v29 }
 0x4cb   : > { %7177 = vmatprep.subr.bf16.mxu1 %v14689_v21 }
 0x4ce   : > { %7178 = vmatpush1.bf16.msra.mxu1 %v14687_v61  ;;  %v14717_v61 = vld [vmem:[%s19914_s3 + $0x380] ss:$8 sps:$4 sm:$0xff]  }
 0x4cf   : > { %7179 = vmatprep.subr.bf16.mxu1 %v14692_v43 }
 0x4d0   : > { %v6233_v34 = vpop.f32.mrb[88].mxu1 }
 0x4d1   : > { %v6234_v6 = vadd.f32 %v6233_v34, %v18039_v39  ;;  %v6235_v24 = vpop.f32.mrb[89].mxu1  ;;  %v14696_v39 = vld [vmem:[%s19914_s3 + $0x310] ss:$8 sps:$4 sm:$0xff]   ;;  %v14725_v34 = vld [vmem:[%s19914_s3 + $0x3a4] ss:$8 sps:$4 sm:$0xff]  }
 0x4d2   : > { %v6236_v37 = vadd.f32 %v6235_v24, %v18042_v35  ;;  %v6237_v18 = vpop.f32.mrb[90].mxu1  ;;  %7180 = vmatpush1.bf16.msra.mxu1 %v14690_v0  ;;  %v14701_v35 = vld [vmem:[%s19914_s3 + $0x324] ss:$8 sps:$4 sm:$0xff]   ;;  %v14722_v0 = vld [vmem:[%s19914_s3 + $0x394] ss:$8 sps:$4 sm:$0xff]  }
 0x4d3   : > { %v6238_v63 = vpop.f32.mrb[91].mxu1  ;;  %7200 = vmatprep.subr.bf16.mxu1 %v14695_v36  ;;  %v14720_v36 = vld [vmem:[%s19914_s3 + $0x390] ss:$8 sps:$4 sm:$0xff]   ;;  %v14728_v24 = vld [vmem:[%s19914_s3 + $0x3b4] ss:$8 sps:$4 sm:$0xff]  }
 0x4d4   : > { %v14731_v18 = vld [vmem:[%s19914_s3 + $0x3c4] ss:$8 sps:$4 sm:$0xff]   ;;  %v14734_v63 = vld [vmem:[%s19914_s3 + $0x3d4] ss:$8 sps:$4 sm:$0xff]  }
 0x4d5   : > { %7182 = vmatmul.mubr.bf16.vlgmr.msra.gmra.mrb[72].mxu1 %v12339_v33  ;;  %v14702_v33 = vld [vmem:[%s19914_s3 + $0x330] ss:$8 sps:$4 sm:$0xff]  }
 0x4d6   : > { %7191 = vmatprep.mubr.bf16.mxu1 %v12349_v53  ;;  %7201 = vmatpush1.bf16.msra.mxu1 %v14693_v38  ;;  %v14729_v38 = vld [vmem:[%s19914_s3 + $0x3c0] ss:$8 sps:$4 sm:$0xff]   ;;  %v14737_v53 = vld [vmem:[%s19914_s3 + $0x3e4] ss:$8 sps:$4 sm:$0xff]  }
 0x4d7   : > { %7202 = vmatprep.subr.bf16.mxu1 %v14698_v58  ;;  %v14732_v58 = vld [vmem:[%s19914_s3 + $0x3d0] ss:$8 sps:$4 sm:$0xff]  }
 0x4da   : > { %7203 = vmatpush1.bf16.msra.mxu1 %v14696_v39  ;;  %v14735_v39 = vld [vmem:[%s19914_s3 + $0x3e0] ss:$8 sps:$4 sm:$0xff]  }
 0x4db   : > { %7204 = vmatprep.subr.bf16.mxu1 %v14701_v35  ;;  %v14740_v35 = vld [vmem:[%s19914_s3 + $0x3f4] ss:$8 sps:$4 sm:$0xff]  }
 0x4dd   : > { %7192 = vmatmul.mubr.bf16.gmra.mrb[104].mxu1 %v12348_v57  ;;  %v14743_v57 = vld [vmem:[%s19914_s3 + $0x404] ss:$8 sps:$4 sm:$0xff]  }
 0x4de   : > { %7205 = vmatpush1.bf16.msra.mxu1 %v14699_v11  ;;  %7232 = vmatprep.mubr.bf16.mxu1 %v17423_v26  ;;  %v14708_v26 = vld [vmem:[%s19914_s3 + $0x350] ss:$8 sps:$4 sm:$0xff]  }
 0x4df   : > { %7206 = vmatprep.subr.bf16.mxu1 %v14704_v44  ;;  %v14738_v11 = vld [vmem:[%s19914_s3 + $0x3f0] ss:$8 sps:$4 sm:$0xff]   ;;  %v14741_v44 = vld [vmem:[%s19914_s3 + $0x400] ss:$8 sps:$4 sm:$0xff]  }
 0x4e2   : > { %7207 = vmatpush1.bf16.msra.mxu1 %v14702_v33  ;;  %v14746_v33 = vld [vmem:[%s19914_s3 + $0x414] ss:$8 sps:$4 sm:$0xff]  }
 0x4e3   : > { %7208 = vmatprep.subr.bf16.mxu1 %v14707_v27  ;;  %v12351_v27 = vcombine.low %v17406_v14, %v17406_v14  ;;  %v14930_v14 = vld [vmem:[%s19914_s3 + $0xc54] ss:$8 sps:$4 sm:$0xff]  }
 0x4e6   : > { %7209 = vmatpush1.bf16.msra.mxu1 %v14705_v15  ;;  %v14744_v15 = vld [vmem:[%s19914_s3 + $0x410] ss:$8 sps:$4 sm:$0xff]  }
 0x4e7   : > { %7210 = vmatprep.subr.bf16.mxu1 %v14710_v20  ;;  %v14749_v20 = vld [vmem:[%s19914_s3 + $0x424] ss:$8 sps:$4 sm:$0xff]  }
 0x4ea   : > { %7211 = vmatpush1.bf16.msra.mxu1 %v14708_v26  ;;  %v14747_v26 = vld [vmem:[%s19914_s3 + $0x420] ss:$8 sps:$4 sm:$0xff]  }
 0x4eb   : > { %7212 = vmatprep.subr.bf16.mxu1 %v14713_v46  ;;  %v12350_v46 = vcombine.low %v17421_v3, %v17421_v3  ;;  %v14967_v3 = vld [vmem:[%s19914_s3 + $0xd20] ss:$8 sps:$4 sm:$0xff]  }
 0x4ee   : > { %7213 = vmatpush1.bf16.msra.mxu1 %v14711_v32  ;;  %v14750_v32 = vld [vmem:[%s19914_s3 + $0x430] ss:$8 sps:$4 sm:$0xff]  }
 0x4ef   : > { %7214 = vmatprep.subr.bf16.mxu1 %v14716_v9  ;;  %v18280_v9 = vld [vmem:[#allocation2] sm:$0xff] }
 0x4f0   : > { %v6284_v31 = vpop.f32.mrb[92].mxu1 }
 0x4f1   : > { %v18202_v45 = vadd.f32 %v6284_v31, %v6234_v6  ;;  %v6286_v13 = vpop.f32.mrb[93].mxu1  ;;  %v14723_v6 = vld [vmem:[%s19914_s3 + $0x3a0] ss:$8 sps:$4 sm:$0xff]   ;;  %v14758_v31 = vld [vmem:[%s19914_s3 + $0x454] ss:$8 sps:$4 sm:$0xff]  }
 0x4f2   : > { %v18204_v29 = vadd.f32 %v6286_v13, %v6236_v37  ;;  %v6288_v21 = vpop.f32.mrb[94].mxu1  ;;  %7215 = vmatpush1.bf16.msra.mxu1 %v14714_v25  ;;  %v14726_v37 = vld [vmem:[%s19914_s3 + $0x3b0] ss:$8 sps:$4 sm:$0xff]   ;;  %v14755_v25 = vld [vmem:[%s19914_s3 + $0x444] ss:$8 sps:$4 sm:$0xff]  }
 0x4f3   : > { %v6289_v43 = vpop.f32.mrb[95].mxu1  ;;  %7216 = vmatprep.subr.bf16.mxu1 %v14719_v49  ;;  %v14753_v49 = vld [vmem:[%s19914_s3 + $0x440] ss:$8 sps:$4 sm:$0xff]   ;;  %v14756_v13 = vld [vmem:[%s19914_s3 + $0x450] ss:$8 sps:$4 sm:$0xff]  }
 0x4f4   : > { %v14761_v21 = vld [vmem:[%s19914_s3 + $0x464] ss:$8 sps:$4 sm:$0xff]   ;;  %v14764_v43 = vld [vmem:[%s19914_s3 + $0x474] ss:$8 sps:$4 sm:$0xff]  }
 0x4f6   : > { %7217 = vmatpush1.bf16.msra.mxu1 %v14717_v61  ;;  %v14759_v61 = vld [vmem:[%s19914_s3 + $0x460] ss:$8 sps:$4 sm:$0xff]  }
 0x4f7   : > { %7218 = vmatprep.subr.bf16.mxu1 %v14722_v0  ;;  %v14762_v0 = vld [vmem:[%s19914_s3 + $0x470] ss:$8 sps:$4 sm:$0xff]  }
 0x4fa   : > { %7219 = vmatpush1.bf16.msra.mxu1 %v14720_v36  ;;  %v14767_v36 = vld [vmem:[%s19914_s3 + $0x904] ss:$8 sps:$4 sm:$0xff]  }
 0x4fb   : > { %7220 = vmatprep.subr.bf16.mxu1 %v14725_v34 }
 0x4fe   : > { %7221 = vmatpush1.bf16.msra.mxu1 %v14723_v6 }
 0x4ff   : > { %7222 = vmatprep.subr.bf16.mxu1 %v14728_v24 }
 0x502   : > { %7223 = vmatpush1.bf16.msra.mxu1 %v14726_v37 }
 0x503   : > { %7224 = vmatprep.subr.bf16.mxu1 %v14731_v18 }
 0x506   : > { %7225 = vmatpush1.bf16.msra.mxu1 %v14729_v38  ;;  %v14765_v38 = vld [vmem:[%s19914_s3 + $0x900] ss:$8 sps:$4 sm:$0xff]  }
 0x507   : > { %7226 = vmatprep.subr.bf16.mxu1 %v14734_v63 }
 0x50a   : > { %7227 = vmatpush1.bf16.msra.mxu1 %v14732_v58  ;;  %v14770_v58 = vld [vmem:[%s19914_s3 + $0x914] ss:$8 sps:$4 sm:$0xff]  }
 0x50b   : > { %7228 = vmatprep.subr.bf16.mxu1 %v14737_v53  ;;  %v14771_v53 = vld [vmem:[%s19914_s3 + $0x920] ss:$8 sps:$4 sm:$0xff]  }
 0x50e   : > { %7229 = vmatpush1.bf16.msra.mxu1 %v14735_v39  ;;  %v14777_v39 = vld [vmem:[%s19914_s3 + $0x934] ss:$8 sps:$4 sm:$0xff]  }
 0x50f   : > { %7230 = vmatprep.subr.bf16.mxu1 %v14740_v35  ;;  %v14775_v35 = vld [vmem:[%s19914_s3 + $0x930] ss:$8 sps:$4 sm:$0xff]  }
 0x512   : > { %7231 = vmatpush1.bf16.msra.mxu1 %v14738_v11  ;;  %v14780_v11 = vld [vmem:[%s19914_s3 + $0x944] ss:$8 sps:$4 sm:$0xff]  }
 0x513   : > { %7251 = vmatprep.subr.bf16.mxu1 %v14743_v57  ;;  %v14778_v57 = vld [vmem:[%s19914_s3 + $0x940] ss:$8 sps:$4 sm:$0xff]  }
 0x515   : > { %7233 = vmatmul.mubr.bf16.vlgmr.msra.gmra.mrb[72].mxu1 %v17427_v47  ;;  %v14752_v47 = vld [vmem:[%s19914_s3 + $0x434] ss:$8 sps:$4 sm:$0xff]  }
 0x516   : > { %7242 = vmatprep.mubr.bf16.mxu1 %v12351_v27  ;;  %7252 = vmatpush1.bf16.msra.mxu1 %v14741_v44  ;;  %v14783_v44 = vld [vmem:[%s19914_s3 + $0x954] ss:$8 sps:$4 sm:$0xff]   ;;  %v14784_v27 = vld [vmem:[%s19914_s3 + $0x960] ss:$8 sps:$4 sm:$0xff]  }
 0x517   : > { %7253 = vmatprep.subr.bf16.mxu1 %v14746_v33  ;;  %v14786_v33 = vld [vmem:[%s19914_s3 + $0x964] ss:$8 sps:$4 sm:$0xff]  }
 0x51a   : > { %7254 = vmatpush1.bf16.msra.mxu1 %v14744_v15  ;;  %v14789_v15 = vld [vmem:[%s19914_s3 + $0x974] ss:$8 sps:$4 sm:$0xff]  }
 0x51b   : > { %7255 = vmatprep.subr.bf16.mxu1 %v14749_v20  ;;  %v14787_v20 = vld [vmem:[%s19914_s3 + $0x970] ss:$8 sps:$4 sm:$0xff]  }
 0x51d   : > { %7243 = vmatmul.mubr.bf16.gmra.mrb[108].mxu1 %v12350_v46  ;;  %v14790_v46 = vld [vmem:[%s19914_s3 + $0x980] ss:$8 sps:$4 sm:$0xff]  }
 0x51e   : > { %7256 = vmatpush1.bf16.msra.mxu1 %v14747_v26  ;;  %7283 = vmatprep.mubr.bf16.mxu1 %v18280_v9  ;;  %v14792_v26 = vld [vmem:[%s19914_s3 + $0x984] ss:$8 sps:$4 sm:$0xff]  }
 0x51f   : > { %7257 = vmatprep.subr.bf16.mxu1 %v14752_v47  ;;  %v14795_v47 = vld [vmem:[%s19914_s3 + $0x994] ss:$8 sps:$4 sm:$0xff]  }
 0x522   : > { %7258 = vmatpush1.bf16.msra.mxu1 %v14750_v32  ;;  %v14793_v32 = vld [vmem:[%s19914_s3 + $0x990] ss:$8 sps:$4 sm:$0xff]  }
 0x523   : > { %7259 = vmatprep.subr.bf16.mxu1 %v14755_v25  ;;  %v14798_v25 = vld [vmem:[%s19914_s3 + $0x9a4] ss:$8 sps:$4 sm:$0xff]  }
 0x526   : > { %7260 = vmatpush1.bf16.msra.mxu1 %v14753_v49  ;;  %v14796_v49 = vld [vmem:[%s19914_s3 + $0x9a0] ss:$8 sps:$4 sm:$0xff]  }
 0x527   : > { %7261 = vmatprep.subr.bf16.mxu1 %v14758_v31  ;;  %v14801_v31 = vld [vmem:[%s19914_s3 + $0x9b4] ss:$8 sps:$4 sm:$0xff]  }
 0x52a   : > { %7262 = vmatpush1.bf16.msra.mxu1 %v14756_v13  ;;  %v14799_v13 = vld [vmem:[%s19914_s3 + $0x9b0] ss:$8 sps:$4 sm:$0xff]  }
 0x52b   : > { %7263 = vmatprep.subr.bf16.mxu1 %v14761_v21  ;;  %v14804_v21 = vld [vmem:[%s19914_s3 + $0x9c4] ss:$8 sps:$4 sm:$0xff]  }
 0x52e   : > { %7264 = vmatpush1.bf16.msra.mxu1 %v14759_v61  ;;  %v14802_v61 = vld [vmem:[%s19914_s3 + $0x9c0] ss:$8 sps:$4 sm:$0xff]  }
 0x52f   : > { %7265 = vmatprep.subr.bf16.mxu1 %v14764_v43  ;;  %v14807_v43 = vld [vmem:[%s19914_s3 + $0x9d4] ss:$8 sps:$4 sm:$0xff]  }
 0x530   : > { %v7091_v34 = vpop.f32.mrb[96].mxu1 }
 0x531   : > { %v18311_v6 = vadd.f32 %v7091_v34, %v18202_v45  ;;  %v7093_v24 = vpop.f32.mrb[97].mxu1  ;;  %v14768_v45 = vld [vmem:[%s19914_s3 + $0x910] ss:$8 sps:$4 sm:$0xff]   ;;  %v14808_v34 = vld [vmem:[%s19914_s3 + $0x9e0] ss:$8 sps:$4 sm:$0xff]  }
 0x532   : > { %v18314_v37 = vadd.f32 %v7093_v24, %v18204_v29  ;;  %v7095_v18 = vpop.f32.mrb[98].mxu1  ;;  %7266 = vmatpush1.bf16.msra.mxu1 %v14762_v0  ;;  %v14773_v29 = vld [vmem:[%s19914_s3 + $0x924] ss:$8 sps:$4 sm:$0xff]   ;;  %v14805_v0 = vld [vmem:[%s19914_s3 + $0x9d0] ss:$8 sps:$4 sm:$0xff]  }
 0x533   : > { %v7096_v63 = vpop.f32.mrb[99].mxu1  ;;  %8203 = vmatprep.subr.bf16.mxu1 %v14767_v36  ;;  %v14810_v36 = vld [vmem:[%s19914_s3 + $0x9e4] ss:$8 sps:$4 sm:$0xff]   ;;  %v14813_v24 = vld [vmem:[%s19914_s3 + $0x9f4] ss:$8 sps:$4 sm:$0xff]  }
 0x534   : > { %v14811_v18 = vld [vmem:[%s19914_s3 + $0x9f0] ss:$8 sps:$4 sm:$0xff]  }
 0x535   : > { %7284 = vmatmul.mubr.bf16.vlgmr.msra.gmra.mrb[72].mxu1 %v17223_v17  ;;  %v12352_v17 = vcombine.low %v17221_v60, %v17221_v60  ;;  %v14991_v60 = vld [vmem:[%s19916_s5 + $0x320] ss:$8 sps:$4 sm:$0xff]  }
 0x536   : > { %8204 = vmatpush1.bf16.msra.mxu1 %v14765_v38  ;;  %7293 = vmatprep.mubr.bf16.mxu1 %v18280_v9  ;;  %v14817_v38 = vld [vmem:[%s19914_s3 + $0xa04] ss:$8 sps:$4 sm:$0xff]  }
 0x537   : > { %8205 = vmatprep.subr.bf16.mxu1 %v14770_v58 }
 0x53a   : > { %8206 = vmatpush1.bf16.msra.mxu1 %v14768_v45 }
 0x53b   : > { %8207 = vmatprep.subr.bf16.mxu1 %v14773_v29 }
 0x53d   : > { %7294 = vmatmul.mubr.bf16.gmra.mrb[112].mxu1 %v12352_v17  ;;  %v14815_v17 = vld [vmem:[%s19914_s3 + $0xa00] ss:$8 sps:$4 sm:$0xff]  }
 0x53e   : > { %8208 = vmatpush1.bf16.msra.mxu1 %v14771_v53  ;;  %8235 = vmatprep.mubr.bf16.mxu1 %v12642_v8  ;;  %v14781_v8 = vld [vmem:[%s19914_s3 + $0x950] ss:$8 sps:$4 sm:$0xff]  }
 0x53f   : > { %8209 = vmatprep.subr.bf16.mxu1 %v14777_v39  ;;  %v12651_v39 = vcombine.high %v18280_v9, %v18280_v9 }
 0x542   : > { %8210 = vmatpush1.bf16.msra.mxu1 %v14775_v35 }
 0x543   : > { %8211 = vmatprep.subr.bf16.mxu1 %v14780_v11  ;;  %v14823_v11 = vld [vmem:[%s19914_s3 + $0xa24] ss:$8 sps:$4 sm:$0xff]  }
 0x546   : > { %8212 = vmatpush1.bf16.msra.mxu1 %v14778_v57  ;;  %v12650_v57 = vcombine.low %v18280_v9, %v18280_v9 }
 0x547   : > { %8213 = vmatprep.subr.bf16.mxu1 %v14783_v44  ;;  %v14829_v44 = vld [vmem:[%s19914_s3 + $0xa44] ss:$8 sps:$4 sm:$0xff]  }
 0x54a   : > { %8214 = vmatpush1.bf16.msra.mxu1 %v14781_v8  ;;  %v14827_v8 = vld [vmem:[%s19914_s3 + $0xa40] ss:$8 sps:$4 sm:$0xff]  }
 0x54b   : > { %8215 = vmatprep.subr.bf16.mxu1 %v14786_v33  ;;  %v14833_v33 = vld [vmem:[%s19914_s3 + $0xa60] ss:$8 sps:$4 sm:$0xff]  }
 0x54e   : > { %8216 = vmatpush1.bf16.msra.mxu1 %v14784_v27  ;;  %v14838_v27 = vld [vmem:[%s19914_s3 + $0xa74] ss:$8 sps:$4 sm:$0xff]  }
 0x54f   : > { %8217 = vmatprep.subr.bf16.mxu1 %v14789_v15  ;;  %v14836_v15 = vld [vmem:[%s19914_s3 + $0xa70] ss:$8 sps:$4 sm:$0xff]  }
 0x552   : > { %8218 = vmatpush1.bf16.msra.mxu1 %v14787_v20  ;;  %v14841_v20 = vld [vmem:[%s19914_s3 + $0xa84] ss:$8 sps:$4 sm:$0xff]  }
 0x553   : > { %8219 = vmatprep.subr.bf16.mxu1 %v14792_v26  ;;  %v14839_v26 = vld [vmem:[%s19914_s3 + $0xa80] ss:$8 sps:$4 sm:$0xff]  }
 0x556   : > { %8220 = vmatpush1.bf16.msra.mxu1 %v14790_v46  ;;  %v14844_v46 = vld [vmem:[%s19914_s3 + $0xa94] ss:$8 sps:$4 sm:$0xff]  }
 0x557   : > { %8221 = vmatprep.subr.bf16.mxu1 %v14795_v47  ;;  %v14842_v47 = vld [vmem:[%s19914_s3 + $0xa90] ss:$8 sps:$4 sm:$0xff]  }
 0x55a   : > { %8222 = vmatpush1.bf16.msra.mxu1 %v14793_v32  ;;  %v14847_v32 = vld [vmem:[%s19914_s3 + $0xaa4] ss:$8 sps:$4 sm:$0xff]  }
 0x55b   : > { %8223 = vmatprep.subr.bf16.mxu1 %v14798_v25  ;;  %v14845_v25 = vld [vmem:[%s19914_s3 + $0xaa0] ss:$8 sps:$4 sm:$0xff]  }
 0x55e   : > { %8224 = vmatpush1.bf16.msra.mxu1 %v14796_v49  ;;  %v14850_v49 = vld [vmem:[%s19914_s3 + $0xab4] ss:$8 sps:$4 sm:$0xff]  }
 0x55f   : > { %8225 = vmatprep.subr.bf16.mxu1 %v14801_v31  ;;  %v14848_v31 = vld [vmem:[%s19914_s3 + $0xab0] ss:$8 sps:$4 sm:$0xff]  }
 0x562   : > { %8226 = vmatpush1.bf16.msra.mxu1 %v14799_v13  ;;  %v14853_v13 = vld [vmem:[%s19914_s3 + $0xac4] ss:$8 sps:$4 sm:$0xff]  }
 0x563   : > { %8227 = vmatprep.subr.bf16.mxu1 %v14804_v21  ;;  %v18507_v21 = vld [vmem:[#allocation3 + $0x6c] sm:$0x11] }
 0x566   : > { %8228 = vmatpush1.bf16.msra.mxu1 %v14802_v61  ;;  %v14851_v61 = vld [vmem:[%s19914_s3 + $0xac0] ss:$8 sps:$4 sm:$0xff]  }
 0x567   : > { %8229 = vmatprep.subr.bf16.mxu1 %v14807_v43  ;;  %v18514_v43 = vcombine.low %v18280_v9, %v18507_v21 }
 0x56a   : > { %8230 = vmatpush1.bf16.msra.mxu1 %v14805_v0  ;;  %v14856_v0 = vld [vmem:[%s19914_s3 + $0xad4] ss:$8 sps:$4 sm:$0xff]  }
 0x56b   : > { %8231 = vmatprep.subr.bf16.mxu1 %v14810_v36  ;;  %v14854_v36 = vld [vmem:[%s19914_s3 + $0xad0] ss:$8 sps:$4 sm:$0xff]  }
 0x56e   : > { %8232 = vmatpush1.bf16.msra.mxu1 %v14808_v34  ;;  %v4928_v34 = vshll.u32 %v18514_v43, 16 }
 0x56f   : > { %8233 = vmatprep.subr.bf16.mxu1 %v14813_v24  ;;  %v14859_v24 = vld [vmem:[%s19914_s3 + $0xae4] ss:$8 sps:$4 sm:$0xff]  }
 0x570   : > { %v7142_v63 = vpop.f32.mrb[100].mxu1 }
 0x571   : > { %v18420_v58 = vadd.f32 %v7142_v63, %v18311_v6  ;;  %v7144_v45 = vpop.f32.mrb[101].mxu1  ;;  %v14820_v6 = vld [vmem:[%s19914_s3 + $0xa14] ss:$8 sps:$4 sm:$0xff]   ;;  %v4930_v63 = vrot.slane %v4928_v34, 1 }
 0x572   : > { %v18423_v29 = vadd.f32 %v7144_v45, %v18314_v37  ;;  %v7146_v53 = vpop.f32.mrb[102].mxu1  ;;  %8234 = vmatpush1.bf16.msra.mxu1 %v14811_v18  ;;  %v14818_v37 = vld [vmem:[%s19914_s3 + $0xa10] ss:$8 sps:$4 sm:$0xff]   ;;  %v14857_v18 = vld [vmem:[%s19914_s3 + $0xae0] ss:$8 sps:$4 sm:$0xff]  }
 0x573   : > { %v7147_v35 = vpop.f32.mrb[103].mxu1  ;;  %8254 = vmatprep.subr.bf16.mxu1 %v14817_v38  ;;  %v4926_v38 = vshrl.u32 %v18514_v43, 16  ;;  %v14862_v45 = vld [vmem:[%s19914_s3 + $0xaf4] ss:$8 sps:$4 sm:$0xff]   ;;  %v14860_v53 = vld [vmem:[%s19914_s3 + $0xaf0] ss:$8 sps:$4 sm:$0xff]  }
 0x574   : > { %v14906_v34 = vld [vmem:[%s19914_s3 + $0xbd4] ss:$8 sps:$4 sm:$0xff]  }
 0x575   : > { %8236 = vmatmul.mubr.bf16.vlgmr.msra.gmra.mrb[72].mxu1 %v12641_v16  ;;  %v14824_v16 = vld [vmem:[%s19914_s3 + $0xa30] ss:$8 sps:$4 sm:$0xff]  }
 0x576   : > { %8255 = vmatpush1.bf16.msra.mxu1 %v14815_v17  ;;  %8245 = vmatprep.mubr.bf16.mxu1 %v12651_v39  ;;  %v4931_v17 = vor.u32 %v4930_v63, %v4926_v38  ;;  %v14865_v39 = vld [vmem:[%s19914_s3 + $0xb04] ss:$8 sps:$4 sm:$0xff]   ;;  %v18640_v63 = vcombine.high %v18280_v9, %v18507_v21  ;;  %v14910_v21 = vld [vmem:[%s19914_s3 + $0xbf0] ss:$8 sps:$4 sm:$0xff]  }
 0x577   : > { %8256 = vmatprep.subr.bf16.mxu1 %v14820_v6  ;;  %v14909_v38 = vld [vmem:[%s19914_s3 + $0xbe4] ss:$8 sps:$4 sm:$0xff]  }
 0x57a   : > { %8257 = vmatpush1.bf16.msra.mxu1 %v14818_v37 }
 0x57b   : > { %8258 = vmatprep.subr.bf16.mxu1 %v14823_v11 }
 0x57d   : > { %8246 = vmatmul.mubr.bf16.gmra.mrb[116].mxu1 %v12650_v57 }
 0x57e   : > { %8259 = vmatpush1.bf16.msra.mxu1 %v14821_v62  ;;  %8286 = vmatprep.mubr.bf16.mxu1 %v12644_v5  ;;  %v14835_v5 = vld [vmem:[%s19914_s3 + $0xa64] ss:$8 sps:$4 sm:$0xff]   ;;  %v14863_v62 = vld [vmem:[%s19914_s3 + $0xb00] ss:$8 sps:$4 sm:$0xff]  }
 0x57f   : > { %8260 = vmatprep.subr.bf16.mxu1 %v14826_v2  ;;  %v12653_v2 = vcombine.low %v4931_v17, %v4931_v17 }
 0x582   : > { %8261 = vmatpush1.bf16.msra.mxu1 %v14824_v16 }
 0x583   : > { %8262 = vmatprep.subr.bf16.mxu1 %v14829_v44  ;;  %v14868_v44 = vld [vmem:[%s19914_s3 + $0xb14] ss:$8 sps:$4 sm:$0xff]  }
 0x586   : > { %8263 = vmatpush1.bf16.msra.mxu1 %v14827_v8  ;;  %v14873_v8 = vld [vmem:[%s19914_s3 + $0xb24] ss:$8 sps:$4 sm:$0xff]  }
 0x587   : > { %8264 = vmatprep.subr.bf16.mxu1 %v14832_v54 }
 0x58a   : > { %8265 = vmatpush1.bf16.msra.mxu1 %v14830_v7  ;;  %v14871_v7 = vld [vmem:[%s19914_s3 + $0xb20] ss:$8 sps:$4 sm:$0xff]  }
 0x58b   : > { %8266 = vmatprep.subr.bf16.mxu1 %v14835_v5  ;;  %v14877_v5 = vld [vmem:[%s19914_s3 + $0xb40] ss:$8 sps:$4 sm:$0xff]  }
 0x58e   : > { %8267 = vmatpush1.bf16.msra.mxu1 %v14833_v33  ;;  %v14883_v33 = vld [vmem:[%s19914_s3 + $0xb60] ss:$8 sps:$4 sm:$0xff]  }
 0x58f   : > { %8268 = vmatprep.subr.bf16.mxu1 %v14838_v27  ;;  %v14888_v27 = vld [vmem:[%s19914_s3 + $0xb74] ss:$8 sps:$4 sm:$0xff]  }
 0x592   : > { %8269 = vmatpush1.bf16.msra.mxu1 %v14836_v15  ;;  %v14886_v15 = vld [vmem:[%s19914_s3 + $0xb70] ss:$8 sps:$4 sm:$0xff]  }
 0x593   : > { %8270 = vmatprep.subr.bf16.mxu1 %v14841_v20  ;;  %v14891_v20 = vld [vmem:[%s19914_s3 + $0xb84] ss:$8 sps:$4 sm:$0xff]  }
 0x596   : > { %8271 = vmatpush1.bf16.msra.mxu1 %v14839_v26  ;;  %v14889_v26 = vld [vmem:[%s19914_s3 + $0xb80] ss:$8 sps:$4 sm:$0xff]  }
 0x597   : > { %8272 = vmatprep.subr.bf16.mxu1 %v14844_v46  ;;  %v14894_v46 = vld [vmem:[%s19914_s3 + $0xb94] ss:$8 sps:$4 sm:$0xff]  }
 0x59a   : > { %8273 = vmatpush1.bf16.msra.mxu1 %v14842_v47  ;;  %v14892_v47 = vld [vmem:[%s19914_s3 + $0xb90] ss:$8 sps:$4 sm:$0xff]  }
 0x59b   : > { %8274 = vmatprep.subr.bf16.mxu1 %v14847_v32  ;;  %v14897_v32 = vld [vmem:[%s19914_s3 + $0xba4] ss:$8 sps:$4 sm:$0xff]  }
 0x59e   : > { %8275 = vmatpush1.bf16.msra.mxu1 %v14845_v25  ;;  %v14895_v25 = vld [vmem:[%s19914_s3 + $0xba0] ss:$8 sps:$4 sm:$0xff]  }
 0x59f   : > { %8276 = vmatprep.subr.bf16.mxu1 %v14850_v49  ;;  %v14900_v49 = vld [vmem:[%s19914_s3 + $0xbb4] ss:$8 sps:$4 sm:$0xff]  }
 0x5a2   : > { %8277 = vmatpush1.bf16.msra.mxu1 %v14848_v31  ;;  %v14898_v31 = vld [vmem:[%s19914_s3 + $0xbb0] ss:$8 sps:$4 sm:$0xff]  }
 0x5a3   : > { %8278 = vmatprep.subr.bf16.mxu1 %v14853_v13  ;;  %v4775_v13 = vld [vmem:[#allocation3 + $0x74] sm:$0x1] }
 0x5a6   : > { %8279 = vmatpush1.bf16.msra.mxu1 %v14851_v61  ;;  %v14903_v61 = vld [vmem:[%s19914_s3 + $0xbc4] ss:$8 sps:$4 sm:$0xff]  }
 0x5a7   : > { %8280 = vmatprep.subr.bf16.mxu1 %v14856_v0 }
 0x5aa   : > { %8281 = vmatpush1.bf16.msra.mxu1 %v14854_v36  ;;  %v14901_v36 = vld [vmem:[%s19914_s3 + $0xbc0] ss:$8 sps:$4 sm:$0xff]  }
 0x5ab   : > { %8282 = vmatprep.subr.bf16.mxu1 %v14859_v24  ;;  %v14904_v24 = vld [vmem:[%s19914_s3 + $0xbd0] ss:$8 sps:$4 sm:$0xff]  }
 0x5ae   : > { %8283 = vmatpush1.bf16.msra.mxu1 %v14857_v18 }
 0x5af   : > { %8284 = vmatprep.subr.bf16.mxu1 %v14862_v45  ;;  %v14907_v45 = vld [vmem:[%s19914_s3 + $0xbe0] ss:$8 sps:$4 sm:$0xff]  }
 0x5b0   : > { %v7193_v35 = vpop.f32.mrb[104].mxu1 }
 0x5b1   : > { %v18540_v6 = vadd.f32 %v7193_v35, %v18420_v58  ;;  %v7195_v37 = vpop.f32.mrb[105].mxu1  ;;  %v14866_v58 = vld [vmem:[%s19914_s3 + $0xb10] ss:$8 sps:$4 sm:$0xff]   ;;  %v4935_v35 = vshll.u32 %v18640_v63, 16 }
 0x5b2   : > { %v18543_v11 = vadd.f32 %v7195_v37, %v18423_v29  ;;  %v7197_v57 = vpop.f32.mrb[106].mxu1  ;;  %8285 = vmatpush1.bf16.msra.mxu1 %v14860_v53  ;;  %v4773_v29 = vld [vmem:[#allocation3 + $0x68] sm:$0xf] }
 0x5b3   : > { %v7198_v16 = vpop.f32.mrb[107].mxu1  ;;  %8305 = vmatprep.subr.bf16.mxu1 %v14865_v39  ;;  %v12652_v54 = vcombine.low %v4773_v29, %v4773_v29  ;;  %v18623_v0 = vcombine.low %v4773_v29, %v4775_v13  ;;  %v14912_v39 = vld [vmem:[%s19914_s3 + $0xbf4] ss:$8 sps:$4 sm:$0xff]   ;;  %v14915_v57 = vld [vmem:[%s19914_s3 + $0xc04] ss:$8 sps:$4 sm:$0xff]  }
 0x5b4   : > { %v14940_v13 = vld [vmem:[%s19914_s3 + $0xc90] ss:$8 sps:$4 sm:$0xff]  }
 0x5b5   : > { %8287 = vmatmul.mubr.bf16.vlgmr.msra.gmra.mrb[72].mxu1 %v12643_v12  ;;  %v14879_v12 = vld [vmem:[%s19914_s3 + $0xb44] ss:$8 sps:$4 sm:$0xff]   ;;  %v4942_v18 = vshll.u32 %v18623_v0, 16  ;;  %v4940_v53 = vshrl.u32 %v18623_v0, 16 }
 0x5b6   : > { %8306 = vmatpush1.bf16.msra.mxu1 %v14863_v62  ;;  %8296 = vmatprep.mubr.bf16.mxu1 %v12653_v2 }
 0x5b7   : > { %8307 = vmatprep.subr.bf16.mxu1 %v14868_v44  ;;  %v4944_v17 = vrot.slane %v4942_v18, 1  ;;  %v4933_v44 = vshrl.u32 %v18640_v63, 16  ;;  %v14951_v18 = vld [vmem:[%s19914_s3 + $0xcc4] ss:$8 sps:$4 sm:$0xff]  }
 0x5b9   : > { %v4945_v37 = vor.u32 %v4944_v17, %v4940_v53  ;;  %v14952_v53 = vld [vmem:[%s19914_s3 + $0xcd0] ss:$8 sps:$4 sm:$0xff]   ;;  %v14957_v17 = vld [vmem:[%s19914_s3 + $0xce4] ss:$8 sps:$4 sm:$0xff]  }
 0x5ba   : > { %8308 = vmatpush1.bf16.msra.mxu1 %v14866_v58  ;;  %v4937_v58 = vrot.slane %v4935_v35, 1  ;;  %v14960_v35 = vld [vmem:[%s19914_s3 + $0xcf4] ss:$8 sps:$4 sm:$0xff]  }
 0x5bb   : > { %8309 = vmatprep.subr.bf16.mxu1 %v14873_v8 }
 0x5bd   : > { %8297 = vmatmul.mubr.bf16.gmra.mrb[120].mxu1 %v12652_v54  ;;  %v14913_v54 = vld [vmem:[%s19914_s3 + $0xc00] ss:$8 sps:$4 sm:$0xff]  }
 0x5be   : > { %8310 = vmatpush1.bf16.msra.mxu1 %v14871_v7  ;;  %8337 = vmatprep.mubr.bf16.mxu1 %v12646_v41  ;;  %v14885_v41 = vld [vmem:[%s19914_s3 + $0xb64] ss:$8 sps:$4 sm:$0xff]   ;;  %v12655_v7 = vcombine.low %v4945_v37, %v4945_v37  ;;  %v4959_v37 = vrot.slane %v18640_v63, 1  ;;  %v4958_v63 = vrot.slane %v18514_v43, 1 }
 0x5bf   : > { %8311 = vmatprep.subr.bf16.mxu1 %v14876_v48  ;;  %v14975_v43 = vld [vmem:[%s19914_s3 + $0xd44] ss:$8 sps:$4 sm:$0xff]  }
 0x5c2   : > { %8312 = vmatpush1.bf16.msra.mxu1 %v14874_v4  ;;  %v14918_v4 = vld [vmem:[%s19914_s3 + $0xc14] ss:$8 sps:$4 sm:$0xff]  }
 0x5c3   : > { %8313 = vmatprep.subr.bf16.mxu1 %v14879_v12  ;;  %v14921_v12 = vld [vmem:[%s19914_s3 + $0xc24] ss:$8 sps:$4 sm:$0xff]  }
 0x5c6   : > { %8314 = vmatpush1.bf16.msra.mxu1 %v14877_v5 }
 0x5c7   : > { %8315 = vmatprep.subr.bf16.mxu1 %v14882_v10  ;;  %v14919_v10 = vld [vmem:[%s19914_s3 + $0xc20] ss:$8 sps:$4 sm:$0xff]  }
 0x5ca   : > { %8316 = vmatpush1.bf16.msra.mxu1 %v14880_v23  ;;  %v14925_v23 = vld [vmem:[%s19914_s3 + $0xc40] ss:$8 sps:$4 sm:$0xff]  }
 0x5cb   : > { %8317 = vmatprep.subr.bf16.mxu1 %v14885_v41  ;;  %v14931_v41 = vld [vmem:[%s19914_s3 + $0xc60] ss:$8 sps:$4 sm:$0xff]  }
 0x5ce   : > { %8318 = vmatpush1.bf16.msra.mxu1 %v14883_v33  ;;  %v14936_v33 = vld [vmem:[%s19914_s3 + $0xc74] ss:$8 sps:$4 sm:$0xff]  }
 0x5cf   : > { %8319 = vmatprep.subr.bf16.mxu1 %v14888_v27  ;;  %v14934_v27 = vld [vmem:[%s19914_s3 + $0xc70] ss:$8 sps:$4 sm:$0xff]  }
 0x5d2   : > { %8320 = vmatpush1.bf16.msra.mxu1 %v14886_v15  ;;  %v14939_v15 = vld [vmem:[%s19914_s3 + $0xc84] ss:$8 sps:$4 sm:$0xff]  }
 0x5d3   : > { %8321 = vmatprep.subr.bf16.mxu1 %v14891_v20 }
 0x5d6   : > { %8322 = vmatpush1.bf16.msra.mxu1 %v14889_v26 }
 0x5d7   : > { %8323 = vmatprep.subr.bf16.mxu1 %v14894_v46 }
 0x5da   : > { %8324 = vmatpush1.bf16.msra.mxu1 %v14892_v47 }
 0x5db   : > { %8325 = vmatprep.subr.bf16.mxu1 %v14897_v32 }
 0x5de   : > { %8326 = vmatpush1.bf16.msra.mxu1 %v14895_v25  ;;  %v14937_v25 = vld [vmem:[%s19914_s3 + $0xc80] ss:$8 sps:$4 sm:$0xff]  }
 0x5df   : > { %8327 = vmatprep.subr.bf16.mxu1 %v14900_v49 }
 0x5e2   : > { %8328 = vmatpush1.bf16.msra.mxu1 %v14898_v31  ;;  %v14942_v31 = vld [vmem:[%s19914_s3 + $0xc94] ss:$8 sps:$4 sm:$0xff]  }
 0x5e3   : > { %8329 = vmatprep.subr.bf16.mxu1 %v14903_v61  ;;  %v14945_v61 = vld [vmem:[%s19914_s3 + $0xca4] ss:$8 sps:$4 sm:$0xff]  }
 0x5e6   : > { %8330 = vmatpush1.bf16.msra.mxu1 %v14901_v36  ;;  %v14943_v36 = vld [vmem:[%s19914_s3 + $0xca0] ss:$8 sps:$4 sm:$0xff]  }
 0x5e7   : > { %8331 = vmatprep.subr.bf16.mxu1 %v14906_v34  ;;  %v14948_v34 = vld [vmem:[%s19914_s3 + $0xcb4] ss:$8 sps:$4 sm:$0xff]  }
 0x5ea   : > { %8332 = vmatpush1.bf16.msra.mxu1 %v14904_v24  ;;  %v14946_v24 = vld [vmem:[%s19914_s3 + $0xcb0] ss:$8 sps:$4 sm:$0xff]  }
 0x5eb   : > { %8333 = vmatprep.subr.bf16.mxu1 %v14909_v38  ;;  %v14949_v38 = vld [vmem:[%s19914_s3 + $0xcc0] ss:$8 sps:$4 sm:$0xff]  }
 0x5ee   : > { %8334 = vmatpush1.bf16.msra.mxu1 %v14907_v45  ;;  %v14954_v45 = vld [vmem:[%s19914_s3 + $0xcd4] ss:$8 sps:$4 sm:$0xff]  }
 0x5ef   : > { %8335 = vmatprep.subr.bf16.mxu1 %v14912_v39  ;;  %v14955_v39 = vld [vmem:[%s19914_s3 + $0xce0] ss:$8 sps:$4 sm:$0xff]  }
 0x5f0   : > { %v7244_v62 = vpop.f32.mrb[108].mxu1 }
 0x5f1   : > { %v7245_v2 = vadd.f32 %v7244_v62, %v18540_v6  ;;  %v7246_v16 = vpop.f32.mrb[109].mxu1  ;;  %v4938_v6 = vor.u32 %v4937_v58, %v4933_v44  ;;  %v14961_v62 = vld [vmem:[%s19914_s3 + $0xd00] ss:$8 sps:$4 sm:$0xff]   ;;  %v14964_v44 = vld [vmem:[%s19914_s3 + $0xd10] ss:$8 sps:$4 sm:$0xff]  }
 0x5f2   : > { %v7247_v29 = vadd.f32 %v7246_v16, %v18543_v11  ;;  %v7248_v8 = vpop.f32.mrb[110].mxu1  ;;  %8336 = vmatpush1.bf16.msra.mxu1 %v14910_v21  ;;  %v14916_v11 = vld [vmem:[%s19914_s3 + $0xc10] ss:$8 sps:$4 sm:$0xff]   ;;  %v14966_v16 = vld [vmem:[%s19914_s3 + $0xd14] ss:$8 sps:$4 sm:$0xff]  }
 0x5f3   : > { %v7249_v48 = vpop.f32.mrb[111].mxu1  ;;  %8356 = vmatprep.subr.bf16.mxu1 %v14915_v57  ;;  %v12654_v5 = vcombine.low %v4938_v6, %v4938_v6  ;;  %v14958_v21 = vld [vmem:[%s19914_s3 + $0xcf0] ss:$8 sps:$4 sm:$0xff]   ;;  %v14963_v57 = vld [vmem:[%s19914_s3 + $0xd04] ss:$8 sps:$4 sm:$0xff]  }
 0x5f4   : > { %v14969_v58 = vld [vmem:[%s19914_s3 + $0xd24] ss:$8 sps:$4 sm:$0xff]   ;;  %v14973_v8 = vld [vmem:[%s19914_s3 + $0xd40] ss:$8 sps:$4 sm:$0xff]   ;;  %v14984_v6 = vld [vmem:[%s19914_s3 + $0xd74] ss:$8 sps:$4 sm:$0xff]  }
 0x5f5   : > { %8338 = vmatmul.mubr.bf16.vlgmr.msra.gmra.mrb[72].mxu1 %v12645_v40  ;;  %v14927_v40 = vld [vmem:[%s19914_s3 + $0xc44] ss:$8 sps:$4 sm:$0xff]  }
 0x5f6   : > { %8357 = vmatpush1.bf16.msra.mxu1 %v14913_v54  ;;  %8347 = vmatprep.mubr.bf16.mxu1 %v12655_v7  ;;  %v14978_v54 = vld [vmem:[%s19914_s3 + $0xd54] ss:$8 sps:$4 sm:$0xff]   ;;  %v14976_v7 = vld [vmem:[%s19914_s3 + $0xd50] ss:$8 sps:$4 sm:$0xff]   ;;  %v14981_v48 = vld [vmem:[%s19914_s3 + $0xd64] ss:$8 sps:$4 sm:$0xff]  }
 0x5f7   : > { %8358 = vmatprep.subr.bf16.mxu1 %v14918_v4  ;;  %v14979_v4 = vld [vmem:[%s19914_s3 + $0xd60] ss:$8 sps:$4 sm:$0xff]  }
 0x5fa   : > { %8359 = vmatpush1.bf16.msra.mxu1 %v14916_v11  ;;  %v14982_v11 = vld [vmem:[%s19914_s3 + $0xd70] ss:$8 sps:$4 sm:$0xff]  }
 0x5fb   : > { %8360 = vmatprep.subr.bf16.mxu1 %v14921_v12 }
 0x5fd   : > { %8348 = vmatmul.mubr.bf16.gmra.mrb[124].mxu1 %v12654_v5 }
 0x5fe   : > { %8361 = vmatpush1.bf16.msra.mxu1 %v14919_v10  ;;  %8388 = vmatprep.mubr.bf16.mxu1 %v12648_v19  ;;  %v14933_v19 = vld [vmem:[%s19914_s3 + $0xc64] ss:$8 sps:$4 sm:$0xff]  }
 0x5ff   : > { %8362 = vmatprep.subr.bf16.mxu1 %v14924_v22 }
 0x602   : > { %8363 = vmatpush1.bf16.msra.mxu1 %v14922_v1  ;;  %v14985_v1 = vld [vmem:[%s19916_s5 + $0x300] ss:$8 sps:$4 sm:$0xff]  }
 0x603   : > { %8364 = vmatprep.subr.bf16.mxu1 %v14927_v40  ;;  %v14987_v40 = vld [vmem:[%s19916_s5 + $0x304] ss:$8 sps:$4 sm:$0xff]  }
 0x604   : > { %9416 = vmatprep.subr.bf16.mxu0 %v14987_v40 }
 0x605   : > { %9417 = vmatpush1.bf16.msra.mxu0 %v14985_v1  ;;  %v8464_v1 = vld [vmem:[%s19915_s4] sm:$0x3] }
 0x606   : > { %8365 = vmatpush1.bf16.msra.mxu1 %v14925_v23  ;;  %v14990_v23 = vld [vmem:[%s19916_s5 + $0x314] ss:$8 sps:$4 sm:$0xff]   ;;  %v8469_v40 = vrot.slane %v8464_v1, %v17358_v30 }
 0x607   : > { %8366 = vmatprep.subr.bf16.mxu1 %v14930_v14  ;;  %v4960_v14 = vrot.slane %v18623_v0, 1  ;;  %9418 = vmatprep.subr.bf16.mxu0 %v14990_v23  ;;  %v8473_v23 = vrot.slane %v8464_v1, %v17361_v50 }
 0x60a   : > { %8367 = vmatpush1.bf16.msra.mxu1 %v14928_v28  ;;  %v14988_v28 = vld [vmem:[%s19916_s5 + $0x310] ss:$8 sps:$4 sm:$0xff]  }
 0x60b   : > { %8368 = vmatprep.subr.bf16.mxu1 %v14933_v19  ;;  %v14993_v19 = vld [vmem:[%s19916_s5 + $0x324] ss:$8 sps:$4 sm:$0xff]   ;;  %9419 = vmatpush1.bf16.msra.mxu0 %v14988_v28 }
 0x60c   : > { %9420 = vmatprep.subr.bf16.mxu0 %v14993_v19 }
 0x60e   : > { %8369 = vmatpush1.bf16.msra.mxu1 %v14931_v41  ;;  %v12658_v41 = vcombine.low %v4960_v14, %v4960_v14 }
 0x60f   : > { %8370 = vmatprep.subr.bf16.mxu1 %v14936_v33  ;;  %9421 = vmatpush1.bf16.msra.mxu0 %v14991_v60 }
 0x610   : > { %v7295_v20 = vpop.f32.mrb[112].mxu1  ;;  %9422 = vmatprep.subr.bf16.mxu0 %v14996_v51 }
 0x611   : > { %v18713_v26 = vadd.f32 %v7295_v20, %v7245_v2  ;;  %v7297_v46 = vpop.f32.mrb[113].mxu1  ;;  %v12657_v2 = vcombine.low %v4959_v37, %v4959_v37  ;;  %v14997_v20 = vld [vmem:[%s19916_s5 + $0x340] ss:$8 sps:$4 sm:$0xff]   ;;  %v15018_v37 = vld [vmem:[%s19916_s5 + $0x3b0] ss:$8 sps:$4 sm:$0xff]  }
 0x612   : > { %v18715_v47 = vadd.f32 %v7297_v46, %v7247_v29  ;;  %v7299_v32 = vpop.f32.mrb[114].mxu1  ;;  %8371 = vmatpush1.bf16.msra.mxu1 %v14934_v27  ;;  %v12656_v29 = vcombine.low %v4958_v63, %v4958_v63  ;;  %v14999_v46 = vld [vmem:[%s19916_s5 + $0x344] ss:$8 sps:$4 sm:$0xff]   ;;  %v8506_v63 = vld [vmem:[#allocation4 + $0x30] sm:$0x11] }
 0x613   : > { %v7300_v49 = vpop.f32.mrb[115].mxu1  ;;  %8372 = vmatprep.subr.bf16.mxu1 %v14939_v15 }
 0x614   : > { %v15000_v49 = vld [vmem:[%s19916_s5 + $0x350] ss:$8 sps:$4 sm:$0xff]  }
 0x616   : > { %8373 = vmatpush1.bf16.msra.mxu1 %v14937_v25  ;;  %v15002_v25 = vld [vmem:[%s19916_s5 + $0x354] ss:$8 sps:$4 sm:$0xff]  }
 0x617   : > { %8374 = vmatprep.subr.bf16.mxu1 %v14942_v31  ;;  %v15005_v31 = vld [vmem:[%s19916_s5 + $0x364] ss:$8 sps:$4 sm:$0xff]  }
 0x61a   : > { %8375 = vmatpush1.bf16.msra.mxu1 %v14940_v13  ;;  %v15003_v13 = vld [vmem:[%s19916_s5 + $0x360] ss:$8 sps:$4 sm:$0xff]  }
 0x61b   : > { %8376 = vmatprep.subr.bf16.mxu1 %v14945_v61  ;;  %v15008_v61 = vld [vmem:[%s19916_s5 + $0x374] ss:$8 sps:$4 sm:$0xff]  }
 0x61e   : > { %8377 = vmatpush1.bf16.msra.mxu1 %v14943_v36  ;;  %v15006_v36 = vld [vmem:[%s19916_s5 + $0x370] ss:$8 sps:$4 sm:$0xff]  }
 0x61f   : > { %8378 = vmatprep.subr.bf16.mxu1 %v14948_v34  ;;  %v15011_v34 = vld [vmem:[%s19916_s5 + $0x384] ss:$8 sps:$4 sm:$0xff]  }
 0x622   : > { %8379 = vmatpush1.bf16.msra.mxu1 %v14946_v24  ;;  %v15009_v24 = vld [vmem:[%s19916_s5 + $0x380] ss:$8 sps:$4 sm:$0xff]  }
 0x623   : > { %8380 = vmatprep.subr.bf16.mxu1 %v14951_v18  ;;  %v15014_v18 = vld [vmem:[%s19916_s5 + $0x394] ss:$8 sps:$4 sm:$0xff]  }
 0x626   : > { %8381 = vmatpush1.bf16.msra.mxu1 %v14949_v38  ;;  %v15012_v38 = vld [vmem:[%s19916_s5 + $0x390] ss:$8 sps:$4 sm:$0xff]  }
 0x627   : > { %8382 = vmatprep.subr.bf16.mxu1 %v14954_v45  ;;  %v15017_v45 = vld [vmem:[%s19916_s5 + $0x3a4] ss:$8 sps:$4 sm:$0xff]  }
 0x62a   : > { %8383 = vmatpush1.bf16.msra.mxu1 %v14952_v53  ;;  %v8500_v53 = vld [vmem:[#allocation4 + $0x10] sm:$0x11] }
 0x62b   : > { %8384 = vmatprep.subr.bf16.mxu1 %v14957_v17  ;;  %v15015_v17 = vld [vmem:[%s19916_s5 + $0x3a0] ss:$8 sps:$4 sm:$0xff]  }
 0x62e   : > { %8385 = vmatpush1.bf16.msra.mxu1 %v14955_v39  ;;  %v8501_v39 = vsel %vm15600_vm6, 0, %v8500_v53 }
 0x62f   : > { %8386 = vmatprep.subr.bf16.mxu1 %v14960_v35  ;;  %8502 = vst [vmem:[#allocation4 + $0x10] sm:$0x11] %v8501_v39  ;;  %v15020_v35 = vld [vmem:[%s19916_s5 + $0x3b4] ss:$8 sps:$4 sm:$0xff]  }
 0x632   : > { %8387 = vmatpush1.bf16.msra.mxu1 %v14958_v21  ;;  %v8503_v21 = vld [vmem:[#allocation4 + $0x20] sm:$0x11] }
 0x633   : > { %8407 = vmatprep.subr.bf16.mxu1 %v14963_v57  ;;  %v8504_v57 = vsel %vm15600_vm6, 0, %v8503_v21 }
 0x634   : > { %8505 = vst [vmem:[#allocation4 + $0x20] sm:$0x11] %v8504_v57 }
 0x635   : > { %8389 = vmatmul.mubr.bf16.vlgmr.msra.gmra.mrb[72].mxu1 %v12647_v59  ;;  %v14970_v59 = vld [vmem:[%s19914_s3 + $0xd30] ss:$8 sps:$4 sm:$0xff]  }
 0x636   : > { %8408 = vmatpush1.bf16.msra.mxu1 %v14961_v62  ;;  %8398 = vmatprep.mubr.bf16.mxu1 %v12657_v2  ;;  %v15023_v62 = vld [vmem:[%s19916_s5 + $0x3c4] ss:$8 sps:$4 sm:$0xff]   ;;  %v15021_v2 = vld [vmem:[%s19916_s5 + $0x3c0] ss:$8 sps:$4 sm:$0xff]  }
 0x637   : > { %8409 = vmatprep.subr.bf16.mxu1 %v14966_v16  ;;  %v15026_v16 = vld [vmem:[%s19916_s5 + $0x3d4] ss:$8 sps:$4 sm:$0xff]  }
 0x63a   : > { %8410 = vmatpush1.bf16.msra.mxu1 %v14964_v44  ;;  %v15024_v44 = vld [vmem:[%s19916_s5 + $0x3d0] ss:$8 sps:$4 sm:$0xff]  }
 0x63b   : > { %8411 = vmatprep.subr.bf16.mxu1 %v14969_v58  ;;  %v8507_v58 = vsel %vm15600_vm6, 0, %v8506_v63  ;;  %v8563_v21 = vld [vmem:[#allocation4 + $0x20] sm:$0x33] }
 0x63c   : > { %8508 = vst [vmem:[#allocation4 + $0x30] sm:$0x11] %v8507_v58 }
 0x63d   : > { %8399 = vmatmul.mubr.bf16.gmra.mrb[128].mxu1 %v12656_v29  ;;  %v15029_v29 = vld [vmem:[%s19916_s5 + $0x3e4] ss:$8 sps:$4 sm:$0xff]  }
 0x63e   : > { %8412 = vmatpush1.bf16.msra.mxu1 %v14967_v3  ;;  %8439 = vmatprep.mubr.bf16.mxu1 %v18280_v9  ;;  %v15027_v3 = vld [vmem:[%s19916_s5 + $0x3e0] ss:$8 sps:$4 sm:$0xff]  }
 0x63f   : > { %8413 = vmatprep.subr.bf16.mxu1 %v14972_v56  ;;  %v15032_v56 = vld [vmem:[%s19916_s5 + $0x3f4] ss:$8 sps:$4 sm:$0xff]  }
 0x642   : > { %8414 = vmatpush1.bf16.msra.mxu1 %v14970_v59  ;;  %v15036_v59 = vld [vmem:[%s19916_s5 + $0x404] ss:$8 sps:$4 sm:$0xff]  }
 0x643   : > { %8415 = vmatprep.subr.bf16.mxu1 %v14975_v43 }
 0x646   : > { %8416 = vmatpush1.bf16.msra.mxu1 %v14973_v8 }
 0x647   : > { %8417 = vmatprep.subr.bf16.mxu1 %v14978_v54 }
 0x64a   : > { %8418 = vmatpush1.bf16.msra.mxu1 %v14976_v7 }
 0x64b   : > { %8419 = vmatprep.subr.bf16.mxu1 %v14981_v48 }
 0x64e   : > { %8420 = vmatpush1.bf16.msra.mxu1 %v14979_v4 }
 0x64f   : > { %8421 = vmatprep.subr.bf16.mxu1 %v14984_v6 }
 0x650   : > { %v8247_v12 = vpop.f32.mrb[116].mxu1 }
 0x651   : > { %v8249_v5 = vpop.f32.mrb[117].mxu1 }
 0x652   : > { %8422 = vmatpush1.bf16.msra.mxu1 %v14982_v11  ;;  %v8251_v10 = vpop.f32.mrb[118].mxu1 }
 0x653   : > { %v8252_v22 = vpop.f32.mrb[119].mxu1 }
 0x655   : > { %8440 = vmatmul.mubr.bf16.vlgmr.msra.gmra.mrb[72].mxu1 %v12649_v55  ;;  %v14994_v55 = vld [vmem:[%s19916_s5 + $0x330] ss:$8 sps:$4 sm:$0xff]  }
 0x656   : > { %8449 = vmatprep.mubr.bf16.mxu1 %v18280_v9  ;;  %9423 = vmatpush1.bf16.msra.mxu0 %v14994_v55 }
 0x657   : > { %9424 = vmatprep.subr.bf16.mxu0 %v14999_v46 }
 0x65a   : > { %9425 = vmatpush1.bf16.msra.mxu0 %v14997_v20 }
 0x65b   : > { %9426 = vmatprep.subr.bf16.mxu0 %v15002_v25 }
 0x65d   : > { %8450 = vmatmul.mubr.bf16.gmra.mrb[132].mxu1 %v12658_v41 }
 0x65e   : > { %9427 = vmatpush1.bf16.msra.mxu0 %v15000_v49 }
 0x65f   : > { %9428 = vmatprep.subr.bf16.mxu0 %v15005_v31 }
 0x662   : > { %9429 = vmatpush1.bf16.msra.mxu0 %v15003_v13 }
 0x663   : > { %9430 = vmatprep.subr.bf16.mxu0 %v15008_v61 }
 0x666   : > { %9431 = vmatpush1.bf16.msra.mxu0 %v15006_v36 }
 0x667   : > { %9432 = vmatprep.subr.bf16.mxu0 %v15011_v34 }
 0x66a   : > { %9433 = vmatpush1.bf16.msra.mxu0 %v15009_v24 }
 0x66b   : > { %9434 = vmatprep.subr.bf16.mxu0 %v15014_v18  ;;  %v8560_v18 = vld [vmem:[#allocation4 + $0x10] sm:$0x33] }
 0x66e   : > { %9435 = vmatpush1.bf16.msra.mxu0 %v15012_v38 }
 0x66f   : > { %9436 = vmatprep.subr.bf16.mxu0 %v15017_v45 }
 0x672   : > { %9437 = vmatpush1.bf16.msra.mxu0 %v15015_v17 }
 0x673   : > { %9438 = vmatprep.subr.bf16.mxu0 %v15020_v35 }
 0x676   : > { %9439 = vmatpush1.bf16.msra.mxu0 %v15018_v37 }
 0x677   : > { %9440 = vmatprep.subr.bf16.mxu0 %v15023_v62 }
 0x67a   : > { %9441 = vmatpush1.bf16.msra.mxu0 %v15021_v2 }
 0x67b   : > { %9442 = vmatprep.subr.bf16.mxu0 %v15026_v16 }
 0x67e   : > { %9443 = vmatpush1.bf16.msra.mxu0 %v15024_v44 }
 0x67f   : > { %9444 = vmatprep.subr.bf16.mxu0 %v15029_v29  ;;  %v8572_v29 = vld [vmem:[#allocation4 + $0x18] sm:$0x11] }
 0x682   : > { %9445 = vmatpush1.bf16.msra.mxu0 %v15027_v3 }
 0x683   : > { %9446 = vmatprep.subr.bf16.mxu0 %v15032_v56 }
 0x686   : > { %9447 = vmatpush1.bf16.msra.mxu0 %v15030_v52 }
 0x687   : > { %9467 = vmatprep.subr.bf16.mxu0 %v15036_v59  ;;  %v8574_v59 = vld [vmem:[#allocation4 + $0x28] sm:$0x11] }
 0x690   : > { %v8298_v9 = vpop.f32.mrb[120].mxu1 }
 0x691   : > { %v18845_v0 = vadd.f32 %v8298_v9, %v8247_v12  ;;  %v8300_v33 = vpop.f32.mrb[121].mxu1 }
 0x692   : > { %v18847_v27 = vadd.f32 %v8300_v33, %v8249_v5  ;;  %v8302_v15 = vpop.f32.mrb[122].mxu1 }
 0x693   : > { %v8303_v32 = vpop.f32.mrb[123].mxu1 }
 0x6d0   : > { %v8349_v43 = vpop.f32.mrb[124].mxu1 }
 0x6d1   : > { %v8350_v8 = vadd.f32 %v8349_v43, %v18845_v0  ;;  %v8351_v54 = vpop.f32.mrb[125].mxu1  ;;  %v8566_v43 = vld [vmem:[#allocation4 + $0x30] sm:$0x33] }
 0x6d2   : > { %v8352_v7 = vadd.f32 %v8351_v54, %v18847_v27  ;;  %v8353_v48 = vpop.f32.mrb[126].mxu1 }
 0x6d3   : > { %v8354_v4 = vpop.f32.mrb[127].mxu1 }
 0x6d4   : > { %v18965_v4 = vld [vmem:[#allocation2] sm:$0xff] }
 0x710   : > { %v8400_v6 = vpop.f32.mrb[128].mxu1 }
 0x711   : > { %v8401_v11 = vadd.f32 %v8400_v6, %v8350_v8  ;;  %v8402_v12 = vpop.f32.mrb[129].mxu1 }
 0x712   : > { %v8403_v5 = vadd.f32 %v8402_v12, %v8352_v7  ;;  %v8404_v10 = vpop.f32.mrb[130].mxu1 }
 0x713   : > { %v8405_v22 = vpop.f32.mrb[131].mxu1 }
 0x728   : > { %v8441_v14 = vpop.f32.mrb[72].mxu1 }
 0x729   : > { %v8476_v28 = vadd.f32 %v8469_v40, %v8441_v14  ;;  %v8443_v19 = vpop.f32.mrb[73].mxu1 }
 0x72a   : > { %v8477_v41 = vadd.f32 %v8473_v23, %v8443_v19  ;;  %v8445_v60 = vpop.f32.mrb[74].mxu1 }
 0x72b   : > { %v8482_v51 = vmax.f32 %v8476_v28, 0.0  ;;  %v8478_v55 = vadd.f32 %v8469_v40, %v8445_v60  ;;  %v8447_v9 = vpop.f32.mrb[75].mxu1 }
 0x72c   : > { %v8483_v0 = vmax.f32 %v8477_v41, 0.0  ;;  %v8479_v33 = vadd.f32 %v8473_v23, %v8447_v9 }
 0x72d   : > { %8488 = vst [vmem:[%s18943_s23] sm:$0xff] %v8482_v51  ;;  %v8484_v27 = vmax.f32 %v8478_v55, 0.0 }
 0x72e   : > { %8489 = vst [vmem:[%s18943_s23 + $0x8] sm:$0xff] %v8483_v0  ;;  %v13340_v15 = vpack.c.bf16 %v8483_v0, %v8482_v51  ;;  %v8485_v20 = vmax.f32 %v8479_v33, 0.0  ;;  %v15043_v33 = vld [vmem:[%s19916_s5 + $0x424] ss:$8 sps:$4 sm:$0xff]  }
 0x72f   : > { %8490 = vst [vmem:[%s18943_s23 + $0x10] sm:$0xff] %v8484_v27 }
 0x730   : > { %v8537_v46 = vshrl.u32 %v13340_v15, 16  ;;  %8491 = vst [vmem:[%s18943_s23 + $0x18] sm:$0xff] %v8485_v20  ;;  %v13341_v32 = vpack.c.bf16 %v8485_v20, %v8484_v27  ;;  %v8451_v25 = vpop.f32.mrb[132].mxu1  ;;  %v8540_v61 = vshll.u32 %v13340_v15, 16 }
 0x731   : > { %v8452_v49 = vadd.f32 %v8451_v25, %v8401_v11  ;;  %v8453_v31 = vpop.f32.mrb[133].mxu1  ;;  %v8576_v25 = vld [vmem:[#allocation4 + $0x38] sm:$0x11] }
 0x732   : > { %v8539_v13 = vrot.slane %v8537_v46, 7  ;;  %v8544_v36 = vshrl.u32 %v13341_v32, 16  ;;  %v8454_v34 = vadd.f32 %v8453_v31, %v8403_v5  ;;  %v8455_v24 = vpop.f32.mrb[134].mxu1  ;;  %v8547_v39 = vshll.u32 %v13341_v32, 16  ;;  %v15034_v5 = vld [vmem:[%s19916_s5 + $0x400] ss:$8 sps:$4 sm:$0xff]  }
 0x733   : > { %v8462_v38 = vadd.f32 %v8452_v49, %v18713_v26  ;;  %v8456_v45 = vpop.f32.mrb[135].mxu1  ;;  %v15048_v24 = vld [vmem:[%s19916_s5 + $0x434] ss:$8 sps:$4 sm:$0xff]  }
 0x734   : > { %v8542_v53 = vor.u32 %v8540_v61, %v8539_v13  ;;  %v8546_v17 = vrot.slane %v8544_v36, 7  ;;  %v8463_v35 = vadd.f32 %v8454_v34, %v18715_v47  ;;  %v8570_v47 = vld [vmem:[#allocation4 + $0x8] sm:$0x11]  ;;  %v15041_v13 = vld [vmem:[%s19916_s5 + $0x420] ss:$8 sps:$4 sm:$0xff]  }
 0x735   : > { %v8480_v37 = vadd.f32 %v8469_v40, %v8462_v38  ;;  %v18968_v6 = vcombine.low %v18965_v4, %v8570_v47  ;;  %v18971_v11 = vcombine.high %v18965_v4, %v8570_v47 }
 0x736   : > { %v8561_v57 = vsel %vm15666_vm13, %v8542_v53, %v8560_v18  ;;  %v8549_v62 = vor.u32 %v8547_v39, %v8546_v17  ;;  %v8481_v2 = vadd.f32 %v8473_v23, %v8463_v35  ;;  %v15040_v23 = vld [vmem:[%s19916_s5 + $0x414] ss:$8 sps:$4 sm:$0xff]  }
 0x737   : > { %8562 = vst [vmem:[#allocation4 + $0x10] sm:$0x33] %v8561_v57  ;;  %v8486_v16 = vmax.f32 %v8480_v37, 0.0  ;;  %v8690_v60 = vrot.slane %v18971_v11, 1  ;;  %v8689_v51 = vrot.slane %v18968_v6, 1 }
 0x738   : > { %v8564_v26 = vsel %vm15666_vm13, %v8549_v62, %v8563_v21  ;;  %v8487_v63 = vmax.f32 %v8481_v2, 0.0  ;;  %v15046_v21 = vld [vmem:[%s19916_s5 + $0x430] ss:$8 sps:$4 sm:$0xff]  }
 0x739   : > { %8565 = vst [vmem:[#allocation4 + $0x20] sm:$0x33] %v8564_v26  ;;  %8492 = vst [vmem:[%s18943_s23 + $0x20] sm:$0xff] %v8486_v16 }
 0x73a   : > { %8493 = vst [vmem:[%s18943_s23 + $0x28] sm:$0xff] %v8487_v63  ;;  %v13342_v44 = vpack.c.bf16 %v8487_v63, %v8486_v16  ;;  %v15055_v16 = vld [vmem:[%s19916_s5 + $0x444] ss:$8 sps:$4 sm:$0xff]  }
 0x73c   : > { %v8551_v58 = vshrl.u32 %v13342_v44, 16  ;;  %v8554_v56 = vshll.u32 %v13342_v44, 16 }
 0x73e   : > { %v8553_v3 = vrot.slane %v8551_v58, 7  ;;  %v18957_v52 = vld [vmem:[#allocation4 + $0x10] sm:$0xff] }
 0x73f   : > { %v12809_v8 = vcombine.high %v18957_v52, %v8572_v29  ;;  %v18963_v48 = vcombine.low %v18957_v52, %v8572_v29 }
 0x740   : > { %v8556_v54 = vor.u32 %v8554_v56, %v8553_v3  ;;  %v18960_v7 = vld [vmem:[#allocation4 + $0x20] sm:$0xff] }
 0x741   : > { %v12913_v12 = vcombine.high %v18957_v52, %v18960_v7  ;;  %v12912_v10 = vcombine.low %v18957_v52, %v18960_v7  ;;  %v18981_v22 = vcombine.low %v18960_v7, %v8574_v59  ;;  %v12811_v1 = vcombine.high %v18960_v7, %v8574_v59 }
 0x742   : > { %v8567_v40 = vsel %vm15666_vm13, %v8556_v54, %v8566_v43  ;;  %v8643_v14 = vshll.u32 %v12809_v8, 16  ;;  %v8692_v19 = vrot.slane %v12809_v8, 1  ;;  %v8691_v9 = vrot.slane %v18963_v48, 1  ;;  %v15053_v43 = vld [vmem:[%s19916_s5 + $0x440] ss:$8 sps:$4 sm:$0xff]  }
 0x743   : > { %8568 = vst [vmem:[#allocation4 + $0x30] sm:$0x33] %v8567_v40  ;;  %9448 = vmatprep.mubr.bf16.mxu0 %v12913_v12  ;;  %v8657_v28 = vshll.u32 %v12811_v1, 16  ;;  %v18989_v41 = vrot.slane %v12811_v1, 1  ;;  %v18998_v0 = vrot.slane %v18981_v22, 1  ;;  %v8655_v20 = vshrl.u32 %v12811_v1, 16 }
 0x744   : > { %9449 = vmatmul.mubr.bf16.vlgmr.msra.gmra.mrb[40].mxu0 %v12912_v10  ;;  %v8645_v27 = vrot.slane %v8643_v14, 1  ;;  %v8641_v32 = vshrl.u32 %v12809_v8, 16  ;;  %v19009_v49 = vcombine.low %v8690_v60, %v8692_v19  ;;  %v19011_v31 = vcombine.low %v8689_v51, %v8691_v9  ;;  %v15056_v1 = vld [vmem:[%s19916_s5 + $0x450] ss:$8 sps:$4 sm:$0xff]   ;;  %v15061_v40 = vld [vmem:[%s19916_s5 + $0x464] ss:$8 sps:$4 sm:$0xff]  }
 0x745   : > { %9468 = vmatpush1.bf16.msra.mxu0 %v15034_v5  ;;  %v8659_v55 = vrot.slane %v8657_v28, 1  ;;  %v19004_v15 = vcombine.low %v8692_v19, %v18989_v41  ;;  %v19007_v46 = vcombine.low %v8691_v9, %v18998_v0  ;;  %v8650_v36 = vshll.u32 %v18981_v22, 16  ;;  %v15058_v5 = vld [vmem:[%s19916_s5 + $0x454] ss:$8 sps:$4 sm:$0xff]   ;;  %v15062_v28 = vld [vmem:[%s19916_s5 + $0x470] ss:$8 sps:$4 sm:$0xff]  }
 0x746   : > { %9469 = vmatprep.subr.bf16.mxu0 %v15040_v23  ;;  %v19024_v18 = vor.u32 %v8645_v27, %v8641_v32  ;;  %v8648_v26 = vshrl.u32 %v18981_v22, 16  ;;  %v15059_v23 = vld [vmem:[%s19916_s5 + $0x460] ss:$8 sps:$4 sm:$0xff]   ;;  %v15064_v14 = vld [vmem:[%s19916_s5 + $0x474] ss:$8 sps:$4 sm:$0xff]  }
 0x747   : > { %v19016_v61 = vor.u32 %v8659_v55, %v8655_v20  ;;  %v8652_v57 = vrot.slane %v8650_v36, 1  ;;  %v15067_v19 = vld [vmem:[%s19916_s5 + $0x484] ss:$8 sps:$4 sm:$0xff]   ;;  %v15065_v60 = vld [vmem:[%s19916_s5 + $0x480] ss:$8 sps:$4 sm:$0xff]  }
 0x748   : > { %v15070_v51 = vld [vmem:[%s19916_s5 + $0x494] ss:$8 sps:$4 sm:$0xff]   ;;  %v15073_v55 = vld [vmem:[%s19916_s5 + $0x4a4] ss:$8 sps:$4 sm:$0xff]   ;;  %v15071_v9 = vld [vmem:[%s19916_s5 + $0x4a0] ss:$8 sps:$4 sm:$0xff]  }
 0x749   : > { %9470 = vmatpush1.bf16.msra.mxu0 %v15038_v42  ;;  %v12915_v37 = vcombine.low %v19024_v18, %v19016_v61  ;;  %v19056_v8 = vor.u32 %v8652_v57, %v8648_v26  ;;  %v15068_v42 = vld [vmem:[%s19916_s5 + $0x490] ss:$8 sps:$4 sm:$0xff]   ;;  %v15079_v20 = vld [vmem:[%s19916_s5 + $0x4c4] ss:$8 sps:$4 sm:$0xff]   ;;  %v15077_v32 = vld [vmem:[%s19916_s5 + $0x4c0] ss:$8 sps:$4 sm:$0xff]  }
 0x74a   : > { %9471 = vmatprep.subr.bf16.mxu0 %v15043_v33  ;;  %v19019_v34 = vld [vmem:[#allocation4 + $0x30] sm:$0xff]  ;;  %v15085_v36 = vld [vmem:[%s19916_s5 + $0x4e4] ss:$8 sps:$4 sm:$0xff]  }
 0x74b   : > { %v12919_v38 = vcombine.high %v19019_v34, %v19019_v34  ;;  %v12918_v45 = vcombine.low %v19019_v34, %v19019_v34  ;;  %v12813_v53 = vcombine.high %v19019_v34, %v8576_v25  ;;  %v12812_v17 = vcombine.low %v19019_v34, %v8576_v25  ;;  %v15076_v33 = vld [vmem:[%s19916_s5 + $0x4b4] ss:$8 sps:$4 sm:$0xff]   ;;  %v15074_v27 = vld [vmem:[%s19916_s5 + $0x4b0] ss:$8 sps:$4 sm:$0xff]  }
 0x74c   : > { %v13225_v39 = vcombine.high %v18960_v7, %v19019_v34  ;;  %v13224_v35 = vcombine.low %v18960_v7, %v19019_v34  ;;  %v15082_v25 = vld [vmem:[%s19916_s5 + $0x4d4] ss:$8 sps:$4 sm:$0xff]   ;;  %v15093_v26 = vld [vmem:[%s19916_s5 + $0x510] ss:$8 sps:$4 sm:$0xff]  }
 0x74d   : > { %9472 = vmatpush1.bf16.msra.mxu0 %v15041_v13  ;;  %9458 = vmatprep.mubr.bf16.mxu0 %v12919_v38  ;;  %v8671_v62 = vshll.u32 %v12813_v53, 16  ;;  %v8664_v2 = vshll.u32 %v12812_v17, 16  ;;  %v19045_v63 = vrot.slane %v12813_v53, 1  ;;  %v19047_v44 = vrot.slane %v12812_v17, 1  ;;  %v15080_v13 = vld [vmem:[%s19916_s5 + $0x4d0] ss:$8 sps:$4 sm:$0xff]  }
 0x74e   : > { %9459 = vmatmul.mubr.bf16.gmra.mrb[44].mxu0 %v12918_v45  ;;  %9473 = vmatprep.subr.bf16.mxu0 %v15048_v24  ;;  %v8669_v58 = vshrl.u32 %v12813_v53, 16  ;;  %v8662_v47 = vshrl.u32 %v12812_v17, 16  ;;  %v8636_v24 = vshll.u32 %v18963_v48, 16  ;;  %v15083_v38 = vld [vmem:[%s19916_s5 + $0x4e0] ss:$8 sps:$4 sm:$0xff]  }
 0x74f   : > { %9499 = vmatprep.mubr.bf16.mxu0 %v12915_v37  ;;  %v8673_v29 = vrot.slane %v8671_v62, 1  ;;  %v8666_v3 = vrot.slane %v8664_v2, 1  ;;  %v13228_v56 = vcombine.low %v18998_v0, %v19047_v44  ;;  %v13229_v59 = vcombine.low %v18989_v41, %v19045_v63  ;;  %v15088_v45 = vld [vmem:[%s19916_s5 + $0x4f4] ss:$8 sps:$4 sm:$0xff]   ;;  %v15086_v17 = vld [vmem:[%s19916_s5 + $0x4f0] ss:$8 sps:$4 sm:$0xff]  }
 0x750   : > { %v8638_v53 = vrot.slane %v8636_v24, 1  ;;  %v15091_v37 = vld [vmem:[%s19916_s5 + $0x504] ss:$8 sps:$4 sm:$0xff]   ;;  %v15089_v62 = vld [vmem:[%s19916_s5 + $0x500] ss:$8 sps:$4 sm:$0xff]  }
 0x751   : > { %9474 = vmatpush1.bf16.msra.mxu0 %v15046_v21  ;;  %v19058_v54 = vor.u32 %v8673_v29, %v8669_v58  ;;  %v19060_v12 = vor.u32 %v8666_v3, %v8662_v47  ;;  %v8634_v21 = vshrl.u32 %v18963_v48, 16  ;;  %v15099_v58 = vld [vmem:[%s19916_s5 + $0x524] ss:$8 sps:$4 sm:$0xff]   ;;  %v15097_v29 = vld [vmem:[%s19916_s5 + $0x520] ss:$8 sps:$4 sm:$0xff]  }
 0x752   : > { %9475 = vmatprep.subr.bf16.mxu0 %v15055_v16  ;;  %v15095_v16 = vld [vmem:[%s19916_s5 + $0x514] ss:$8 sps:$4 sm:$0xff]   ;;  %v15135_v24 = vld [vmem:[%s19916_s5 + $0x5e4] ss:$8 sps:$4 sm:$0xff]   ;;  %v15344_v34 = vld [vmem:[%s19916_s5 + $0x730] ss:$8 sps:$4 sm:$0xff]  }
 0x753   : > { %v13226_v10 = vcombine.low %v19056_v8, %v19060_v12  ;;  %v13227_v22 = vcombine.low %v19016_v61, %v19058_v54  ;;  %v19137_v57 = vor.u32 %v8638_v53, %v8634_v21  ;;  %v12921_v48 = vcombine.low %v19058_v54, %v19058_v54  ;;  %v15102_v3 = vld [vmem:[%s19916_s5 + $0x534] ss:$8 sps:$4 sm:$0xff]   ;;  %v15136_v53 = vld [vmem:[%s19916_s5 + $0x5f0] ss:$8 sps:$4 sm:$0xff]   ;;  %v15139_v21 = vld [vmem:[%s19916_s5] ss:$8 sps:$4 sm:$0xff]  }
 0x754   : > { %v12920_v47 = vcombine.low %v19060_v12, %v19060_v12  ;;  %v15350_v54 = vld [vmem:[%s19916_s5 + $0x750] ss:$8 sps:$4 sm:$0xff]  }
 0x755   : > { %9476 = vmatpush1.bf16.msra.mxu0 %v15053_v43  ;;  %v12914_v2 = vcombine.low %v19137_v57, %v19056_v8  ;;  %v15100_v43 = vld [vmem:[%s19916_s5 + $0x530] ss:$8 sps:$4 sm:$0xff]  }
 0x756   : > { %9477 = vmatprep.subr.bf16.mxu0 %v15058_v5  ;;  %v15105_v5 = vld [vmem:[%s19916_s5 + $0x544] ss:$8 sps:$4 sm:$0xff]   ;;  %v15392_v12 = vld [vmem:[%s19916_s5 + $0x830] ss:$8 sps:$4 sm:$0xff]  }
 0x759   : > { %9478 = vmatpush1.bf16.msra.mxu0 %v15056_v1  ;;  %v15103_v1 = vld [vmem:[%s19916_s5 + $0x540] ss:$8 sps:$4 sm:$0xff]  }
 0x75a   : > { %9479 = vmatprep.subr.bf16.mxu0 %v15061_v40  ;;  %v15108_v40 = vld [vmem:[%s19916_s5 + $0x554] ss:$8 sps:$4 sm:$0xff]  }
 0x75d   : > { %9480 = vmatpush1.bf16.msra.mxu0 %v15059_v23  ;;  %v15111_v23 = vld [vmem:[%s19916_s5 + $0x564] ss:$8 sps:$4 sm:$0xff]  }
 0x75e   : > { %9481 = vmatprep.subr.bf16.mxu0 %v15064_v14  ;;  %v15109_v14 = vld [vmem:[%s19916_s5 + $0x560] ss:$8 sps:$4 sm:$0xff]  }
 0x761   : > { %9482 = vmatpush1.bf16.msra.mxu0 %v15062_v28  ;;  %v15114_v28 = vld [vmem:[%s19916_s5 + $0x574] ss:$8 sps:$4 sm:$0xff]  }
 0x762   : > { %9483 = vmatprep.subr.bf16.mxu0 %v15067_v19  ;;  %v15112_v19 = vld [vmem:[%s19916_s5 + $0x570] ss:$8 sps:$4 sm:$0xff]  }
 0x765   : > { %9484 = vmatpush1.bf16.msra.mxu0 %v15065_v60  ;;  %v15117_v60 = vld [vmem:[%s19916_s5 + $0x584] ss:$8 sps:$4 sm:$0xff]  }
 0x766   : > { %9485 = vmatprep.subr.bf16.mxu0 %v15070_v51  ;;  %v15115_v51 = vld [vmem:[%s19916_s5 + $0x580] ss:$8 sps:$4 sm:$0xff]  }
 0x769   : > { %9486 = vmatpush1.bf16.msra.mxu0 %v15068_v42  ;;  %v15120_v42 = vld [vmem:[%s19916_s5 + $0x594] ss:$8 sps:$4 sm:$0xff]  }
 0x76a   : > { %9487 = vmatprep.subr.bf16.mxu0 %v15073_v55  ;;  %v15118_v55 = vld [vmem:[%s19916_s5 + $0x590] ss:$8 sps:$4 sm:$0xff]  }
 0x76d   : > { %9488 = vmatpush1.bf16.msra.mxu0 %v15071_v9  ;;  %v15123_v9 = vld [vmem:[%s19916_s5 + $0x5a4] ss:$8 sps:$4 sm:$0xff]  }
 0x76e   : > { %9489 = vmatprep.subr.bf16.mxu0 %v15076_v33  ;;  %v15121_v33 = vld [vmem:[%s19916_s5 + $0x5a0] ss:$8 sps:$4 sm:$0xff]  }
 0x771   : > { %9490 = vmatpush1.bf16.msra.mxu0 %v15074_v27  ;;  %v15126_v27 = vld [vmem:[%s19916_s5 + $0x5b4] ss:$8 sps:$4 sm:$0xff]  }
 0x772   : > { %9491 = vmatprep.subr.bf16.mxu0 %v15079_v20  ;;  %v15124_v20 = vld [vmem:[%s19916_s5 + $0x5b0] ss:$8 sps:$4 sm:$0xff]  }
 0x775   : > { %9492 = vmatpush1.bf16.msra.mxu0 %v15077_v32  ;;  %v15129_v32 = vld [vmem:[%s19916_s5 + $0x5c4] ss:$8 sps:$4 sm:$0xff]  }
 0x776   : > { %9493 = vmatprep.subr.bf16.mxu0 %v15082_v25  ;;  %v15127_v25 = vld [vmem:[%s19916_s5 + $0x5c0] ss:$8 sps:$4 sm:$0xff]  }
 0x779   : > { %9494 = vmatpush1.bf16.msra.mxu0 %v15080_v13  ;;  %v15132_v13 = vld [vmem:[%s19916_s5 + $0x5d4] ss:$8 sps:$4 sm:$0xff]  }
 0x77a   : > { %9495 = vmatprep.subr.bf16.mxu0 %v15085_v36  ;;  %v15130_v36 = vld [vmem:[%s19916_s5 + $0x5d0] ss:$8 sps:$4 sm:$0xff]  }
 0x77d   : > { %9496 = vmatpush1.bf16.msra.mxu0 %v15083_v38  ;;  %v15133_v38 = vld [vmem:[%s19916_s5 + $0x5e0] ss:$8 sps:$4 sm:$0xff]  }
 0x77e   : > { %9497 = vmatprep.subr.bf16.mxu0 %v15088_v45  ;;  %v15138_v45 = vld [vmem:[%s19916_s5 + $0x5f4] ss:$8 sps:$4 sm:$0xff]  }
 0x781   : > { %9498 = vmatpush1.bf16.msra.mxu0 %v15086_v17  ;;  %v15141_v17 = vld [vmem:[%s19916_s5 + $0x4] ss:$8 sps:$4 sm:$0xff]  }
 0x782   : > { %9518 = vmatprep.subr.bf16.mxu0 %v15091_v37  ;;  %v15144_v37 = vld [vmem:[%s19916_s5 + $0x14] ss:$8 sps:$4 sm:$0xff]  }
 0x784   : > { %9500 = vmatmul.mubr.bf16.vlgmr.msra.gmra.mrb[40].mxu0 %v12914_v2  ;;  %v15142_v2 = vld [vmem:[%s19916_s5 + $0x10] ss:$8 sps:$4 sm:$0xff]  }
 0x785   : > { %9509 = vmatprep.mubr.bf16.mxu0 %v12921_v48  ;;  %9519 = vmatpush1.bf16.msra.mxu0 %v15089_v62  ;;  %v12923_v62 = vcombine.low %v19045_v63, %v19045_v63  ;;  %v15145_v48 = vld [vmem:[%s19916_s5 + $0x20] ss:$8 sps:$4 sm:$0xff]   ;;  %v15398_v63 = vld [vmem:[%s19916_s5 + $0x850] ss:$8 sps:$4 sm:$0xff]  }
 0x786   : > { %9520 = vmatprep.subr.bf16.mxu0 %v15095_v16  ;;  %v15147_v16 = vld [vmem:[%s19916_s5 + $0x24] ss:$8 sps:$4 sm:$0xff]  }
 0x789   : > { %9521 = vmatpush1.bf16.msra.mxu0 %v15093_v26  ;;  %v12922_v26 = vcombine.low %v19047_v44, %v19047_v44 }
 0x78a   : > { %9522 = vmatprep.subr.bf16.mxu0 %v15099_v58  ;;  %v13021_v58 = vcombine.high %v18965_v4, %v18957_v52 }
 0x78c   : > { %9510 = vmatmul.mubr.bf16.gmra.mrb[48].mxu0 %v12920_v47  ;;  %v15153_v47 = vld [vmem:[%s19916_s5 + $0x44] ss:$8 sps:$4 sm:$0xff]  }
 0x78d   : > { %9523 = vmatpush1.bf16.msra.mxu0 %v15097_v29  ;;  %9550 = vmatprep.mubr.bf16.mxu0 %v19004_v15  ;;  %v15106_v15 = vld [vmem:[%s19916_s5 + $0x550] ss:$8 sps:$4 sm:$0xff]  }
 0x78e   : > { %9524 = vmatprep.subr.bf16.mxu0 %v15102_v3  ;;  %v15148_v29 = vld [vmem:[%s19916_s5 + $0x30] ss:$8 sps:$4 sm:$0xff]   ;;  %v15151_v3 = vld [vmem:[%s19916_s5 + $0x40] ss:$8 sps:$4 sm:$0xff]  }
 0x791   : > { %9525 = vmatpush1.bf16.msra.mxu0 %v15100_v43  ;;  %v15156_v43 = vld [vmem:[%s19916_s5 + $0x54] ss:$8 sps:$4 sm:$0xff]  }
 0x792   : > { %9526 = vmatprep.subr.bf16.mxu0 %v15105_v5  ;;  %v15154_v5 = vld [vmem:[%s19916_s5 + $0x50] ss:$8 sps:$4 sm:$0xff]  }
 0x795   : > { %9527 = vmatpush1.bf16.msra.mxu0 %v15103_v1  ;;  %v15159_v1 = vld [vmem:[%s19916_s5 + $0x64] ss:$8 sps:$4 sm:$0xff]  }
 0x796   : > { %9528 = vmatprep.subr.bf16.mxu0 %v15108_v40  ;;  %v15157_v40 = vld [vmem:[%s19916_s5 + $0x60] ss:$8 sps:$4 sm:$0xff]  }
 0x799   : > { %9529 = vmatpush1.bf16.msra.mxu0 %v15106_v15  ;;  %v15162_v15 = vld [vmem:[%s19916_s5 + $0x74] ss:$8 sps:$4 sm:$0xff]  }
 0x79a   : > { %9530 = vmatprep.subr.bf16.mxu0 %v15111_v23  ;;  %v15160_v23 = vld [vmem:[%s19916_s5 + $0x70] ss:$8 sps:$4 sm:$0xff]  }
 0x79d   : > { %9531 = vmatpush1.bf16.msra.mxu0 %v15109_v14  ;;  %v15165_v14 = vld [vmem:[%s19916_s5 + $0x84] ss:$8 sps:$4 sm:$0xff]  }
 0x79e   : > { %9532 = vmatprep.subr.bf16.mxu0 %v15114_v28  ;;  %v15163_v28 = vld [vmem:[%s19916_s5 + $0x80] ss:$8 sps:$4 sm:$0xff]  }
 0x7a1   : > { %9533 = vmatpush1.bf16.msra.mxu0 %v15112_v19  ;;  %v15168_v19 = vld [vmem:[%s19916_s5 + $0x94] ss:$8 sps:$4 sm:$0xff]  }
 0x7a2   : > { %9534 = vmatprep.subr.bf16.mxu0 %v15117_v60  ;;  %v15166_v60 = vld [vmem:[%s19916_s5 + $0x90] ss:$8 sps:$4 sm:$0xff]  }
 0x7a5   : > { %9535 = vmatpush1.bf16.msra.mxu0 %v15115_v51  ;;  %v15171_v51 = vld [vmem:[%s19916_s5 + $0xa4] ss:$8 sps:$4 sm:$0xff]  }
 0x7a6   : > { %9536 = vmatprep.subr.bf16.mxu0 %v15120_v42  ;;  %v15169_v42 = vld [vmem:[%s19916_s5 + $0xa0] ss:$8 sps:$4 sm:$0xff]  }
 0x7a9   : > { %9537 = vmatpush1.bf16.msra.mxu0 %v15118_v55  ;;  %v15174_v55 = vld [vmem:[%s19916_s5 + $0xb4] ss:$8 sps:$4 sm:$0xff]  }
 0x7aa   : > { %9538 = vmatprep.subr.bf16.mxu0 %v15123_v9  ;;  %v15172_v9 = vld [vmem:[%s19916_s5 + $0xb0] ss:$8 sps:$4 sm:$0xff]  }
 0x7ad   : > { %9539 = vmatpush1.bf16.msra.mxu0 %v15121_v33  ;;  %v15177_v33 = vld [vmem:[%s19916_s5 + $0xc4] ss:$8 sps:$4 sm:$0xff]  }
 0x7ae   : > { %9540 = vmatprep.subr.bf16.mxu0 %v15126_v27  ;;  %v15175_v27 = vld [vmem:[%s19916_s5 + $0xc0] ss:$8 sps:$4 sm:$0xff]  }
 0x7b1   : > { %9541 = vmatpush1.bf16.msra.mxu0 %v15124_v20  ;;  %v15180_v20 = vld [vmem:[%s19916_s5 + $0xd4] ss:$8 sps:$4 sm:$0xff]  }
 0x7b2   : > { %9542 = vmatprep.subr.bf16.mxu0 %v15129_v32  ;;  %v15178_v32 = vld [vmem:[%s19916_s5 + $0xd0] ss:$8 sps:$4 sm:$0xff]  }
 0x7b5   : > { %9543 = vmatpush1.bf16.msra.mxu0 %v15127_v25  ;;  %v15183_v25 = vld [vmem:[%s19916_s5 + $0xe4] ss:$8 sps:$4 sm:$0xff]  }
 0x7b6   : > { %9544 = vmatprep.subr.bf16.mxu0 %v15132_v13  ;;  %v15181_v13 = vld [vmem:[%s19916_s5 + $0xe0] ss:$8 sps:$4 sm:$0xff]  }
 0x7b9   : > { %9545 = vmatpush1.bf16.msra.mxu0 %v15130_v36  ;;  %v15186_v36 = vld [vmem:[%s19916_s5 + $0xf4] ss:$8 sps:$4 sm:$0xff]  }
 0x7ba   : > { %9546 = vmatprep.subr.bf16.mxu0 %v15135_v24  ;;  %v15184_v24 = vld [vmem:[%s19916_s5 + $0xf0] ss:$8 sps:$4 sm:$0xff]  }
 0x7bd   : > { %9547 = vmatpush1.bf16.msra.mxu0 %v15133_v38  ;;  %v15189_v38 = vld [vmem:[%s19916_s5 + $0x104] ss:$8 sps:$4 sm:$0xff]  }
 0x7be   : > { %9548 = vmatprep.subr.bf16.mxu0 %v15138_v45  ;;  %v8629_v45 = vshll.u32 %v18971_v11, 16 }
 0x7c1   : > { %9549 = vmatpush1.bf16.msra.mxu0 %v15136_v53  ;;  %v15187_v53 = vld [vmem:[%s19916_s5 + $0x100] ss:$8 sps:$4 sm:$0xff]  }
 0x7c2   : > { %10073 = vmatprep.subr.bf16.mxu0 %v15141_v17  ;;  %v13020_v17 = vcombine.low %v18965_v4, %v18957_v52  ;;  %v15197_v52 = vld [vmem:[%s19916_s5 + $0x124] ss:$8 sps:$4 sm:$0xff]  }
 0x7c4   : > { %9551 = vmatmul.mubr.bf16.vlgmr.msra.gmra.mrb[40].mxu0 %v19007_v46  ;;  %v15150_v46 = vld [vmem:[%s19916_s5 + $0x34] ss:$8 sps:$4 sm:$0xff]  }
 0x7c5   : > { %9560 = vmatprep.mubr.bf16.mxu0 %v12923_v62  ;;  %10074 = vmatpush1.bf16.msra.mxu0 %v15139_v21  ;;  %v15193_v21 = vld [vmem:[%s19916_s5 + $0x114] ss:$8 sps:$4 sm:$0xff]   ;;  %v8627_v62 = vshrl.u32 %v18971_v11, 16  ;;  %v13026_v11 = vcombine.low %v18960_v7, %v18960_v7 }
 0x7c6   : > { %10075 = vmatprep.subr.bf16.mxu0 %v15144_v37  ;;  %v13027_v37 = vcombine.high %v18960_v7, %v18960_v7  ;;  %v15346_v7 = vld [vmem:[%s19916_s5 + $0x734] ss:$8 sps:$4 sm:$0xff]  }
 0x7c9   : > { %10076 = vmatpush1.bf16.msra.mxu0 %v15142_v2  ;;  %v8631_v2 = vrot.slane %v8629_v45, 1  ;;  %v15231_v45 = vld [vmem:[%s19916_s5 + $0x1e0] ss:$8 sps:$4 sm:$0xff]  }
 0x7ca   : > { %10077 = vmatprep.subr.bf16.mxu0 %v15147_v16  ;;  %v15191_v16 = vld [vmem:[%s19916_s5 + $0x110] ss:$8 sps:$4 sm:$0xff]  }
 0x7cc   : > { %9561 = vmatmul.mubr.bf16.gmra.mrb[52].mxu0 %v12922_v26  ;;  %v15195_v26 = vld [vmem:[%s19916_s5 + $0x120] ss:$8 sps:$4 sm:$0xff]  }
 0x7cd   : > { %10078 = vmatpush1.bf16.msra.mxu0 %v15145_v48  ;;  %10105 = vmatprep.mubr.bf16.mxu0 %v13021_v58  ;;  %v8632_v48 = vor.u32 %v8631_v2, %v8627_v62  ;;  %v15239_v2 = vld [vmem:[%s19916_s5 + $0x204] ss:$8 sps:$4 sm:$0xff]  }
 0x7ce   : > { %10079 = vmatprep.subr.bf16.mxu0 %v15150_v46  ;;  %v15200_v46 = vld [vmem:[%s19916_s5 + $0x134] ss:$8 sps:$4 sm:$0xff]  }
 0x7cf   : > { %v13023_v58 = vcombine.low %v8632_v48, %v19024_v18  ;;  %v15206_v18 = vld [vmem:[%s19916_s5 + $0x154] ss:$8 sps:$4 sm:$0xff]   ;;  %v13029_v48 = vcombine.low %v19016_v61, %v19016_v61 }
 0x7d0   : > { %v15352_v61 = vld [vmem:[%s19916_s5 + $0x754] ss:$8 sps:$4 sm:$0xff]  }
 0x7d1   : > { %10080 = vmatpush1.bf16.msra.mxu0 %v15148_v29  ;;  %v15198_v29 = vld [vmem:[%s19916_s5 + $0x130] ss:$8 sps:$4 sm:$0xff]  }
 0x7d2   : > { %10081 = vmatprep.subr.bf16.mxu0 %v15153_v47  ;;  %v15203_v47 = vld [vmem:[%s19916_s5 + $0x144] ss:$8 sps:$4 sm:$0xff]  }
 0x7d5   : > { %10082 = vmatpush1.bf16.msra.mxu0 %v15151_v3  ;;  %v15201_v3 = vld [vmem:[%s19916_s5 + $0x140] ss:$8 sps:$4 sm:$0xff]  }
 0x7d6   : > { %10083 = vmatprep.subr.bf16.mxu0 %v15156_v43  ;;  %v15204_v43 = vld [vmem:[%s19916_s5 + $0x150] ss:$8 sps:$4 sm:$0xff]  }
 0x7d9   : > { %10084 = vmatpush1.bf16.msra.mxu0 %v15154_v5  ;;  %v15209_v5 = vld [vmem:[%s19916_s5 + $0x164] ss:$8 sps:$4 sm:$0xff]  }
 0x7da   : > { %10085 = vmatprep.subr.bf16.mxu0 %v15159_v1  ;;  %v15207_v1 = vld [vmem:[%s19916_s5 + $0x160] ss:$8 sps:$4 sm:$0xff]  }
 0x7dd   : > { %10086 = vmatpush1.bf16.msra.mxu0 %v15157_v40  ;;  %v15212_v40 = vld [vmem:[%s19916_s5 + $0x174] ss:$8 sps:$4 sm:$0xff]  }
 0x7de   : > { %10087 = vmatprep.subr.bf16.mxu0 %v15162_v15  ;;  %v15210_v15 = vld [vmem:[%s19916_s5 + $0x170] ss:$8 sps:$4 sm:$0xff]  }
 0x7e1   : > { %10088 = vmatpush1.bf16.msra.mxu0 %v15160_v23  ;;  %v15215_v23 = vld [vmem:[%s19916_s5 + $0x184] ss:$8 sps:$4 sm:$0xff]  }
 0x7e2   : > { %10089 = vmatprep.subr.bf16.mxu0 %v15165_v14 }
 0x7e5   : > { %10090 = vmatpush1.bf16.msra.mxu0 %v15163_v28  ;;  %v15213_v28 = vld [vmem:[%s19916_s5 + $0x180] ss:$8 sps:$4 sm:$0xff]  }
 0x7e6   : > { %10091 = vmatprep.subr.bf16.mxu0 %v15168_v19 }
 0x7e9   : > { %10092 = vmatpush1.bf16.msra.mxu0 %v15166_v60  ;;  %v15218_v60 = vld [vmem:[%s19916_s5 + $0x194] ss:$8 sps:$4 sm:$0xff]  }
 0x7ea   : > { %10093 = vmatprep.subr.bf16.mxu0 %v15171_v51 }
 0x7ed   : > { %10094 = vmatpush1.bf16.msra.mxu0 %v15169_v42 }
 0x7ee   : > { %10095 = vmatprep.subr.bf16.mxu0 %v15174_v55  ;;  %v15216_v55 = vld [vmem:[%s19916_s5 + $0x190] ss:$8 sps:$4 sm:$0xff]  }
 0x7f1   : > { %10096 = vmatpush1.bf16.msra.mxu0 %v15172_v9  ;;  %v15221_v9 = vld [vmem:[%s19916_s5 + $0x1a4] ss:$8 sps:$4 sm:$0xff]  }
 0x7f2   : > { %10097 = vmatprep.subr.bf16.mxu0 %v15177_v33  ;;  %v15219_v33 = vld [vmem:[%s19916_s5 + $0x1a0] ss:$8 sps:$4 sm:$0xff]  }
 0x7f5   : > { %10098 = vmatpush1.bf16.msra.mxu0 %v15175_v27  ;;  %v15224_v27 = vld [vmem:[%s19916_s5 + $0x1b4] ss:$8 sps:$4 sm:$0xff]  }
 0x7f6   : > { %10099 = vmatprep.subr.bf16.mxu0 %v15180_v20  ;;  %v15222_v20 = vld [vmem:[%s19916_s5 + $0x1b0] ss:$8 sps:$4 sm:$0xff]  }
 0x7f9   : > { %10100 = vmatpush1.bf16.msra.mxu0 %v15178_v32  ;;  %v15227_v32 = vld [vmem:[%s19916_s5 + $0x1c4] ss:$8 sps:$4 sm:$0xff]  }
 0x7fa   : > { %10101 = vmatprep.subr.bf16.mxu0 %v15183_v25  ;;  %v15225_v25 = vld [vmem:[%s19916_s5 + $0x1c0] ss:$8 sps:$4 sm:$0xff]  }
 0x7fd   : > { %10102 = vmatpush1.bf16.msra.mxu0 %v15181_v13  ;;  %v15230_v13 = vld [vmem:[%s19916_s5 + $0x1d4] ss:$8 sps:$4 sm:$0xff]  }
 0x7fe   : > { %10103 = vmatprep.subr.bf16.mxu0 %v15186_v36  ;;  %v15228_v36 = vld [vmem:[%s19916_s5 + $0x1d0] ss:$8 sps:$4 sm:$0xff]  }
 0x801   : > { %10104 = vmatpush1.bf16.msra.mxu0 %v15184_v24  ;;  %v15233_v24 = vld [vmem:[%s19916_s5 + $0x1e4] ss:$8 sps:$4 sm:$0xff]  }
 0x802   : > { %10124 = vmatprep.subr.bf16.mxu0 %v15189_v38  ;;  %v8622_v38 = vshll.u32 %v18968_v6, 16 }
 0x804   : > { %10106 = vmatmul.mubr.bf16.vlgmr.msra.gmra.mrb[40].mxu0 %v13020_v17  ;;  %v8620_v17 = vshrl.u32 %v18968_v6, 16  ;;  %v15242_v6 = vld [vmem:[%s19916_s5 + $0x214] ss:$8 sps:$4 sm:$0xff]  }
 0x805   : > { %10115 = vmatprep.mubr.bf16.mxu0 %v13027_v37  ;;  %10125 = vmatpush1.bf16.msra.mxu0 %v15187_v53  ;;  %v15236_v53 = vld [vmem:[%s19916_s5 + $0x1f4] ss:$8 sps:$4 sm:$0xff]   ;;  %v15234_v37 = vld [vmem:[%s19916_s5 + $0x1f0] ss:$8 sps:$4 sm:$0xff]  }
 0x806   : > { %10126 = vmatprep.subr.bf16.mxu0 %v15193_v21  ;;  %v8624_v21 = vrot.slane %v8622_v38, 1  ;;  %v15281_v38 = vld [vmem:[%s19916_s5 + $0x2e4] ss:$8 sps:$4 sm:$0xff]  }
 0x808   : > { %v8625_v62 = vor.u32 %v8624_v21, %v8620_v17  ;;  %v15282_v17 = vld [vmem:[%s19916_s5 + $0x2f0] ss:$8 sps:$4 sm:$0xff]   ;;  %v15287_v21 = vld [vmem:[%s19916_s5 + $0x604] ss:$8 sps:$4 sm:$0xff]  }
 0x809   : > { %10127 = vmatpush1.bf16.msra.mxu0 %v15191_v16  ;;  %v15237_v16 = vld [vmem:[%s19916_s5 + $0x200] ss:$8 sps:$4 sm:$0xff]  }
 0x80a   : > { %10128 = vmatprep.subr.bf16.mxu0 %v15197_v52  ;;  %v13022_v52 = vcombine.low %v8625_v62, %v19137_v57  ;;  %v15245_v57 = vld [vmem:[%s19916_s5 + $0x224] ss:$8 sps:$4 sm:$0xff]   ;;  %v15290_v62 = vld [vmem:[%s19916_s5 + $0x614] ss:$8 sps:$4 sm:$0xff]  }
 0x80c   : > { %10116 = vmatmul.mubr.bf16.gmra.mrb[56].mxu0 %v13026_v11  ;;  %v15243_v11 = vld [vmem:[%s19916_s5 + $0x220] ss:$8 sps:$4 sm:$0xff]  }
 0x80d   : > { %10129 = vmatpush1.bf16.msra.mxu0 %v15195_v26  ;;  %10156 = vmatprep.mubr.bf16.mxu0 %v13023_v58  ;;  %v15240_v26 = vld [vmem:[%s19916_s5 + $0x210] ss:$8 sps:$4 sm:$0xff]   ;;  %v15248_v58 = vld [vmem:[%s19916_s5 + $0x234] ss:$8 sps:$4 sm:$0xff]  }
 0x80e   : > { %10130 = vmatprep.subr.bf16.mxu0 %v15200_v46  ;;  %v13028_v46 = vcombine.low %v19056_v8, %v19056_v8  ;;  %v15394_v8 = vld [vmem:[%s19916_s5 + $0x834] ss:$8 sps:$4 sm:$0xff]  }
 0x811   : > { %10131 = vmatpush1.bf16.msra.mxu0 %v15198_v29  ;;  %v15246_v29 = vld [vmem:[%s19916_s5 + $0x230] ss:$8 sps:$4 sm:$0xff]  }
 0x812   : > { %10132 = vmatprep.subr.bf16.mxu0 %v15203_v47  ;;  %v15251_v47 = vld [vmem:[%s19916_s5 + $0x244] ss:$8 sps:$4 sm:$0xff]  }
 0x815   : > { %10133 = vmatpush1.bf16.msra.mxu0 %v15201_v3  ;;  %v15249_v3 = vld [vmem:[%s19916_s5 + $0x240] ss:$8 sps:$4 sm:$0xff]  }
 0x816   : > { %10134 = vmatprep.subr.bf16.mxu0 %v15206_v18  ;;  %v15254_v18 = vld [vmem:[%s19916_s5 + $0x254] ss:$8 sps:$4 sm:$0xff]  }
 0x819   : > { %10135 = vmatpush1.bf16.msra.mxu0 %v15204_v43  ;;  %v15257_v43 = vld [vmem:[%s19916_s5 + $0x264] ss:$8 sps:$4 sm:$0xff]  }
 0x81a   : > { %10136 = vmatprep.subr.bf16.mxu0 %v15209_v5  ;;  %v15255_v5 = vld [vmem:[%s19916_s5 + $0x260] ss:$8 sps:$4 sm:$0xff]  }
 0x81d   : > { %10137 = vmatpush1.bf16.msra.mxu0 %v15207_v1  ;;  %v15260_v1 = vld [vmem:[%s19916_s5 + $0x274] ss:$8 sps:$4 sm:$0xff]  }
 0x81e   : > { %10138 = vmatprep.subr.bf16.mxu0 %v15212_v40  ;;  %v15258_v40 = vld [vmem:[%s19916_s5 + $0x270] ss:$8 sps:$4 sm:$0xff]  }
 0x821   : > { %10139 = vmatpush1.bf16.msra.mxu0 %v15210_v15  ;;  %v19402_v14 = vpop.f32.mrb[44].mxu0  ;;  %v15263_v15 = vld [vmem:[%s19916_s5 + $0x284] ss:$8 sps:$4 sm:$0xff]  }
 0x822   : > { %v19407_v19 = vpop.f32.mrb[45].mxu0  ;;  %10140 = vmatprep.subr.bf16.mxu0 %v15215_v23 }
 0x823   : > { %v9464_v51 = vpop.f32.mrb[46].mxu0 }
 0x824   : > { %v9465_v42 = vpop.f32.mrb[47].mxu0 }
 0x825   : > { %10141 = vmatpush1.bf16.msra.mxu0 %v15213_v28 }
 0x826   : > { %10142 = vmatprep.subr.bf16.mxu0 %v15218_v60 }
 0x829   : > { %10143 = vmatpush1.bf16.msra.mxu0 %v15216_v55  ;;  %v15261_v55 = vld [vmem:[%s19916_s5 + $0x280] ss:$8 sps:$4 sm:$0xff]  }
 0x82a   : > { %10144 = vmatprep.subr.bf16.mxu0 %v15221_v9 }
 0x82d   : > { %10145 = vmatpush1.bf16.msra.mxu0 %v15219_v33  ;;  %v15266_v33 = vld [vmem:[%s19916_s5 + $0x294] ss:$8 sps:$4 sm:$0xff]  }
 0x82e   : > { %10146 = vmatprep.subr.bf16.mxu0 %v15224_v27  ;;  %v15267_v27 = vld [vmem:[%s19916_s5 + $0x2a0] ss:$8 sps:$4 sm:$0xff]  }
 0x831   : > { %10147 = vmatpush1.bf16.msra.mxu0 %v15222_v20  ;;  %v15272_v20 = vld [vmem:[%s19916_s5 + $0x2b4] ss:$8 sps:$4 sm:$0xff]  }
 0x832   : > { %10148 = vmatprep.subr.bf16.mxu0 %v15227_v32  ;;  %v15270_v32 = vld [vmem:[%s19916_s5 + $0x2b0] ss:$8 sps:$4 sm:$0xff]  }
 0x835   : > { %10149 = vmatpush1.bf16.msra.mxu0 %v15225_v25  ;;  %v15275_v25 = vld [vmem:[%s19916_s5 + $0x2c4] ss:$8 sps:$4 sm:$0xff]  }
 0x836   : > { %10150 = vmatprep.subr.bf16.mxu0 %v15230_v13  ;;  %v15273_v13 = vld [vmem:[%s19916_s5 + $0x2c0] ss:$8 sps:$4 sm:$0xff]  }
 0x839   : > { %10151 = vmatpush1.bf16.msra.mxu0 %v15228_v36  ;;  %v15278_v36 = vld [vmem:[%s19916_s5 + $0x2d4] ss:$8 sps:$4 sm:$0xff]  }
 0x83a   : > { %10152 = vmatprep.subr.bf16.mxu0 %v15233_v24  ;;  %v15276_v24 = vld [vmem:[%s19916_s5 + $0x2d0] ss:$8 sps:$4 sm:$0xff]  }
 0x83d   : > { %10153 = vmatpush1.bf16.msra.mxu0 %v15231_v45  ;;  %v15279_v45 = vld [vmem:[%s19916_s5 + $0x2e0] ss:$8 sps:$4 sm:$0xff]  }
 0x83e   : > { %10154 = vmatprep.subr.bf16.mxu0 %v15236_v53  ;;  %v15284_v53 = vld [vmem:[%s19916_s5 + $0x2f4] ss:$8 sps:$4 sm:$0xff]  }
 0x841   : > { %10155 = vmatpush1.bf16.msra.mxu0 %v15234_v37  ;;  %v15285_v37 = vld [vmem:[%s19916_s5 + $0x600] ss:$8 sps:$4 sm:$0xff]  }
 0x842   : > { %10175 = vmatprep.subr.bf16.mxu0 %v15239_v2  ;;  %v13031_v2 = vcombine.low %v18989_v41, %v18989_v41  ;;  %v15400_v41 = vld [vmem:[%s19916_s5 + $0x854] ss:$8 sps:$4 sm:$0xff]  }
 0x844   : > { %10157 = vmatmul.mubr.bf16.vlgmr.msra.gmra.mrb[40].mxu0 %v13022_v52  ;;  %v15293_v52 = vld [vmem:[%s19916_s5 + $0x624] ss:$8 sps:$4 sm:$0xff]  }
 0x845   : > { %10166 = vmatprep.mubr.bf16.mxu0 %v13029_v48  ;;  %10176 = vmatpush1.bf16.msra.mxu0 %v15237_v16  ;;  %v15288_v16 = vld [vmem:[%s19916_s5 + $0x610] ss:$8 sps:$4 sm:$0xff]   ;;  %v13030_v48 = vcombine.low %v18998_v0, %v18998_v0 }
 0x846   : > { %10177 = vmatprep.subr.bf16.mxu0 %v15242_v6  ;;  %v15291_v6 = vld [vmem:[%s19916_s5 + $0x620] ss:$8 sps:$4 sm:$0xff]  }
 0x849   : > { %10178 = vmatpush1.bf16.msra.mxu0 %v15240_v26  ;;  %v15295_v26 = vld [vmem:[%s19916_s5 + $0x630] ss:$8 sps:$4 sm:$0xff]  }
 0x84a   : > { %10179 = vmatprep.subr.bf16.mxu0 %v15245_v57  ;;  %v15300_v57 = vld [vmem:[%s19916_s5 + $0x644] ss:$8 sps:$4 sm:$0xff]  }
 0x84c   : > { %10167 = vmatmul.mubr.bf16.gmra.mrb[60].mxu0 %v13028_v46  ;;  %v15303_v46 = vld [vmem:[%s19916_s5 + $0x654] ss:$8 sps:$4 sm:$0xff]  }
 0x84d   : > { %10180 = vmatpush1.bf16.msra.mxu0 %v15243_v11  ;;  %10207 = vmatprep.mubr.bf16.mxu0 %v19009_v49  ;;  %v15252_v49 = vld [vmem:[%s19916_s5 + $0x250] ss:$8 sps:$4 sm:$0xff]   ;;  %v15298_v11 = vld [vmem:[%s19916_s5 + $0x640] ss:$8 sps:$4 sm:$0xff]  }
 0x84e   : > { %10181 = vmatprep.subr.bf16.mxu0 %v15248_v58  ;;  %v15306_v58 = vld [vmem:[%s19916_s5 + $0x664] ss:$8 sps:$4 sm:$0xff]  }
 0x851   : > { %10182 = vmatpush1.bf16.msra.mxu0 %v15246_v29  ;;  %v15304_v29 = vld [vmem:[%s19916_s5 + $0x660] ss:$8 sps:$4 sm:$0xff]  }
 0x852   : > { %10183 = vmatprep.subr.bf16.mxu0 %v15251_v47  ;;  %v15309_v47 = vld [vmem:[%s19916_s5 + $0x674] ss:$8 sps:$4 sm:$0xff]  }
 0x855   : > { %10184 = vmatpush1.bf16.msra.mxu0 %v15249_v3  ;;  %v15307_v3 = vld [vmem:[%s19916_s5 + $0x670] ss:$8 sps:$4 sm:$0xff]  }
 0x856   : > { %10185 = vmatprep.subr.bf16.mxu0 %v15254_v18  ;;  %v15312_v18 = vld [vmem:[%s19916_s5 + $0x684] ss:$8 sps:$4 sm:$0xff]  }
 0x859   : > { %10186 = vmatpush1.bf16.msra.mxu0 %v15252_v49 }
 0x85a   : > { %10187 = vmatprep.subr.bf16.mxu0 %v15257_v43 }
 0x85d   : > { %10188 = vmatpush1.bf16.msra.mxu0 %v15255_v5 }
 0x85e   : > { %10189 = vmatprep.subr.bf16.mxu0 %v15260_v1 }
 0x85f   : > { %v9511_v23 = vpop.f32.mrb[48].mxu0 }
 0x860   : > { %v19511_v28 = vadd.f32 %v9511_v23, %v19402_v14  ;;  %v9513_v60 = vpop.f32.mrb[49].mxu0  ;;  %v15264_v14 = vld [vmem:[%s19916_s5 + $0x290] ss:$8 sps:$4 sm:$0xff]  }
 0x861   : > { %v19514_v51 = vadd.f32 %v9513_v60, %v19407_v19  ;;  %v9515_v42 = vpop.f32.mrb[50].mxu0  ;;  %10190 = vmatpush1.bf16.msra.mxu0 %v15258_v40  ;;  %v15269_v19 = vld [vmem:[%s19916_s5 + $0x2a4] ss:$8 sps:$4 sm:$0xff]   ;;  %v15315_v60 = vld [vmem:[%s19916_s5 + $0x694] ss:$8 sps:$4 sm:$0xff]  }
 0x862   : > { %v9516_v9 = vpop.f32.mrb[51].mxu0  ;;  %10191 = vmatprep.subr.bf16.mxu0 %v15263_v15  ;;  %v15310_v15 = vld [vmem:[%s19916_s5 + $0x680] ss:$8 sps:$4 sm:$0xff]  }
 0x863   : > { %v15316_v42 = vld [vmem:[%s19916_s5 + $0x6a0] ss:$8 sps:$4 sm:$0xff]   ;;  %v15319_v9 = vld [vmem:[%s19916_s5 + $0x6b0] ss:$8 sps:$4 sm:$0xff]  }
 0x865   : > { %10192 = vmatpush1.bf16.msra.mxu0 %v15261_v55  ;;  %v15321_v55 = vld [vmem:[%s19916_s5 + $0x6b4] ss:$8 sps:$4 sm:$0xff]  }
 0x866   : > { %10193 = vmatprep.subr.bf16.mxu0 %v15266_v33  ;;  %v15324_v33 = vld [vmem:[%s19916_s5 + $0x6c4] ss:$8 sps:$4 sm:$0xff]  }
 0x869   : > { %10194 = vmatpush1.bf16.msra.mxu0 %v15264_v14  ;;  %v15322_v14 = vld [vmem:[%s19916_s5 + $0x6c0] ss:$8 sps:$4 sm:$0xff]  }
 0x86a   : > { %10195 = vmatprep.subr.bf16.mxu0 %v15269_v19  ;;  %v15327_v19 = vld [vmem:[%s19916_s5 + $0x6d4] ss:$8 sps:$4 sm:$0xff]  }
 0x86d   : > { %10196 = vmatpush1.bf16.msra.mxu0 %v15267_v27  ;;  %v15325_v27 = vld [vmem:[%s19916_s5 + $0x6d0] ss:$8 sps:$4 sm:$0xff]  }
 0x86e   : > { %10197 = vmatprep.subr.bf16.mxu0 %v15272_v20  ;;  %v15330_v20 = vld [vmem:[%s19916_s5 + $0x6e4] ss:$8 sps:$4 sm:$0xff]  }
 0x871   : > { %10198 = vmatpush1.bf16.msra.mxu0 %v15270_v32  ;;  %v15328_v32 = vld [vmem:[%s19916_s5 + $0x6e0] ss:$8 sps:$4 sm:$0xff]  }
 0x872   : > { %10199 = vmatprep.subr.bf16.mxu0 %v15275_v25  ;;  %v15333_v25 = vld [vmem:[%s19916_s5 + $0x6f4] ss:$8 sps:$4 sm:$0xff]  }
 0x875   : > { %10200 = vmatpush1.bf16.msra.mxu0 %v15273_v13  ;;  %v15331_v13 = vld [vmem:[%s19916_s5 + $0x6f0] ss:$8 sps:$4 sm:$0xff]  }
 0x876   : > { %10201 = vmatprep.subr.bf16.mxu0 %v15278_v36  ;;  %v15337_v36 = vld [vmem:[%s19916_s5 + $0x704] ss:$8 sps:$4 sm:$0xff]  }
 0x879   : > { %10202 = vmatpush1.bf16.msra.mxu0 %v15276_v24  ;;  %v15335_v24 = vld [vmem:[%s19916_s5 + $0x700] ss:$8 sps:$4 sm:$0xff]  }
 0x87a   : > { %10203 = vmatprep.subr.bf16.mxu0 %v15281_v38  ;;  %v13231_v38 = vcombine.high %v18965_v4, %v18965_v4  ;;  %v15343_v4 = vld [vmem:[%s19916_s5 + $0x724] ss:$8 sps:$4 sm:$0xff]  }
 0x87d   : > { %10204 = vmatpush1.bf16.msra.mxu0 %v15279_v45  ;;  %v15340_v45 = vld [vmem:[%s19916_s5 + $0x714] ss:$8 sps:$4 sm:$0xff]  }
 0x87e   : > { %10205 = vmatprep.subr.bf16.mxu0 %v15284_v53  ;;  %v15338_v53 = vld [vmem:[%s19916_s5 + $0x710] ss:$8 sps:$4 sm:$0xff]  }
 0x881   : > { %10206 = vmatpush1.bf16.msra.mxu0 %v15282_v17  ;;  %v15442_v17 = vld [vmem:[#allocation2] sm:$0xff] }
 0x882   : > { %10827 = vmatprep.subr.bf16.mxu0 %v15287_v21  ;;  %v13230_v21 = vcombine.low %v15442_v17, %v15442_v17 }
 0x884   : > { %10208 = vmatmul.mubr.bf16.vlgmr.msra.gmra.mrb[40].mxu0 %v19011_v31  ;;  %v15297_v31 = vld [vmem:[%s19916_s5 + $0x634] ss:$8 sps:$4 sm:$0xff]  }
 0x885   : > { %10217 = vmatprep.mubr.bf16.mxu0 %v13031_v2  ;;  %10828 = vmatpush1.bf16.msra.mxu0 %v15285_v37  ;;  %v15341_v37 = vld [vmem:[%s19916_s5 + $0x720] ss:$8 sps:$4 sm:$0xff]  }
 0x886   : > { %10829 = vmatprep.subr.bf16.mxu0 %v15290_v62  ;;  %v15347_v62 = vld [vmem:[%s19916_s5 + $0x740] ss:$8 sps:$4 sm:$0xff]  }
 0x887   : > { %v15353_v2 = vld [vmem:[%s19916_s5 + $0x760] ss:$8 sps:$4 sm:$0xff]  }
 0x889   : > { %10830 = vmatpush1.bf16.msra.mxu0 %v15288_v16  ;;  %v15358_v16 = vld [vmem:[%s19916_s5 + $0x774] ss:$8 sps:$4 sm:$0xff]  }
 0x88a   : > { %10831 = vmatprep.subr.bf16.mxu0 %v15293_v52  ;;  %v15356_v52 = vld [vmem:[%s19916_s5 + $0x770] ss:$8 sps:$4 sm:$0xff]  }
 0x88c   : > { %10218 = vmatmul.mubr.bf16.gmra.mrb[64].mxu0 %v13030_v48 }
 0x88d   : > { %10832 = vmatpush1.bf16.msra.mxu0 %v15291_v6  ;;  %10859 = vmatprep.mubr.bf16.mxu0 %v13225_v39  ;;  %v15301_v39 = vld [vmem:[%s19916_s5 + $0x650] ss:$8 sps:$4 sm:$0xff]   ;;  %v15361_v6 = vld [vmem:[%s19916_s5 + $0x784] ss:$8 sps:$4 sm:$0xff]  }
 0x88e   : > { %10833 = vmatprep.subr.bf16.mxu0 %v15297_v31 }
 0x891   : > { %10834 = vmatpush1.bf16.msra.mxu0 %v15295_v26 }
 0x892   : > { %10835 = vmatprep.subr.bf16.mxu0 %v15300_v57 }
 0x895   : > { %10836 = vmatpush1.bf16.msra.mxu0 %v15298_v11 }
 0x896   : > { %10837 = vmatprep.subr.bf16.mxu0 %v15303_v46  ;;  %v15359_v46 = vld [vmem:[%s19916_s5 + $0x780] ss:$8 sps:$4 sm:$0xff]  }
 0x899   : > { %10838 = vmatpush1.bf16.msra.mxu0 %v15301_v39 }
 0x89a   : > { %10839 = vmatprep.subr.bf16.mxu0 %v15306_v58  ;;  %v15364_v58 = vld [vmem:[%s19916_s5 + $0x794] ss:$8 sps:$4 sm:$0xff]  }
 0x89d   : > { %10840 = vmatpush1.bf16.msra.mxu0 %v15304_v29  ;;  %v15362_v29 = vld [vmem:[%s19916_s5 + $0x790] ss:$8 sps:$4 sm:$0xff]  }
 0x89e   : > { %10841 = vmatprep.subr.bf16.mxu0 %v15309_v47  ;;  %v15367_v47 = vld [vmem:[%s19916_s5 + $0x7a4] ss:$8 sps:$4 sm:$0xff]  }
 0x89f   : > { %v9562_v49 = vpop.f32.mrb[52].mxu0 }
 0x8a0   : > { %v19621_v43 = vadd.f32 %v9562_v49, %v19511_v28  ;;  %v9564_v5 = vpop.f32.mrb[53].mxu0  ;;  %v15313_v28 = vld [vmem:[%s19916_s5 + $0x690] ss:$8 sps:$4 sm:$0xff]  }
 0x8a1   : > { %v19624_v1 = vadd.f32 %v9564_v5, %v19514_v51  ;;  %v9566_v40 = vpop.f32.mrb[54].mxu0  ;;  %10842 = vmatpush1.bf16.msra.mxu0 %v15307_v3  ;;  %v15318_v51 = vld [vmem:[%s19916_s5 + $0x6a4] ss:$8 sps:$4 sm:$0xff]   ;;  %v15365_v3 = vld [vmem:[%s19916_s5 + $0x7a0] ss:$8 sps:$4 sm:$0xff]  }
 0x8a2   : > { %v9567_v23 = vpop.f32.mrb[55].mxu0  ;;  %10843 = vmatprep.subr.bf16.mxu0 %v15312_v18  ;;  %v15370_v18 = vld [vmem:[%s19916_s5 + $0x7b4] ss:$8 sps:$4 sm:$0xff]   ;;  %v15368_v49 = vld [vmem:[%s19916_s5 + $0x7b0] ss:$8 sps:$4 sm:$0xff]  }
 0x8a3   : > { %v8578_v5 = vld [vmem:[#allocation4 + $0x48] sm:$0x11] }
 0x8a4   : > { %v19763_v40 = vcombine.high %v15442_v17, %v8578_v5  ;;  %v15374_v23 = vld [vmem:[%s19916_s5 + $0x7d0] ss:$8 sps:$4 sm:$0xff]  }
 0x8a5   : > { %10844 = vmatpush1.bf16.msra.mxu0 %v15310_v15  ;;  %v15376_v15 = vld [vmem:[%s19916_s5 + $0x7d4] ss:$8 sps:$4 sm:$0xff]  }
 0x8a6   : > { %10845 = vmatprep.subr.bf16.mxu0 %v15315_v60  ;;  %v8685_v60 = vshll.u32 %v19763_v40, 16 }
 0x8a9   : > { %10846 = vmatpush1.bf16.msra.mxu0 %v15313_v28  ;;  %v15379_v28 = vld [vmem:[%s19916_s5 + $0x7e4] ss:$8 sps:$4 sm:$0xff]  }
 0x8aa   : > { %10847 = vmatprep.subr.bf16.mxu0 %v15318_v51  ;;  %v19775_v51 = vcombine.low %v15442_v17, %v8578_v5  ;;  %v15389_v17 = vld [vmem:[%s19916_s5 + $0x820] ss:$8 sps:$4 sm:$0xff]  }
 0x8ad   : > { %10848 = vmatpush1.bf16.msra.mxu0 %v15316_v42  ;;  %v15377_v42 = vld [vmem:[%s19916_s5 + $0x7e0] ss:$8 sps:$4 sm:$0xff]  }
 0x8ae   : > { %10849 = vmatprep.subr.bf16.mxu0 %v15321_v55  ;;  %v8683_v55 = vshrl.u32 %v19763_v40, 16 }
 0x8b1   : > { %10850 = vmatpush1.bf16.msra.mxu0 %v15319_v9  ;;  %v8687_v9 = vrot.slane %v8685_v60, 1 }
 0x8b2   : > { %10851 = vmatprep.subr.bf16.mxu0 %v15324_v33  ;;  %v15382_v33 = vld [vmem:[%s19916_s5 + $0x7f4] ss:$8 sps:$4 sm:$0xff]  }
 0x8b5   : > { %10852 = vmatpush1.bf16.msra.mxu0 %v15322_v14  ;;  %v8678_v14 = vshll.u32 %v19775_v51, 16 }
 0x8b6   : > { %10853 = vmatprep.subr.bf16.mxu0 %v15327_v19  ;;  %v15380_v19 = vld [vmem:[%s19916_s5 + $0x7f0] ss:$8 sps:$4 sm:$0xff]  }
 0x8b9   : > { %10854 = vmatpush1.bf16.msra.mxu0 %v15325_v27  ;;  %v8688_v27 = vor.u32 %v8687_v9, %v8683_v55 }
 0x8ba   : > { %10855 = vmatprep.subr.bf16.mxu0 %v15330_v20  ;;  %v15385_v20 = vld [vmem:[%s19916_s5 + $0x804] ss:$8 sps:$4 sm:$0xff]  }
 0x8bd   : > { %10856 = vmatpush1.bf16.msra.mxu0 %v15328_v32  ;;  %v8676_v32 = vshrl.u32 %v19775_v51, 16 }
 0x8be   : > { %10857 = vmatprep.subr.bf16.mxu0 %v15333_v25  ;;  %v8680_v25 = vrot.slane %v8678_v14, 1 }
 0x8c1   : > { %10858 = vmatpush1.bf16.msra.mxu0 %v15331_v13  ;;  %v15383_v13 = vld [vmem:[%s19916_s5 + $0x800] ss:$8 sps:$4 sm:$0xff]  }
 0x8c2   : > { %10878 = vmatprep.subr.bf16.mxu0 %v15337_v36  ;;  %v13233_v36 = vcombine.low %v8688_v27, %v8688_v27 }
 0x8c4   : > { %10860 = vmatmul.mubr.bf16.vlgmr.msra.gmra.mrb[40].mxu0 %v13224_v35  ;;  %v15349_v35 = vld [vmem:[%s19916_s5 + $0x744] ss:$8 sps:$4 sm:$0xff]  }
 0x8c5   : > { %10879 = vmatpush1.bf16.msra.mxu0 %v15335_v24  ;;  %10869 = vmatprep.mubr.bf16.mxu0 %v13231_v38  ;;  %v15388_v24 = vld [vmem:[%s19916_s5 + $0x814] ss:$8 sps:$4 sm:$0xff]   ;;  %v8681_v38 = vor.u32 %v8680_v25, %v8676_v32  ;;  %v10986_v32 = vld [vmem:[%s19917_s6] sm:$0x3] }
 0x8c6   : > { %10880 = vmatprep.subr.bf16.mxu0 %v15340_v45  ;;  %v15386_v45 = vld [vmem:[%s19916_s5 + $0x810] ss:$8 sps:$4 sm:$0xff]   ;;  %v10991_v25 = vrot.slane %v10986_v32, %v17358_v30 }
 0x8c9   : > { %10881 = vmatpush1.bf16.msra.mxu0 %v15338_v53  ;;  %v15391_v53 = vld [vmem:[%s19916_s5 + $0x824] ss:$8 sps:$4 sm:$0xff]  }
 0x8ca   : > { %10882 = vmatprep.subr.bf16.mxu0 %v15343_v4  ;;  %v13232_v4 = vcombine.low %v8681_v38, %v8681_v38 }
 0x8cc   : > { %10870 = vmatmul.mubr.bf16.gmra.mrb[68].mxu0 %v13230_v21  ;;  %v15395_v21 = vld [vmem:[%s19916_s5 + $0x840] ss:$8 sps:$4 sm:$0xff]  }
 0x8cd   : > { %10883 = vmatpush1.bf16.msra.mxu0 %v15341_v37  ;;  %10910 = vmatprep.mubr.bf16.mxu0 %v13227_v22  ;;  %v15355_v22 = vld [vmem:[%s19916_s5 + $0x764] ss:$8 sps:$4 sm:$0xff]   ;;  %v15401_v37 = vld [vmem:[%s19916_s5 + $0x860] ss:$8 sps:$4 sm:$0xff]  }
 0x8ce   : > { %10884 = vmatprep.subr.bf16.mxu0 %v15346_v7  ;;  %v15406_v7 = vld [vmem:[%s19916_s5 + $0x874] ss:$8 sps:$4 sm:$0xff]  }
 0x8d1   : > { %10885 = vmatpush1.bf16.msra.mxu0 %v15344_v34  ;;  %v15404_v34 = vld [vmem:[%s19916_s5 + $0x870] ss:$8 sps:$4 sm:$0xff]  }
 0x8d2   : > { %10886 = vmatprep.subr.bf16.mxu0 %v15349_v35  ;;  %v15409_v35 = vld [vmem:[%s19916_s5 + $0x884] ss:$8 sps:$4 sm:$0xff]  }
 0x8d5   : > { %10887 = vmatpush1.bf16.msra.mxu0 %v15347_v62 }
 0x8d6   : > { %10888 = vmatprep.subr.bf16.mxu0 %v15352_v61 }
 0x8d9   : > { %10889 = vmatpush1.bf16.msra.mxu0 %v15350_v54 }
 0x8da   : > { %10890 = vmatprep.subr.bf16.mxu0 %v15355_v22 }
 0x8dd   : > { %10891 = vmatpush1.bf16.msra.mxu0 %v15353_v2 }
 0x8de   : > { %10892 = vmatprep.subr.bf16.mxu0 %v15358_v16  ;;  %v15407_v16 = vld [vmem:[%s19916_s5 + $0x880] ss:$8 sps:$4 sm:$0xff]  }
 0x8df   : > { %v10117_v48 = vpop.f32.mrb[56].mxu0 }
 0x8e0   : > { %v19731_v31 = vadd.f32 %v10117_v48, %v19621_v43  ;;  %v10119_v26 = vpop.f32.mrb[57].mxu0  ;;  %v15373_v43 = vld [vmem:[%s19916_s5 + $0x7c4] ss:$8 sps:$4 sm:$0xff]   ;;  %v15410_v48 = vld [vmem:[%s19916_s5 + $0x890] ss:$8 sps:$4 sm:$0xff]  }
 0x8e1   : > { %v19734_v57 = vadd.f32 %v10119_v26, %v19624_v1  ;;  %v10121_v11 = vpop.f32.mrb[58].mxu0  ;;  %10893 = vmatpush1.bf16.msra.mxu0 %v15356_v52  ;;  %v15371_v1 = vld [vmem:[%s19916_s5 + $0x7c0] ss:$8 sps:$4 sm:$0xff]  }
 0x8e2   : > { %v10122_v39 = vpop.f32.mrb[59].mxu0  ;;  %10894 = vmatprep.subr.bf16.mxu0 %v15361_v6  ;;  %v15412_v6 = vld [vmem:[%s19916_s5 + $0x894] ss:$8 sps:$4 sm:$0xff]   ;;  %v15413_v26 = vld [vmem:[%s19916_s5 + $0x8a0] ss:$8 sps:$4 sm:$0xff]  }
 0x8e3   : > { %v15416_v11 = vld [vmem:[%s19916_s5 + $0x8b0] ss:$8 sps:$4 sm:$0xff]   ;;  %v15419_v39 = vld [vmem:[%s19916_s5 + $0x8c0] ss:$8 sps:$4 sm:$0xff]  }
 0x8e5   : > { %10895 = vmatpush1.bf16.msra.mxu0 %v15359_v46  ;;  %v15421_v46 = vld [vmem:[%s19916_s5 + $0x8c4] ss:$8 sps:$4 sm:$0xff]  }
 0x8e6   : > { %10896 = vmatprep.subr.bf16.mxu0 %v15364_v58  ;;  %v15424_v58 = vld [vmem:[%s19916_s5 + $0x8d4] ss:$8 sps:$4 sm:$0xff]  }
 0x8e9   : > { %10897 = vmatpush1.bf16.msra.mxu0 %v15362_v29  ;;  %v15422_v29 = vld [vmem:[%s19916_s5 + $0x8d0] ss:$8 sps:$4 sm:$0xff]  }
 0x8ea   : > { %10898 = vmatprep.subr.bf16.mxu0 %v15367_v47  ;;  %v15427_v47 = vld [vmem:[%s19916_s5 + $0x8e4] ss:$8 sps:$4 sm:$0xff]  }
 0x8ed   : > { %10899 = vmatpush1.bf16.msra.mxu0 %v15365_v3  ;;  %v15425_v3 = vld [vmem:[%s19916_s5 + $0x8e0] ss:$8 sps:$4 sm:$0xff]  }
 0x8ee   : > { %10900 = vmatprep.subr.bf16.mxu0 %v15370_v18  ;;  %v15430_v18 = vld [vmem:[%s19916_s5 + $0x8f4] ss:$8 sps:$4 sm:$0xff]  }
 0x8f1   : > { %10901 = vmatpush1.bf16.msra.mxu0 %v15368_v49  ;;  %v15428_v49 = vld [vmem:[%s19916_s5 + $0x8f0] ss:$8 sps:$4 sm:$0xff]  }
 0x8f2   : > { %10902 = vmatprep.subr.bf16.mxu0 %v15373_v43  ;;  %v8698_v43 = vrot.slane %v19763_v40, 1 }
 0x8f4   : > { %v13235_v5 = vcombine.low %v8698_v43, %v8698_v43 }
 0x8f5   : > { %10903 = vmatpush1.bf16.msra.mxu0 %v15371_v1  ;;  %v8697_v1 = vrot.slane %v19775_v51, 1 }
 0x8f6   : > { %10904 = vmatprep.subr.bf16.mxu0 %v15376_v15 }
 0x8f7   : > { %v13234_v15 = vcombine.low %v8697_v1, %v8697_v1 }
 0x8f9   : > { %10905 = vmatpush1.bf16.msra.mxu0 %v15374_v23 }
 0x8fa   : > { %10906 = vmatprep.subr.bf16.mxu0 %v15379_v28 }
 0x8fd   : > { %10907 = vmatpush1.bf16.msra.mxu0 %v15377_v42 }
 0x8fe   : > { %10908 = vmatprep.subr.bf16.mxu0 %v15382_v33 }
 0x901   : > { %10909 = vmatpush1.bf16.msra.mxu0 %v15380_v19 }
 0x902   : > { %10929 = vmatprep.subr.bf16.mxu0 %v15385_v20 }
 0x904   : > { %10911 = vmatmul.mubr.bf16.vlgmr.msra.gmra.mrb[40].mxu0 %v13226_v10  ;;  %v15397_v10 = vld [vmem:[%s19916_s5 + $0x844] ss:$8 sps:$4 sm:$0xff]  }
 0x905   : > { %10930 = vmatpush1.bf16.msra.mxu0 %v15383_v13  ;;  %10920 = vmatprep.mubr.bf16.mxu0 %v13233_v36  ;;  %v10995_v13 = vrot.slane %v10986_v32, %v17361_v50 }
 0x906   : > { %10931 = vmatprep.subr.bf16.mxu0 %v15388_v24 }
 0x909   : > { %10932 = vmatpush1.bf16.msra.mxu0 %v15386_v45 }
 0x90a   : > { %10933 = vmatprep.subr.bf16.mxu0 %v15391_v53 }
 0x90c   : > { %10921 = vmatmul.mubr.bf16.gmra.mrb[72].mxu0 %v13232_v4 }
 0x90d   : > { %10934 = vmatpush1.bf16.msra.mxu0 %v15389_v17  ;;  %10961 = vmatprep.mubr.bf16.mxu0 %v13229_v59  ;;  %v15403_v59 = vld [vmem:[%s19916_s5 + $0x864] ss:$8 sps:$4 sm:$0xff]  }
 0x90e   : > { %10935 = vmatprep.subr.bf16.mxu0 %v15394_v8 }
 0x911   : > { %10936 = vmatpush1.bf16.msra.mxu0 %v15392_v12 }
 0x912   : > { %10937 = vmatprep.subr.bf16.mxu0 %v15397_v10 }
 0x915   : > { %10938 = vmatpush1.bf16.msra.mxu0 %v15395_v21 }
 0x916   : > { %10939 = vmatprep.subr.bf16.mxu0 %v15400_v41 }
 0x919   : > { %10940 = vmatpush1.bf16.msra.mxu0 %v15398_v63 }
 0x91a   : > { %10941 = vmatprep.subr.bf16.mxu0 %v15403_v59 }
 0x91d   : > { %10942 = vmatpush1.bf16.msra.mxu0 %v15401_v37 }
 0x91e   : > { %10943 = vmatprep.subr.bf16.mxu0 %v15406_v7 }
 0x91f   : > { %v10168_v62 = vpop.f32.mrb[60].mxu0 }
 0x920   : > { %v10169_v61 = vadd.f32 %v10168_v62, %v19731_v31  ;;  %v10170_v54 = vpop.f32.mrb[61].mxu0  ;;  %v15415_v31 = vld [vmem:[%s19916_s5 + $0x8a4] ss:$8 sps:$4 sm:$0xff]  }
 0x921   : > { %v10171_v22 = vadd.f32 %v10170_v54, %v19734_v57  ;;  %v10172_v2 = vpop.f32.mrb[62].mxu0  ;;  %10944 = vmatpush1.bf16.msra.mxu0 %v15404_v34  ;;  %v15418_v57 = vld [vmem:[%s19916_s5 + $0x8b4] ss:$8 sps:$4 sm:$0xff]  }
 0x922   : > { %v10173_v52 = vpop.f32.mrb[63].mxu0  ;;  %10945 = vmatprep.subr.bf16.mxu0 %v15409_v35 }
 0x925   : > { %10946 = vmatpush1.bf16.msra.mxu0 %v15407_v16 }
 0x926   : > { %10947 = vmatprep.subr.bf16.mxu0 %v15412_v6 }
 0x929   : > { %10948 = vmatpush1.bf16.msra.mxu0 %v15410_v48 }
 0x92a   : > { %10949 = vmatprep.subr.bf16.mxu0 %v15415_v31 }
 0x92d   : > { %10950 = vmatpush1.bf16.msra.mxu0 %v15413_v26 }
 0x92e   : > { %10951 = vmatprep.subr.bf16.mxu0 %v15418_v57 }
 0x931   : > { %10952 = vmatpush1.bf16.msra.mxu0 %v15416_v11 }
 0x932   : > { %10953 = vmatprep.subr.bf16.mxu0 %v15421_v46 }
 0x935   : > { %10954 = vmatpush1.bf16.msra.mxu0 %v15419_v39 }
 0x936   : > { %10955 = vmatprep.subr.bf16.mxu0 %v15424_v58 }
 0x939   : > { %10956 = vmatpush1.bf16.msra.mxu0 %v15422_v29 }
 0x93a   : > { %10957 = vmatprep.subr.bf16.mxu0 %v15427_v47 }
 0x93d   : > { %10958 = vmatpush1.bf16.msra.mxu0 %v15425_v3 }
 0x93e   : > { %10959 = vmatprep.subr.bf16.mxu0 %v15430_v18 }
 0x941   : > { %10960 = vmatpush1.bf16.msra.mxu0 %v15428_v49 }
 0x944   : > { %10962 = vmatmul.mubr.bf16.vlgmr.msra.gmra.mrb[40].mxu0 %v13228_v56 }
 0x945   : > { %10971 = vmatprep.mubr.bf16.mxu0 %v13235_v5 }
 0x94c   : > { %10972 = vmatmul.mubr.bf16.gmra.mrb[76].mxu0 %v13234_v15 }
 0x95f   : > { %v10219_v23 = vpop.f32.mrb[64].mxu0 }
 0x960   : > { %v10220_v60 = vadd.f32 %v10219_v23, %v10169_v61  ;;  %v10221_v28 = vpop.f32.mrb[65].mxu0 }
 0x961   : > { %v10222_v42 = vadd.f32 %v10221_v28, %v10171_v22  ;;  %v10223_v55 = vpop.f32.mrb[66].mxu0 }
 0x962   : > { %v10224_v9 = vpop.f32.mrb[67].mxu0 }
 0x99f   : > { %v10871_v33 = vpop.f32.mrb[68].mxu0 }
 0x9a0   : > { %v10873_v40 = vpop.f32.mrb[69].mxu0 }
 0x9a1   : > { %v10875_v14 = vpop.f32.mrb[70].mxu0 }
 0x9a2   : > { %v10876_v19 = vpop.f32.mrb[71].mxu0 }
 0x9df   : > { %v10922_v27 = vpop.f32.mrb[72].mxu0 }
 0x9e0   : > { %v10923_v20 = vadd.f32 %v10922_v27, %v10871_v33  ;;  %v10924_v0 = vpop.f32.mrb[73].mxu0 }
 0x9e1   : > { %v10925_v44 = vadd.f32 %v10924_v0, %v10873_v40  ;;  %v10926_v56 = vpop.f32.mrb[74].mxu0 }
 0x9e2   : > { %v10927_v51 = vpop.f32.mrb[75].mxu0 }
 0xa17   : > { %v10963_v36 = vpop.f32.mrb[40].mxu0 }
 0xa18   : > { %v10998_v24 = vadd.f32 %v10991_v25, %v10963_v36  ;;  %v10965_v38 = vpop.f32.mrb[41].mxu0 }
 0xa19   : > { %v10999_v45 = vadd.f32 %v10995_v13, %v10965_v38  ;;  %v10967_v53 = vpop.f32.mrb[42].mxu0 }
 0xa1a   : > { %v11004_v4 = vmax.f32 %v10998_v24, 0.0  ;;  %v11000_v17 = vadd.f32 %v10991_v25, %v10967_v53  ;;  %v10969_v8 = vpop.f32.mrb[43].mxu0 }
 0xa1b   : > { %v11005_v12 = vmax.f32 %v10999_v45, 0.0  ;;  %v11001_v10 = vadd.f32 %v10995_v13, %v10969_v8 }
 0xa1c   : > { %11010 = vst [vmem:[%s357_s13] sm:$0xff] %v11004_v4  ;;  %v11006_v21 = vmax.f32 %v11000_v17, 0.0 }
 0xa1d   : > { %11011 = vst [vmem:[%s357_s13 + $0x8] sm:$0xff] %v11005_v12  ;;  %v11007_v30 = vmax.f32 %v11001_v10, 0.0 }
 0xa1e   : > { %11012 = vst [vmem:[%s357_s13 + $0x10] sm:$0xff] %v11006_v21 }
 0xa1f   : > { %11013 = vst [vmem:[%s357_s13 + $0x18] sm:$0xff] %v11007_v30  ;;  %v10973_v50 = vpop.f32.mrb[76].mxu0 }
 0xa20   : > { %v10974_v41 = vadd.f32 %v10973_v50, %v10923_v20  ;;  %v10975_v63 = vpop.f32.mrb[77].mxu0 }
 0xa21   : > { %v10976_v59 = vadd.f32 %v10975_v63, %v10925_v44  ;;  %v10977_v37 = vpop.f32.mrb[78].mxu0 }
 0xa22   : > { %v10984_v7 = vadd.f32 %v10974_v41, %v10220_v60  ;;  %v10978_v34 = vpop.f32.mrb[79].mxu0 }
 0xa23   : > { %v10985_v35 = vadd.f32 %v10976_v59, %v10222_v42 }
 0xa24   : > { %v11002_v62 = vadd.f32 %v10991_v25, %v10984_v7 }
 0xa25   : > { %v11003_v61 = vadd.f32 %v10995_v13, %v10985_v35 }
 0xa26   : > { %v11008_v54 = vmax.f32 %v11002_v62, 0.0 }
 0xa27   : > { %v11009_v22 = vmax.f32 %v11003_v61, 0.0 }
 0xa28   : > { %11014 = vst [vmem:[%s357_s13 + $0x20] sm:$0xff] %v11008_v54 }
 0xa29   : > { %11015 = vst [vmem:[%s357_s13 + $0x28] sm:$0xff] %v11009_v22 }
 0xa2a PF: > { %s20_s30 = sadd.s32 1, %s15449_s30  }
 0xa2b   : > { %p17_p4 = scmp.ge.s32.totalorder %s20_s30, 4  }
 0xa2d   :  { %19 = sbr.rel (!%p17_p4) target bundleno = 1 (0x1), region = 114 }

</bundles_post_ra>
